<compile_context>
chip_gen: v7x
topology: tpu7x:2x2x1
jax: 0.10.0
libtpu: 0.0.40
codegen_flags: <defaults>
</compile_context>

<pallas_src>
import functools

import jax
import jax.numpy as jnp
from jax.experimental import pallas as pl
from jax.experimental.pallas import tpu as pltpu

C_IN = 3       # network input channels
C_IN_PAD = 8   # zero-padded input channels fed to the kernel (sublane aligned)
C_HID = 32     # hidden channels
C_OUT = 3      # network output channels


def _fcn_fused_kernel(x_ref, mask_ref, w1_ref, b1_ref, w2_ref, b2_ref,
                      w3_ref, b3_ref, o_ref, *, Wp, Lp, blk):
    """Fused 5-layer FCN forward for a block of `blk` images.

    Channel-major, lane-dense layouts (Lp = (H+2)*(W+2)):
      x_ref  : (blk, C_IN_PAD, Lp) bf16  zero-padded input (flattened grid)
      mask   : (1, Lp)             f32   1.0 on interior pixels, 0.0 on halo
      wN_ref : (9, Cout, Cin)      bf16  per-tap weights, t = (dy+1)*3 + (dx+1)
      bN_ref : (Cout, 1)           f32
      o_ref  : (blk, C_OUT, Lp)    f32   channel-major padded output
                                         (halo garbage sliced off in wrapper)
    """
    mask = mask_ref[...]                                  # (1, Lp) f32

    # Hoist all weight/bias reads out of the per-image / shared-conv loops.
    w1 = [w1_ref[t] for t in range(9)]
    w2 = [w2_ref[t] for t in range(9)]
    w3 = [w3_ref[t] for t in range(9)]
    b1 = b1_ref[...]
    b2 = b2_ref[...]
    b3 = b3_ref[...]

    def conv3x3_relu(src_bf16, w_taps, bias, *, masked, out_dtype):
        # Conv as 9 accumulated MXU dots on ONE bf16 operand.  A tap (dy, dx)
        # needs src[:, p + dy*Wp + dx]; instead of shifting the input we roll
        # the per-tap f32 result on the lane axis (XLU), so there is no im2col
        # materialization and no relayout copies.  Wrapped lanes only affect
        # halo pixels, which the mask (or the wrapper slice) discards.
        acc = None
        t = 0
        for dy in (-1, 0, 1):
            for dx in (-1, 0, 1):
                o = dy * Wp + dx
                d = jnp.dot(w_taps[t], src_bf16,
                            preferred_element_type=jnp.float32)  # (Cout, Lp)
                if o != 0:
                    d = pltpu.roll(d, (-o) % Lp, axis=1)
                acc = d if acc is None else acc + d
                t += 1
        out = jnp.maximum(acc + bias, 0.0)
        if masked:
            out = out * mask        # keep halo exactly zero (== zero padding)
        return out.astype(out_dtype)

    for b in range(blk):
        a = conv3x3_relu(x_ref[b], w1, b1, masked=True, out_dtype=jnp.bfloat16)
        for _ in range(3):          # shared `conv` block applied 3x
            a = conv3x3_relu(a, w2, b2, masked=True, out_dtype=jnp.bfloat16)
        o_ref[b] = conv3x3_relu(a, w3, b3, masked=False, out_dtype=jnp.float32)


def fcn_forward(params, x_nchw, *, images_per_step=None):
    """Full FCN forward. x_nchw: (N, 3, H, W) f32 -> (N, 3, H, W) f32."""
    N, Cin, H, W = x_nchw.shape
    assert Cin == C_IN
    Hp, Wp = H + 2, W + 2
    Lp = Hp * Wp

    if images_per_step is None:
        # >=2 grid steps when possible (v7x has 2 TCs) while amortizing the
        # per-grid-step overhead for tiny images.
        images_per_step = max(1, min(8, N // 2)) if H * W <= 64 * 64 else 1
    blk = int(max(1, min(images_per_step, N)))
    n_steps = -(-N // blk)
    N_pad = n_steps * blk

    # Channel-major zero-pad (spatial + channels 3->8), flatten padded spatial
    # grid onto the lane axis, pad batch to a multiple of the block.
    xp = jnp.pad(x_nchw.astype(jnp.float32),
                 ((0, 0), (0, C_IN_PAD - C_IN), (1, 1), (1, 1)))
    xp = xp.reshape(N, C_IN_PAD, Lp)
    if N_pad != N:
        xp = jnp.pad(xp, ((0, N_pad - N), (0, 0), (0, 0)))
    xp = xp.astype(jnp.bfloat16)

    # Interior mask: 1 inside, 0 on the 1-pixel halo of the padded grid.
    ys = (jnp.arange(Hp) >= 1) & (jnp.arange(Hp) <= H)
    xs = (jnp.arange(Wp) >= 1) & (jnp.arange(Wp) <= W)
    mask = (ys[:, None] & xs[None, :]).reshape(1, Lp).astype(jnp.float32)

    def prep(w, b):
        # (3,3,Cin,Cout) HWIO -> per-tap (9, Cout, Cin) bf16, bias (Cout,1) f32
        cout, cin = w.shape[-1], w.shape[-2]
        w_taps = jnp.transpose(w, (0, 1, 3, 2)).reshape(9, cout, cin)
        return w_taps.astype(jnp.bfloat16), b.reshape(cout, 1).astype(jnp.float32)

    w1, b1 = params["inc"]
    w1 = jnp.pad(w1, ((0, 0), (0, 0), (0, C_IN_PAD - C_IN), (0, 0)))
    w1t, b1c = prep(w1, b1)
    w2t, b2c = prep(*params["conv"])
    w3t, b3c = prep(*params["outc"])

    # Explicit VMEM budget (scoped defaults 16 MiB v5e / 32 MiB v6e+), capped
    # with headroom under v7x's 64 MiB physical VMEM.
    act_bytes = C_HID * Lp * 4
    est = (2 * blk * Lp * (C_IN_PAD * 2 + C_OUT * 4)
           + 4 * 9 * (C_HID * C_IN_PAD + C_HID * C_HID + C_OUT * C_HID)
           + 24 * act_bytes + (2 << 20))
    vmem_limit = int(min(max(est, 16 << 20), 56 << 20))

    kernel = functools.partial(_fcn_fused_kernel, Wp=Wp, Lp=Lp, blk=blk)
    out = pl.pallas_call(
        kernel,
        out_shape=jax.ShapeDtypeStruct((N_pad, C_OUT, Lp), jnp.float32),
        grid_spec=pltpu.PrefetchScalarGridSpec(
            num_scalar_prefetch=0,
            grid=(n_steps,),
            in_specs=[
                pl.BlockSpec((blk, C_IN_PAD, Lp), lambda n: (n, 0, 0)),   # x
                pl.BlockSpec((1, Lp), lambda n: (0, 0)),                  # mask
                pl.BlockSpec((9, C_HID, C_IN_PAD), lambda n: (0, 0, 0)),  # w1
                pl.BlockSpec((C_HID, 1), lambda n: (0, 0)),               # b1
                pl.BlockSpec((9, C_HID, C_HID), lambda n: (0, 0, 0)),     # w2
                pl.BlockSpec((C_HID, 1), lambda n: (0, 0)),               # b2
                pl.BlockSpec((9, C_OUT, C_HID), lambda n: (0, 0, 0)),     # w3
                pl.BlockSpec((C_OUT, 1), lambda n: (0, 0)),               # b3
            ],
            out_specs=pl.BlockSpec((blk, C_OUT, Lp), lambda n: (n, 0, 0)),
        ),
        compiler_params=pltpu.CompilerParams(
            dimension_semantics=("parallel",),     # batch blocks split across TCs
            vmem_limit_bytes=vmem_limit,
        ),
    )(xp, mask, w1t, b1c, w2t, b2c, w3t, b3c)

    # Output is already channel-major (NCHW): just un-flatten and drop halo.
    out = out.reshape(N_pad, C_OUT, Hp, Wp)[:N, :, 1:H + 1, 1:W + 1]
    return out


def init_fcn_params(key):
    """Deterministic parameter init (PyTorch Conv2d-style uniform bounds)."""
    ks = jax.random.split(key, 6)

    def conv_init(kw, kb, cin, cout):
        fan_in = cin * 9
        bound = 1.0 / jnp.sqrt(jnp.float32(fan_in))
        w = jax.random.uniform(kw, (3, 3, cin, cout), jnp.float32, -bound, bound)
        b = jax.random.uniform(kb, (cout,), jnp.float32, -bound, bound)
        return w, b

    return {
        "inc": conv_init(ks[0], ks[1], C_IN, C_HID),
        "conv": conv_init(ks[2], ks[3], C_HID, C_HID),  # shared across conv2/3/4
        "outc": conv_init(ks[4], ks[5], C_HID, C_OUT),
    }


def _ref_conv3x3_relu(x_nhwc, w, b):
    """Pure-JAX reference (lax conv, f32) for correctness checking."""
    out = jax.lax.conv_general_dilated(
        x_nhwc, w,
        window_strides=(1, 1), padding="SAME",
        dimension_numbers=("NHWC", "HWIO", "NHWC"),
    )
    return jnp.maximum(out + b, 0.0)


def _ref_fcn_forward(params, x_nchw):
    x = jnp.transpose(x_nchw, (0, 2, 3, 1))
    x = _ref_conv3x3_relu(x, *params["inc"])
    x = _ref_conv3x3_relu(x, *params["conv"])
    x = _ref_conv3x3_relu(x, *params["conv"])
    x = _ref_conv3x3_relu(x, *params["conv"])
    x = _ref_conv3x3_relu(x, *params["outc"])
    return jnp.transpose(x, (0, 3, 1, 2))


if __name__ == "__main__":
    key = jax.random.PRNGKey(0)
    k_param, k_x = jax.random.split(key)

    params = init_fcn_params(k_param)
    x = jax.random.normal(k_x, (2, 3, 16, 16), dtype=jnp.float32)  # NCHW

    out = jax.block_until_ready(fcn_forward(params, x))
    ref = jax.block_until_ready(_ref_fcn_forward(params, x))

    assert out.shape == (2, 3, 16, 16)
    max_err = jnp.max(jnp.abs(out - ref))
    # bf16 MXU feed with f32 accumulation -> relaxed tolerance vs f32 reference.
    assert jnp.allclose(out, ref, atol=3e-2, rtol=3e-2), (
        f"mismatch vs reference (max abs err {max_err})")

    print("KERNEL_OK")
</pallas_src>

<mosaic_0001>
module attributes {stable_mosaic.version = 11 : i64} {
  func.func @_fcn_fused_kernel(%arg0: i32, %arg1: memref<1x8x324xbf16, #tpu.memory_space<vmem>>, %arg2: memref<1x324xf32, #tpu.memory_space<vmem>>, %arg3: memref<9x32x8xbf16, #tpu.memory_space<vmem>>, %arg4: memref<32x1xf32, #tpu.memory_space<vmem>>, %arg5: memref<9x32x32xbf16, #tpu.memory_space<vmem>>, %arg6: memref<32x1xf32, #tpu.memory_space<vmem>>, %arg7: memref<9x3x32xbf16, #tpu.memory_space<vmem>>, %arg8: memref<3x1xf32, #tpu.memory_space<vmem>>, %arg9: memref<1x3x324xf32, #tpu.memory_space<vmem>>) attributes {dimension_semantics = [#tpu.dimension_semantics<parallel>], iteration_bounds = array<i64: 2>, scalar_prefetch = 0 : i64, scratch_operands = 0 : i64, tpu.core_type = #tpu.core_type<tc>, window_params = [{transform_indices = @transform_0, window_bounds = array<i64: 1, 8, 324>}, {pipeline_mode = #tpu.pipeline_mode<synchronous>, transform_indices = @transform_1, window_bounds = array<i64: 1, 324>}, {pipeline_mode = #tpu.pipeline_mode<synchronous>, transform_indices = @transform_2, window_bounds = array<i64: 9, 32, 8>}, {pipeline_mode = #tpu.pipeline_mode<synchronous>, transform_indices = @transform_3, window_bounds = array<i64: 32, 1>}, {pipeline_mode = #tpu.pipeline_mode<synchronous>, transform_indices = @transform_4, window_bounds = array<i64: 9, 32, 32>}, {pipeline_mode = #tpu.pipeline_mode<synchronous>, transform_indices = @transform_5, window_bounds = array<i64: 32, 1>}, {pipeline_mode = #tpu.pipeline_mode<synchronous>, transform_indices = @transform_6, window_bounds = array<i64: 9, 3, 32>}, {pipeline_mode = #tpu.pipeline_mode<synchronous>, transform_indices = @transform_7, window_bounds = array<i64: 3, 1>}, {transform_indices = @transform_8, window_bounds = array<i64: 1, 3, 324>}]} {
    %c0 = arith.constant 0 : index
    %c0_0 = arith.constant 0 : index
    %0 = vector.load %arg2[%c0, %c0_0] : memref<1x324xf32, #tpu.memory_space<vmem>>, vector<1x324xf32>
    %c0_1 = arith.constant 0 : index
    %c0_2 = arith.constant 0 : index
    %c0_3 = arith.constant 0 : index
    %1 = vector.load %arg3[%c0_1, %c0_2, %c0_3] : memref<9x32x8xbf16, #tpu.memory_space<vmem>>, vector<1x32x8xbf16>
    %2 = vector.shape_cast %1 : vector<1x32x8xbf16> to vector<32x8xbf16>
    %c1 = arith.constant 1 : index
    %c0_4 = arith.constant 0 : index
    %c0_5 = arith.constant 0 : index
    %3 = vector.load %arg3[%c1, %c0_4, %c0_5] : memref<9x32x8xbf16, #tpu.memory_space<vmem>>, vector<1x32x8xbf16>
    %4 = vector.shape_cast %3 : vector<1x32x8xbf16> to vector<32x8xbf16>
    %c2 = arith.constant 2 : index
    %c0_6 = arith.constant 0 : index
    %c0_7 = arith.constant 0 : index
    %5 = vector.load %arg3[%c2, %c0_6, %c0_7] : memref<9x32x8xbf16, #tpu.memory_space<vmem>>, vector<1x32x8xbf16>
    %6 = vector.shape_cast %5 : vector<1x32x8xbf16> to vector<32x8xbf16>
    %c3 = arith.constant 3 : index
    %c0_8 = arith.constant 0 : index
    %c0_9 = arith.constant 0 : index
    %7 = vector.load %arg3[%c3, %c0_8, %c0_9] : memref<9x32x8xbf16, #tpu.memory_space<vmem>>, vector<1x32x8xbf16>
    %8 = vector.shape_cast %7 : vector<1x32x8xbf16> to vector<32x8xbf16>
    %c4 = arith.constant 4 : index
    %c0_10 = arith.constant 0 : index
    %c0_11 = arith.constant 0 : index
    %9 = vector.load %arg3[%c4, %c0_10, %c0_11] : memref<9x32x8xbf16, #tpu.memory_space<vmem>>, vector<1x32x8xbf16>
    %10 = vector.shape_cast %9 : vector<1x32x8xbf16> to vector<32x8xbf16>
    %c5 = arith.constant 5 : index
    %c0_12 = arith.constant 0 : index
    %c0_13 = arith.constant 0 : index
    %11 = vector.load %arg3[%c5, %c0_12, %c0_13] : memref<9x32x8xbf16, #tpu.memory_space<vmem>>, vector<1x32x8xbf16>
    %12 = vector.shape_cast %11 : vector<1x32x8xbf16> to vector<32x8xbf16>
    %c6 = arith.constant 6 : index
    %c0_14 = arith.constant 0 : index
    %c0_15 = arith.constant 0 : index
    %13 = vector.load %arg3[%c6, %c0_14, %c0_15] : memref<9x32x8xbf16, #tpu.memory_space<vmem>>, vector<1x32x8xbf16>
    %14 = vector.shape_cast %13 : vector<1x32x8xbf16> to vector<32x8xbf16>
    %c7 = arith.constant 7 : index
    %c0_16 = arith.constant 0 : index
    %c0_17 = arith.constant 0 : index
    %15 = vector.load %arg3[%c7, %c0_16, %c0_17] : memref<9x32x8xbf16, #tpu.memory_space<vmem>>, vector<1x32x8xbf16>
    %16 = vector.shape_cast %15 : vector<1x32x8xbf16> to vector<32x8xbf16>
    %c8 = arith.constant 8 : index
    %c0_18 = arith.constant 0 : index
    %c0_19 = arith.constant 0 : index
    %17 = vector.load %arg3[%c8, %c0_18, %c0_19] : memref<9x32x8xbf16, #tpu.memory_space<vmem>>, vector<1x32x8xbf16>
    %18 = vector.shape_cast %17 : vector<1x32x8xbf16> to vector<32x8xbf16>
    %c0_20 = arith.constant 0 : index
    %c0_21 = arith.constant 0 : index
    %c0_22 = arith.constant 0 : index
    %19 = vector.load %arg5[%c0_20, %c0_21, %c0_22] : memref<9x32x32xbf16, #tpu.memory_space<vmem>>, vector<1x32x32xbf16>
    %20 = vector.shape_cast %19 : vector<1x32x32xbf16> to vector<32x32xbf16>
    %c1_23 = arith.constant 1 : index
    %c0_24 = arith.constant 0 : index
    %c0_25 = arith.constant 0 : index
    %21 = vector.load %arg5[%c1_23, %c0_24, %c0_25] : memref<9x32x32xbf16, #tpu.memory_space<vmem>>, vector<1x32x32xbf16>
    %22 = vector.shape_cast %21 : vector<1x32x32xbf16> to vector<32x32xbf16>
    %c2_26 = arith.constant 2 : index
    %c0_27 = arith.constant 0 : index
    %c0_28 = arith.constant 0 : index
    %23 = vector.load %arg5[%c2_26, %c0_27, %c0_28] : memref<9x32x32xbf16, #tpu.memory_space<vmem>>, vector<1x32x32xbf16>
    %24 = vector.shape_cast %23 : vector<1x32x32xbf16> to vector<32x32xbf16>
    %c3_29 = arith.constant 3 : index
    %c0_30 = arith.constant 0 : index
    %c0_31 = arith.constant 0 : index
    %25 = vector.load %arg5[%c3_29, %c0_30, %c0_31] : memref<9x32x32xbf16, #tpu.memory_space<vmem>>, vector<1x32x32xbf16>
    %26 = vector.shape_cast %25 : vector<1x32x32xbf16> to vector<32x32xbf16>
    %c4_32 = arith.constant 4 : index
    %c0_33 = arith.constant 0 : index
    %c0_34 = arith.constant 0 : index
    %27 = vector.load %arg5[%c4_32, %c0_33, %c0_34] : memref<9x32x32xbf16, #tpu.memory_space<vmem>>, vector<1x32x32xbf16>
    %28 = vector.shape_cast %27 : vector<1x32x32xbf16> to vector<32x32xbf16>
    %c5_35 = arith.constant 5 : index
    %c0_36 = arith.constant 0 : index
    %c0_37 = arith.constant 0 : index
    %29 = vector.load %arg5[%c5_35, %c0_36, %c0_37] : memref<9x32x32xbf16, #tpu.memory_space<vmem>>, vector<1x32x32xbf16>
    %30 = vector.shape_cast %29 : vector<1x32x32xbf16> to vector<32x32xbf16>
    %c6_38 = arith.constant 6 : index
    %c0_39 = arith.constant 0 : index
    %c0_40 = arith.constant 0 : index
    %31 = vector.load %arg5[%c6_38, %c0_39, %c0_40] : memref<9x32x32xbf16, #tpu.memory_space<vmem>>, vector<1x32x32xbf16>
    %32 = vector.shape_cast %31 : vector<1x32x32xbf16> to vector<32x32xbf16>
    %c7_41 = arith.constant 7 : index
    %c0_42 = arith.constant 0 : index
    %c0_43 = arith.constant 0 : index
    %33 = vector.load %arg5[%c7_41, %c0_42, %c0_43] : memref<9x32x32xbf16, #tpu.memory_space<vmem>>, vector<1x32x32xbf16>
    %34 = vector.shape_cast %33 : vector<1x32x32xbf16> to vector<32x32xbf16>
    %c8_44 = arith.constant 8 : index
    %c0_45 = arith.constant 0 : index
    %c0_46 = arith.constant 0 : index
    %35 = vector.load %arg5[%c8_44, %c0_45, %c0_46] : memref<9x32x32xbf16, #tpu.memory_space<vmem>>, vector<1x32x32xbf16>
    %36 = vector.shape_cast %35 : vector<1x32x32xbf16> to vector<32x32xbf16>
    %c0_47 = arith.constant 0 : index
    %c0_48 = arith.constant 0 : index
    %c0_49 = arith.constant 0 : index
    %37 = vector.load %arg7[%c0_47, %c0_48, %c0_49] : memref<9x3x32xbf16, #tpu.memory_space<vmem>>, vector<1x3x32xbf16>
    %38 = vector.shape_cast %37 : vector<1x3x32xbf16> to vector<3x32xbf16>
    %c1_50 = arith.constant 1 : index
    %c0_51 = arith.constant 0 : index
    %c0_52 = arith.constant 0 : index
    %39 = vector.load %arg7[%c1_50, %c0_51, %c0_52] : memref<9x3x32xbf16, #tpu.memory_space<vmem>>, vector<1x3x32xbf16>
    %40 = vector.shape_cast %39 : vector<1x3x32xbf16> to vector<3x32xbf16>
    %c2_53 = arith.constant 2 : index
    %c0_54 = arith.constant 0 : index
    %c0_55 = arith.constant 0 : index
    %41 = vector.load %arg7[%c2_53, %c0_54, %c0_55] : memref<9x3x32xbf16, #tpu.memory_space<vmem>>, vector<1x3x32xbf16>
    %42 = vector.shape_cast %41 : vector<1x3x32xbf16> to vector<3x32xbf16>
    %c3_56 = arith.constant 3 : index
    %c0_57 = arith.constant 0 : index
    %c0_58 = arith.constant 0 : index
    %43 = vector.load %arg7[%c3_56, %c0_57, %c0_58] : memref<9x3x32xbf16, #tpu.memory_space<vmem>>, vector<1x3x32xbf16>
    %44 = vector.shape_cast %43 : vector<1x3x32xbf16> to vector<3x32xbf16>
    %c4_59 = arith.constant 4 : index
    %c0_60 = arith.constant 0 : index
    %c0_61 = arith.constant 0 : index
    %45 = vector.load %arg7[%c4_59, %c0_60, %c0_61] : memref<9x3x32xbf16, #tpu.memory_space<vmem>>, vector<1x3x32xbf16>
    %46 = vector.shape_cast %45 : vector<1x3x32xbf16> to vector<3x32xbf16>
    %c5_62 = arith.constant 5 : index
    %c0_63 = arith.constant 0 : index
    %c0_64 = arith.constant 0 : index
    %47 = vector.load %arg7[%c5_62, %c0_63, %c0_64] : memref<9x3x32xbf16, #tpu.memory_space<vmem>>, vector<1x3x32xbf16>
    %48 = vector.shape_cast %47 : vector<1x3x32xbf16> to vector<3x32xbf16>
    %c6_65 = arith.constant 6 : index
    %c0_66 = arith.constant 0 : index
    %c0_67 = arith.constant 0 : index
    %49 = vector.load %arg7[%c6_65, %c0_66, %c0_67] : memref<9x3x32xbf16, #tpu.memory_space<vmem>>, vector<1x3x32xbf16>
    %50 = vector.shape_cast %49 : vector<1x3x32xbf16> to vector<3x32xbf16>
    %c7_68 = arith.constant 7 : index
    %c0_69 = arith.constant 0 : index
    %c0_70 = arith.constant 0 : index
    %51 = vector.load %arg7[%c7_68, %c0_69, %c0_70] : memref<9x3x32xbf16, #tpu.memory_space<vmem>>, vector<1x3x32xbf16>
    %52 = vector.shape_cast %51 : vector<1x3x32xbf16> to vector<3x32xbf16>
    %c8_71 = arith.constant 8 : index
    %c0_72 = arith.constant 0 : index
    %c0_73 = arith.constant 0 : index
    %53 = vector.load %arg7[%c8_71, %c0_72, %c0_73] : memref<9x3x32xbf16, #tpu.memory_space<vmem>>, vector<1x3x32xbf16>
    %54 = vector.shape_cast %53 : vector<1x3x32xbf16> to vector<3x32xbf16>
    %c0_74 = arith.constant 0 : index
    %c0_75 = arith.constant 0 : index
    %55 = vector.load %arg4[%c0_74, %c0_75] : memref<32x1xf32, #tpu.memory_space<vmem>>, vector<32x1xf32>
    %c0_76 = arith.constant 0 : index
    %c0_77 = arith.constant 0 : index
    %56 = vector.load %arg6[%c0_76, %c0_77] : memref<32x1xf32, #tpu.memory_space<vmem>>, vector<32x1xf32>
    %c0_78 = arith.constant 0 : index
    %c0_79 = arith.constant 0 : index
    %57 = vector.load %arg8[%c0_78, %c0_79] : memref<3x1xf32, #tpu.memory_space<vmem>>, vector<3x1xf32>
    %c0_80 = arith.constant 0 : index
    %c0_81 = arith.constant 0 : index
    %c0_82 = arith.constant 0 : index
    %58 = vector.load %arg1[%c0_80, %c0_81, %c0_82] : memref<1x8x324xbf16, #tpu.memory_space<vmem>>, vector<1x8x324xbf16>
    %59 = vector.shape_cast %58 : vector<1x8x324xbf16> to vector<8x324xbf16>
    %cst = arith.constant dense<0.000000e+00> : vector<32x324xf32>
    %60 = tpu.matmul %2, %59, %cst {dimension_numbers = #tpu.dot_dimension_numbers<[1], [0], [0], [1], [0, 0, 1, 1], [], []>} : vector<32x8xbf16>, vector<8x324xbf16>, vector<32x324xf32> -> vector<32x324xf32>
    %c19_i32 = arith.constant 19 : i32
    %61 = tpu.dynamic_rotate %60 by %c19_i32 dim 1 : vector<32x324xf32>, i32 -> vector<32x324xf32>
    %cst_83 = arith.constant dense<0.000000e+00> : vector<32x324xf32>
    %62 = tpu.matmul %4, %59, %cst_83 {dimension_numbers = #tpu.dot_dimension_numbers<[1], [0], [0], [1], [0, 0, 1, 1], [], []>} : vector<32x8xbf16>, vector<8x324xbf16>, vector<32x324xf32> -> vector<32x324xf32>
    %c18_i32 = arith.constant 18 : i32
    %63 = tpu.dynamic_rotate %62 by %c18_i32 dim 1 : vector<32x324xf32>, i32 -> vector<32x324xf32>
    %64 = arith.addf %61, %63 : vector<32x324xf32>
    %cst_84 = arith.constant dense<0.000000e+00> : vector<32x324xf32>
    %65 = tpu.matmul %6, %59, %cst_84 {dimension_numbers = #tpu.dot_dimension_numbers<[1], [0], [0], [1], [0, 0, 1, 1], [], []>} : vector<32x8xbf16>, vector<8x324xbf16>, vector<32x324xf32> -> vector<32x324xf32>
    %c17_i32 = arith.constant 17 : i32
    %66 = tpu.dynamic_rotate %65 by %c17_i32 dim 1 : vector<32x324xf32>, i32 -> vector<32x324xf32>
    %67 = arith.addf %64, %66 : vector<32x324xf32>
    %cst_85 = arith.constant dense<0.000000e+00> : vector<32x324xf32>
    %68 = tpu.matmul %8, %59, %cst_85 {dimension_numbers = #tpu.dot_dimension_numbers<[1], [0], [0], [1], [0, 0, 1, 1], [], []>} : vector<32x8xbf16>, vector<8x324xbf16>, vector<32x324xf32> -> vector<32x324xf32>
    %c1_i32 = arith.constant 1 : i32
    %69 = tpu.dynamic_rotate %68 by %c1_i32 dim 1 : vector<32x324xf32>, i32 -> vector<32x324xf32>
    %70 = arith.addf %67, %69 : vector<32x324xf32>
    %cst_86 = arith.constant dense<0.000000e+00> : vector<32x324xf32>
    %71 = tpu.matmul %10, %59, %cst_86 {dimension_numbers = #tpu.dot_dimension_numbers<[1], [0], [0], [1], [0, 0, 1, 1], [], []>} : vector<32x8xbf16>, vector<8x324xbf16>, vector<32x324xf32> -> vector<32x324xf32>
    %72 = arith.addf %70, %71 : vector<32x324xf32>
    %cst_87 = arith.constant dense<0.000000e+00> : vector<32x324xf32>
    %73 = tpu.matmul %12, %59, %cst_87 {dimension_numbers = #tpu.dot_dimension_numbers<[1], [0], [0], [1], [0, 0, 1, 1], [], []>} : vector<32x8xbf16>, vector<8x324xbf16>, vector<32x324xf32> -> vector<32x324xf32>
    %c323_i32 = arith.constant 323 : i32
    %74 = tpu.dynamic_rotate %73 by %c323_i32 dim 1 : vector<32x324xf32>, i32 -> vector<32x324xf32>
    %75 = arith.addf %72, %74 : vector<32x324xf32>
    %cst_88 = arith.constant dense<0.000000e+00> : vector<32x324xf32>
    %76 = tpu.matmul %14, %59, %cst_88 {dimension_numbers = #tpu.dot_dimension_numbers<[1], [0], [0], [1], [0, 0, 1, 1], [], []>} : vector<32x8xbf16>, vector<8x324xbf16>, vector<32x324xf32> -> vector<32x324xf32>
    %c307_i32 = arith.constant 307 : i32
    %77 = tpu.dynamic_rotate %76 by %c307_i32 dim 1 : vector<32x324xf32>, i32 -> vector<32x324xf32>
    %78 = arith.addf %75, %77 : vector<32x324xf32>
    %cst_89 = arith.constant dense<0.000000e+00> : vector<32x324xf32>
    %79 = tpu.matmul %16, %59, %cst_89 {dimension_numbers = #tpu.dot_dimension_numbers<[1], [0], [0], [1], [0, 0, 1, 1], [], []>} : vector<32x8xbf16>, vector<8x324xbf16>, vector<32x324xf32> -> vector<32x324xf32>
    %c306_i32 = arith.constant 306 : i32
    %80 = tpu.dynamic_rotate %79 by %c306_i32 dim 1 : vector<32x324xf32>, i32 -> vector<32x324xf32>
    %81 = arith.addf %78, %80 : vector<32x324xf32>
    %cst_90 = arith.constant dense<0.000000e+00> : vector<32x324xf32>
    %82 = tpu.matmul %18, %59, %cst_90 {dimension_numbers = #tpu.dot_dimension_numbers<[1], [0], [0], [1], [0, 0, 1, 1], [], []>} : vector<32x8xbf16>, vector<8x324xbf16>, vector<32x324xf32> -> vector<32x324xf32>
    %c305_i32 = arith.constant 305 : i32
    %83 = tpu.dynamic_rotate %82 by %c305_i32 dim 1 : vector<32x324xf32>, i32 -> vector<32x324xf32>
    %84 = arith.addf %81, %83 : vector<32x324xf32>
    %85 = vector.broadcast %55 : vector<32x1xf32> to vector<32x324xf32>
    %86 = arith.addf %84, %85 : vector<32x324xf32>
    %cst_91 = arith.constant 0.000000e+00 : f32
    %87 = vector.broadcast %cst_91 : f32 to vector<32x324xf32>
    %88 = arith.maximumf %86, %87 : vector<32x324xf32>
    %89 = vector.broadcast %0 : vector<1x324xf32> to vector<32x324xf32>
    %90 = arith.mulf %88, %89 : vector<32x324xf32>
    %91 = arith.truncf %90 : vector<32x324xf32> to vector<32x324xbf16>
    %cst_92 = arith.constant dense<0.000000e+00> : vector<32x324xf32>
    %92 = tpu.matmul %20, %91, %cst_92 {dimension_numbers = #tpu.dot_dimension_numbers<[1], [0], [0], [1], [0, 0, 1, 1], [], []>} : vector<32x32xbf16>, vector<32x324xbf16>, vector<32x324xf32> -> vector<32x324xf32>
    %c19_i32_93 = arith.constant 19 : i32
    %93 = tpu.dynamic_rotate %92 by %c19_i32_93 dim 1 : vector<32x324xf32>, i32 -> vector<32x324xf32>
    %cst_94 = arith.constant dense<0.000000e+00> : vector<32x324xf32>
    %94 = tpu.matmul %22, %91, %cst_94 {dimension_numbers = #tpu.dot_dimension_numbers<[1], [0], [0], [1], [0, 0, 1, 1], [], []>} : vector<32x32xbf16>, vector<32x324xbf16>, vector<32x324xf32> -> vector<32x324xf32>
    %c18_i32_95 = arith.constant 18 : i32
    %95 = tpu.dynamic_rotate %94 by %c18_i32_95 dim 1 : vector<32x324xf32>, i32 -> vector<32x324xf32>
    %96 = arith.addf %93, %95 : vector<32x324xf32>
    %cst_96 = arith.constant dense<0.000000e+00> : vector<32x324xf32>
    %97 = tpu.matmul %24, %91, %cst_96 {dimension_numbers = #tpu.dot_dimension_numbers<[1], [0], [0], [1], [0, 0, 1, 1], [], []>} : vector<32x32xbf16>, vector<32x324xbf16>, vector<32x324xf32> -> vector<32x324xf32>
    %c17_i32_97 = arith.constant 17 : i32
    %98 = tpu.dynamic_rotate %97 by %c17_i32_97 dim 1 : vector<32x324xf32>, i32 -> vector<32x324xf32>
    %99 = arith.addf %96, %98 : vector<32x324xf32>
    %cst_98 = arith.constant dense<0.000000e+00> : vector<32x324xf32>
    %100 = tpu.matmul %26, %91, %cst_98 {dimension_numbers = #tpu.dot_dimension_numbers<[1], [0], [0], [1], [0, 0, 1, 1], [], []>} : vector<32x32xbf16>, vector<32x324xbf16>, vector<32x324xf32> -> vector<32x324xf32>
    %c1_i32_99 = arith.constant 1 : i32
    %101 = tpu.dynamic_rotate %100 by %c1_i32_99 dim 1 : vector<32x324xf32>, i32 -> vector<32x324xf32>
    %102 = arith.addf %99, %101 : vector<32x324xf32>
    %cst_100 = arith.constant dense<0.000000e+00> : vector<32x324xf32>
    %103 = tpu.matmul %28, %91, %cst_100 {dimension_numbers = #tpu.dot_dimension_numbers<[1], [0], [0], [1], [0, 0, 1, 1], [], []>} : vector<32x32xbf16>, vector<32x324xbf16>, vector<32x324xf32> -> vector<32x324xf32>
    %104 = arith.addf %102, %103 : vector<32x324xf32>
    %cst_101 = arith.constant dense<0.000000e+00> : vector<32x324xf32>
    %105 = tpu.matmul %30, %91, %cst_101 {dimension_numbers = #tpu.dot_dimension_numbers<[1], [0], [0], [1], [0, 0, 1, 1], [], []>} : vector<32x32xbf16>, vector<32x324xbf16>, vector<32x324xf32> -> vector<32x324xf32>
    %c323_i32_102 = arith.constant 323 : i32
    %106 = tpu.dynamic_rotate %105 by %c323_i32_102 dim 1 : vector<32x324xf32>, i32 -> vector<32x324xf32>
    %107 = arith.addf %104, %106 : vector<32x324xf32>
    %cst_103 = arith.constant dense<0.000000e+00> : vector<32x324xf32>
    %108 = tpu.matmul %32, %91, %cst_103 {dimension_numbers = #tpu.dot_dimension_numbers<[1], [0], [0], [1], [0, 0, 1, 1], [], []>} : vector<32x32xbf16>, vector<32x324xbf16>, vector<32x324xf32> -> vector<32x324xf32>
    %c307_i32_104 = arith.constant 307 : i32
    %109 = tpu.dynamic_rotate %108 by %c307_i32_104 dim 1 : vector<32x324xf32>, i32 -> vector<32x324xf32>
    %110 = arith.addf %107, %109 : vector<32x324xf32>
    %cst_105 = arith.constant dense<0.000000e+00> : vector<32x324xf32>
    %111 = tpu.matmul %34, %91, %cst_105 {dimension_numbers = #tpu.dot_dimension_numbers<[1], [0], [0], [1], [0, 0, 1, 1], [], []>} : vector<32x32xbf16>, vector<32x324xbf16>, vector<32x324xf32> -> vector<32x324xf32>
    %c306_i32_106 = arith.constant 306 : i32
    %112 = tpu.dynamic_rotate %111 by %c306_i32_106 dim 1 : vector<32x324xf32>, i32 -> vector<32x324xf32>
    %113 = arith.addf %110, %112 : vector<32x324xf32>
    %cst_107 = arith.constant dense<0.000000e+00> : vector<32x324xf32>
    %114 = tpu.matmul %36, %91, %cst_107 {dimension_numbers = #tpu.dot_dimension_numbers<[1], [0], [0], [1], [0, 0, 1, 1], [], []>} : vector<32x32xbf16>, vector<32x324xbf16>, vector<32x324xf32> -> vector<32x324xf32>
    %c305_i32_108 = arith.constant 305 : i32
    %115 = tpu.dynamic_rotate %114 by %c305_i32_108 dim 1 : vector<32x324xf32>, i32 -> vector<32x324xf32>
    %116 = arith.addf %113, %115 : vector<32x324xf32>
    %117 = vector.broadcast %56 : vector<32x1xf32> to vector<32x324xf32>
    %118 = arith.addf %116, %117 : vector<32x324xf32>
    %cst_109 = arith.constant 0.000000e+00 : f32
    %119 = vector.broadcast %cst_109 : f32 to vector<32x324xf32>
    %120 = arith.maximumf %118, %119 : vector<32x324xf32>
    %121 = vector.broadcast %0 : vector<1x324xf32> to vector<32x324xf32>
    %122 = arith.mulf %120, %121 : vector<32x324xf32>
    %123 = arith.truncf %122 : vector<32x324xf32> to vector<32x324xbf16>
    %cst_110 = arith.constant dense<0.000000e+00> : vector<32x324xf32>
    %124 = tpu.matmul %20, %123, %cst_110 {dimension_numbers = #tpu.dot_dimension_numbers<[1], [0], [0], [1], [0, 0, 1, 1], [], []>} : vector<32x32xbf16>, vector<32x324xbf16>, vector<32x324xf32> -> vector<32x324xf32>
    %c19_i32_111 = arith.constant 19 : i32
    %125 = tpu.dynamic_rotate %124 by %c19_i32_111 dim 1 : vector<32x324xf32>, i32 -> vector<32x324xf32>
    %cst_112 = arith.constant dense<0.000000e+00> : vector<32x324xf32>
    %126 = tpu.matmul %22, %123, %cst_112 {dimension_numbers = #tpu.dot_dimension_numbers<[1], [0], [0], [1], [0, 0, 1, 1], [], []>} : vector<32x32xbf16>, vector<32x324xbf16>, vector<32x324xf32> -> vector<32x324xf32>
    %c18_i32_113 = arith.constant 18 : i32
    %127 = tpu.dynamic_rotate %126 by %c18_i32_113 dim 1 : vector<32x324xf32>, i32 -> vector<32x324xf32>
    %128 = arith.addf %125, %127 : vector<32x324xf32>
    %cst_114 = arith.constant dense<0.000000e+00> : vector<32x324xf32>
    %129 = tpu.matmul %24, %123, %cst_114 {dimension_numbers = #tpu.dot_dimension_numbers<[1], [0], [0], [1], [0, 0, 1, 1], [], []>} : vector<32x32xbf16>, vector<32x324xbf16>, vector<32x324xf32> -> vector<32x324xf32>
    %c17_i32_115 = arith.constant 17 : i32
    %130 = tpu.dynamic_rotate %129 by %c17_i32_115 dim 1 : vector<32x324xf32>, i32 -> vector<32x324xf32>
    %131 = arith.addf %128, %130 : vector<32x324xf32>
    %cst_116 = arith.constant dense<0.000000e+00> : vector<32x324xf32>
    %132 = tpu.matmul %26, %123, %cst_116 {dimension_numbers = #tpu.dot_dimension_numbers<[1], [0], [0], [1], [0, 0, 1, 1], [], []>} : vector<32x32xbf16>, vector<32x324xbf16>, vector<32x324xf32> -> vector<32x324xf32>
    %c1_i32_117 = arith.constant 1 : i32
    %133 = tpu.dynamic_rotate %132 by %c1_i32_117 dim 1 : vector<32x324xf32>, i32 -> vector<32x324xf32>
    %134 = arith.addf %131, %133 : vector<32x324xf32>
    %cst_118 = arith.constant dense<0.000000e+00> : vector<32x324xf32>
    %135 = tpu.matmul %28, %123, %cst_118 {dimension_numbers = #tpu.dot_dimension_numbers<[1], [0], [0], [1], [0, 0, 1, 1], [], []>} : vector<32x32xbf16>, vector<32x324xbf16>, vector<32x324xf32> -> vector<32x324xf32>
    %136 = arith.addf %134, %135 : vector<32x324xf32>
    %cst_119 = arith.constant dense<0.000000e+00> : vector<32x324xf32>
    %137 = tpu.matmul %30, %123, %cst_119 {dimension_numbers = #tpu.dot_dimension_numbers<[1], [0], [0], [1], [0, 0, 1, 1], [], []>} : vector<32x32xbf16>, vector<32x324xbf16>, vector<32x324xf32> -> vector<32x324xf32>
    %c323_i32_120 = arith.constant 323 : i32
    %138 = tpu.dynamic_rotate %137 by %c323_i32_120 dim 1 : vector<32x324xf32>, i32 -> vector<32x324xf32>
    %139 = arith.addf %136, %138 : vector<32x324xf32>
    %cst_121 = arith.constant dense<0.000000e+00> : vector<32x324xf32>
    %140 = tpu.matmul %32, %123, %cst_121 {dimension_numbers = #tpu.dot_dimension_numbers<[1], [0], [0], [1], [0, 0, 1, 1], [], []>} : vector<32x32xbf16>, vector<32x324xbf16>, vector<32x324xf32> -> vector<32x324xf32>
    %c307_i32_122 = arith.constant 307 : i32
    %141 = tpu.dynamic_rotate %140 by %c307_i32_122 dim 1 : vector<32x324xf32>, i32 -> vector<32x324xf32>
    %142 = arith.addf %139, %141 : vector<32x324xf32>
    %cst_123 = arith.constant dense<0.000000e+00> : vector<32x324xf32>
    %143 = tpu.matmul %34, %123, %cst_123 {dimension_numbers = #tpu.dot_dimension_numbers<[1], [0], [0], [1], [0, 0, 1, 1], [], []>} : vector<32x32xbf16>, vector<32x324xbf16>, vector<32x324xf32> -> vector<32x324xf32>
    %c306_i32_124 = arith.constant 306 : i32
    %144 = tpu.dynamic_rotate %143 by %c306_i32_124 dim 1 : vector<32x324xf32>, i32 -> vector<32x324xf32>
    %145 = arith.addf %142, %144 : vector<32x324xf32>
    %cst_125 = arith.constant dense<0.000000e+00> : vector<32x324xf32>
    %146 = tpu.matmul %36, %123, %cst_125 {dimension_numbers = #tpu.dot_dimension_numbers<[1], [0], [0], [1], [0, 0, 1, 1], [], []>} : vector<32x32xbf16>, vector<32x324xbf16>, vector<32x324xf32> -> vector<32x324xf32>
    %c305_i32_126 = arith.constant 305 : i32
    %147 = tpu.dynamic_rotate %146 by %c305_i32_126 dim 1 : vector<32x324xf32>, i32 -> vector<32x324xf32>
    %148 = arith.addf %145, %147 : vector<32x324xf32>
    %149 = vector.broadcast %56 : vector<32x1xf32> to vector<32x324xf32>
    %150 = arith.addf %148, %149 : vector<32x324xf32>
    %cst_127 = arith.constant 0.000000e+00 : f32
    %151 = vector.broadcast %cst_127 : f32 to vector<32x324xf32>
    %152 = arith.maximumf %150, %151 : vector<32x324xf32>
    %153 = vector.broadcast %0 : vector<1x324xf32> to vector<32x324xf32>
    %154 = arith.mulf %152, %153 : vector<32x324xf32>
    %155 = arith.truncf %154 : vector<32x324xf32> to vector<32x324xbf16>
    %cst_128 = arith.constant dense<0.000000e+00> : vector<32x324xf32>
    %156 = tpu.matmul %20, %155, %cst_128 {dimension_numbers = #tpu.dot_dimension_numbers<[1], [0], [0], [1], [0, 0, 1, 1], [], []>} : vector<32x32xbf16>, vector<32x324xbf16>, vector<32x324xf32> -> vector<32x324xf32>
    %c19_i32_129 = arith.constant 19 : i32
    %157 = tpu.dynamic_rotate %156 by %c19_i32_129 dim 1 : vector<32x324xf32>, i32 -> vector<32x324xf32>
    %cst_130 = arith.constant dense<0.000000e+00> : vector<32x324xf32>
    %158 = tpu.matmul %22, %155, %cst_130 {dimension_numbers = #tpu.dot_dimension_numbers<[1], [0], [0], [1], [0, 0, 1, 1], [], []>} : vector<32x32xbf16>, vector<32x324xbf16>, vector<32x324xf32> -> vector<32x324xf32>
    %c18_i32_131 = arith.constant 18 : i32
    %159 = tpu.dynamic_rotate %158 by %c18_i32_131 dim 1 : vector<32x324xf32>, i32 -> vector<32x324xf32>
    %160 = arith.addf %157, %159 : vector<32x324xf32>
    %cst_132 = arith.constant dense<0.000000e+00> : vector<32x324xf32>
    %161 = tpu.matmul %24, %155, %cst_132 {dimension_numbers = #tpu.dot_dimension_numbers<[1], [0], [0], [1], [0, 0, 1, 1], [], []>} : vector<32x32xbf16>, vector<32x324xbf16>, vector<32x324xf32> -> vector<32x324xf32>
    %c17_i32_133 = arith.constant 17 : i32
    %162 = tpu.dynamic_rotate %161 by %c17_i32_133 dim 1 : vector<32x324xf32>, i32 -> vector<32x324xf32>
    %163 = arith.addf %160, %162 : vector<32x324xf32>
    %cst_134 = arith.constant dense<0.000000e+00> : vector<32x324xf32>
    %164 = tpu.matmul %26, %155, %cst_134 {dimension_numbers = #tpu.dot_dimension_numbers<[1], [0], [0], [1], [0, 0, 1, 1], [], []>} : vector<32x32xbf16>, vector<32x324xbf16>, vector<32x324xf32> -> vector<32x324xf32>
    %c1_i32_135 = arith.constant 1 : i32
    %165 = tpu.dynamic_rotate %164 by %c1_i32_135 dim 1 : vector<32x324xf32>, i32 -> vector<32x324xf32>
    %166 = arith.addf %163, %165 : vector<32x324xf32>
    %cst_136 = arith.constant dense<0.000000e+00> : vector<32x324xf32>
    %167 = tpu.matmul %28, %155, %cst_136 {dimension_numbers = #tpu.dot_dimension_numbers<[1], [0], [0], [1], [0, 0, 1, 1], [], []>} : vector<32x32xbf16>, vector<32x324xbf16>, vector<32x324xf32> -> vector<32x324xf32>
    %168 = arith.addf %166, %167 : vector<32x324xf32>
    %cst_137 = arith.constant dense<0.000000e+00> : vector<32x324xf32>
    %169 = tpu.matmul %30, %155, %cst_137 {dimension_numbers = #tpu.dot_dimension_numbers<[1], [0], [0], [1], [0, 0, 1, 1], [], []>} : vector<32x32xbf16>, vector<32x324xbf16>, vector<32x324xf32> -> vector<32x324xf32>
    %c323_i32_138 = arith.constant 323 : i32
    %170 = tpu.dynamic_rotate %169 by %c323_i32_138 dim 1 : vector<32x324xf32>, i32 -> vector<32x324xf32>
    %171 = arith.addf %168, %170 : vector<32x324xf32>
    %cst_139 = arith.constant dense<0.000000e+00> : vector<32x324xf32>
    %172 = tpu.matmul %32, %155, %cst_139 {dimension_numbers = #tpu.dot_dimension_numbers<[1], [0], [0], [1], [0, 0, 1, 1], [], []>} : vector<32x32xbf16>, vector<32x324xbf16>, vector<32x324xf32> -> vector<32x324xf32>
    %c307_i32_140 = arith.constant 307 : i32
    %173 = tpu.dynamic_rotate %172 by %c307_i32_140 dim 1 : vector<32x324xf32>, i32 -> vector<32x324xf32>
    %174 = arith.addf %171, %173 : vector<32x324xf32>
    %cst_141 = arith.constant dense<0.000000e+00> : vector<32x324xf32>
    %175 = tpu.matmul %34, %155, %cst_141 {dimension_numbers = #tpu.dot_dimension_numbers<[1], [0], [0], [1], [0, 0, 1, 1], [], []>} : vector<32x32xbf16>, vector<32x324xbf16>, vector<32x324xf32> -> vector<32x324xf32>
    %c306_i32_142 = arith.constant 306 : i32
    %176 = tpu.dynamic_rotate %175 by %c306_i32_142 dim 1 : vector<32x324xf32>, i32 -> vector<32x324xf32>
    %177 = arith.addf %174, %176 : vector<32x324xf32>
    %cst_143 = arith.constant dense<0.000000e+00> : vector<32x324xf32>
    %178 = tpu.matmul %36, %155, %cst_143 {dimension_numbers = #tpu.dot_dimension_numbers<[1], [0], [0], [1], [0, 0, 1, 1], [], []>} : vector<32x32xbf16>, vector<32x324xbf16>, vector<32x324xf32> -> vector<32x324xf32>
    %c305_i32_144 = arith.constant 305 : i32
    %179 = tpu.dynamic_rotate %178 by %c305_i32_144 dim 1 : vector<32x324xf32>, i32 -> vector<32x324xf32>
    %180 = arith.addf %177, %179 : vector<32x324xf32>
    %181 = vector.broadcast %56 : vector<32x1xf32> to vector<32x324xf32>
    %182 = arith.addf %180, %181 : vector<32x324xf32>
    %cst_145 = arith.constant 0.000000e+00 : f32
    %183 = vector.broadcast %cst_145 : f32 to vector<32x324xf32>
    %184 = arith.maximumf %182, %183 : vector<32x324xf32>
    %185 = vector.broadcast %0 : vector<1x324xf32> to vector<32x324xf32>
    %186 = arith.mulf %184, %185 : vector<32x324xf32>
    %187 = arith.truncf %186 : vector<32x324xf32> to vector<32x324xbf16>
    %cst_146 = arith.constant dense<0.000000e+00> : vector<3x324xf32>
    %188 = tpu.matmul %38, %187, %cst_146 {dimension_numbers = #tpu.dot_dimension_numbers<[1], [0], [0], [1], [0, 0, 1, 1], [], []>} : vector<3x32xbf16>, vector<32x324xbf16>, vector<3x324xf32> -> vector<3x324xf32>
    %c19_i32_147 = arith.constant 19 : i32
    %189 = tpu.dynamic_rotate %188 by %c19_i32_147 dim 1 : vector<3x324xf32>, i32 -> vector<3x324xf32>
    %cst_148 = arith.constant dense<0.000000e+00> : vector<3x324xf32>
    %190 = tpu.matmul %40, %187, %cst_148 {dimension_numbers = #tpu.dot_dimension_numbers<[1], [0], [0], [1], [0, 0, 1, 1], [], []>} : vector<3x32xbf16>, vector<32x324xbf16>, vector<3x324xf32> -> vector<3x324xf32>
    %c18_i32_149 = arith.constant 18 : i32
    %191 = tpu.dynamic_rotate %190 by %c18_i32_149 dim 1 : vector<3x324xf32>, i32 -> vector<3x324xf32>
    %192 = arith.addf %189, %191 : vector<3x324xf32>
    %cst_150 = arith.constant dense<0.000000e+00> : vector<3x324xf32>
    %193 = tpu.matmul %42, %187, %cst_150 {dimension_numbers = #tpu.dot_dimension_numbers<[1], [0], [0], [1], [0, 0, 1, 1], [], []>} : vector<3x32xbf16>, vector<32x324xbf16>, vector<3x324xf32> -> vector<3x324xf32>
    %c17_i32_151 = arith.constant 17 : i32
    %194 = tpu.dynamic_rotate %193 by %c17_i32_151 dim 1 : vector<3x324xf32>, i32 -> vector<3x324xf32>
    %195 = arith.addf %192, %194 : vector<3x324xf32>
    %cst_152 = arith.constant dense<0.000000e+00> : vector<3x324xf32>
    %196 = tpu.matmul %44, %187, %cst_152 {dimension_numbers = #tpu.dot_dimension_numbers<[1], [0], [0], [1], [0, 0, 1, 1], [], []>} : vector<3x32xbf16>, vector<32x324xbf16>, vector<3x324xf32> -> vector<3x324xf32>
    %c1_i32_153 = arith.constant 1 : i32
    %197 = tpu.dynamic_rotate %196 by %c1_i32_153 dim 1 : vector<3x324xf32>, i32 -> vector<3x324xf32>
    %198 = arith.addf %195, %197 : vector<3x324xf32>
    %cst_154 = arith.constant dense<0.000000e+00> : vector<3x324xf32>
    %199 = tpu.matmul %46, %187, %cst_154 {dimension_numbers = #tpu.dot_dimension_numbers<[1], [0], [0], [1], [0, 0, 1, 1], [], []>} : vector<3x32xbf16>, vector<32x324xbf16>, vector<3x324xf32> -> vector<3x324xf32>
    %200 = arith.addf %198, %199 : vector<3x324xf32>
    %cst_155 = arith.constant dense<0.000000e+00> : vector<3x324xf32>
    %201 = tpu.matmul %48, %187, %cst_155 {dimension_numbers = #tpu.dot_dimension_numbers<[1], [0], [0], [1], [0, 0, 1, 1], [], []>} : vector<3x32xbf16>, vector<32x324xbf16>, vector<3x324xf32> -> vector<3x324xf32>
    %c323_i32_156 = arith.constant 323 : i32
    %202 = tpu.dynamic_rotate %201 by %c323_i32_156 dim 1 : vector<3x324xf32>, i32 -> vector<3x324xf32>
    %203 = arith.addf %200, %202 : vector<3x324xf32>
    %cst_157 = arith.constant dense<0.000000e+00> : vector<3x324xf32>
    %204 = tpu.matmul %50, %187, %cst_157 {dimension_numbers = #tpu.dot_dimension_numbers<[1], [0], [0], [1], [0, 0, 1, 1], [], []>} : vector<3x32xbf16>, vector<32x324xbf16>, vector<3x324xf32> -> vector<3x324xf32>
    %c307_i32_158 = arith.constant 307 : i32
    %205 = tpu.dynamic_rotate %204 by %c307_i32_158 dim 1 : vector<3x324xf32>, i32 -> vector<3x324xf32>
    %206 = arith.addf %203, %205 : vector<3x324xf32>
    %cst_159 = arith.constant dense<0.000000e+00> : vector<3x324xf32>
    %207 = tpu.matmul %52, %187, %cst_159 {dimension_numbers = #tpu.dot_dimension_numbers<[1], [0], [0], [1], [0, 0, 1, 1], [], []>} : vector<3x32xbf16>, vector<32x324xbf16>, vector<3x324xf32> -> vector<3x324xf32>
    %c306_i32_160 = arith.constant 306 : i32
    %208 = tpu.dynamic_rotate %207 by %c306_i32_160 dim 1 : vector<3x324xf32>, i32 -> vector<3x324xf32>
    %209 = arith.addf %206, %208 : vector<3x324xf32>
    %cst_161 = arith.constant dense<0.000000e+00> : vector<3x324xf32>
    %210 = tpu.matmul %54, %187, %cst_161 {dimension_numbers = #tpu.dot_dimension_numbers<[1], [0], [0], [1], [0, 0, 1, 1], [], []>} : vector<3x32xbf16>, vector<32x324xbf16>, vector<3x324xf32> -> vector<3x324xf32>
    %c305_i32_162 = arith.constant 305 : i32
    %211 = tpu.dynamic_rotate %210 by %c305_i32_162 dim 1 : vector<3x324xf32>, i32 -> vector<3x324xf32>
    %212 = arith.addf %209, %211 : vector<3x324xf32>
    %213 = vector.broadcast %57 : vector<3x1xf32> to vector<3x324xf32>
    %214 = arith.addf %212, %213 : vector<3x324xf32>
    %cst_163 = arith.constant 0.000000e+00 : f32
    %215 = vector.broadcast %cst_163 : f32 to vector<3x324xf32>
    %216 = arith.maximumf %214, %215 : vector<3x324xf32>
    %c0_164 = arith.constant 0 : index
    %c0_165 = arith.constant 0 : index
    %c0_166 = arith.constant 0 : index
    %217 = vector.load %arg9[%c0_164, %c0_165, %c0_166] : memref<1x3x324xf32, #tpu.memory_space<vmem>>, vector<1x3x324xf32>
    %218 = vector.shape_cast %217 : vector<1x3x324xf32> to vector<3x324xf32>
    %219 = vector.shape_cast %216 : vector<3x324xf32> to vector<1x3x324xf32>
    tpu.vector_store %arg9[%c0_164, %c0_165, %c0_166], %219 {strides = array<i32>} : memref<1x3x324xf32, #tpu.memory_space<vmem>>, vector<1x3x324xf32>,
    return
  }
  func.func @transform_0(%arg0: i32) -> (i32, i32, i32) {
    %c0_i32 = arith.constant 0 : i32
    %c0_i32_0 = arith.constant 0 : i32
    %c0_i32_1 = arith.constant 0 : i32
    return %arg0, %c0_i32, %c0_i32_0 : i32, i32, i32
  }
  func.func @transform_1(%arg0: i32) -> (i32, i32) {
    %c0_i32 = arith.constant 0 : i32
    %c0_i32_0 = arith.constant 0 : i32
    %c0_i32_1 = arith.constant 0 : i32
    return %c0_i32, %c0_i32_0 : i32, i32
  }
  func.func @transform_2(%arg0: i32) -> (i32, i32, i32) {
    %c0_i32 = arith.constant 0 : i32
    %c0_i32_0 = arith.constant 0 : i32
    %c0_i32_1 = arith.constant 0 : i32
    %c0_i32_2 = arith.constant 0 : i32
    return %c0_i32, %c0_i32_0, %c0_i32_1 : i32, i32, i32
  }
  func.func @transform_3(%arg0: i32) -> (i32, i32) {
    %c0_i32 = arith.constant 0 : i32
    %c0_i32_0 = arith.constant 0 : i32
    %c0_i32_1 = arith.constant 0 : i32
    return %c0_i32, %c0_i32_0 : i32, i32
  }
  func.func @transform_4(%arg0: i32) -> (i32, i32, i32) {
    %c0_i32 = arith.constant 0 : i32
    %c0_i32_0 = arith.constant 0 : i32
    %c0_i32_1 = arith.constant 0 : i32
    %c0_i32_2 = arith.constant 0 : i32
    return %c0_i32, %c0_i32_0, %c0_i32_1 : i32, i32, i32
  }
  func.func @transform_5(%arg0: i32) -> (i32, i32) {
    %c0_i32 = arith.constant 0 : i32
    %c0_i32_0 = arith.constant 0 : i32
    %c0_i32_1 = arith.constant 0 : i32
    return %c0_i32, %c0_i32_0 : i32, i32
  }
  func.func @transform_6(%arg0: i32) -> (i32, i32, i32) {
    %c0_i32 = arith.constant 0 : i32
    %c0_i32_0 = arith.constant 0 : i32
    %c0_i32_1 = arith.constant 0 : i32
    %c0_i32_2 = arith.constant 0 : i32
    return %c0_i32, %c0_i32_0, %c0_i32_1 : i32, i32, i32
  }
  func.func @transform_7(%arg0: i32) -> (i32, i32) {
    %c0_i32 = arith.constant 0 : i32
    %c0_i32_0 = arith.constant 0 : i32
    %c0_i32_1 = arith.constant 0 : i32
    return %c0_i32, %c0_i32_0 : i32, i32
  }
  func.func @transform_8(%arg0: i32) -> (i32, i32, i32) {
    %c0_i32 = arith.constant 0 : i32
    %c0_i32_0 = arith.constant 0 : i32
    %c0_i32_1 = arith.constant 0 : i32
    return %arg0, %c0_i32, %c0_i32_0 : i32, i32, i32
  }
}

</mosaic_0001>

<bundles_post_ra>
// kernel: tpu_custom_call.1
= control target key start
LH: loop header
LB: loop body
LE: loop exit
PB: predicated region body
PF: predicated region fallthrough
CT: control target
= control target key end

     0   :  { %s9762_s27 = smov 0   ;;  %s14758_s0 = inlined_call_operand.vmem [shape: bf16[2,8,324], index: 0, kind: input, shape index: {}]   ;;  %s14759_s1 = inlined_call_operand.vmem [shape: f32[1,324], index: 1, kind: input, shape index: {}]   ;;  %s14760_s2 = inlined_call_operand.vmem [shape: bf16[9,32,8], index: 2, kind: input, shape index: {}]   ;;  %s14761_s3 = inlined_call_operand.vmem [shape: f32[32,1], index: 3, kind: input, shape index: {}]   ;;  %s14762_s4 = inlined_call_operand.vmem [shape: bf16[9,32,32], index: 4, kind: input, shape index: {}]   ;;  %s14763_s5 = inlined_call_operand.vmem [shape: f32[32,1], index: 5, kind: input, shape index: {}]   ;;  %s14764_s6 = inlined_call_operand.vmem [shape: bf16[9,3,32], index: 6, kind: input, shape index: {}]   ;;  %s14765_s7 = inlined_call_operand.vmem [shape: f32[3,1], index: 7, kind: input, shape index: {}]   ;;  %s14766_s8 = inlined_call_operand.vmem [shape: f32[2,3,324], index: 8, kind: output, shape index: {}]  }
   0x1 LB: > { %s8793_s28 = sadd.s32 4294967295, %s9702_s27   ;;  %p8797_p0 = scmp.ge.s32.totalorder %s9702_s27, 1  ;;  %s9702_s27 = sphi %s9762_s27, %s18_s27  }
   0x2   : > { %p262_p1 = scmp.lt.s32.totalorder %s9702_s27, 3 }
   0x4   : > { %p263_p2 = pnand %p8797_p0, %p262_p1 }
   0x6   : > { %266 = sbr.rel (%p263_p2) target bundleno = 4140 (0x102c), region = 52 }
   0xd   : > { %p296_p3 = scmp.lt.s32.totalorder %s8793_s28, 1  ;;  %v9624_v0 = vld [vmem:[%s14760_s2] sm:$0xff]   ;;  %v14767_v1 = vmov 0   ;;  %vm442_vm0 = vcmask 64512   ;;  %vm449_vm1 = vcmask 1043456   ;;  %v9625_v7 = vld [vmem:[%s14760_s2 + $0x8] sm:$0xff]  }
   0xe   : > { %491 = vmatprep.mubr.bf16.mxu0 %v14767_v1  ;;  %9620 = vset.pattern.permute.xlu1 %v14767_v1  ;;  %v9626_v9 = vld [vmem:[%s14760_s2 + $0x10] sm:$0xff]   ;;  %v414_v10 = vld [vmem:[%s14761_s3 + $0x8] sm:$0xff]  ;;  %v413_v11 = vld [vmem:[%s14761_s3] sm:$0xff]  ;;  %s9705_s17 = smov 68   ;;  %s9706_s18 = smov 49   ;;  %vm561_vm2 = vcmask 1048096  }
   0xf   : > { %s15424_s28 = smov (!%p296_p3, %s8793_s28), 1  ;;  %9248 = vmatprep.mubr.msk.bf16.mxu1 %vm442_vm0, %v9624_v0  ;;  %9619 = vset.pattern.permute.xlu0 %v14767_v1  ;;  %v415_v12 = vld [vmem:[%s14761_s3 + $0x10] sm:$0xff]  ;;  %v416_v13 = vld [vmem:[%s14761_s3 + $0x18] sm:$0xff]  ;;  %v9628_v15 = vld [vmem:[%s14760_s2 + $0x20] sm:$0xff]   ;;  %s9707_s19 = smov 48   ;;  %vm788_vm3 = vcmask 1039360  }
  0x10   : > { %s9597_s9 = smul.u32 12, %s15424_s28  ;;  %2273 = vperm.xlu1 %9620, %v414_v10   ;;  %2268 = vperm.xlu0 %9619, %v413_v11   ;;  %v9627_v14 = vld [vmem:[%s14760_s2 + $0x18] sm:$0xff]   ;;  %v9629_v16 = vld [vmem:[%s14760_s2 + $0x28] sm:$0xff]   ;;  %v9630_v17 = vld [vmem:[%s14760_s2 + $0x30] sm:$0xff]   ;;  %s9708_s20 = smov 32   ;;  %vm1011_vm4 = vcmask 1031168  }
  0x11   : > { %v9631_v18 = vld [vmem:[%s14760_s2 + $0x38] sm:$0xff]   ;;  %v9632_v19 = vld [vmem:[%s14760_s2 + $0x40] sm:$0xff]   ;;  %v9633_v20 = vld [vmem:[%s14760_s2 + $0x48] sm:$0xff]   ;;  %s9709_s21 = smov 31   ;;  %s9710_s22 = smov 30   ;;  %vm1246_vm5 = vcmask 900096  }
  0x12   : > { %s300_s12 = scalar_lea.vmem %s14758_s0, %s9597_s9  ;;  %v9634_v21 = vld [vmem:[%s14760_s2 + $0x50] sm:$0xff]   ;;  %v9635_v22 = vld [vmem:[%s14760_s2 + $0x58] sm:$0xff]   ;;  %v9636_v23 = vld [vmem:[%s14760_s2 + $0x60] sm:$0xff]   ;;  %s9711_s23 = smov 127   ;;  %vm1437_vm6 = vcmask 400384   ;;  %vm1636_vm7 = vcmask 392192  }
  0x13   : > { %v422_v2 = vld [vmem:[%s300_s12] sm:$0xff]  ;;  %v9785_v3 = vld [vmem:[%s300_s12 + $0x8] ss:$0 sps:$4 sm:$0xff]   ;;  %v9638_v25 = vld [vmem:[%s14760_s2 + $0x70] sm:$0xff]   ;;  %s9712_s24 = smov 126   ;;  %s9713_s25 = smov 110  }
  0x14   : > { %v9787_v4 = vcombine.high %v422_v2, %v422_v2  ;;  %v8874_v5 = vcombine.low %v422_v2, %v422_v2  ;;  %9588 = vmatprep.subr.msk.bf16.mxu1 %vm449_vm1, %v9785_v3  ;;  %v9793_v6 = vsel %vm449_vm1, %v9785_v3, 0  ;;  %2278 = vperm.xlu1 %9620, %v415_v12   ;;  %v9637_v24 = vld [vmem:[%s14760_s2 + $0x68] sm:$0xff]   ;;  %v9639_v26 = vld [vmem:[%s14760_s2 + $0x78] sm:$0xff]   ;;  %v9640_v27 = vld [vmem:[%s14760_s2 + $0x80] sm:$0xff]   ;;  %vm1835_vm8 = vcmask 261120   ;;  %s9714_s11 = smov 79  }
  0x15   : > { %9247 = vmatpush3.bf16.msra.mxu1 %v9793_v6  ;;  %2283 = vperm.xlu0 %9619, %v416_v13   ;;  %v9641_v28 = vld [vmem:[%s14760_s2 + $0x88] sm:$0xff]   ;;  %vm2034_vm9 = vcmask 252928   ;;  %vm2233_vm10 = vcmask 244736   ;;  %vm2380_vm11 = vcmask 646144   ;;  %vm9716_vm12 = vmmov 0  }
  0x16   : > { %8877 = vmatprep.subr.msk.bf16.mxu0 %vm449_vm1, %v9787_v4  ;;  %v9801_v8 = vsel %vm449_vm1, %v8874_v5, 0  ;;  %8884 = vmatprep.subr.msk.bf16.mxu1 %vm449_vm1, %v9787_v4  ;;  %vm8736_vm13 = vcmask 550912  }
  0x17   : > { %460 = vmatpush1.bf16.msra.mxu0 %v9801_v8 }
  0x18   : > { %9589 = vmatprep.subr.msk.bf16.mxu0 %vm449_vm1, %v9785_v3  ;;  %9249 = vmatmul.mubr.msk.bf16.vlgmr.msra.gmra.mrb[0].mxu1 %vm442_vm0, %v9625_v7 }
  0x19   : > { %615 = vmatpush1.bf16.msra.mxu1 %v9801_v8  ;;  %646 = vmatprep.mubr.bf16.mxu1 %v14767_v1 }
  0x1a   : > { %8878 = vmatmul.mubr.msk.bf16.vlgmr.msra.gmra.mrb[0].mxu0 %vm442_vm0, %v9624_v0  ;;  %9590 = vmatprep.subr.msk.bf16.mxu1 %vm449_vm1, %v9785_v3 }
  0x1b   : > { %501 = vmatprep.mubr.bf16.mxu0 %v14767_v1  ;;  %9253 = vmatpush3.bf16.msra.mxu0 %v9793_v6 }
  0x1c   : > { %8891 = vmatprep.subr.msk.bf16.mxu0 %vm449_vm1, %v9787_v4 }
  0x20   : > { %8885 = vmatmul.mubr.msk.bf16.vlgmr.msra.gmra.mrb[4].mxu1 %vm442_vm0, %v9626_v9 }
  0x21   : > { %656 = vmatprep.mubr.bf16.mxu1 %v14767_v1  ;;  %9259 = vmatpush3.bf16.msra.mxu1 %v9793_v6 }
  0x22   : > { %8879 = vmatmul.mubr.msk.bf16.gmra.mrb[4].mxu0 %vm442_vm0, %v9625_v7  ;;  %8898 = vmatprep.subr.msk.bf16.mxu1 %vm449_vm1, %v9787_v4 }
  0x23   : > { %9254 = vmatprep.mubr.msk.bf16.mxu0 %vm442_vm0, %v9626_v9 }
  0x28   : > { %8886 = vmatmul.mubr.msk.bf16.gmra.mrb[8].mxu1 %vm442_vm0, %v9627_v14 }
  0x29   : > { %9260 = vmatprep.mubr.msk.bf16.mxu1 %vm442_vm0, %v9628_v15 }
  0x2a   : > { %9255 = vmatmul.mubr.msk.bf16.vlgmr.msra.gmra.mrb[8].mxu0 %vm442_vm0, %v9627_v14 }
  0x2b   : > { %838 = vmatpush1.bf16.msra.mxu0 %v9801_v8  ;;  %869 = vmatprep.mubr.bf16.mxu0 %v14767_v1 }
  0x2c   : > { %9591 = vmatprep.subr.msk.bf16.mxu0 %vm449_vm1, %v9785_v3 }
  0x30   : > { %9261 = vmatmul.mubr.msk.bf16.vlgmr.msra.gmra.mrb[12].mxu1 %vm442_vm0, %v9629_v16 }
  0x31   : > { %1061 = vmatpush1.bf16.msra.mxu1 %v9801_v8  ;;  %1092 = vmatprep.mubr.bf16.mxu1 %v14767_v1 }
  0x32   : > { %8892 = vmatmul.mubr.msk.bf16.vlgmr.msra.gmra.mrb[12].mxu0 %vm442_vm0, %v9628_v15  ;;  %9592 = vmatprep.subr.msk.bf16.mxu1 %vm449_vm1, %v9785_v3 }
  0x33   : > { %879 = vmatprep.mubr.bf16.mxu0 %v14767_v1  ;;  %9265 = vmatpush3.bf16.msra.mxu0 %v9793_v6 }
  0x34   : > { %8905 = vmatprep.subr.msk.bf16.mxu0 %vm449_vm1, %v9787_v4 }
  0x38   : > { %8899 = vmatmul.mubr.msk.bf16.vlgmr.msra.gmra.mrb[16].mxu1 %vm442_vm0, %v9630_v17 }
  0x39   : > { %1102 = vmatprep.mubr.bf16.mxu1 %v14767_v1  ;;  %9271 = vmatpush3.bf16.msra.mxu1 %v9793_v6 }
  0x3a   : > { %8893 = vmatmul.mubr.msk.bf16.gmra.mrb[16].mxu0 %vm442_vm0, %v9629_v16  ;;  %8912 = vmatprep.subr.msk.bf16.mxu1 %vm449_vm1, %v9787_v4 }
  0x3b   : > { %9266 = vmatprep.mubr.msk.bf16.mxu0 %vm442_vm0, %v9630_v17 }
  0x40   : > { %8900 = vmatmul.mubr.msk.bf16.gmra.mrb[20].mxu1 %vm442_vm0, %v9631_v18 }
  0x41   : > { %9272 = vmatprep.mubr.msk.bf16.mxu1 %vm442_vm0, %v9632_v19 }
  0x42   : > { %9267 = vmatmul.mubr.msk.bf16.vlgmr.msra.gmra.mrb[20].mxu0 %vm442_vm0, %v9631_v18 }
  0x43   : > { %1300 = vmatpush1.bf16.msra.mxu0 %v9801_v8  ;;  %1331 = vmatprep.mubr.bf16.mxu0 %v14767_v1 }
  0x44   : > { %9593 = vmatprep.subr.msk.bf16.mxu0 %vm449_vm1, %v9785_v3 }
  0x48   : > { %9273 = vmatmul.mubr.msk.bf16.vlgmr.msra.gmra.mrb[24].mxu1 %vm442_vm0, %v9633_v20 }
  0x49   : > { %1487 = vmatpush1.bf16.msra.mxu1 %v9801_v8  ;;  %1518 = vmatprep.mubr.bf16.mxu1 %v14767_v1 }
  0x4a   : > { %8906 = vmatmul.mubr.msk.bf16.vlgmr.msra.gmra.mrb[24].mxu0 %vm442_vm0, %v9632_v19  ;;  %9594 = vmatprep.subr.msk.bf16.mxu1 %vm449_vm1, %v9785_v3 }
  0x4b   : > { %1341 = vmatprep.mubr.bf16.mxu0 %v14767_v1  ;;  %9277 = vmatpush3.bf16.msra.mxu0 %v9793_v6 }
  0x4c   : > { %8919 = vmatprep.subr.msk.bf16.mxu0 %vm449_vm1, %v9787_v4 }
  0x50   : > { %8913 = vmatmul.mubr.msk.bf16.vlgmr.msra.gmra.mrb[28].mxu1 %vm442_vm0, %v9634_v21 }
  0x51   : > { %1528 = vmatprep.mubr.bf16.mxu1 %v14767_v1  ;;  %9283 = vmatpush3.bf16.msra.mxu1 %v9793_v6 }
  0x52   : > { %8907 = vmatmul.mubr.msk.bf16.gmra.mrb[28].mxu0 %vm442_vm0, %v9633_v20  ;;  %8926 = vmatprep.subr.msk.bf16.mxu1 %vm449_vm1, %v9787_v4 }
  0x53   : > { %9278 = vmatprep.mubr.msk.bf16.mxu0 %vm442_vm0, %v9634_v21 }
  0x58   : > { %8914 = vmatmul.mubr.msk.bf16.gmra.mrb[32].mxu1 %vm442_vm0, %v9635_v22 }
  0x59   : > { %9284 = vmatprep.mubr.msk.bf16.mxu1 %vm442_vm0, %v9636_v23 }
  0x5a   : > { %9279 = vmatmul.mubr.msk.bf16.vlgmr.msra.gmra.mrb[32].mxu0 %vm442_vm0, %v9635_v22 }
  0x5b   : > { %1686 = vmatpush1.bf16.msra.mxu0 %v9801_v8  ;;  %1717 = vmatprep.mubr.bf16.mxu0 %v14767_v1 }
  0x5c   : > { %9595 = vmatprep.subr.msk.bf16.mxu0 %vm449_vm1, %v9785_v3 }
  0x60   : > { %9285 = vmatmul.mubr.msk.bf16.vlgmr.msra.gmra.mrb[36].mxu1 %vm442_vm0, %v9637_v24 }
  0x61   : > { %1885 = vmatpush1.bf16.msra.mxu1 %v9801_v8  ;;  %1916 = vmatprep.mubr.bf16.mxu1 %v14767_v1 }
  0x62   : > { %8920 = vmatmul.mubr.msk.bf16.vlgmr.msra.gmra.mrb[36].mxu0 %vm442_vm0, %v9636_v23  ;;  %9596 = vmatprep.subr.msk.bf16.mxu1 %vm449_vm1, %v9785_v3 }
  0x63   : > { %1727 = vmatprep.mubr.bf16.mxu0 %v14767_v1  ;;  %9289 = vmatpush3.bf16.msra.mxu0 %v9793_v6 }
  0x64   : > { %8933 = vmatprep.subr.msk.bf16.mxu0 %vm449_vm1, %v9787_v4 }
  0x68   : > { %8927 = vmatmul.mubr.msk.bf16.vlgmr.msra.gmra.mrb[40].mxu1 %vm442_vm0, %v9638_v25 }
  0x69   : > { %1926 = vmatprep.mubr.bf16.mxu1 %v14767_v1  ;;  %9295 = vmatpush3.bf16.msra.mxu1 %v9793_v6 }
  0x6a   : > { %8921 = vmatmul.mubr.msk.bf16.gmra.mrb[40].mxu0 %vm442_vm0, %v9637_v24 }
  0x6b   : > { %9290 = vmatprep.mubr.msk.bf16.mxu0 %vm442_vm0, %v9638_v25 }
  0x70   : > { %8928 = vmatmul.mubr.msk.bf16.gmra.mrb[44].mxu1 %vm442_vm0, %v9639_v26 }
  0x71   : > { %9296 = vmatprep.mubr.msk.bf16.mxu1 %vm442_vm0, %v9640_v27 }
  0x72   : > { %9291 = vmatmul.mubr.msk.bf16.vlgmr.msra.gmra.mrb[44].mxu0 %vm442_vm0, %v9639_v26 }
  0x73   : > { %2084 = vmatpush1.bf16.msra.mxu0 %v9801_v8  ;;  %2115 = vmatprep.mubr.bf16.mxu0 %v14767_v1 }
  0x78   : > { %9297 = vmatmul.mubr.msk.bf16.vlgmr.msra.gmra.mrb[48].mxu1 %vm442_vm0, %v9641_v28 }
  0x79   : > { %2429 = vmatprep.mubr.bf16.mxu1 %v14767_v1 }
  0x7a   : > { %8934 = vmatmul.mubr.msk.bf16.vlgmr.msra.gmra.mrb[48].mxu0 %vm442_vm0, %v9640_v27 }
  0x7b   : > { %2125 = vmatprep.mubr.bf16.mxu0 %v14767_v1 }
  0x82   : > { %8935 = vmatmul.mubr.msk.bf16.gmra.mrb[52].mxu0 %vm442_vm0, %v9641_v28 }
  0xeb   : > { %v9966_v29 = vpop.f32.mrb[0].mxu1 }
  0xec   : > { %v9968_v31 = vpop.f32.mrb[1].mxu1 }
  0xed   : > { %v493_v30 = vpop.f32.mrb[0].mxu0  ;;  %v9971_v33 = vpop.f32.mrb[2].mxu1 }
  0xee   : > { %562 = vrot.lane.b32.xlu0 %v493_v30, %s9705_s17  ;;  %v495_v32 = vpop.f32.mrb[1].mxu0  ;;  %v9973_v35 = vpop.f32.mrb[3].mxu1 }
  0xef   : > { %v497_v34 = vpop.f32.mrb[2].mxu0 }
  0xf0   : > { %565 = vrot.lane.b32.xlu1 %v497_v34, %s9705_s17  ;;  %v499_v36 = vpop.f32.mrb[3].mxu0 }
  0xf2   : > { %574 = vrot.lane.b32.xlu0 %v495_v32, %s9705_s17 }
  0xf3   : > { %v648_v37 = vpop.f32.mrb[4].mxu1 }
  0xf4   : > { %576 = vrot.lane.b32.xlu1 %v499_v36, %s9705_s17  ;;  %v650_v39 = vpop.f32.mrb[5].mxu1 }
  0xf5   : > { %v503_v38 = vpop.f32.mrb[4].mxu0  ;;  %v652_v41 = vpop.f32.mrb[6].mxu1 }
  0xf6   : > { %716 = vrot.lane.b32.xlu0 %v648_v37, %s9705_s17  ;;  %v505_v40 = vpop.f32.mrb[5].mxu0  ;;  %v654_v43 = vpop.f32.mrb[7].mxu1 }
  0xf7   : > { %v507_v42 = vpop.f32.mrb[6].mxu0 }
  0xf8   : > { %571 = vrot.lane.b32.xlu1 %v507_v42, %s9705_s17  ;;  %v509_v44 = vpop.f32.mrb[7].mxu0 }
  0xfa   : > { %568 = vrot.lane.b32.xlu0 %v503_v38, %s9705_s17 }
  0xfb   : > { %v658_v45 = vpop.f32.mrb[8].mxu1 }
  0xfc   : > { %730 = vrot.lane.b32.xlu1 %v654_v43, %s9705_s17  ;;  %v660_v46 = vpop.f32.mrb[9].mxu1 }
  0xfd   : > { %v9982_v47 = vpop.f32.mrb[8].mxu0  ;;  %v662_v48 = vpop.f32.mrb[10].mxu1 }
  0xfe   : > { %728 = vrot.lane.b32.xlu0 %v650_v39, %s9705_s17  ;;  %v9985_v49 = vpop.f32.mrb[9].mxu0  ;;  %v664_v50 = vpop.f32.mrb[11].mxu1 }
  0xff   : > { %v9987_v51 = vpop.f32.mrb[10].mxu0 }
 0x100   : > { %580 = vrot.lane.b32.xlu1 %v509_v44, %s9705_s17  ;;  %v9990_v52 = vpop.f32.mrb[11].mxu0 }
 0x102   : > { %578 = vrot.lane.b32.xlu0 %v505_v40, %s9705_s17 }
 0x103   : > { %v9994_v53 = vpop.f32.mrb[12].mxu1 }
 0x104   : > { %725 = vrot.lane.b32.xlu1 %v662_v48, %s9705_s17  ;;  %v9996_v55 = vpop.f32.mrb[13].mxu1 }
 0x105   : > { %v871_v54 = vpop.f32.mrb[12].mxu0  ;;  %v9999_v57 = vpop.f32.mrb[14].mxu1 }
 0x106   : > { %719 = vrot.lane.b32.xlu0 %v652_v41, %s9705_s17  ;;  %v873_v56 = vpop.f32.mrb[13].mxu0  ;;  %v10001_v59 = vpop.f32.mrb[15].mxu1 }
 0x107   : > { %v875_v58 = vpop.f32.mrb[14].mxu0 }
 0x108   : > { %734 = vrot.lane.b32.xlu1 %v664_v50, %s9705_s17  ;;  %v877_v60 = vpop.f32.mrb[15].mxu0 }
 0x10a   : > { %722 = vrot.lane.b32.xlu0 %v658_v45, %s9705_s17 }
 0x10b   : > { %v1094_v61 = vpop.f32.mrb[16].mxu1 }
 0x10c   : > { %939 = vrot.lane.b32.xlu1 %v871_v54, %s9705_s17  ;;  %v1096_v62 = vpop.f32.mrb[17].mxu1 }
 0x10d   : > { %v881_v63 = vpop.f32.mrb[16].mxu0  ;;  %v1098_v0 = vpop.f32.mrb[18].mxu1 }
 0x10e   : > { %732 = vrot.lane.b32.xlu0 %v660_v46, %s9705_s17  ;;  %v883_v2 = vpop.f32.mrb[17].mxu0  ;;  %v1100_v3 = vpop.f32.mrb[19].mxu1 }
 0x10f   : > { %v885_v4 = vpop.f32.mrb[18].mxu0 }
 0x110   : > { %942 = vrot.lane.b32.xlu1 %v875_v58, %s9705_s17  ;;  %v887_v5 = vpop.f32.mrb[19].mxu0 }
 0x112   : > { %951 = vrot.lane.b32.xlu0 %v873_v56, %s9705_s17 }
 0x113   : > { %v1104_v6 = vpop.f32.mrb[20].mxu1 }
 0x114   : > { %953 = vrot.lane.b32.xlu1 %v877_v60, %s9705_s17  ;;  %v1106_v7 = vpop.f32.mrb[21].mxu1 }
 0x115   : > { %v10010_v8 = vpop.f32.mrb[20].mxu0  ;;  %v1108_v9 = vpop.f32.mrb[22].mxu1 }
 0x116   : > { %1162 = vrot.lane.b32.xlu0 %v1094_v61, %s9705_s17  ;;  %v10013_v10 = vpop.f32.mrb[21].mxu0  ;;  %v1110_v11 = vpop.f32.mrb[23].mxu1 }
 0x117   : > { %v10015_v12 = vpop.f32.mrb[22].mxu0 }
 0x118   : > { %1165 = vrot.lane.b32.xlu1 %v1098_v0, %s9705_s17  ;;  %v10018_v13 = vpop.f32.mrb[23].mxu0 }
 0x11a   : > { %945 = vrot.lane.b32.xlu0 %v881_v63, %s9705_s17 }
 0x11b   : > { %v9274_v14 = vpop.f32.mrb[24].mxu1 }
 0x11c   : > { %948 = vrot.lane.b32.xlu1 %v885_v4, %s9705_s17  ;;  %v1386_v16 = vpop.f32.mrb[25].mxu1 }
 0x11d   : > { %v1333_v15 = vpop.f32.mrb[24].mxu0  ;;  %v9275_v17 = vpop.f32.mrb[26].mxu1 }
 0x11e   : > { %1174 = vrot.lane.b32.xlu0 %v1096_v62, %s9705_s17  ;;  %v1335_v18 = vpop.f32.mrb[25].mxu0  ;;  %v1389_v19 = vpop.f32.mrb[27].mxu1 }
 0x11f   : > { %v1337_v20 = vpop.f32.mrb[26].mxu0 }
 0x120   : > { %1176 = vrot.lane.b32.xlu1 %v1100_v3, %s9705_s17  ;;  %v1339_v21 = vpop.f32.mrb[27].mxu0 }
 0x122   : > { %955 = vrot.lane.b32.xlu0 %v883_v2, %s9705_s17 }
 0x123   : > { %v1520_v22 = vpop.f32.mrb[28].mxu1 }
 0x124   : > { %957 = vrot.lane.b32.xlu1 %v887_v5, %s9705_s17  ;;  %v1522_v23 = vpop.f32.mrb[29].mxu1 }
 0x125   : > { %v1343_v24 = vpop.f32.mrb[28].mxu0  ;;  %v1524_v26 = vpop.f32.mrb[30].mxu1 }
 0x126   : > { %1168 = vrot.lane.b32.xlu0 %v1104_v6, %s9705_s17  ;;  %v1345_v25 = vpop.f32.mrb[29].mxu0  ;;  %v1526_v27 = vpop.f32.mrb[31].mxu1 }
 0x127   : > { %v1347_v28 = vpop.f32.mrb[30].mxu0 }
 0x128   : > { %1171 = vrot.lane.b32.xlu1 %v1108_v9, %s9705_s17  ;;  %v1349_v30 = vpop.f32.mrb[31].mxu0 }
 0x12a   : > { %1178 = vrot.lane.b32.xlu0 %v1106_v7, %s9705_s17 }
 0x12b   : > { %v1530_v32 = vpop.f32.mrb[32].mxu1 }
 0x12c   : > { %1180 = vrot.lane.b32.xlu1 %v1110_v11, %s9705_s17  ;;  %v1532_v34 = vpop.f32.mrb[33].mxu1 }
 0x12d   : > { %v10030_v36 = vpop.f32.mrb[32].mxu0  ;;  %v1534_v37 = vpop.f32.mrb[34].mxu1 }
 0x12e   : > { %1413 = vrot.lane.b32.xlu0 %v1333_v15, %s9706_s18  ;;  %v10033_v38 = vpop.f32.mrb[33].mxu0  ;;  %v1536_v39 = vpop.f32.mrb[35].mxu1 }
 0x12f   : > { %v10035_v40 = vpop.f32.mrb[34].mxu0 }
 0x130   : > { %1429 = vrot.lane.b32.xlu1 %v9274_v14, %s9706_s18  ;;  %v10038_v41 = vpop.f32.mrb[35].mxu0 }
 0x132   : > { %1415 = vrot.lane.b32.xlu0 %v1335_v18, %s9706_s18 }
 0x133   : > { %v10042_v42 = vpop.f32.mrb[36].mxu1 }
 0x134   : > { %1417 = vrot.lane.b32.xlu1 %v1386_v16, %s9706_s18  ;;  %v10044_v44 = vpop.f32.mrb[37].mxu1 }
 0x135   : > { %v1719_v43 = vpop.f32.mrb[36].mxu0  ;;  %v10047_v46 = vpop.f32.mrb[38].mxu1 }
 0x136   : > { %1421 = vrot.lane.b32.xlu0 %v1339_v21, %s9706_s18  ;;  %v1721_v45 = vpop.f32.mrb[37].mxu0  ;;  %v10049_v50 = vpop.f32.mrb[39].mxu1 }
 0x137   : > { %v1723_v48 = vpop.f32.mrb[38].mxu0 }
 0x138   : > { %1419 = vrot.lane.b32.xlu1 %v1337_v20, %s9706_s18  ;;  %v1725_v54 = vpop.f32.mrb[39].mxu0 }
 0x13a   : > { %1588 = vrot.lane.b32.xlu0 %v1520_v22, %s9705_s17 }
 0x13b   : > { %v1918_v56 = vpop.f32.mrb[40].mxu1 }
 0x13c   : > { %1435 = vrot.lane.b32.xlu1 %v9275_v17, %s9706_s18  ;;  %v10054_v58 = vpop.f32.mrb[41].mxu1 }
 0x13d   : > { %v10056_v60 = vpop.f32.mrb[40].mxu0  ;;  %v10059_v61 = vpop.f32.mrb[42].mxu1 }
 0x13e   : > { %1614 = vrot.lane.b32.xlu0 %v1522_v23, %s9707_s19  ;;  %v1731_v62 = vpop.f32.mrb[41].mxu0  ;;  %v10061_v63 = vpop.f32.mrb[43].mxu1 }
 0x13f   : > { %v10063_v0 = vpop.f32.mrb[42].mxu0  ;;  %v10111_v23 = vpop.permute.xlu1 %2273 }
 0x140   : > { %1423 = vrot.lane.b32.xlu1 %v1389_v19, %s9706_s18  ;;  %v10066_v2 = vpop.f32.mrb[43].mxu0  ;;  %v10102_v19 = vpop.permute.xlu0 %2268  ;;  %14941 = vst [vmem:[#allocation6_spill] sm:$0xff] %v10111_v23 }
 0x141   : > { %14939 = vst [vmem:[#allocation4_spill] sm:$0xff] %v10102_v19 }
 0x142   : > { %1427 = vrot.lane.b32.xlu0 %v1345_v25, %s9706_s18 }
 0x143   : > { %v10070_v3 = vpop.f32.mrb[44].mxu1 }
 0x144   : > { %1612 = vrot.lane.b32.xlu1 %v1520_v22, %s9707_s19  ;;  %14937 = vst [vmem:[#allocation2_spill] sm:$0xff] %v10070_v3  ;;  %v10074_v5 = vpop.f32.mrb[45].mxu1  ;;  %v10117_v25 = vpop.permute.xlu0 %2283 }
 0x145   : > { %v10072_v4 = vpop.f32.mrb[44].mxu0  ;;  %v10079_v7 = vpop.f32.mrb[46].mxu1  ;;  %14942 = vst [vmem:[#allocation7_spill] sm:$0xff] %v10117_v25 }
 0x146   : > { %1618 = vrot.lane.b32.xlu0 %v1524_v26, %s9707_s19  ;;  %v10077_v6 = vpop.f32.mrb[45].mxu0  ;;  %14938 = vst [vmem:[#allocation3_spill] sm:$0xff] %v10079_v7  ;;  %v10083_v11 = vpop.f32.mrb[47].mxu1 }
 0x147   : > { %v10081_v9 = vpop.f32.mrb[46].mxu0 }
 0x148   : > { %1425 = vrot.lane.b32.xlu1 %v1343_v24, %s9706_s18  ;;  %v10086_v14 = vpop.f32.mrb[47].mxu0 }
 0x14a   : > { %1431 = vrot.lane.b32.xlu0 %v1347_v28, %s9706_s18 }
 0x14c   : > { %1590 = vrot.lane.b32.xlu1 %v1524_v26, %s9705_s17  ;;  %v10120_v26 = vpop.permute.xlu1 %2278 }
 0x14d   : > { %v10090_v15 = vpop.f32.mrb[48].mxu0  ;;  %14943 = vst [vmem:[#allocation8_spill] sm:$0xff] %v10120_v26 }
 0x14e   : > { %1620 = vrot.lane.b32.xlu0 %v1526_v27, %s9707_s19  ;;  %v10093_v16 = vpop.f32.mrb[49].mxu0 }
 0x14f   : > { %v10095_v17 = vpop.f32.mrb[50].mxu0 }
 0x150   : > { %1624 = vrot.lane.b32.xlu1 %v1530_v32, %s9707_s19  ;;  %v10098_v18 = vpop.f32.mrb[51].mxu0 }
 0x152   : > { %1433 = vrot.lane.b32.xlu0 %v1349_v30, %s9706_s18 }
 0x154   : > { %1626 = vrot.lane.b32.xlu1 %v1532_v34, %s9707_s19 }
 0x155   : > { %v10104_v20 = vpop.f32.mrb[52].mxu0 }
 0x156   : > { %14940 = vst [vmem:[#allocation5_spill] sm:$0xff] %v10104_v20  ;;  %1592 = vrot.lane.b32.xlu0 %v1530_v32, %s9705_s17  ;;  %v10107_v21 = vpop.f32.mrb[53].mxu0 }
 0x157   : > { %v10109_v22 = vpop.f32.mrb[54].mxu0 }
 0x158   : > { %1594 = vrot.lane.b32.xlu1 %v1534_v37, %s9705_s17  ;;  %v10114_v24 = vpop.f32.mrb[55].mxu0 }
 0x15a   : > { %1630 = vrot.lane.b32.xlu0 %v1534_v37, %s9707_s19 }
 0x15c   : > { %1632 = vrot.lane.b32.xlu1 %v1536_v39, %s9707_s19 }
 0x15e   : > { %1787 = vrot.lane.b32.xlu0 %v1719_v43, %s9705_s17 }
 0x160   : > { %v10123_v27 = vpop.permute.xlu0 %562  ;;  %1811 = vrot.lane.b32.xlu1 %v1719_v43, %s9708_s20 }
 0x161   : > { %14944 = vst [vmem:[#allocation9_spill] sm:$0xff] %v10123_v27 }
 0x162   : > { %v10126_v28 = vpop.permute.xlu1 %565  ;;  %1813 = vrot.lane.b32.xlu0 %v1721_v45, %s9708_s20 }
 0x164   : > { %v10129_v30 = vpop.permute.xlu0 %574  ;;  %1789 = vrot.lane.b32.xlu1 %v1723_v48, %s9705_s17 }
 0x165   : > { %14945 = vst [vmem:[#allocation10_spill] sm:$0xff] %v10129_v30 }
 0x166   : > { %v10132_v32 = vpop.permute.xlu1 %576  ;;  %1817 = vrot.lane.b32.xlu0 %v1723_v48, %s9708_s20 }
 0x167   : > { %14946 = vst [vmem:[#allocation11_spill] sm:$0xff] %v10132_v32 }
 0x168   : > { %v717_v34 = vpop.permute.xlu0 %716  ;;  %2010 = vrot.lane.b32.xlu1 %v1918_v56, %s9709_s21 }
 0x16a   : > { %v10136_v37 = vpop.permute.xlu1 %571  ;;  %1819 = vrot.lane.b32.xlu0 %v1725_v54, %s9708_s20 }
 0x16c   : > { %v10139_v39 = vpop.permute.xlu0 %568  ;;  %1823 = vrot.lane.b32.xlu1 %v10056_v60, %s9708_s20 }
 0x16d   : > { %14947 = vst [vmem:[#allocation12_spill] sm:$0xff] %v10139_v39 }
 0x16e   : > { %v10143_v43 = vpop.permute.xlu1 %730  ;;  %1986 = vrot.lane.b32.xlu0 %v1918_v56, %s9705_s17 }
 0x170   : > { %v10146_v45 = vpop.permute.xlu0 %728  ;;  %2012 = vrot.lane.b32.xlu1 %v10054_v58, %s9709_s21 }
 0x172   : > { %v10150_v48 = vpop.permute.xlu1 %580  ;;  %1791 = vrot.lane.b32.xlu0 %v10056_v60, %s9705_s17 }
 0x173   : > { %14948 = vst [vmem:[#allocation13_spill] sm:$0xff] %v10150_v48  ;;  %v10204_v48 = vsel %vm561_vm2, %v10123_v27, %v9968_v31  ;;  %v10228_v27 = vsel %vm561_vm2, %v10139_v39, %v9966_v29  ;;  %v744_v29 = vsel %vm561_vm2, %v10146_v45, %v717_v34 }
 0x174   : > { %v10154_v54 = vpop.permute.xlu0 %578  ;;  %1825 = vrot.lane.b32.xlu1 %v1731_v62, %s9708_s20  ;;  %14950 = vst [vmem:[#allocation15_spill] sm:$0xff] %v10204_v48  ;;  %14951 = vst [vmem:[#allocation16_spill] sm:$0xff] %v10228_v27 }
 0x175   : > { %14949 = vst [vmem:[#allocation14_spill] sm:$0xff] %v10154_v54 }
 0x176   : > { %v10157_v1 = vpop.permute.xlu1 %725  ;;  %2016 = vrot.lane.b32.xlu0 %v10059_v61, %s9709_s21 }
 0x178   : > { %v10161_v56 = vpop.permute.xlu0 %719  ;;  %1988 = vrot.lane.b32.xlu1 %v10059_v61, %s9705_s17  ;;  %v10179_v61 = vpop.f32.mrb[48].mxu1 }
 0x179   : > { %v10185_v19 = vpop.f32.mrb[49].mxu1 }
 0x17a   : > { %v10165_v58 = vpop.permute.xlu1 %734  ;;  %1829 = vrot.lane.b32.xlu0 %v10063_v0, %s9708_s20  ;;  %v10199_v54 = vpop.f32.mrb[50].mxu1 }
 0x17b   : > { %v10206_v32 = vpop.f32.mrb[51].mxu1 }
 0x17c   : > { %v723_v60 = vpop.permute.xlu0 %722  ;;  %1793 = vrot.lane.b32.xlu1 %v10063_v0, %s9705_s17 }
 0x17e   : > { %v10171_v62 = vpop.permute.xlu1 %939  ;;  %1990 = vrot.lane.b32.xlu0 %v10070_v3, %s9705_s17 }
 0x180   : > { %v10175_v25 = vpop.permute.xlu0 %732  ;;  %2018 = vrot.lane.b32.xlu1 %v10061_v63, %s9709_s21 }
 0x182   : > { %v10181_v26 = vpop.permute.xlu1 %942  ;;  %2185 = vrot.lane.b32.xlu0 %v10090_v15, %s9705_s17 }
 0x184   : > { %v10187_v0 = vpop.permute.xlu0 %951  ;;  %1831 = vrot.lane.b32.xlu1 %v10066_v2, %s9708_s20 }
 0x186   : > { %v10191_v23 = vpop.permute.xlu1 %953  ;;  %2189 = vrot.lane.b32.xlu0 %v10104_v20, %s9705_s17 }
 0x188   : > { %v10195_v63 = vpop.permute.xlu0 %1162  ;;  %2024 = vrot.lane.b32.xlu1 %v10074_v5, %s9709_s21  ;;  %v718_v5 = vsel %vm561_vm2, %v717_v34, %v9985_v49 }
 0x18a   : > { %v10208_v2 = vpop.permute.xlu1 %1165  ;;  %582 = vrot.lane.b32.xlu0 %v10204_v48, %s9705_s17 }
 0x18c   : > { %v10212_v30 = vpop.permute.xlu0 %945  ;;  %1992 = vrot.lane.b32.xlu1 %v10079_v7, %s9705_s17 }
 0x18e   : > { %v10218_v20 = vpop.permute.xlu1 %948  ;;  %736 = vrot.lane.b32.xlu0 %v718_v5, %s9705_s17 }
 0x190   : > { %v10221_v31 = vpop.permute.xlu0 %1174  ;;  %2030 = vrot.lane.b32.xlu1 %v10083_v11, %s9709_s21 }
 0x192   : > { %v10230_v48 = vpop.permute.xlu1 %1176  ;;  %586 = vrot.lane.b32.xlu0 %v10228_v27, %s9705_s17 }
 0x194   : > { %v10234_v49 = vpop.permute.xlu0 %955  ;;  %2211 = vrot.lane.b32.xlu1 %v10093_v16, %s9710_s22  ;;  %v724_v16 = vsel %vm561_vm2, %v723_v60, %v9982_v47  ;;  %v746_v47 = vsel %vm561_vm2, %v10175_v25, %v723_v60  ;;  %v10295_v60 = vsel %vm561_vm2, %v10136_v37, %v9971_v33 }
 0x195   : > { %14956 = vst [vmem:[#allocation21_spill] sm:$0xff] %v10295_v60 }
 0x196   : > { %v10238_v7 = vpop.permute.xlu1 %957  ;;  %764 = vrot.lane.b32.xlu0 %v718_v5, %s9711_s23 }
 0x198   : > { %v10241_v11 = vpop.permute.xlu0 %1168  ;;  %2187 = vrot.lane.b32.xlu1 %v10095_v17, %s9705_s17 }
 0x19a   : > { %v10247_v27 = vpop.permute.xlu1 %1171  ;;  %766 = vrot.lane.b32.xlu0 %v744_v29, %s9711_s23 }
 0x19c   : > { %v10250_v39 = vpop.permute.xlu0 %1178  ;;  %2217 = vrot.lane.b32.xlu1 %v10098_v18, %s9710_s22  ;;  %v10269_v18 = vsel %vm561_vm2, %v10126_v28, %v9973_v35  ;;  %v941_v35 = vsel %vm561_vm2, %v10171_v62, %v9996_v55 }
 0x19d   : > { %14954 = vst [vmem:[#allocation19_spill] sm:$0xff] %v10269_v18 }
 0x19e   : > { %v10256_v5 = vpop.permute.xlu1 %1180  ;;  %740 = vrot.lane.b32.xlu0 %v724_v16, %s9705_s17 }
 0x1a0   : > { %v10259_v3 = vpop.permute.xlu0 %1413  ;;  %2191 = vrot.lane.b32.xlu1 %v10109_v22, %s9705_s17 }
 0x1a1   : > { %14952 = vst [vmem:[#allocation17_spill] sm:$0xff] %v10259_v3 }
 0x1a2   : > { %v10263_v34 = vpop.permute.xlu1 %1429  ;;  %776 = vrot.lane.b32.xlu0 %v724_v16, %s9711_s23  ;;  %v721_v16 = vsel %vm561_vm2, %v10161_v56, %v9990_v52 }
 0x1a3   : > { %14953 = vst [vmem:[#allocation18_spill] sm:$0xff] %v10263_v34 }
 0x1a4   : > { %v10271_v29 = vpop.permute.xlu0 %1415  ;;  %584 = vrot.lane.b32.xlu1 %v10269_v18, %s9705_s17 }
 0x1a6   : > { %v10277_v3 = vpop.permute.xlu1 %1417  ;;  %778 = vrot.lane.b32.xlu0 %v746_v47, %s9711_s23 }
 0x1a8   : > { %v10283_v34 = vpop.permute.xlu0 %1421  ;;  %738 = vrot.lane.b32.xlu1 %v721_v16, %s9705_s17 }
 0x1aa   : > { %v10289_v18 = vpop.permute.xlu1 %1419  ;;  %959 = vrot.lane.b32.xlu0 %v941_v35, %s9705_s17 }
 0x1ab   : > { %14955 = vst [vmem:[#allocation20_spill] sm:$0xff] %v10289_v18  ;;  %v967_v18 = vsel %vm561_vm2, %v10187_v0, %v10171_v62  ;;  %v727_v62 = vsel %vm561_vm2, %v10157_v1, %v9987_v51  ;;  %v747_v51 = vsel %vm561_vm2, %v10165_v58, %v10157_v1  ;;  %v969_v1 = vsel %vm561_vm2, %v10234_v49, %v10212_v30 }
 0x1ac   : > { %v10297_v47 = vpop.permute.xlu0 %1588  ;;  %588 = vrot.lane.b32.xlu1 %v10295_v60, %s9705_s17  ;;  %v745_v60 = vsel %vm561_vm2, %v10143_v43, %v10161_v56  ;;  %v947_v56 = vsel %vm561_vm2, %v10212_v30, %v9994_v53  ;;  %v1190_v53 = vsel %vm561_vm2, %v10221_v31, %v10195_v63  ;;  %v1170_v30 = vsel %vm561_vm2, %v10241_v11, %v10010_v8 }
 0x1ad   : > { %v1173_v8 = vsel %vm561_vm2, %v10247_v27, %v10015_v12 }
 0x1ae   : > { %v10301_v52 = vpop.permute.xlu1 %1435  ;;  %987 = vrot.lane.b32.xlu0 %v941_v35, %s9712_s24 }
 0x1af   : > { %14957 = vst [vmem:[#allocation22_spill] sm:$0xff] %v10301_v52 }
 0x1b0   : > { %v10304_v55 = vpop.permute.xlu0 %1614  ;;  %770 = vrot.lane.b32.xlu1 %v721_v16, %s9711_s23  ;;  %v1164_v16 = vsel %vm561_vm2, %v10195_v63, %v10013_v10 }
 0x1b1   : > { %14958 = vst [vmem:[#allocation23_spill] sm:$0xff] %v10304_v55 }
 0x1b2   : > { %v10310_v33 = vpop.permute.xlu1 %1423  ;;  %989 = vrot.lane.b32.xlu0 %v967_v18, %s9712_s24 }
 0x1b4   : > { %v10316_v52 = vpop.permute.xlu0 %1427  ;;  %772 = vrot.lane.b32.xlu1 %v745_v60, %s9711_s23 }
 0x1b6   : > { %v10322_v35 = vpop.permute.xlu1 %1612  ;;  %1182 = vrot.lane.b32.xlu0 %v1164_v16, %s9705_s17 }
 0x1b7   : > { %14959 = vst [vmem:[#allocation24_spill] sm:$0xff] %v10322_v35 }
 0x1b8   : > { %v10328_v18 = vpop.permute.xlu0 %1618  ;;  %742 = vrot.lane.b32.xlu1 %v727_v62, %s9705_s17 }
 0x1b9   : > { %14960 = vst [vmem:[#allocation25_spill] sm:$0xff] %v10328_v18 }
 0x1ba   : > { %v10334_v60 = vpop.permute.xlu1 %1425  ;;  %963 = vrot.lane.b32.xlu0 %v947_v56, %s9705_s17 }
 0x1bb   : > { %14961 = vst [vmem:[#allocation26_spill] sm:$0xff] %v10334_v60 }
 0x1bc   : > { %v10337_v10 = vpop.permute.xlu0 %1431  ;;  %782 = vrot.lane.b32.xlu1 %v727_v62, %s9711_s23 }
 0x1bd   : > { %14962 = vst [vmem:[#allocation27_spill] sm:$0xff] %v10337_v10 }
 0x1be   : > { %v10340_v35 = vpop.permute.xlu1 %1590  ;;  %1214 = vrot.lane.b32.xlu0 %v1164_v16, %s9713_s25  ;;  %v944_v16 = vsel %vm561_vm2, %v10181_v26, %v10001_v59 }
 0x1c0   : > { %v10346_v18 = vpop.permute.xlu0 %1620  ;;  %784 = vrot.lane.b32.xlu1 %v747_v51, %s9711_s23 }
 0x1c2   : > { %v10352_v10 = vpop.permute.xlu1 %1624  ;;  %1216 = vrot.lane.b32.xlu0 %v1190_v53, %s9713_s25  ;;  %v950_v53 = vsel %vm561_vm2, %v10218_v20, %v9999_v57 }
 0x1c3   : > { %14963 = vst [vmem:[#allocation28_spill] sm:$0xff] %v10352_v10  ;;  %v968_v10 = vsel %vm561_vm2, %v10191_v23, %v10181_v26  ;;  %v1167_v26 = vsel %vm561_vm2, %v10208_v2, %v10018_v13  ;;  %v1193_v13 = vsel %vm561_vm2, %v10256_v5, %v10247_v27 }
 0x1c4   : > { %v10358_v62 = vpop.permute.xlu0 %1433  ;;  %961 = vrot.lane.b32.xlu1 %v944_v16, %s9705_s17 }
 0x1c5   : > { %14964 = vst [vmem:[#allocation29_spill] sm:$0xff] %v10358_v62 }
 0x1c6   : > { %v10364_v51 = vpop.permute.xlu1 %1626  ;;  %1001 = vrot.lane.b32.xlu0 %v969_v1, %s9712_s24 }
 0x1c8   : > { %v1593_v63 = vpop.permute.xlu0 %1592  ;;  %993 = vrot.lane.b32.xlu1 %v944_v16, %s9712_s24 }
 0x1c9   : > { %v1598_v12 = vsel %vm561_vm2, %v1593_v63, %v10030_v36  ;;  %v970_v36 = vsel %vm561_vm2, %v10238_v7, %v10218_v20  ;;  %v1192_v20 = vsel %vm561_vm2, %v10250_v39, %v10241_v11 }
 0x1ca   : > { %v1595_v59 = vpop.permute.xlu1 %1594  ;;  %1005 = vrot.lane.b32.xlu0 %v950_v53, %s9712_s24 }
 0x1cc   : > { %v10375_v62 = vpop.permute.xlu0 %1630  ;;  %995 = vrot.lane.b32.xlu1 %v968_v10, %s9712_s24 }
 0x1cd   : > { %14965 = vst [vmem:[#allocation30_spill] sm:$0xff] %v10375_v62 }
 0x1ce   : > { %v10381_v16 = vpop.permute.xlu1 %1632  ;;  %1186 = vrot.lane.b32.xlu0 %v1170_v30, %s9705_s17 }
 0x1d0   : > { %v10384_v57 = vpop.permute.xlu0 %1787  ;;  %999 = vrot.lane.b32.xlu1 %v947_v56, %s9712_s24 }
 0x1d2   : > { %v10387_v1 = vpop.permute.xlu1 %1811  ;;  %2215 = vrot.lane.b32.xlu0 %v10095_v17, %s9710_s22 }
 0x1d3   : > { %14966 = vst [vmem:[#allocation31_spill] sm:$0xff] %v10387_v1 }
 0x1d4   : > { %v10394_v10 = vpop.permute.xlu0 %1813  ;;  %1184 = vrot.lane.b32.xlu1 %v1167_v26, %s9705_s17 }
 0x1d5   : > { %14967 = vst [vmem:[#allocation32_spill] sm:$0xff] %v10394_v10 }
 0x1d6   : > { %v10400_v62 = vpop.permute.xlu1 %1789  ;;  %1238 = vrot.lane.b32.xlu0 %v1173_v8, %s9713_s25 }
 0x1d8   : > { %v10403_v56 = vpop.permute.xlu0 %1817  ;;  %965 = vrot.lane.b32.xlu1 %v950_v53, %s9705_s17  ;;  %v1191_v53 = vsel %vm561_vm2, %v10230_v48, %v10208_v2 }
 0x1da   : > { %v10409_v17 = vpop.permute.xlu1 %2010  ;;  %1240 = vrot.lane.b32.xlu0 %v1193_v13, %s9713_s25  ;;  %v1599_v13 = vsel %vm561_vm2, %v1595_v59, %v10035_v40 }
 0x1db   : > { %14968 = vst [vmem:[#allocation33_spill] sm:$0xff] %v10409_v17 }
 0x1dc   : > { %v10412_v1 = vpop.permute.xlu0 %1819  ;;  %1222 = vrot.lane.b32.xlu1 %v1167_v26, %s9713_s25 }
 0x1de   : > { %v10417_v10 = vpop.permute.xlu1 %1823  ;;  %1628 = vrot.lane.b32.xlu0 %v1598_v12, %s9707_s19 }
 0x1df   : > { %14969 = vst [vmem:[#allocation34_spill] sm:$0xff] %v10417_v10 }
 0x1e0   : > { %v1987_v27 = vpop.permute.xlu0 %1986  ;;  %1224 = vrot.lane.b32.xlu1 %v1191_v53, %s9713_s25 }
 0x1e1   : > { %v1994_v2 = vsel %vm561_vm2, %v1987_v27, %v10077_v6 }
 0x1e2   : > { %v10426_v17 = vpop.permute.xlu1 %2012  ;;  %1634 = vrot.lane.b32.xlu0 %v1599_v13, %s9707_s19 }
 0x1e4   : > { %v1792_v63 = vpop.permute.xlu0 %1791  ;;  %1007 = vrot.lane.b32.xlu1 %v970_v36, %s9712_s24 }
 0x1e5   : > { %v1797_v40 = vsel %vm561_vm2, %v1792_v63, %v10042_v42 }
 0x1e6   : > { %v10435_v26 = vpop.permute.xlu1 %1825  ;;  %2014 = vrot.lane.b32.xlu0 %v1994_v2, %s9709_s21 }
 0x1e8   : > { %v10438_v12 = vpop.permute.xlu0 %2016  ;;  %1230 = vrot.lane.b32.xlu1 %v1170_v30, %s9713_s25 }
 0x1ea   : > { %v1989_v59 = vpop.permute.xlu1 %1988  ;;  %1827 = vrot.lane.b32.xlu0 %v1797_v40, %s9708_s20 }
 0x1eb   : > { %v1995_v6 = vsel %vm561_vm2, %v1989_v59, %v10086_v14 }
 0x1ec   : > { %v10447_v53 = vpop.permute.xlu0 %1829  ;;  %1232 = vrot.lane.b32.xlu1 %v1192_v20, %s9713_s25 }
 0x1ee   : > { %v1794_v27 = vpop.permute.xlu1 %1793  ;;  %2020 = vrot.lane.b32.xlu0 %v1995_v6, %s9709_s21 }
 0x1ef   : > { %v1798_v42 = vsel %vm561_vm2, %v1794_v27, %v10047_v46 }
 0x1f0   : > { %v1991_v30 = vpop.permute.xlu0 %1990  ;;  %1188 = vrot.lane.b32.xlu1 %v1173_v8, %s9705_s17 }
 0x1f1   : > { %v1996_v14 = vsel %vm561_vm2, %v1991_v30, %v10072_v4  ;;  %v1596_v4 = vsel %vm561_vm2, %v10297_v47, %v10033_v38 }
 0x1f2   : > { %v10456_v13 = vpop.permute.xlu1 %2018  ;;  %1833 = vrot.lane.b32.xlu0 %v1798_v42, %s9708_s20 }
 0x1f4   : > { %v2186_v11 = vpop.permute.xlu0 %2185  ;;  %2209 = vrot.lane.b32.xlu1 %v10090_v15, %s9710_s22 }
 0x1f6   : > { %v10463_v36 = vpop.permute.xlu1 %1831  ;;  %2026 = vrot.lane.b32.xlu0 %v1996_v14, %s9709_s21 }
 0x1f8   : > { %v2190_v63 = vpop.permute.xlu0 %2189  ;;  %2223 = vrot.lane.b32.xlu1 %v10107_v21, %s9710_s22  ;;  %v2193_v21 = vsel %vm561_vm2, %v2186_v11, %v10185_v19 }
 0x1fa   : > { %v10468_v46 = vpop.permute.xlu1 %2024 }
 0x1fb   : > { %14970 = vst [vmem:[#allocation35_spill] sm:$0xff] %v10468_v46 }
 0x1fc   : > { %v10470_v8 = vpop.permute.xlu0 %582  ;;  %2229 = vrot.lane.b32.xlu1 %v10114_v24, %s9710_s22  ;;  %v1597_v24 = vsel %vm561_vm2, %v10340_v35, %v10038_v41  ;;  %v1796_v41 = vsel %vm561_vm2, %v10400_v62, %v10049_v50 }
 0x1fe   : > { %v1993_v2 = vpop.permute.xlu1 %1992 }
 0x1ff   : > { %v1997_v15 = vsel %vm561_vm2, %v1993_v2, %v10081_v9  ;;  %v1795_v9 = vsel %vm561_vm2, %v10384_v57, %v10044_v44  ;;  %v2195_v44 = vsel %vm561_vm2, %v2190_v63, %v10179_v61 }
 0x200   : > { %v737_v40 = vpop.permute.xlu0 %736  ;;  %2032 = vrot.lane.b32.xlu0 %v1997_v15, %s9709_s21  ;;  %1616 = vrot.lane.b32.xlu1 %v1596_v4, %s9707_s19 }
 0x201   : > { %v748_v50 = vsel %vm561_vm2, %v737_v40, %v10146_v45 }
 0x202   : > { %v10483_v59 = vpop.permute.xlu1 %2030 }
 0x203   : > { %14971 = vst [vmem:[#allocation36_spill] sm:$0xff] %v10483_v59 }
 0x204   : > { %v10488_v20 = vpop.permute.xlu0 %586  ;;  %2213 = vrot.lane.b32.xlu0 %v2193_v21, %s9710_s22  ;;  %1622 = vrot.lane.b32.xlu1 %v1597_v24, %s9707_s19 }
 0x206   : > { %v10492_v38 = vpop.permute.xlu1 %2211 }
 0x207   : > { %14972 = vst [vmem:[#allocation37_spill] sm:$0xff] %v10492_v38 }
 0x208   : > { %v10497_v47 = vpop.permute.xlu0 %764  ;;  %1815 = vrot.lane.b32.xlu1 %v1795_v9, %s9708_s20 }
 0x20a   : > { %v2188_v19 = vpop.permute.xlu1 %2187 }
 0x20b   : > { %v2194_v35 = vsel %vm561_vm2, %v2188_v19, %v10206_v32 }
 0x20c   : > { %v10505_v6 = vpop.permute.xlu0 %766  ;;  %2219 = vrot.lane.b32.xlu0 %v2194_v35, %s9710_s22  ;;  %1821 = vrot.lane.b32.xlu1 %v1796_v41, %s9708_s20 }
 0x20e   : > { %v10511_v57 = vpop.permute.xlu1 %2217 }
 0x20f   : > { %14973 = vst [vmem:[#allocation38_spill] sm:$0xff] %v10511_v57  ;;  %v15011_v57 = vld [vmem:[#allocation17_spill] sm:$0xff] }
 0x210   : > { %v741_v27 = vpop.permute.xlu0 %740  ;;  %2225 = vrot.lane.b32.xlu0 %v2195_v44, %s9710_s22 }
 0x211   : > { %v750_v42 = vsel %vm561_vm2, %v741_v27, %v10175_v25 }
 0x212   : > { %v10514_v30 = vpop.permute.xlu1 %2191 }
 0x213   : > { %v2196_v59 = vsel %vm561_vm2, %v10514_v30, %v10199_v54  ;;  %v14984_v54 = vld [vmem:[#allocation5_spill] sm:$0xff] }
 0x214   : > { %v10518_v32 = vpop.permute.xlu0 %776  ;;  %768 = vrot.lane.b32.xlu0 %v748_v50, %s9711_s23 }
 0x216   : > { %v10521_v62 = vpop.permute.xlu1 %584 }
 0x218   : > { %v10525_v61 = vpop.permute.xlu0 %778  ;;  %780 = vrot.lane.b32.xlu0 %v750_v42, %s9711_s23 }
 0x21a   : > { %v739_v11 = vpop.permute.xlu1 %738 }
 0x21b   : > { %v749_v14 = vsel %vm561_vm2, %v739_v11, %v10143_v43 }
 0x21c   : > { %v960_v63 = vpop.permute.xlu0 %959  ;;  %774 = vrot.lane.b32.xlu1 %v749_v14, %s9711_s23 }
 0x21d   : > { %v971_v45 = vsel %vm561_vm2, %v960_v63, %v10187_v0 }
 0x21e   : > { %991 = vrot.lane.b32.xlu0 %v971_v45, %s9712_s24  ;;  %v10534_v2 = vpop.permute.xlu1 %588 }
 0x21f   : > { %14974 = vst [vmem:[#allocation39_spill] sm:$0xff] %v10534_v2  ;;  %v15026_v2 = vld [vmem:[#allocation22_spill] sm:$0xff] }
 0x220   : > { %v10536_v4 = vpop.permute.xlu0 %987 }
 0x222   : > { %v10538_v25 = vpop.permute.xlu1 %770 }
 0x224   : > { %v10540_v15 = vpop.permute.xlu0 %989 }
 0x226   : > { %v10542_v40 = vpop.permute.xlu1 %772 }
 0x228   : > { %v1183_v21 = vpop.permute.xlu0 %1182 }
 0x229   : > { %v1194_v43 = vsel %vm561_vm2, %v1183_v21, %v10221_v31 }
 0x22a   : > { %1218 = vrot.lane.b32.xlu0 %v1194_v43, %s9713_s25  ;;  %v743_v24 = vpop.permute.xlu1 %742 }
 0x22b   : > { %v751_v0 = vsel %vm561_vm2, %v743_v24, %v10165_v58 }
 0x22c   : > { %v964_v9 = vpop.permute.xlu0 %963  ;;  %786 = vrot.lane.b32.xlu1 %v751_v0, %s9711_s23 }
 0x22d   : > { %v973_v19 = vsel %vm561_vm2, %v964_v9, %v10234_v49 }
 0x22e   : > { %1003 = vrot.lane.b32.xlu0 %v973_v19, %s9712_s24  ;;  %v10553_v41 = vpop.permute.xlu1 %782 }
 0x230   : > { %v10555_v35 = vpop.permute.xlu0 %1214 }
 0x232   : > { %v10557_v44 = vpop.permute.xlu1 %784 }
 0x234   : > { %v10559_v31 = vpop.permute.xlu0 %1216 }
 0x236   : > { %v962_v27 = vpop.permute.xlu1 %961 }
 0x237   : > { %v972_v58 = vsel %vm561_vm2, %v962_v27, %v10191_v23 }
 0x238   : > { %997 = vrot.lane.b32.xlu1 %v972_v58, %s9712_s24  ;;  %v10566_v42 = vpop.permute.xlu0 %1001 }
 0x23a   : > { %v10564_v50 = vpop.permute.xlu1 %993 }
 0x23c   : > { %1220 = vrot.lane.b32.xlu1 %v1183_v21, %s9713_s25  ;;  %v10571_v11 = vpop.permute.xlu0 %1005 }
 0x23e   : > { %v10569_v49 = vpop.permute.xlu1 %995 }
 0x240   : > { %v1187_v45 = vpop.permute.xlu0 %1186 }
 0x241   : > { %v1196_v21 = vsel %vm561_vm2, %v1187_v45, %v10250_v39 }
 0x242   : > { %v10573_v14 = vpop.permute.xlu1 %999 }
 0x244   : > { %v10592_v19 = vpop.permute.xlu0 %2215 }
 0x245   : > { %14975 = vst [vmem:[#allocation40_spill] sm:$0xff] %v10592_v19 }
 0x246   : > { %v1185_v63 = vpop.permute.xlu1 %1184 }
 0x247   : > { %1228 = vrot.lane.b32.xlu1 %v1185_v63, %s9713_s25  ;;  %v1195_v23 = vsel %vm561_vm2, %v1185_v63, %v10230_v48 }
 0x248   : > { %1226 = vrot.lane.b32.xlu0 %v1195_v23, %s9713_s25  ;;  %v10596_v58 = vpop.permute.xlu0 %1238 }
 0x249   : > { %14977 = vst [vmem:[#allocation42_spill] sm:$0xff] %v10596_v58 }
 0x24a   : > { %v966_v43 = vpop.permute.xlu1 %965 }
 0x24b   : > { %v974_v24 = vsel %vm561_vm2, %v966_v43, %v10238_v7  ;;  %v2311_v7 = vlaneseq }
 0x24c   : > { %1234 = vrot.lane.b32.xlu0 %v1196_v21, %s9713_s25  ;;  %1009 = vrot.lane.b32.xlu1 %v974_v24, %s9712_s24  ;;  %v10600_v43 = vpop.permute.xlu0 %1240  ;;  %v307_v21 = vld [vmem:[%s14759_s1] sm:$0x7] }
 0x24d   : > { %v2312_v63 = vshrl.u32 %v2311_v7, 7  ;;  %14979 = vst [vmem:[#allocation44_spill] sm:$0xff] %v10600_v43  ;;  %v14980_v7 = vld [vmem:[#allocation2_spill] sm:$0xff]  ;;  %v15008_v43 = vld [vmem:[#allocation12_spill] sm:$0xff] }
 0x24e   : > { %v10585_v0 = vpop.permute.xlu1 %1222 }
 0x24f   : > { %v2317_v24 = vsub.s32 1, %v2312_v63  ;;  %v2321_v46 = vsub.s32 2, %v2312_v63 }
 0x250   : > { %1236 = vrot.lane.b32.xlu1 %v1187_v45, %s9713_s25 }
 0x251   : > { %v2318_v38 = vrot.slane %v307_v21, %v2317_v24 }
 0x252   : > { %v10588_v9 = vpop.permute.xlu1 %1224 }
 0x256   : > { %v10590_v48 = vpop.permute.xlu1 %1007 }
 0x25a   : > { %v10594_v27 = vpop.permute.xlu1 %1230 }
 0x25b   : > { %14976 = vst [vmem:[#allocation41_spill] sm:$0xff] %v10594_v27  ;;  %v10615_v27 = vpop.permute.xlu0 %1628 }
 0x25c   : > { %14981 = vst [vmem:[#allocation2_spill] sm:$0xff] %v10615_v27  ;;  %v791_v27 = vsel %vm788_vm3, %v10538_v25, %v10542_v40  ;;  %v1014_v25 = vsel %vm1011_vm4, %v10564_v50, %v10569_v49 }
 0x25e   : > { %v10598_v39 = vpop.permute.xlu1 %1232 }
 0x25f   : > { %14978 = vst [vmem:[#allocation43_spill] sm:$0xff] %v10598_v39  ;;  %v10620_v39 = vpop.permute.xlu0 %1634 }
 0x262   : > { %v1189_v23 = vpop.permute.xlu1 %1188 }
 0x263   : > { %1244 = vrot.lane.b32.xlu1 %v1189_v23, %s9713_s25  ;;  %v1197_v45 = vsel %vm561_vm2, %v1189_v23, %v10256_v5  ;;  %v2313_v5 = vsub.s32 0, %v2312_v63  ;;  %v14982_v23 = vld [vmem:[#allocation3_spill] sm:$0xff] }
 0x264   : > { %1242 = vrot.lane.b32.xlu0 %v1197_v45, %s9713_s25  ;;  %v2322_v45 = vrot.slane %v307_v21, %v2321_v46  ;;  %14983 = vst [vmem:[#allocation3_spill] sm:$0xff] %v10620_v39 }
 0x265   : > { %v2314_v30 = vrot.slane %v307_v21, %v2313_v5 }
 0x266   : > { %v10632_v63 = vpop.permute.xlu1 %2209 }
 0x267   : > { %2022 = vrot.lane.b32.xlu1 %v14980_v7, %s9709_s21  ;;  %14987 = vst [vmem:[#allocation46_spill] sm:$0xff] %v10632_v63 }
 0x268   : > { %2231 = vrot.lane.b32.xlu0 %v2196_v59, %s9710_s22  ;;  %v10628_v59 = vpop.permute.xlu0 %2014 }
 0x269   : > { %14985 = vst [vmem:[#allocation5_spill] sm:$0xff] %v10628_v59 }
 0x26a   : > { %v10636_v24 = vpop.permute.xlu1 %2223 }
 0x26b   : > { %2325 = vrot.lane.b32.xlu1 %v2318_v38, %s9706_s18  ;;  %14989 = vst [vmem:[#allocation48_spill] sm:$0xff] %v10636_v24 }
 0x26c   : > { %2028 = vrot.lane.b32.xlu0 %v14982_v23, %s9709_s21  ;;  %v10630_v38 = vpop.permute.xlu0 %1827 }
 0x26d   : > { %14986 = vst [vmem:[#allocation45_spill] sm:$0xff] %v10630_v38 }
 0x26e   : > { %v10640_v21 = vpop.permute.xlu1 %2229 }
 0x26f   : > { %2221 = vrot.lane.b32.xlu1 %v14984_v54, %s9710_s22  ;;  %14991 = vst [vmem:[#allocation50_spill] sm:$0xff] %v10640_v21 }
 0x270   : > { %2327 = vrot.lane.b32.xlu0 %v2322_v45, %s9706_s18  ;;  %v10634_v46 = vpop.permute.xlu0 %2020 }
 0x271   : > { %14988 = vst [vmem:[#allocation47_spill] sm:$0xff] %v10634_v46 }
 0x272   : > { %v10646_v45 = vpop.permute.xlu1 %1616 }
 0x273   : > { %2323 = vrot.lane.b32.xlu1 %v2314_v30, %s9706_s18  ;;  %14994 = vst [vmem:[#allocation53_spill] sm:$0xff] %v10646_v45  ;;  %v15004_v45 = vld [vmem:[#allocation10_spill] sm:$0xff] }
 0x274   : > { %2227 = vrot.lane.b32.xlu0 %v10109_v22, %s9710_s22  ;;  %v10638_v7 = vpop.permute.xlu0 %1833 }
 0x275   : > { %14990 = vst [vmem:[#allocation49_spill] sm:$0xff] %v10638_v7 }
 0x276   : > { %v10650_v54 = vpop.permute.xlu1 %1622 }
 0x277   : > { %14996 = vst [vmem:[#allocation55_spill] sm:$0xff] %v10650_v54  ;;  %v1247_v54 = vsel %vm1246_vm5, %v10555_v35, %v10559_v31 }
 0x278   : > { %v10642_v5 = vpop.permute.xlu0 %2026 }
 0x279   : > { %14992 = vst [vmem:[#allocation51_spill] sm:$0xff] %v10642_v5 }
 0x27a   : > { %v10654_v63 = vpop.permute.xlu1 %1815 }
 0x27b   : > { %14998 = vst [vmem:[#allocation57_spill] sm:$0xff] %v10654_v63 }
 0x27c   : > { %v10644_v23 = vpop.permute.xlu0 %2032 }
 0x27d   : > { %14993 = vst [vmem:[#allocation52_spill] sm:$0xff] %v10644_v23 }
 0x27e   : > { %v10658_v24 = vpop.permute.xlu1 %1821 }
 0x27f   : > { %15000 = vst [vmem:[#allocation59_spill] sm:$0xff] %v10658_v24  ;;  %v15002_v24 = vld [vmem:[#allocation15_spill] sm:$0xff] }
 0x280   : > { %v10648_v22 = vpop.permute.xlu0 %2213 }
 0x281   : > { %14995 = vst [vmem:[#allocation54_spill] sm:$0xff] %v10648_v22 }
 0x284   : > { %v10652_v30 = vpop.permute.xlu0 %2219 }
 0x285   : > { %14997 = vst [vmem:[#allocation56_spill] sm:$0xff] %v10652_v30  ;;  %v789_v30 = vsel %vm788_vm3, %v10497_v47, %v10505_v6  ;;  %v15003_v47 = vld [vmem:[#allocation9_spill] sm:$0xff] }
 0x286   : > { %v809_v63 = vadd.f32 %v789_v30, %v15002_v24  ;;  %v590_v58 = vsel %vm561_vm2, %v15004_v45, %v15003_v47  ;;  %v15006_v30 = vld [vmem:[#allocation13_spill] sm:$0xff]  ;;  %v15009_v47 = vld [vmem:[#allocation14_spill] sm:$0xff] }
 0x287   : > { %v10690_v35 = vsel %vm561_vm2, %v15006_v30, %v10136_v37  ;;  %v10698_v19 = vsel %vm561_vm2, %v15009_v47, %v15008_v43  ;;  %v1439_v37 = vsel %vm1437_vm6, %v10271_v29, %v10277_v3  ;;  %v10717_v43 = vsel %vm1437_vm6, %v10283_v34, %v10310_v33  ;;  %v15022_v33 = vld [vmem:[#allocation25_spill] sm:$0xff] }
 0x288   : > { %v10656_v46 = vpop.permute.xlu0 %2225  ;;  %15007 = vst [vmem:[#allocation15_spill] sm:$0xff] %v10690_v35  ;;  %15010 = vst [vmem:[#allocation9_spill] sm:$0xff] %v10698_v19  ;;  %v15014_v35 = vld [vmem:[#allocation20_spill] sm:$0xff]  ;;  %v15017_v19 = vld [vmem:[#allocation18_spill] sm:$0xff]  ;;  %v1250_v3 = vsel %vm1246_vm5, %v10585_v0, %v10588_v9 }
 0x289   : > { %14999 = vst [vmem:[#allocation58_spill] sm:$0xff] %v10656_v46  ;;  %v1012_v46 = vsel %vm1011_vm4, %v10536_v4, %v10540_v15  ;;  %v15005_v4 = vld [vmem:[#allocation11_spill] sm:$0xff]  ;;  %v10712_v50 = vsel %vm1437_vm6, %v15014_v35, %v10283_v34  ;;  %15016 = vst [vmem:[#allocation13_spill] sm:$0xff] %v10717_v43  ;;  %v10737_v34 = vsel %vm1437_vm6, %v10334_v60, %v10316_v52  ;;  %v15030_v60 = vld [vmem:[#allocation30_spill] sm:$0xff] }
 0x28a   : > { %v1032_v39 = vadd.f32 %v1012_v46, %v809_v63  ;;  %v591_v24 = vsel %vm561_vm2, %v15005_v4, %v10126_v28  ;;  %v10703_v28 = vsel %vm1437_vm6, %v15011_v57, %v10271_v29  ;;  %15015 = vst [vmem:[#allocation11_spill] sm:$0xff] %v10712_v50  ;;  %15021 = vst [vmem:[#allocation17_spill] sm:$0xff] %v10737_v34  ;;  %v15023_v50 = vld [vmem:[#allocation29_spill] sm:$0xff]  ;;  %v15024_v0 = vld [vmem:[#allocation27_spill] sm:$0xff] }
 0x28b   : > { %15012 = vst [vmem:[#allocation10_spill] sm:$0xff] %v10703_v28  ;;  %v10722_v28 = vsel %vm1437_vm6, %v10316_v52, %v15017_v19  ;;  %v10742_v19 = vsel %vm1636_vm7, %v15022_v33, %v10346_v18  ;;  %v10747_v43 = vsel %vm1437_vm6, %v15024_v0, %v15023_v50  ;;  %v15033_v0 = vld [vmem:[#allocation31_spill] sm:$0xff] }
 0x28c   : > { %v769_v7 = vpop.permute.xlu0 %768  ;;  %v1271_v63 = vadd.f32 %v1247_v54, %v1032_v39  ;;  %v15013_v39 = vld [vmem:[#allocation19_spill] sm:$0xff]  ;;  %15018 = vst [vmem:[#allocation12_spill] sm:$0xff] %v10722_v28 }
 0x28d   : > { %v812_v54 = vadd.f32 %v791_v27, %v15013_v39  ;;  %v15019_v27 = vld [vmem:[#allocation24_spill] sm:$0xff]  ;;  %15025 = vst [vmem:[#allocation19_spill] sm:$0xff] %v10747_v43 }
 0x28e   : > { %v10660_v21 = vpop.permute.xlu1 %774  ;;  %v10732_v39 = vsel %vm1636_vm7, %v15019_v27, %v10304_v55  ;;  %v15028_v55 = vld [vmem:[#allocation28_spill] sm:$0xff]  ;;  %v1458_v34 = vadd.f32 %v15011_v57, %v1271_v63  ;;  %v15034_v57 = vld [vmem:[#allocation33_spill] sm:$0xff] }
 0x28f   : > { %15020 = vst [vmem:[#allocation14_spill] sm:$0xff] %v10732_v39  ;;  %v1035_v28 = vadd.f32 %v1014_v25, %v812_v54  ;;  %v10752_v39 = vsel %vm1437_vm6, %v15023_v50, %v15026_v2  ;;  %v10757_v52 = vsel %vm1636_vm7, %v15028_v55, %v10364_v51  ;;  %v10763_v25 = vsel %vm1636_vm7, %v15030_v60, %v10381_v16  ;;  %v15032_v54 = vld [vmem:[#allocation32_spill] sm:$0xff] }
 0x290   : > { %v10664_v23 = vpop.permute.xlu0 %780  ;;  %15027 = vst [vmem:[#allocation20_spill] sm:$0xff] %v10752_v39  ;;  %15029 = vst [vmem:[#allocation18_spill] sm:$0xff] %v10757_v52  ;;  %v10768_v43 = vsel %vm1835_vm8, %v15033_v0, %v15032_v54  ;;  %v10773_v2 = vsel %vm1835_vm8, %v10403_v56, %v10412_v1  ;;  %v10780_v63 = vsel %vm2034_vm9, %v15034_v57, %v10426_v17 }
 0x291   : > { %15031 = vst [vmem:[#allocation24_spill] sm:$0xff] %v10763_v25  ;;  %v1274_v50 = vadd.f32 %v1250_v3, %v1035_v28  ;;  %v10785_v25 = vsel %vm1835_vm8, %v10417_v10, %v10435_v26  ;;  %v10790_v52 = vsel %vm2034_vm9, %v10438_v12, %v10456_v13  ;;  %v594_v28 = vsel %vm561_vm2, %v10470_v8, %v15004_v45 }
 0x292   : > { %15035 = vst [vmem:[#allocation25_spill] sm:$0xff] %v10785_v25  ;;  %15036 = vst [vmem:[#allocation29_spill] sm:$0xff] %v10790_v52  ;;  %v596_v39 = vsel %vm561_vm2, %v10488_v20, %v15009_v47  ;;  %v595_v60 = vsel %vm561_vm2, %v10521_v62, %v15005_v4  ;;  %v790_v25 = vsel %vm788_vm3, %v10505_v6, %v769_v7 }
 0x293   : > { %v811_v10 = vadd.f32 %v769_v7, %v594_v28  ;;  %v793_v52 = vsel %vm788_vm3, %v10518_v32, %v10525_v61  ;;  %v1657_v8 = vadd.f32 %v15019_v27, %v1458_v34  ;;  %v792_v45 = vsel %vm788_vm3, %v10542_v40, %v10660_v21 }
 0x294   : > { %v992_v22 = vpop.permute.xlu0 %991  ;;  %v1461_v47 = vadd.f32 %v15014_v35, %v1274_v50  ;;  %v814_v62 = vadd.f32 %v10660_v21, %v595_v60  ;;  %v795_v32 = vsel %vm788_vm3, %v10553_v41, %v10557_v44  ;;  %v810_v4 = vadd.f32 %v790_v25, %v590_v58  ;;  %v15038_v50 = vld [vmem:[#allocation21_spill] sm:$0xff] }
 0x295   : > { %v1013_v6 = vsel %vm1011_vm4, %v10540_v15, %v992_v22  ;;  %v1034_v7 = vadd.f32 %v992_v22, %v811_v10  ;;  %v813_v34 = vadd.f32 %v792_v45, %v591_v24  ;;  %v1856_v10 = vadd.f32 %v15033_v0, %v1657_v8  ;;  %v15037_v0 = vld [vmem:[#allocation16_spill] sm:$0xff] }
 0x296   : > { %v817_v22 = vadd.f32 %v10664_v23, %v596_v39  ;;  %v1033_v41 = vadd.f32 %v1013_v6, %v810_v4  ;;  %v818_v28 = vadd.f32 %v795_v32, %v15038_v50  ;;  %v10843_v8 = vsel %vm1835_vm8, %v10447_v53, %v10463_v36  ;;  %v15040_v6 = vld [vmem:[#allocation13_spill] sm:$0xff]  ;;  %v15042_v32 = vld [vmem:[#allocation40_spill] sm:$0xff] }
 0x29c   : > { %v1219_v59 = vpop.permute.xlu0 %1218 }
 0x29d   : > { %v1248_v60 = vsel %vm1246_vm5, %v10559_v31, %v1219_v59  ;;  %v1016_v31 = vsel %vm1011_vm4, %v10573_v14, %v10566_v42  ;;  %v15039_v14 = vld [vmem:[#allocation39_spill] sm:$0xff] }
 0x29e   : > { %v10662_v5 = vpop.permute.xlu1 %786  ;;  %v597_v45 = vsel %vm561_vm2, %v15039_v14, %v15006_v30  ;;  %v15046_v30 = vld [vmem:[#allocation23_spill] sm:$0xff]  ;;  %v15058_v14 = vld [vmem:[#allocation14_spill] sm:$0xff] }
 0x29f   : > { %15001 = vst [vmem:[#allocation60_spill] sm:$0xff] %v10662_v5 }
 0x2a0   : > { %v10727_v29 = vpop.permute.xlu0 %1003 }
 0x2a1   : > { %v1040_v39 = vadd.f32 %v10727_v29, %v817_v22 }
 0x2aa   : > { %v10666_v38 = vpop.permute.xlu1 %997 }
 0x2ab   : > { %v1015_v27 = vsel %vm1011_vm4, %v10569_v49, %v10666_v38  ;;  %v1037_v21 = vadd.f32 %v10666_v38, %v814_v62  ;;  %v1660_v49 = vadd.f32 %v15022_v33, %v1461_v47  ;;  %v1272_v38 = vadd.f32 %v1248_v60, %v1033_v41  ;;  %v15047_v60 = vld [vmem:[#allocation10_spill] sm:$0xff]  ;;  %v15049_v41 = vld [vmem:[#allocation11_spill] sm:$0xff] }
 0x2ad   : > { %v1859_v62 = vadd.f32 %v10403_v56, %v1660_v49  ;;  %v15050_v49 = vld [vmem:[#allocation3_spill] sm:$0xff] }
 0x2ae   : > { %v1221_v5 = vpop.permute.xlu1 %1220 }
 0x2af   : > { %v1249_v20 = vsel %vm1246_vm5, %v1219_v59, %v1221_v5  ;;  %v1018_v59 = vsel %vm1011_vm4, %v10571_v11, %v10590_v48  ;;  %v2055_v11 = vadd.f32 %v15034_v57, %v1856_v10  ;;  %v794_v10 = vsel %vm788_vm3, %v10525_v61, %v10664_v23 }
 0x2b0   : > { %v1273_v15 = vadd.f32 %v1249_v20, %v1034_v7  ;;  %v2058_v61 = vadd.f32 %v10438_v12, %v1859_v62 }
 0x2b2   : > { %v1460_v33 = vadd.f32 %v1439_v37, %v1273_v15  ;;  %v15041_v37 = vld [vmem:[#allocation38_spill] sm:$0xff] }
 0x2b3   : > { %v10854_v4 = vsel %vm2233_vm10, %v15042_v32, %v15041_v37  ;;  %v15048_v15 = vld [vmem:[#allocation2_spill] sm:$0xff] }
 0x2b4   : > { %v1642_v56 = vsel %vm1636_vm7, %v10364_v51, %v15048_v15  ;;  %v15064_v15 = vld [vmem:[#allocation15_spill] sm:$0xff] }
 0x2b9   : > { %v1229_v46 = vpop.permute.xlu1 %1228 }
 0x2ba   : > { %v1227_v3 = vpop.permute.xlu0 %1226 }
 0x2bb   : > { %v1252_v40 = vsel %vm1246_vm5, %v1227_v3, %v1229_v46  ;;  %v1251_v58 = vsel %vm1246_vm5, %v10588_v9, %v1227_v3  ;;  %v1036_v46 = vadd.f32 %v1015_v27, %v813_v34  ;;  %v815_v9 = vadd.f32 %v793_v52, %v15037_v0  ;;  %v15043_v27 = vld [vmem:[#allocation44_spill] sm:$0xff]  ;;  %v15045_v34 = vld [vmem:[#allocation53_spill] sm:$0xff] }
 0x2bc   : > { %v1276_v25 = vadd.f32 %v1252_v40, %v1037_v21  ;;  %v1041_v52 = vadd.f32 %v1018_v59, %v818_v28  ;;  %v15044_v40 = vld [vmem:[#allocation42_spill] sm:$0xff]  ;;  %v1638_v57 = vsel %vm1636_vm7, %v15046_v30, %v15045_v34  ;;  %v1459_v21 = vadd.f32 %v15047_v60, %v1272_v38  ;;  %v15053_v59 = vld [vmem:[#allocation55_spill] sm:$0xff]  ;;  %v15054_v38 = vld [vmem:[#allocation12_spill] sm:$0xff] }
 0x2bd   : > { %v1275_v3 = vadd.f32 %v1251_v58, %v1036_v46  ;;  %v1038_v47 = vadd.f32 %v1016_v31, %v815_v9  ;;  %v1659_v22 = vadd.f32 %v1638_v57, %v1460_v33  ;;  %v10873_v46 = vsel %vm1636_vm7, %v10381_v16, %v15050_v49  ;;  %v15055_v16 = vld [vmem:[#allocation5_spill] sm:$0xff] }
 0x2be   : > { %v10775_v55 = vpop.permute.xlu1 %1009  ;;  %v1235_v35 = vpop.permute.xlu0 %1234  ;;  %v1463_v7 = vadd.f32 %v15040_v6, %v1276_v25  ;;  %v15051_v25 = vld [vmem:[#allocation43_spill] sm:$0xff]  ;;  %v1640_v51 = vsel %vm1636_vm7, %v10346_v18, %v15053_v59  ;;  %v1017_v0 = vsel %vm1011_vm4, %v10566_v42, %v10727_v29  ;;  %v2036_v50 = vsel %vm2034_vm9, %v10426_v17, %v15055_v16  ;;  %v15056_v28 = vld [vmem:[#allocation57_spill] sm:$0xff]  ;;  %v15060_v17 = vld [vmem:[#allocation60_spill] sm:$0xff] }
 0x2bf   : > { %v1462_v58 = vadd.f32 %v15049_v41, %v1275_v3  ;;  %v1837_v33 = vsel %vm1835_vm8, %v15032_v54, %v15056_v28  ;;  %v15057_v3 = vld [vmem:[#allocation9_spill] sm:$0xff]  ;;  %v1254_v42 = vsel %vm1246_vm5, %v15051_v25, %v1235_v35  ;;  %v15059_v29 = vld [vmem:[#allocation59_spill] sm:$0xff]  ;;  %v2257_v57 = vadd.f32 %v15042_v32, %v2058_v61  ;;  %v15065_v41 = vld [vmem:[#allocation26_spill] sm:$0xff] }
 0x2c0   : > { %v1662_v9 = vadd.f32 %v1640_v51, %v1463_v7  ;;  %v816_v18 = vadd.f32 %v794_v10, %v15057_v3  ;;  %v1858_v12 = vadd.f32 %v1837_v33, %v1659_v22  ;;  %v796_v7 = vsel %vm788_vm3, %v10557_v44, %v15060_v17  ;;  %v15062_v30 = vld [vmem:[#allocation45_spill] sm:$0xff]  ;;  %v15069_v59 = vld [vmem:[#allocation54_spill] sm:$0xff] }
 0x2c1   : > { %v1661_v62 = vadd.f32 %v10742_v19, %v1462_v58  ;;  %v1019_v44 = vsel %vm1011_vm4, %v10590_v48, %v10775_v55  ;;  %v820_v10 = vadd.f32 %v15060_v17, %v597_v45  ;;  %v15066_v58 = vld [vmem:[#allocation46_spill] sm:$0xff]  ;;  %v15070_v51 = vld [vmem:[#allocation37_spill] sm:$0xff]  ;;  %v15078_v17 = vld [vmem:[#allocation28_spill] sm:$0xff] }
 0x2c2   : > { %v1237_v5 = vpop.permute.xlu1 %1236  ;;  %v1039_v54 = vadd.f32 %v1017_v0, %v816_v18  ;;  %v2057_v22 = vadd.f32 %v2036_v50, %v1858_v12  ;;  %v2254_v49 = vadd.f32 %v15066_v58, %v2055_v11  ;;  %v2235_v48 = vsel %vm2233_vm10, %v15070_v51, %v15069_v59  ;;  %v15072_v50 = vld [vmem:[#allocation29_spill] sm:$0xff]  ;;  %v15073_v18 = vld [vmem:[#allocation56_spill] sm:$0xff]  ;;  %v15075_v12 = vld [vmem:[#allocation6_spill] sm:$0xff] }
 0x2c3   : > { %v1255_v24 = vsel %vm1246_vm5, %v1235_v35, %v1237_v5  ;;  %v1256_v5 = vsel %vm1246_vm5, %v15044_v40, %v15043_v27  ;;  %v15063_v35 = vld [vmem:[#allocation47_spill] sm:$0xff]  ;;  %v1043_v45 = vadd.f32 %v10775_v55, %v820_v10  ;;  %v15087_v59 = vld [vmem:[#allocation34_spill] sm:$0xff] }
 0x2c4   : > { %v1279_v20 = vadd.f32 %v1255_v24, %v1040_v39  ;;  %v15052_v24 = vld [vmem:[#allocation41_spill] sm:$0xff]  ;;  %v1280_v23 = vadd.f32 %v1256_v5, %v1041_v52  ;;  %v1839_v52 = vsel %vm1835_vm8, %v10412_v1, %v15059_v29  ;;  %v15061_v5 = vld [vmem:[#allocation27_spill] sm:$0xff]  ;;  %v2038_v60 = vsel %vm2034_vm9, %v10456_v13, %v15063_v35  ;;  %v15077_v29 = vld [vmem:[#allocation20_spill] sm:$0xff] }
 0x2c5   : > { %v1253_v31 = vsel %vm1246_vm5, %v15052_v24, %v15051_v25  ;;  %v1861_v19 = vadd.f32 %v1839_v52, %v1662_v9  ;;  %v15067_v25 = vld [vmem:[#allocation51_spill] sm:$0xff]  ;;  %v2256_v16 = vadd.f32 %v2235_v48, %v2057_v22 }
 0x2c6   : > { %v1466_v39 = vadd.f32 %v15054_v38, %v1279_v20  ;;  %v1658_v20 = vadd.f32 %v15058_v14, %v1459_v21  ;;  %v1277_v6 = vadd.f32 %v1253_v31, %v1038_v47  ;;  %v1467_v34 = vadd.f32 %v15061_v5, %v1280_v23  ;;  %v15068_v13 = vld [vmem:[#allocation35_spill] sm:$0xff]  ;;  %v15071_v23 = vld [vmem:[#allocation17_spill] sm:$0xff] }
 0x2c7   : > { %v1841_v47 = vsel %vm1835_vm8, %v10435_v26, %v15062_v30  ;;  %v1278_v21 = vadd.f32 %v1254_v42, %v1039_v54  ;;  %v1860_v26 = vadd.f32 %v10773_v2, %v1661_v62  ;;  %v2060_v38 = vadd.f32 %v2038_v60, %v1861_v19  ;;  %v15076_v42 = vld [vmem:[#allocation19_spill] sm:$0xff] }
 0x2c8   : > { %v1665_v40 = vadd.f32 %v1642_v56, %v1466_v39  ;;  %v1857_v1 = vadd.f32 %v10768_v43, %v1658_v20  ;;  %v819_v56 = vadd.f32 %v796_v7, %v15064_v15  ;;  %v1464_v32 = vadd.f32 %v15065_v41, %v1277_v6  ;;  %v15074_v6 = vld [vmem:[#allocation30_spill] sm:$0xff]  ;;  %v15083_v15 = vld [vmem:[#allocation49_spill] sm:$0xff] }
 0x2c9   : > { %v2040_v43 = vsel %vm2034_vm9, %v15068_v13, %v15067_v25  ;;  %v1465_v0 = vadd.f32 %v15071_v23, %v1278_v21  ;;  %v2059_v28 = vadd.f32 %v15072_v50, %v1860_v26  ;;  %v2237_v14 = vsel %vm2233_vm10, %v15041_v37, %v15073_v18  ;;  %v15079_v37 = vld [vmem:[#allocation4_spill] sm:$0xff]  ;;  %v15089_v23 = vld [vmem:[#allocation50_spill] sm:$0xff] }
 0x2ca   : > { %v1864_v24 = vadd.f32 %v1841_v47, %v1665_v40  ;;  %v1042_v39 = vadd.f32 %v1019_v44, %v819_v56  ;;  %v2056_v2 = vadd.f32 %v10780_v63, %v1857_v1  ;;  %v1666_v63 = vadd.f32 %v15074_v6, %v1467_v34  ;;  %v15080_v47 = vld [vmem:[#allocation58_spill] sm:$0xff]  ;;  %v15081_v34 = vld [vmem:[#allocation48_spill] sm:$0xff] }
 0x2cb   : > { %v10938_v62 = vadd.f32 %v15075_v12, %v2257_v57  ;;  %v1663_v7 = vadd.f32 %v15078_v17, %v1464_v32  ;;  %v2259_v40 = vadd.f32 %v2237_v14, %v2060_v38  ;;  %v2234_v5 = vsel %vm2233_vm10, %v15066_v58, %v15070_v51  ;;  %v15082_v57 = vld [vmem:[#allocation18_spill] sm:$0xff] }
 0x2cc   : > { %v2063_v55 = vadd.f32 %v2040_v43, %v1864_v24  ;;  %v10947_v30 = vadd.f32 %v15079_v37, %v2254_v49  ;;  %v2239_v19 = vsel %vm2233_vm10, %v15081_v34, %v15080_v47  ;;  %v1664_v35 = vadd.f32 %v15082_v57, %v1465_v0  ;;  %v15084_v49 = vld [vmem:[#allocation24_spill] sm:$0xff] }
 0x2cd   : > { %v2288_v1 = vadd.f32 %v15079_v37, %v2256_v16  ;;  %v2255_v21 = vadd.f32 %v2234_v5, %v2056_v2  ;;  %v2258_v44 = vadd.f32 %v10854_v4, %v2059_v28  ;;  %v1843_v56 = vsel %vm1835_vm8, %v10463_v36, %v15083_v15  ;;  %v15085_v24 = vld [vmem:[#allocation52_spill] sm:$0xff] }
 0x2ce   : > { %v2262_v10 = vadd.f32 %v2239_v19, %v2063_v55  ;;  %v1865_v26 = vadd.f32 %v10447_v53, %v1666_v63  ;;  %v2301_v41 = vmax.f32 %v10938_v62, 0.0  ;;  %v2291_v43 = vadd.f32 %v15075_v12, %v2259_v40  ;;  %v15088_v53 = vld [vmem:[#allocation25_spill] sm:$0xff]  ;;  %v10987_v63 = vld [vmem:[%s14762_s4] sm:$0xff]  }
 0x2cf   : > { %v2298_v4 = vmax.f32 %v10947_v30, 0.0  ;;  %v1862_v51 = vadd.f32 %v15087_v59, %v1663_v7  ;;  %v1863_v48 = vadd.f32 %v15088_v53, %v1664_v35  ;;  %9304 = vmatprep.mubr.msk.bf16.mxu0 %vm1835_vm8, %v10987_v63  ;;  %v418_v53 = vld [vmem:[%s14763_s5 + $0x8] sm:$0xff] }
 0x2d0   : > { %v2303_v18 = vmax.f32 %v2291_v43, 0.0 }
 0x2d5   : > { %v1245_v31 = vpop.permute.xlu1 %1244 }
 0x2d6   : > { %v1243_v61 = vpop.permute.xlu0 %1242 }
 0x2d7   : > { %v1257_v11 = vsel %vm1246_vm5, %v15043_v27, %v1243_v61  ;;  %v1258_v9 = vsel %vm1246_vm5, %v1243_v61, %v1245_v31  ;;  %v15086_v31 = vld [vmem:[#allocation36_spill] sm:$0xff] }
 0x2d8   : > { %v1281_v33 = vadd.f32 %v1257_v11, %v1042_v39  ;;  %v1282_v3 = vadd.f32 %v1258_v9, %v1043_v45  ;;  %v2042_v36 = vsel %vm2034_vm9, %v15086_v31, %v15085_v24  ;;  %v2300_v39 = vmax.f32 %v2288_v1, 0.0  ;;  %v15090_v9 = vld [vmem:[#allocation8_spill] sm:$0xff] }
 0x2d9   : > { %v2023_v20 = vpop.permute.xlu1 %2022  ;;  %v2290_v45 = vadd.f32 %v15075_v12, %v2258_v44  ;;  %v2294_v16 = vadd.f32 %v15090_v9, %v2262_v10  ;;  %v15092_v12 = vld [vmem:[#allocation7_spill] sm:$0xff] }
 0x2da   : > { %v1468_v27 = vadd.f32 %v15076_v42, %v1281_v33  ;;  %v1469_v52 = vadd.f32 %v15077_v29, %v1282_v3  ;;  %v2232_v54 = vpop.permute.xlu0 %2231  ;;  %v2039_v32 = vsel %vm2034_vm9, %v2023_v20, %v15068_v13  ;;  %v2287_v13 = vadd.f32 %v15079_v37, %v2255_v21 }
 0x2db   : > { %v2061_v61 = vadd.f32 %v2023_v20, %v1862_v51  ;;  %v2062_v2 = vadd.f32 %v2039_v32, %v1863_v48  ;;  %v2241_v0 = vsel %vm2233_vm10, %v15089_v23, %v2232_v54  ;;  %v2302_v7 = vmax.f32 %v2290_v45, 0.0  ;;  %v417_v51 = vld [vmem:[%s14763_s5] sm:$0xff]  ;;  %v419_v48 = vld [vmem:[%s14763_s5 + $0x10] sm:$0xff] }
 0x2dc   : > { %v1668_v60 = vadd.f32 %v10873_v46, %v1469_v52  ;;  %v1667_v25 = vadd.f32 %v15084_v49, %v1468_v27  ;;  %v2299_v27 = vmax.f32 %v2287_v13, 0.0  ;;  %v2306_v54 = vmax.f32 %v2294_v16, 0.0 }
 0x2dd   : > { %v2326_v22 = vpop.permute.xlu1 %2325  ;;  %v15095_v16 = vmov 0  }
 0x2de   : > { %v1867_v58 = vadd.f32 %v1843_v56, %v1668_v60  ;;  %v2029_v46 = vpop.permute.xlu0 %2028  ;;  %v1866_v28 = vadd.f32 %v10843_v8, %v1667_v25 }
 0x2df   : > { %v2041_v14 = vsel %vm2034_vm9, %v2029_v46, %v15086_v31  ;;  %v2064_v29 = vadd.f32 %v2029_v46, %v1865_v26 }
 0x2e0   : > { %v2066_v38 = vadd.f32 %v2042_v36, %v1867_v58  ;;  %v2065_v5 = vadd.f32 %v2041_v14, %v1866_v28  ;;  %v9647_v14 = vld [vmem:[%s14762_s4 + $0x28] sm:$0xff]  }
 0x2e1   : > { %v2222_v11 = vpop.permute.xlu1 %2221 }
 0x2e2   : > { %v2265_v50 = vadd.f32 %v2241_v0, %v2066_v38  ;;  %v2238_v33 = vsel %vm2233_vm10, %v2222_v11, %v15081_v34  ;;  %v2328_v3 = vpop.permute.xlu0 %2327  ;;  %v2260_v55 = vadd.f32 %v2222_v11, %v2061_v61  ;;  %v420_v38 = vld [vmem:[%s14763_s5 + $0x18] sm:$0xff] }
 0x2e3   : > { %v2261_v20 = vadd.f32 %v2238_v33, %v2062_v2  ;;  %v10982_v6 = vsel %vm1437_vm6, %v2326_v22, %v2328_v3  ;;  %v9643_v2 = vld [vmem:[%s14762_s4 + $0x8] sm:$0xff]   ;;  %v9644_v33 = vld [vmem:[%s14762_s4 + $0x10] sm:$0xff]   ;;  %v9645_v3 = vld [vmem:[%s14762_s4 + $0x18] sm:$0xff]  }
 0x2e4   : > { %15091 = vst [vmem:[#allocation22_spill] sm:$0xff] %v10982_v6  ;;  %v2297_v8 = vadd.f32 %v15092_v12, %v2265_v50  ;;  %v2336_v62 = vmul.f32 %v10982_v6, %v2300_v39  ;;  %v2339_v42 = vmul.f32 %v10982_v6, %v2303_v18  ;;  %v2292_v34 = vadd.f32 %v15090_v9, %v2260_v55  ;;  %v9646_v18 = vld [vmem:[%s14762_s4 + $0x20] sm:$0xff]   ;;  %v9648_v55 = vld [vmem:[%s14762_s4 + $0x30] sm:$0xff]  }
 0x2e5   : > { %v2293_v52 = vadd.f32 %v15090_v9, %v2261_v20  ;;  %v10993_v17 = vpop.permute.xlu1 %2323  ;;  %v2342_v21 = vmul.f32 %v10982_v6, %v2306_v54  ;;  %v9649_v20 = vld [vmem:[%s14762_s4 + $0x38] sm:$0xff]   ;;  %v9658_v54 = vld [vmem:[%s14762_s4 + $0x80] sm:$0xff]  }
 0x2e6   : > { %15093 = vst [vmem:[#allocation32_spill] sm:$0xff] %v10993_v17  ;;  %v2309_v40 = vmax.f32 %v2297_v8, 0.0  ;;  %v2228_v37 = vpop.permute.xlu0 %2227  ;;  %v10999_v30 = vsel %vm1437_vm6, %v10993_v17, %v2326_v22  ;;  %v2348_v47 = vpack.c.bf16 %v2339_v42, %v2336_v62  ;;  %v2334_v10 = vmul.f32 %v10993_v17, %v2298_v4  ;;  %v9651_v8 = vld [vmem:[%s14762_s4 + $0x48] sm:$0xff]   ;;  %v9652_v62 = vld [vmem:[%s14762_s4 + $0x50] sm:$0xff]   ;;  %v9653_v42 = vld [vmem:[%s14762_s4 + $0x58] sm:$0xff]  }
 0x2e7   : > { %15094 = vst [vmem:[#allocation31_spill] sm:$0xff] %v10999_v30  ;;  %v2240_v19 = vsel %vm2233_vm10, %v2228_v37, %v15089_v23  ;;  %v2263_v57 = vadd.f32 %v2228_v37, %v2064_v29  ;;  %v2335_v35 = vmul.f32 %v10999_v30, %v2299_v27  ;;  %v2338_v1 = vmul.f32 %v10999_v30, %v2302_v7  ;;  %v9654_v27 = vld [vmem:[%s14762_s4 + $0x60] sm:$0xff]   ;;  %v9655_v29 = vld [vmem:[%s14762_s4 + $0x68] sm:$0xff]   ;;  %v9657_v7 = vld [vmem:[%s14762_s4 + $0x78] sm:$0xff]  }
 0x2e8   : > { %v2264_v60 = vadd.f32 %v2240_v19, %v2065_v5  ;;  %2372 = vrot.lane.b32.xlu0 %v2348_v47, %s9714_s11  ;;  %v2345_v44 = vmul.f32 %v10982_v6, %v2309_v40  ;;  %v2305_v15 = vmax.f32 %v2293_v52, 0.0  ;;  %v2337_v58 = vmul.f32 %v10993_v17, %v2301_v41  ;;  %v9656_v52 = vld [vmem:[%s14762_s4 + $0x70] sm:$0xff]   ;;  %v9659_v40 = vld [vmem:[%s14762_s4 + $0x88] sm:$0xff]  }
 0x2e9   : > { %v2295_v56 = vadd.f32 %v15092_v12, %v2263_v57  ;;  %v2347_v26 = vpack.c.bf16 %v2338_v1, %v2335_v35  ;;  %v2304_v49 = vmax.f32 %v2292_v34, 0.0 }
 0x2ea   : > { %v2296_v22 = vadd.f32 %v15092_v12, %v2264_v60  ;;  %v2351_v32 = vpack.c.bf16 %v2345_v44, %v2342_v21  ;;  %v2346_v31 = vpack.c.bf16 %v2337_v58, %v2334_v10  ;;  %v2341_v4 = vmul.f32 %v10999_v30, %v2305_v15  ;;  %v9650_v12 = vld [vmem:[%s14762_s4 + $0x40] sm:$0xff]  }
 0x2eb   : > { %v2307_v46 = vmax.f32 %v2295_v56, 0.0  ;;  %2370 = vrot.lane.b32.xlu1 %v2347_v26, %s9714_s11  ;;  %v2340_v59 = vmul.f32 %v10993_v17, %v2304_v49 }
 0x2ec   : > { %v2308_v25 = vmax.f32 %v2296_v22, 0.0  ;;  %2378 = vrot.lane.b32.xlu0 %v2351_v32, %s9714_s11 }
 0x2ed   : > { %v2343_v43 = vmul.f32 %v10993_v17, %v2307_v46 }
 0x2ee   : > { %v2344_v24 = vmul.f32 %v10999_v30, %v2308_v25 }
 0x2ef   : > { %2368 = vrot.lane.b32.xlu1 %v2346_v31, %s9714_s11  ;;  %v2349_v41 = vpack.c.bf16 %v2343_v43, %v2340_v59 }
 0x2f0   : > { %v2350_v36 = vpack.c.bf16 %v2344_v24, %v2341_v4 }
 0x2f2   : > { %2376 = vrot.lane.b32.xlu0 %v2350_v36, %s9714_s11 }
 0x2f3   : > { %2374 = vrot.lane.b32.xlu1 %v2349_v41, %s9714_s11 }
 0x2f6   : > { %4197 = vperm.xlu0 %9619, %v417_v51  }
 0x2f7   : > { %4202 = vperm.xlu1 %9620, %v418_v53  }
 0x2fa   : > { %4207 = vperm.xlu0 %9619, %v419_v48  }
 0x2fb   : > { %4212 = vperm.xlu1 %9620, %v420_v38  }
 0x35a   : > { %v11034_v39 = vpop.permute.xlu0 %2372 }
 0x35b   : > { %9300 = vmatprep.subr.bf16.mxu0 %v11034_v39 }
 0x35c   : > { %9301 = vmatpush3.bf16.msra.mxu0 %v11034_v39 }
 0x35d   : > { %v2371_v13 = vpop.permute.xlu1 %2370 }
 0x35e   : > { %v11038_v45 = vpop.permute.xlu0 %2378  ;;  %v11042_v61 = vsel %vm2380_vm11, %v2371_v13, %v11034_v39 }
 0x35f   : > { %9302 = vmatprep.subr.bf16.mxu0 %v11038_v45  ;;  %2397 = vmatprep.subr.bf16.mxu1 %v11042_v61 }
 0x360   : > { %9303 = vmatpush3.bf16.msra.mxu0 %v11038_v45 }
 0x361   : > { %2551 = vmatprep.subr.bf16.mxu0 %v11042_v61  ;;  %v2369_v23 = vpop.permute.xlu1 %2368 }
 0x362   : > { %v11052_v0 = vsel %vm2380_vm11, %v2369_v23, %v2371_v13 }
 0x363   : > { %9305 = vmatmul.mubr.msk.bf16.vlgmr.msra.gmra.mrb[56].mxu0 %vm1835_vm8, %v9643_v2  ;;  %2398 = vmatpush1.bf16.msra.mxu1 %v11052_v0 }
 0x364   : > { %v2377_v11 = vpop.permute.xlu0 %2376  ;;  %2552 = vmatpush1.bf16.msra.mxu0 %v11052_v0  ;;  %2583 = vmatprep.mubr.bf16.mxu0 %v15095_v16 }
 0x365   : > { %v11059_v9 = vsel %vm2380_vm11, %v2377_v11, %v11038_v45  ;;  %v2375_v50 = vpop.permute.xlu1 %2374 }
 0x366   : > { %2399 = vmatprep.subr.bf16.mxu1 %v11059_v9  ;;  %2553 = vmatprep.subr.bf16.mxu0 %v11059_v9  ;;  %v11065_v28 = vsel %vm2380_vm11, %v2375_v50, %v2377_v11 }
 0x367   : > { %2400 = vmatpush1.bf16.msra.mxu1 %v11065_v28 }
 0x368   : > { %2554 = vmatpush1.bf16.msra.mxu0 %v11065_v28  ;;  %9308 = vmatprep.subr.bf16.mxu1 %v11034_v39 }
 0x369   : > { %9316 = vmatprep.subr.bf16.mxu0 %v11034_v39 }
 0x36a   : > { %8940 = vmatmul.mubr.msk.bf16.vlgmr.msra.gmra.mrb[52].mxu1 %vm1835_vm8, %v10987_v63 }
 0x36b   : > { %8946 = vmatmul.mubr.msk.bf16.vlgmr.msra.gmra.mrb[60].mxu0 %vm1835_vm8, %v9644_v33  ;;  %9309 = vmatpush3.bf16.msra.mxu1 %v11034_v39 }
 0x36c   : > { %9317 = vmatpush3.bf16.msra.mxu0 %v11034_v39  ;;  %9310 = vmatprep.subr.bf16.mxu1 %v11038_v45 }
 0x36d   : > { %9318 = vmatprep.subr.bf16.mxu0 %v11038_v45  ;;  %2439 = vmatprep.mubr.bf16.mxu1 %v15095_v16 }
 0x36e   : > { %2593 = vmatprep.mubr.bf16.mxu0 %v15095_v16 }
 0x36f   : > { %9311 = vmatpush3.bf16.msra.mxu1 %v11038_v45 }
 0x370   : > { %9319 = vmatpush3.bf16.msra.mxu0 %v11038_v45  ;;  %2773 = vmatprep.subr.bf16.mxu1 %v11042_v61 }
 0x371   : > { %2995 = vmatprep.subr.bf16.mxu0 %v11042_v61 }
 0x372   : > { %8941 = vmatmul.mubr.msk.bf16.gmra.mrb[56].mxu1 %vm1835_vm8, %v9643_v2 }
 0x373   : > { %8947 = vmatmul.mubr.msk.bf16.gmra.mrb[64].mxu0 %vm1835_vm8, %v9645_v3  ;;  %9312 = vmatprep.mubr.msk.bf16.mxu1 %vm1835_vm8, %v9644_v33 }
 0x374   : > { %9320 = vmatprep.mubr.msk.bf16.mxu0 %vm1835_vm8, %v9646_v18 }
 0x37a   : > { %9313 = vmatmul.mubr.msk.bf16.vlgmr.msra.gmra.mrb[60].mxu1 %vm1835_vm8, %v9645_v3 }
 0x37b   : > { %9321 = vmatmul.mubr.msk.bf16.vlgmr.msra.gmra.mrb[68].mxu0 %vm1835_vm8, %v9647_v14  ;;  %2774 = vmatpush1.bf16.msra.mxu1 %v11052_v0 }
 0x37c   : > { %2996 = vmatpush1.bf16.msra.mxu0 %v11052_v0  ;;  %2775 = vmatprep.subr.bf16.mxu1 %v11059_v9 }
 0x37d   : > { %2997 = vmatprep.subr.bf16.mxu0 %v11059_v9  ;;  %2805 = vmatprep.mubr.bf16.mxu1 %v15095_v16 }
 0x37e   : > { %3027 = vmatprep.mubr.bf16.mxu0 %v15095_v16 }
 0x37f   : > { %2776 = vmatpush1.bf16.msra.mxu1 %v11065_v28 }
 0x380   : > { %2998 = vmatpush1.bf16.msra.mxu0 %v11065_v28  ;;  %9324 = vmatprep.subr.bf16.mxu1 %v11034_v39 }
 0x381   : > { %9332 = vmatprep.subr.bf16.mxu0 %v11034_v39 }
 0x382   : > { %8952 = vmatmul.mubr.msk.bf16.vlgmr.msra.gmra.mrb[64].mxu1 %vm1835_vm8, %v9646_v18 }
 0x383   : > { %8958 = vmatmul.mubr.msk.bf16.vlgmr.msra.gmra.mrb[72].mxu0 %vm1835_vm8, %v9648_v55  ;;  %9325 = vmatpush3.bf16.msra.mxu1 %v11034_v39 }
 0x384   : > { %9333 = vmatpush3.bf16.msra.mxu0 %v11034_v39  ;;  %9326 = vmatprep.subr.bf16.mxu1 %v11038_v45 }
 0x385   : > { %9334 = vmatprep.subr.bf16.mxu0 %v11038_v45  ;;  %2815 = vmatprep.mubr.bf16.mxu1 %v15095_v16 }
 0x386   : > { %3037 = vmatprep.mubr.bf16.mxu0 %v15095_v16 }
 0x387   : > { %9327 = vmatpush3.bf16.msra.mxu1 %v11038_v45 }
 0x388   : > { %9335 = vmatpush3.bf16.msra.mxu0 %v11038_v45  ;;  %3233 = vmatprep.subr.bf16.mxu1 %v11042_v61 }
 0x389   : > { %3419 = vmatprep.subr.bf16.mxu0 %v11042_v61 }
 0x38a   : > { %8953 = vmatmul.mubr.msk.bf16.gmra.mrb[68].mxu1 %vm1835_vm8, %v9647_v14 }
 0x38b   : > { %8959 = vmatmul.mubr.msk.bf16.gmra.mrb[76].mxu0 %vm1835_vm8, %v9649_v20  ;;  %9328 = vmatprep.mubr.msk.bf16.mxu1 %vm1835_vm8, %v9648_v55 }
 0x38c   : > { %9336 = vmatprep.mubr.msk.bf16.mxu0 %vm1835_vm8, %v9650_v12 }
 0x392   : > { %9329 = vmatmul.mubr.msk.bf16.vlgmr.msra.gmra.mrb[72].mxu1 %vm1835_vm8, %v9649_v20 }
 0x393   : > { %9337 = vmatmul.mubr.msk.bf16.vlgmr.msra.gmra.mrb[80].mxu0 %vm1835_vm8, %v9651_v8  ;;  %3234 = vmatpush1.bf16.msra.mxu1 %v11052_v0 }
 0x394   : > { %3420 = vmatpush1.bf16.msra.mxu0 %v11052_v0  ;;  %3235 = vmatprep.subr.bf16.mxu1 %v11059_v9 }
 0x395   : > { %3421 = vmatprep.subr.bf16.mxu0 %v11059_v9  ;;  %3265 = vmatprep.mubr.bf16.mxu1 %v15095_v16 }
 0x396   : > { %3451 = vmatprep.mubr.bf16.mxu0 %v15095_v16 }
 0x397   : > { %3236 = vmatpush1.bf16.msra.mxu1 %v11065_v28 }
 0x398   : > { %3422 = vmatpush1.bf16.msra.mxu0 %v11065_v28  ;;  %9340 = vmatprep.subr.bf16.mxu1 %v11034_v39 }
 0x399   : > { %9348 = vmatprep.subr.bf16.mxu0 %v11034_v39 }
 0x39a   : > { %8964 = vmatmul.mubr.msk.bf16.vlgmr.msra.gmra.mrb[76].mxu1 %vm1835_vm8, %v9650_v12 }
 0x39b   : > { %8970 = vmatmul.mubr.msk.bf16.vlgmr.msra.gmra.mrb[84].mxu0 %vm1835_vm8, %v9652_v62  ;;  %9341 = vmatpush3.bf16.msra.mxu1 %v11034_v39 }
 0x39c   : > { %9349 = vmatpush3.bf16.msra.mxu0 %v11034_v39  ;;  %9342 = vmatprep.subr.bf16.mxu1 %v11038_v45 }
 0x39d   : > { %9350 = vmatprep.subr.bf16.mxu0 %v11038_v45  ;;  %3275 = vmatprep.mubr.bf16.mxu1 %v15095_v16 }
 0x39e   : > { %3461 = vmatprep.mubr.bf16.mxu0 %v15095_v16 }
 0x39f   : > { %9343 = vmatpush3.bf16.msra.mxu1 %v11038_v45 }
 0x3a0   : > { %9351 = vmatpush3.bf16.msra.mxu0 %v11038_v45  ;;  %3617 = vmatprep.subr.bf16.mxu1 %v11042_v61 }
 0x3a1   : > { %3815 = vmatprep.subr.bf16.mxu0 %v11042_v61 }
 0x3a2   : > { %8965 = vmatmul.mubr.msk.bf16.gmra.mrb[80].mxu1 %vm1835_vm8, %v9651_v8 }
 0x3a3   : > { %8971 = vmatmul.mubr.msk.bf16.gmra.mrb[88].mxu0 %vm1835_vm8, %v9653_v42  ;;  %9344 = vmatprep.mubr.msk.bf16.mxu1 %vm1835_vm8, %v9652_v62 }
 0x3a4   : > { %9352 = vmatprep.mubr.msk.bf16.mxu0 %vm1835_vm8, %v9654_v27 }
 0x3aa   : > { %9345 = vmatmul.mubr.msk.bf16.vlgmr.msra.gmra.mrb[84].mxu1 %vm1835_vm8, %v9653_v42 }
 0x3ab   : > { %9353 = vmatmul.mubr.msk.bf16.vlgmr.msra.gmra.mrb[92].mxu0 %vm1835_vm8, %v9655_v29  ;;  %3618 = vmatpush1.bf16.msra.mxu1 %v11052_v0 }
 0x3ac   : > { %3816 = vmatpush1.bf16.msra.mxu0 %v11052_v0  ;;  %3619 = vmatprep.subr.bf16.mxu1 %v11059_v9 }
 0x3ad   : > { %3817 = vmatprep.subr.bf16.mxu0 %v11059_v9  ;;  %3649 = vmatprep.mubr.bf16.mxu1 %v15095_v16 }
 0x3ae   : > { %3847 = vmatprep.mubr.bf16.mxu0 %v15095_v16 }
 0x3af   : > { %3620 = vmatpush1.bf16.msra.mxu1 %v11065_v28 }
 0x3b0   : > { %3818 = vmatpush1.bf16.msra.mxu0 %v11065_v28  ;;  %9356 = vmatprep.subr.bf16.mxu1 %v11034_v39 }
 0x3b1   : > { %9364 = vmatprep.subr.bf16.mxu0 %v11034_v39 }
 0x3b2   : > { %8976 = vmatmul.mubr.msk.bf16.vlgmr.msra.gmra.mrb[88].mxu1 %vm1835_vm8, %v9654_v27 }
 0x3b3   : > { %8982 = vmatmul.mubr.msk.bf16.vlgmr.msra.gmra.mrb[96].mxu0 %vm1835_vm8, %v9656_v52  ;;  %9357 = vmatpush3.bf16.msra.mxu1 %v11034_v39 }
 0x3b4   : > { %9365 = vmatpush3.bf16.msra.mxu0 %v11034_v39  ;;  %9358 = vmatprep.subr.bf16.mxu1 %v11038_v45 }
 0x3b5   : > { %9366 = vmatprep.subr.bf16.mxu0 %v11038_v45  ;;  %3659 = vmatprep.mubr.bf16.mxu1 %v15095_v16 }
 0x3b6   : > { %3857 = vmatprep.mubr.bf16.mxu0 %v15095_v16 }
 0x3b7   : > { %9359 = vmatpush3.bf16.msra.mxu1 %v11038_v45 }
 0x3b8   : > { %9367 = vmatpush3.bf16.msra.mxu0 %v11038_v45  ;;  %4013 = vmatprep.subr.bf16.mxu1 %v11042_v61 }
 0x3ba   : > { %8977 = vmatmul.mubr.msk.bf16.gmra.mrb[92].mxu1 %vm1835_vm8, %v9655_v29 }
 0x3bb   : > { %8983 = vmatmul.mubr.msk.bf16.gmra.mrb[100].mxu0 %vm1835_vm8, %v9657_v7  ;;  %9360 = vmatprep.mubr.msk.bf16.mxu1 %vm1835_vm8, %v9656_v52 }
 0x3bc   : > { %9368 = vmatprep.mubr.msk.bf16.mxu0 %vm1835_vm8, %v9658_v54 }
 0x3c2   : > { %9361 = vmatmul.mubr.msk.bf16.vlgmr.msra.gmra.mrb[96].mxu1 %vm1835_vm8, %v9657_v7 }
 0x3c3   : > { %9369 = vmatmul.mubr.msk.bf16.vlgmr.msra.gmra.mrb[104].mxu0 %vm1835_vm8, %v9659_v40  ;;  %4014 = vmatpush1.bf16.msra.mxu1 %v11052_v0 }
 0x3c4   : > { %4045 = vmatprep.mubr.bf16.mxu1 %v15095_v16  ;;  %4015 = vmatprep.subr.bf16.mxu1 %v11059_v9 }
 0x3c5   : > { %4317 = vmatprep.mubr.bf16.mxu0 %v15095_v16 }
 0x3c7   : > { %4016 = vmatpush1.bf16.msra.mxu1 %v11065_v28 }
 0x3ca   : > { %8988 = vmatmul.mubr.msk.bf16.vlgmr.msra.gmra.mrb[100].mxu1 %vm1835_vm8, %v9658_v54 }
 0x3cb   : > { %4055 = vmatprep.mubr.bf16.mxu1 %v15095_v16 }
 0x3d2   : > { %8989 = vmatmul.mubr.msk.bf16.gmra.mrb[104].mxu1 %vm1835_vm8, %v9659_v40 }
 0x3d3   : > { %9376 = vmatprep.mubr.msk.bf16.mxu1 %vm1835_vm8, %v10987_v63 }
 0x436   : > { %v11231_v5 = vpop.f32.mrb[56].mxu0 }
 0x437   : > { %v11233_v37 = vpop.f32.mrb[57].mxu0 }
 0x438   : > { %v11235_v47 = vpop.f32.mrb[58].mxu0 }
 0x439   : > { %v11237_v34 = vpop.f32.mrb[59].mxu0 }
 0x43d   : > { %v2431_v19 = vpop.f32.mrb[52].mxu1 }
 0x43e   : > { %v2585_v57 = vpop.f32.mrb[60].mxu0  ;;  %2499 = vrot.lane.b32.xlu0 %v2431_v19, %s9705_s17  ;;  %v2433_v35 = vpop.f32.mrb[53].mxu1 }
 0x43f   : > { %v2587_v60 = vpop.f32.mrb[61].mxu0  ;;  %v2435_v1 = vpop.f32.mrb[54].mxu1 }
 0x440   : > { %v2589_v21 = vpop.f32.mrb[62].mxu0  ;;  %2502 = vrot.lane.b32.xlu1 %v2435_v1, %s9705_s17  ;;  %v2437_v44 = vpop.f32.mrb[55].mxu1 }
 0x441   : > { %v2591_v63 = vpop.f32.mrb[63].mxu0 }
 0x442   : > { %2511 = vrot.lane.b32.xlu0 %v2433_v35, %s9705_s17 }
 0x444   : > { %2513 = vrot.lane.b32.xlu1 %v2437_v44, %s9705_s17 }
 0x445   : > { %v2441_v15 = vpop.f32.mrb[56].mxu1 }
 0x446   : > { %v2595_v56 = vpop.f32.mrb[64].mxu0  ;;  %2653 = vrot.lane.b32.xlu0 %v2585_v57, %s9705_s17  ;;  %v2443_v10 = vpop.f32.mrb[57].mxu1 }
 0x447   : > { %v2597_v22 = vpop.f32.mrb[65].mxu0  ;;  %v2445_v26 = vpop.f32.mrb[58].mxu1 }
 0x448   : > { %v2599_v32 = vpop.f32.mrb[66].mxu0  ;;  %2656 = vrot.lane.b32.xlu1 %v2589_v21, %s9705_s17  ;;  %v2447_v58 = vpop.f32.mrb[59].mxu1 }
 0x449   : > { %v2601_v46 = vpop.f32.mrb[67].mxu0 }
 0x44a   : > { %2665 = vrot.lane.b32.xlu0 %v2587_v60, %s9705_s17 }
 0x44c   : > { %2667 = vrot.lane.b32.xlu1 %v2591_v63, %s9705_s17 }
 0x44d   : > { %v11247_v49 = vpop.f32.mrb[60].mxu1 }
 0x44e   : > { %v11249_v25 = vpop.f32.mrb[68].mxu0  ;;  %2505 = vrot.lane.b32.xlu0 %v2441_v15, %s9705_s17  ;;  %v11252_v43 = vpop.f32.mrb[61].mxu1 }
 0x44f   : > { %v11254_v24 = vpop.f32.mrb[69].mxu0  ;;  %v11256_v31 = vpop.f32.mrb[62].mxu1 }
 0x450   : > { %v11258_v4 = vpop.f32.mrb[70].mxu0  ;;  %2508 = vrot.lane.b32.xlu1 %v2445_v26, %s9705_s17  ;;  %v11261_v36 = vpop.f32.mrb[63].mxu1 }
 0x451   : > { %v11263_v59 = vpop.f32.mrb[71].mxu0 }
 0x452   : > { %2515 = vrot.lane.b32.xlu0 %v2443_v10, %s9705_s17 }
 0x454   : > { %2517 = vrot.lane.b32.xlu1 %v2447_v58, %s9705_s17 }
 0x455   : > { %v2807_v41 = vpop.f32.mrb[64].mxu1 }
 0x456   : > { %v3029_v51 = vpop.f32.mrb[72].mxu0  ;;  %2659 = vrot.lane.b32.xlu0 %v2595_v56, %s9705_s17  ;;  %v2809_v53 = vpop.f32.mrb[65].mxu1 }
 0x457   : > { %v3031_v48 = vpop.f32.mrb[73].mxu0  ;;  %v2811_v38 = vpop.f32.mrb[66].mxu1 }
 0x458   : > { %v3033_v39 = vpop.f32.mrb[74].mxu0  ;;  %2662 = vrot.lane.b32.xlu1 %v2599_v32, %s9705_s17  ;;  %v2813_v13 = vpop.f32.mrb[67].mxu1 }
 0x459   : > { %v3035_v45 = vpop.f32.mrb[75].mxu0 }
 0x45a   : > { %2669 = vrot.lane.b32.xlu0 %v2597_v22, %s9705_s17 }
 0x45c   : > { %2671 = vrot.lane.b32.xlu1 %v2601_v46, %s9705_s17 }
 0x45d   : > { %v2817_v61 = vpop.f32.mrb[68].mxu1 }
 0x45e   : > { %v3039_v2 = vpop.f32.mrb[76].mxu0  ;;  %2875 = vrot.lane.b32.xlu0 %v2807_v41, %s9705_s17  ;;  %v2819_v23 = vpop.f32.mrb[69].mxu1 }
 0x45f   : > { %v3041_v0 = vpop.f32.mrb[77].mxu0  ;;  %v2821_v11 = vpop.f32.mrb[70].mxu1 }
 0x460   : > { %v3043_v9 = vpop.f32.mrb[78].mxu0  ;;  %2878 = vrot.lane.b32.xlu1 %v2811_v38, %s9705_s17  ;;  %v2823_v50 = vpop.f32.mrb[71].mxu1 }
 0x461   : > { %v3045_v28 = vpop.f32.mrb[79].mxu0 }
 0x462   : > { %2887 = vrot.lane.b32.xlu0 %v2809_v53, %s9705_s17 }
 0x464   : > { %2889 = vrot.lane.b32.xlu1 %v2813_v13, %s9705_s17 }
 0x465   : > { %v11275_v33 = vpop.f32.mrb[72].mxu1 }
 0x466   : > { %v9338_v3 = vpop.f32.mrb[80].mxu0  ;;  %3097 = vrot.lane.b32.xlu0 %v3029_v51, %s9705_s17  ;;  %v11278_v18 = vpop.f32.mrb[73].mxu1 }
 0x467   : > { %v3320_v14 = vpop.f32.mrb[81].mxu0  ;;  %v11280_v55 = vpop.f32.mrb[74].mxu1 }
 0x468   : > { %v9339_v20 = vpop.f32.mrb[82].mxu0  ;;  %3100 = vrot.lane.b32.xlu1 %v3033_v39, %s9705_s17  ;;  %v11283_v12 = vpop.f32.mrb[75].mxu1 }
 0x469   : > { %v3323_v8 = vpop.f32.mrb[83].mxu0 }
 0x46a   : > { %2881 = vrot.lane.b32.xlu0 %v2817_v61, %s9705_s17 }
 0x46c   : > { %2884 = vrot.lane.b32.xlu1 %v2821_v11, %s9705_s17 }
 0x46d   : > { %v3267_v62 = vpop.f32.mrb[76].mxu1 }
 0x46e   : > { %v3453_v42 = vpop.f32.mrb[84].mxu0  ;;  %3109 = vrot.lane.b32.xlu0 %v3031_v48, %s9705_s17  ;;  %v3269_v27 = vpop.f32.mrb[77].mxu1 }
 0x46f   : > { %v3455_v29 = vpop.f32.mrb[85].mxu0  ;;  %v3271_v52 = vpop.f32.mrb[78].mxu1 }
 0x470   : > { %v3457_v7 = vpop.f32.mrb[86].mxu0  ;;  %3111 = vrot.lane.b32.xlu1 %v3035_v45, %s9705_s17  ;;  %v3273_v54 = vpop.f32.mrb[79].mxu1 }
 0x471   : > { %v3459_v40 = vpop.f32.mrb[87].mxu0 }
 0x472   : > { %2891 = vrot.lane.b32.xlu0 %v2819_v23, %s9705_s17 }
 0x474   : > { %2893 = vrot.lane.b32.xlu1 %v2823_v50, %s9705_s17 }
 0x475   : > { %v3277_v19 = vpop.f32.mrb[80].mxu1 }
 0x476   : > { %v11291_v57 = vpop.f32.mrb[88].mxu0  ;;  %3103 = vrot.lane.b32.xlu0 %v3039_v2, %s9705_s17  ;;  %v3279_v35 = vpop.f32.mrb[81].mxu1 }
 0x477   : > { %v11294_v60 = vpop.f32.mrb[89].mxu0  ;;  %v3281_v1 = vpop.f32.mrb[82].mxu1 }
 0x478   : > { %v3467_v21 = vpop.f32.mrb[90].mxu0  ;;  %3106 = vrot.lane.b32.xlu1 %v3043_v9, %s9705_s17  ;;  %v3283_v44 = vpop.f32.mrb[83].mxu1 }
 0x479   : > { %v11297_v63 = vpop.f32.mrb[91].mxu0 }
 0x47a   : > { %3113 = vrot.lane.b32.xlu0 %v3041_v0, %s9705_s17 }
 0x47c   : > { %3115 = vrot.lane.b32.xlu1 %v3045_v28, %s9705_s17 }
 0x47d   : > { %v11301_v15 = vpop.f32.mrb[84].mxu1 }
 0x47e   : > { %v11303_v56 = vpop.f32.mrb[92].mxu0  ;;  %3347 = vrot.lane.b32.xlu0 %v3267_v62, %s9706_s18  ;;  %v11306_v10 = vpop.f32.mrb[85].mxu1 }
 0x47f   : > { %v11308_v22 = vpop.f32.mrb[93].mxu0  ;;  %v11310_v26 = vpop.f32.mrb[86].mxu1 }
 0x480   : > { %v11312_v32 = vpop.f32.mrb[94].mxu0  ;;  %3363 = vrot.lane.b32.xlu1 %v9338_v3, %s9706_s18  ;;  %v11315_v58 = vpop.f32.mrb[87].mxu1 }
 0x481   : > { %v11317_v46 = vpop.f32.mrb[95].mxu0 }
 0x482   : > { %3349 = vrot.lane.b32.xlu0 %v3269_v27, %s9706_s18 }
 0x484   : > { %3351 = vrot.lane.b32.xlu1 %v3320_v14, %s9706_s18 }
 0x485   : > { %v3651_v41 = vpop.f32.mrb[88].mxu1 }
 0x486   : > { %v11321_v51 = vpop.f32.mrb[96].mxu0  ;;  %3355 = vrot.lane.b32.xlu0 %v3273_v54, %s9706_s18  ;;  %v11324_v53 = vpop.f32.mrb[89].mxu1 }
 0x487   : > { %v11326_v48 = vpop.f32.mrb[97].mxu0  ;;  %v3655_v38 = vpop.f32.mrb[90].mxu1 }
 0x488   : > { %v11328_v39 = vpop.f32.mrb[98].mxu0  ;;  %3369 = vrot.lane.b32.xlu1 %v9339_v20, %s9706_s18  ;;  %v3657_v13 = vpop.f32.mrb[91].mxu1 }
 0x489   : > { %v11331_v45 = vpop.f32.mrb[99].mxu0 }
 0x48a   : > { %3521 = vrot.lane.b32.xlu0 %v3453_v42, %s9705_s17 }
 0x48c   : > { %3357 = vrot.lane.b32.xlu1 %v3323_v8, %s9706_s18 }
 0x48d   : > { %v11335_v61 = vpop.f32.mrb[92].mxu1 }
 0x48e   : > { %v11337_v2 = vpop.f32.mrb[100].mxu0  ;;  %3545 = vrot.lane.b32.xlu0 %v3453_v42, %s9707_s19  ;;  %v11340_v23 = vpop.f32.mrb[93].mxu1 }
 0x48f   : > { %15096 = vst [vmem:[#allocation33_spill] sm:$0xff] %v11337_v2  ;;  %v11342_v0 = vpop.f32.mrb[101].mxu0  ;;  %v11344_v11 = vpop.f32.mrb[94].mxu1 }
 0x490   : > { %v11346_v9 = vpop.f32.mrb[102].mxu0  ;;  %3353 = vrot.lane.b32.xlu1 %v3271_v52, %s9706_s18  ;;  %v11349_v50 = vpop.f32.mrb[95].mxu1 }
 0x491   : > { %15097 = vst [vmem:[#allocation16_spill] sm:$0xff] %v11346_v9  ;;  %v11351_v28 = vpop.f32.mrb[103].mxu0 }
 0x492   : > { %3547 = vrot.lane.b32.xlu0 %v3455_v29, %s9707_s19 }
 0x494   : > { %3523 = vrot.lane.b32.xlu1 %v3457_v7, %s9705_s17 }
 0x495   : > { %v11355_v3 = vpop.f32.mrb[96].mxu1 }
 0x496   : > { %3359 = vrot.lane.b32.xlu0 %v3277_v19, %s9706_s18  ;;  %v11358_v14 = vpop.f32.mrb[97].mxu1  ;;  %v11389_v19 = vpop.permute.xlu1 %4202 }
 0x497   : > { %v11360_v20 = vpop.f32.mrb[98].mxu1  ;;  %15100 = vst [vmem:[#allocation13_spill] sm:$0xff] %v11389_v19  ;;  %v11458_v19 = vpop.f32.mrb[104].mxu0 }
 0x498   : > { %3551 = vrot.lane.b32.xlu1 %v3457_v7, %s9707_s19  ;;  %v11363_v8 = vpop.f32.mrb[99].mxu1  ;;  %v11381_v7 = vpop.permute.xlu0 %4197 }
 0x499   : > { %15098 = vst [vmem:[#allocation21_spill] sm:$0xff] %v11381_v7 }
 0x49a   : > { %3361 = vrot.lane.b32.xlu0 %v3279_v35, %s9706_s18 }
 0x49c   : > { %3365 = vrot.lane.b32.xlu1 %v3281_v1, %s9706_s18  ;;  %v11396_v1 = vpop.permute.xlu0 %4207 }
 0x49d   : > { %v11367_v62 = vpop.f32.mrb[100].mxu1  ;;  %15102 = vst [vmem:[#allocation40_spill] sm:$0xff] %v11396_v1 }
 0x49e   : > { %3553 = vrot.lane.b32.xlu0 %v3459_v40, %s9707_s19  ;;  %v11370_v42 = vpop.f32.mrb[101].mxu1 }
 0x49f   : > { %v11372_v27 = vpop.f32.mrb[102].mxu1 }
 0x4a0   : > { %3527 = vrot.lane.b32.xlu1 %v3467_v21, %s9705_s17  ;;  %v11375_v29 = vpop.f32.mrb[103].mxu1 }
 0x4a2   : > { %3367 = vrot.lane.b32.xlu0 %v3283_v44, %s9706_s18 }
 0x4a4   : > { %3563 = vrot.lane.b32.xlu1 %v3467_v21, %s9707_s19  ;;  %v11399_v21 = vpop.permute.xlu1 %4212 }
 0x4a5   : > { %v11379_v52 = vpop.f32.mrb[104].mxu1  ;;  %15103 = vst [vmem:[#allocation44_spill] sm:$0xff] %v11399_v21 }
 0x4a6   : > { %3525 = vrot.lane.b32.xlu0 %v11291_v57, %s9705_s17  ;;  %v11385_v54 = vpop.f32.mrb[105].mxu1 }
 0x4a7   : > { %v11387_v40 = vpop.f32.mrb[106].mxu1 }
 0x4a8   : > { %15099 = vst [vmem:[#allocation39_spill] sm:$0xff] %v11387_v40  ;;  %3721 = vrot.lane.b32.xlu1 %v3655_v38, %s9705_s17  ;;  %v11392_v35 = vpop.f32.mrb[107].mxu1 }
 0x4a9   : > { %15101 = vst [vmem:[#allocation38_spill] sm:$0xff] %v11392_v35 }
 0x4aa   : > { %3557 = vrot.lane.b32.xlu0 %v11291_v57, %s9707_s19 }
 0x4ac   : > { %3749 = vrot.lane.b32.xlu1 %v3655_v38, %s9708_s20 }
 0x4ae   : > { %3559 = vrot.lane.b32.xlu0 %v11294_v60, %s9707_s19 }
 0x4b0   : > { %v11403_v44 = vpop.permute.xlu0 %2499  ;;  %3919 = vrot.lane.b32.xlu1 %v11328_v39, %s9705_s17 }
 0x4b1   : > { %15104 = vst [vmem:[#allocation42_spill] sm:$0xff] %v11403_v44 }
 0x4b2   : > { %3565 = vrot.lane.b32.xlu0 %v11297_v63, %s9707_s19  ;;  %v11409_v16 = vpop.permute.xlu1 %2502 }
 0x4b3   : > { %15105 = vst [vmem:[#allocation53_spill] sm:$0xff] %v11409_v16 }
 0x4b4   : > { %v11411_v57 = vpop.permute.xlu0 %2511  ;;  %3725 = vrot.lane.b32.xlu1 %v11344_v11, %s9705_s17 }
 0x4b5   : > { %15106 = vst [vmem:[#allocation23_spill] sm:$0xff] %v11411_v57 }
 0x4b6   : > { %3719 = vrot.lane.b32.xlu0 %v3651_v41, %s9705_s17  ;;  %v11416_v38 = vpop.permute.xlu1 %2513 }
 0x4b7   : > { %15107 = vst [vmem:[#allocation10_spill] sm:$0xff] %v11416_v38  ;;  %v11463_v38 = vpop.f32.mrb[105].mxu0 }
 0x4b8   : > { %v11418_v60 = vpop.permute.xlu0 %2653  ;;  %3923 = vrot.lane.b32.xlu1 %v11346_v9, %s9705_s17 }
 0x4ba   : > { %3743 = vrot.lane.b32.xlu0 %v3651_v41, %s9708_s20  ;;  %v2657_v21 = vpop.permute.xlu1 %2656  ;;  %v11441_v41 = vsel %vm561_vm2, %v11409_v16, %v11237_v34 }
 0x4bb   : > { %15109 = vst [vmem:[#allocation11_spill] sm:$0xff] %v11441_v41 }
 0x4bc   : > { %v11423_v63 = vpop.permute.xlu0 %2665  ;;  %4117 = vrot.lane.b32.xlu1 %v11372_v27, %s9705_s17 }
 0x4be   : > { %3745 = vrot.lane.b32.xlu0 %v11324_v53, %s9708_s20  ;;  %v11429_v1 = vpop.permute.xlu1 %2667 }
 0x4c0   : > { %v11431_v17 = vpop.permute.xlu0 %2505  ;;  %4121 = vrot.lane.b32.xlu1 %v11387_v40, %s9705_s17 }
 0x4c2   : > { %3751 = vrot.lane.b32.xlu0 %v3657_v13, %s9708_s20  ;;  %v11436_v6 = vpop.permute.xlu1 %2508  ;;  %v2658_v13 = vsel %vm561_vm2, %v2657_v21, %v11261_v36 }
 0x4c3   : > { %15108 = vst [vmem:[#allocation2_spill] sm:$0xff] %v11436_v6  ;;  %v11476_v57 = vsel %vm561_vm2, %v11436_v6, %v11235_v47 }
 0x4c4   : > { %v11443_v30 = vpop.permute.xlu0 %2515  ;;  %2521 = vrot.lane.b32.xlu1 %v11441_v41, %s9705_s17  ;;  %15113 = vst [vmem:[#allocation55_spill] sm:$0xff] %v11476_v57 }
 0x4c5   : > { %15110 = vst [vmem:[#allocation3_spill] sm:$0xff] %v11443_v30 }
 0x4c6   : > { %3917 = vrot.lane.b32.xlu0 %v11321_v51, %s9705_s17  ;;  %v11449_v53 = vpop.permute.xlu1 %2517 }
 0x4c7   : > { %15111 = vst [vmem:[#allocation43_spill] sm:$0xff] %v11449_v53  ;;  %v11465_v53 = vpop.f32.mrb[106].mxu0 }
 0x4c8   : > { %v11453_v7 = vpop.permute.xlu0 %2659  ;;  %2675 = vrot.lane.b32.xlu1 %v2658_v13, %s9705_s17  ;;  %15112 = vst [vmem:[#allocation41_spill] sm:$0xff] %v11465_v53  ;;  %v11471_v16 = vpop.f32.mrb[107].mxu0 }
 0x4ca   : > { %3723 = vrot.lane.b32.xlu0 %v11335_v61, %s9705_s17  ;;  %v2663_v34 = vpop.permute.xlu1 %2662 }
 0x4cb   : > { %v2664_v6 = vsel %vm561_vm2, %v2663_v34, %v11256_v31 }
 0x4cc   : > { %v11460_v30 = vpop.permute.xlu0 %2669  ;;  %2707 = vrot.lane.b32.xlu1 %v2658_v13, %s9711_s23 }
 0x4ce   : > { %3943 = vrot.lane.b32.xlu0 %v11326_v48, %s9709_s21  ;;  %v11469_v36 = vpop.permute.xlu1 %2671  ;;  %v2682_v48 = vsel %vm561_vm2, %v11429_v1, %v2657_v21 }
 0x4d0   : > { %v11478_v41 = vpop.permute.xlu0 %2875  ;;  %2525 = vrot.lane.b32.xlu1 %v11476_v57, %s9705_s17 }
 0x4d2   : > { %3757 = vrot.lane.b32.xlu0 %v11340_v23, %s9708_s20  ;;  %v2879_v13 = vpop.permute.xlu1 %2878 }
 0x4d3   : > { %v2880_v9 = vsel %vm561_vm2, %v2879_v13, %v11263_v59 }
 0x4d4   : > { %v11486_v40 = vpop.permute.xlu0 %2887  ;;  %2709 = vrot.lane.b32.xlu1 %v2682_v48, %s9711_s23  ;;  %v2684_v48 = vsel %vm561_vm2, %v11469_v36, %v2663_v34 }
 0x4d6   : > { %3949 = vrot.lane.b32.xlu0 %v11331_v45, %s9709_s21  ;;  %v11491_v47 = vpop.permute.xlu1 %2889 }
 0x4d7   : > { %v2904_v59 = vsel %vm561_vm2, %v11491_v47, %v2879_v13 }
 0x4d8   : > { %v11495_v57 = vpop.permute.xlu0 %3097  ;;  %2679 = vrot.lane.b32.xlu1 %v2664_v6, %s9705_s17 }
 0x4da   : > { %3763 = vrot.lane.b32.xlu0 %v11349_v50, %s9708_s20  ;;  %v3101_v23 = vpop.permute.xlu1 %3100 }
 0x4dc   : > { %v11500_v21 = vpop.permute.xlu0 %2881  ;;  %2719 = vrot.lane.b32.xlu1 %v2664_v6, %s9711_s23 }
 0x4de   : > { %3921 = vrot.lane.b32.xlu0 %v11337_v2, %s9705_s17  ;;  %v2885_v45 = vpop.permute.xlu1 %2884 }
 0x4e0   : > { %v11507_v31 = vpop.permute.xlu0 %3109  ;;  %2721 = vrot.lane.b32.xlu1 %v2684_v48, %s9711_s23 }
 0x4e2   : > { %4115 = vrot.lane.b32.xlu0 %v11367_v62, %s9705_s17  ;;  %v11512_v50 = vpop.permute.xlu1 %3111 }
 0x4e4   : > { %v11516_v6 = vpop.permute.xlu0 %2891  ;;  %2897 = vrot.lane.b32.xlu1 %v2880_v9, %s9705_s17 }
 0x4e6   : > { %4141 = vrot.lane.b32.xlu0 %v11370_v42, %s9710_s22  ;;  %v11521_v34 = vpop.permute.xlu1 %2893 }
 0x4e8   : > { %v11523_v2 = vpop.permute.xlu0 %3103  ;;  %2929 = vrot.lane.b32.xlu1 %v2880_v9, %s9712_s24  ;;  %v3102_v9 = vsel %vm561_vm2, %v3101_v23, %v11283_v12  ;;  %v2655_v12 = vsel %vm561_vm2, %v11418_v60, %v11252_v43  ;;  %v11576_v43 = vsel %vm561_vm2, %v11431_v17, %v11231_v5  ;;  %v2906_v5 = vsel %vm561_vm2, %v11521_v34, %v2885_v45 }
 0x4e9   : > { %15119 = vst [vmem:[#allocation59_spill] sm:$0xff] %v11576_v43 }
 0x4ea   : > { %4147 = vrot.lane.b32.xlu0 %v11375_v29, %s9710_s22  ;;  %v11528_v48 = vpop.permute.xlu1 %3106  ;;  %v11547_v29 = vsel %vm561_vm2, %v11403_v44, %v11233_v37  ;;  %v2886_v37 = vsel %vm561_vm2, %v2885_v45, %v11258_v4 }
 0x4ec   : > { %v11532_v35 = vpop.permute.xlu0 %3113  ;;  %2931 = vrot.lane.b32.xlu1 %v2904_v59, %s9712_s24 }
 0x4ee   : > { %4119 = vrot.lane.b32.xlu0 %v11379_v52, %s9705_s17  ;;  %v11537_v42 = vpop.permute.xlu1 %3115 }
 0x4f0   : > { %v11541_v53 = vpop.permute.xlu0 %3347  ;;  %3119 = vrot.lane.b32.xlu1 %v3102_v9, %s9705_s17 }
 0x4f1   : > { %15114 = vst [vmem:[#allocation12_spill] sm:$0xff] %v11541_v53 }
 0x4f2   : > { %2519 = vrot.lane.b32.xlu0 %v11547_v29, %s9705_s17  ;;  %v11551_v13 = vpop.permute.xlu1 %3363 }
 0x4f3   : > { %15115 = vst [vmem:[#allocation5_spill] sm:$0xff] %v11551_v13 }
 0x4f4   : > { %v11553_v59 = vpop.permute.xlu0 %3349  ;;  %3157 = vrot.lane.b32.xlu1 %v3102_v9, %s9713_s25  ;;  %v3126_v9 = vsel %vm561_vm2, %v11512_v50, %v3101_v23  ;;  %v2681_v23 = vsel %vm561_vm2, %v11423_v63, %v11418_v60 }
 0x4f5   : > { %15116 = vst [vmem:[#allocation57_spill] sm:$0xff] %v11553_v59 }
 0x4f6   : > { %2673 = vrot.lane.b32.xlu0 %v2655_v12, %s9705_s17  ;;  %v11560_v53 = vpop.permute.xlu1 %3351 }
 0x4f8   : > { %v11564_v44 = vpop.permute.xlu0 %3355  ;;  %2901 = vrot.lane.b32.xlu1 %v2886_v37, %s9705_s17 }
 0x4f9   : > { %15117 = vst [vmem:[#allocation9_spill] sm:$0xff] %v11564_v44 }
 0x4fa   : > { %2701 = vrot.lane.b32.xlu0 %v2655_v12, %s9711_s23  ;;  %v11568_v13 = vpop.permute.xlu1 %3369 }
 0x4fb   : > { %15118 = vst [vmem:[#allocation14_spill] sm:$0xff] %v11568_v13 }
 0x4fc   : > { %v3522_v59 = vpop.permute.xlu0 %3521  ;;  %3159 = vrot.lane.b32.xlu1 %v3126_v9, %s9713_s25 }
 0x4fe   : > { %2523 = vrot.lane.b32.xlu0 %v11576_v43, %s9705_s17  ;;  %v11580_v4 = vpop.permute.xlu1 %3357  ;;  %v2661_v43 = vsel %vm561_vm2, %v11453_v7, %v11247_v49  ;;  %v2683_v49 = vsel %vm561_vm2, %v11460_v30, %v11453_v7  ;;  %v3108_v7 = vsel %vm561_vm2, %v11528_v48, %v11280_v55  ;;  %v3128_v55 = vsel %vm561_vm2, %v11537_v42, %v11528_v48 }
 0x500   : > { %v11582_v44 = vpop.permute.xlu0 %3545  ;;  %2941 = vrot.lane.b32.xlu1 %v2886_v37, %s9712_s24 }
 0x502   : > { %2703 = vrot.lane.b32.xlu0 %v2681_v23, %s9711_s23  ;;  %v11589_v12 = vpop.permute.xlu1 %3353 }
 0x504   : > { %v11593_v9 = vpop.permute.xlu0 %3547  ;;  %2943 = vrot.lane.b32.xlu1 %v2906_v5, %s9712_s24 }
 0x506   : > { %2677 = vrot.lane.b32.xlu0 %v2661_v43, %s9705_s17  ;;  %v3524_v37 = vpop.permute.xlu1 %3523 }
 0x508   : > { %v11600_v13 = vpop.permute.xlu0 %3359  ;;  %3947 = vrot.lane.b32.xlu1 %v11328_v39, %s9709_s21  ;;  %v2877_v39 = vsel %vm561_vm2, %v11478_v41, %v11254_v24  ;;  %v2903_v24 = vsel %vm561_vm2, %v11486_v40, %v11478_v41  ;;  %v3529_v41 = vsel %vm561_vm2, %v3522_v59, %v11306_v10 }
 0x50a   : > { %2713 = vrot.lane.b32.xlu0 %v2661_v43, %s9711_s23  ;;  %v11605_v60 = vpop.permute.xlu1 %3551 }
 0x50c   : > { %v11607_v45 = vpop.permute.xlu0 %3361  ;;  %3761 = vrot.lane.b32.xlu1 %v11344_v11, %s9708_s20 }
 0x50e   : > { %2715 = vrot.lane.b32.xlu0 %v2683_v49, %s9711_s23  ;;  %v11615_v23 = vpop.permute.xlu1 %3365 }
 0x50f   : > { %15120 = vst [vmem:[#allocation60_spill] sm:$0xff] %v11615_v23 }
 0x510   : > { %v11617_v5 = vpop.permute.xlu0 %3553  ;;  %4145 = vrot.lane.b32.xlu1 %v11372_v27, %s9710_s22 }
 0x512   : > { %2895 = vrot.lane.b32.xlu0 %v2877_v39, %s9705_s17  ;;  %v3528_v11 = vpop.permute.xlu1 %3527 }
 0x514   : > { %v11628_v43 = vpop.permute.xlu0 %3367  ;;  %3123 = vrot.lane.b32.xlu1 %v3108_v7, %s9705_s17 }
 0x515   : > { %15121 = vst [vmem:[#allocation27_spill] sm:$0xff] %v11628_v43 }
 0x516   : > { %2923 = vrot.lane.b32.xlu0 %v2877_v39, %s9712_s24  ;;  %v11632_v49 = vpop.permute.xlu1 %3563  ;;  %v3099_v39 = vsel %vm561_vm2, %v11495_v57, %v11278_v18  ;;  %v2883_v18 = vsel %vm561_vm2, %v11500_v21, %v11249_v25 }
 0x517   : > { %15122 = vst [vmem:[#allocation45_spill] sm:$0xff] %v11632_v49 }
 0x518   : > { %v3526_v27 = vpop.permute.xlu0 %3525  ;;  %3173 = vrot.lane.b32.xlu1 %v3108_v7, %s9713_s25 }
 0x519   : > { %v3531_v59 = vsel %vm561_vm2, %v3526_v27, %v11301_v15 }
 0x51a   : > { %2925 = vrot.lane.b32.xlu0 %v2903_v24, %s9712_s24  ;;  %v3722_v23 = vpop.permute.xlu1 %3721 }
 0x51c   : > { %v11642_v43 = vpop.permute.xlu0 %3557  ;;  %3175 = vrot.lane.b32.xlu1 %v3128_v55, %s9713_s25  ;;  %v3530_v55 = vsel %vm561_vm2, %v3524_v37, %v11315_v58  ;;  %v3125_v58 = vsel %vm561_vm2, %v11507_v31, %v11495_v57  ;;  %v2905_v57 = vsel %vm561_vm2, %v11516_v6, %v11500_v21 }
 0x51d   : > { %15123 = vst [vmem:[#allocation47_spill] sm:$0xff] %v11642_v43 }
 0x51e   : > { %3117 = vrot.lane.b32.xlu0 %v3099_v39, %s9705_s17  ;;  %v11649_v7 = vpop.permute.xlu1 %3749 }
 0x520   : > { %v11653_v24 = vpop.permute.xlu0 %3559  ;;  %3549 = vrot.lane.b32.xlu1 %v3529_v41, %s9707_s19 }
 0x521   : > { %15124 = vst [vmem:[#allocation15_spill] sm:$0xff] %v11653_v24 }
 0x522   : > { %3149 = vrot.lane.b32.xlu0 %v3099_v39, %s9713_s25  ;;  %v3920_v48 = vpop.permute.xlu1 %3919  ;;  %v3532_v39 = vsel %vm561_vm2, %v3528_v11, %v11310_v26  ;;  %v3728_v11 = vsel %vm561_vm2, %v3722_v23, %v11317_v46 }
 0x524   : > { %v11659_v43 = vpop.permute.xlu0 %3565  ;;  %3555 = vrot.lane.b32.xlu1 %v3530_v55, %s9707_s19 }
 0x525   : > { %15125 = vst [vmem:[#allocation26_spill] sm:$0xff] %v11659_v43 }
 0x526   : > { %2899 = vrot.lane.b32.xlu0 %v2883_v18, %s9705_s17  ;;  %v3726_v10 = vpop.permute.xlu1 %3725 }
 0x528   : > { %v3720_v41 = vpop.permute.xlu0 %3719  ;;  %3561 = vrot.lane.b32.xlu1 %v3531_v59, %s9707_s19 }
 0x529   : > { %v3727_v27 = vsel %vm561_vm2, %v3720_v41, %v11308_v22  ;;  %v3105_v22 = vsel %vm561_vm2, %v11523_v2, %v11275_v33 }
 0x52a   : > { %3151 = vrot.lane.b32.xlu0 %v3125_v58, %s9713_s25  ;;  %v3924_v37 = vpop.permute.xlu1 %3923 }
 0x52c   : > { %v11675_v25 = vpop.permute.xlu0 %3743  ;;  %3567 = vrot.lane.b32.xlu1 %v3532_v39, %s9707_s19 }
 0x52e   : > { %2935 = vrot.lane.b32.xlu0 %v2883_v18, %s9712_s24  ;;  %v4118_v15 = vpop.permute.xlu1 %4117 }
 0x530   : > { %v11681_v55 = vpop.permute.xlu0 %3745  ;;  %3747 = vrot.lane.b32.xlu1 %v3727_v27, %s9708_s20 }
 0x532   : > { %2937 = vrot.lane.b32.xlu0 %v2905_v57, %s9712_s24  ;;  %v11688_v26 = vpop.permute.xlu1 %4121 }
 0x534   : > { %v11692_v18 = vpop.permute.xlu0 %3751  ;;  %3753 = vrot.lane.b32.xlu1 %v3728_v11, %s9708_s20 }
 0x536   : > { %3121 = vrot.lane.b32.xlu0 %v3105_v22, %s9705_s17  ;;  %v11699_v59 = vpop.permute.xlu1 %2521 }
 0x538   : > { %v3918_v21 = vpop.permute.xlu0 %3917 }
 0x539   : > { %v3925_v41 = vsel %vm561_vm2, %v3918_v21, %v11358_v14  ;;  %v3926_v14 = vsel %vm561_vm2, %v3920_v48, %v11363_v8 }
 0x53a   : > { %3941 = vrot.lane.b32.xlu0 %v11321_v51, %s9709_s21  ;;  %3945 = vrot.lane.b32.xlu1 %v3925_v41, %s9709_s21  ;;  %v2676_v46 = vpop.permute.xlu1 %2675 }
 0x53c   : > { %v3724_v23 = vpop.permute.xlu0 %3723 }
 0x53d   : > { %v3729_v58 = vsel %vm561_vm2, %v3724_v23, %v11303_v56 }
 0x53e   : > { %3955 = vrot.lane.b32.xlu0 %v11342_v0, %s9709_s21  ;;  %3759 = vrot.lane.b32.xlu1 %v3729_v58, %s9708_s20  ;;  %v11711_v33 = vpop.permute.xlu1 %2707  ;;  %v3730_v0 = vsel %vm561_vm2, %v3726_v10, %v11312_v32  ;;  %v3127_v10 = vsel %vm561_vm2, %v11532_v35, %v11523_v2  ;;  %v4124_v58 = vsel %vm561_vm2, %v4118_v15, %v11471_v16 }
 0x540   : > { %v11713_v39 = vpop.permute.xlu0 %3943 }
 0x542   : > { %3961 = vrot.lane.b32.xlu0 %v11351_v28, %s9709_s21  ;;  %3951 = vrot.lane.b32.xlu1 %v3926_v14, %s9709_s21  ;;  %v11720_v51 = vpop.permute.xlu1 %2525  ;;  %v2686_v14 = vsel %vm561_vm2, %v2676_v46, %v11429_v1 }
 0x544   : > { %v11722_v56 = vpop.permute.xlu0 %3757 }
 0x545   : > { %15126 = vst [vmem:[#allocation46_spill] sm:$0xff] %v11722_v56 }
 0x546   : > { %3755 = vrot.lane.b32.xlu0 %v11335_v61, %s9708_s20  ;;  %3765 = vrot.lane.b32.xlu1 %v3730_v0, %s9708_s20  ;;  %v11729_v27 = vpop.permute.xlu1 %2709 }
 0x548   : > { %v11731_v8 = vpop.permute.xlu0 %3949 }
 0x54a   : > { %4139 = vrot.lane.b32.xlu0 %v11367_v62, %s9710_s22  ;;  %v2680_v28 = vpop.permute.xlu1 %2679 }
 0x54c   : > { %v11735_v48 = vpop.permute.xlu0 %3763 }
 0x54d   : > { %15127 = vst [vmem:[#allocation51_spill] sm:$0xff] %v11735_v48 }
 0x54e   : > { %3165 = vrot.lane.b32.xlu0 %v3105_v22, %s9713_s25  ;;  %v11738_v57 = vpop.permute.xlu1 %2719  ;;  %v3928_v22 = vsel %vm561_vm2, %v3924_v37, %v11360_v20 }
 0x550   : > { %v3922_v32 = vpop.permute.xlu0 %3921 }
 0x551   : > { %v3927_v61 = vsel %vm561_vm2, %v3922_v32, %v11355_v3  ;;  %v2688_v32 = vsel %vm561_vm2, %v2680_v28, %v11469_v36 }
 0x552   : > { %3167 = vrot.lane.b32.xlu0 %v3127_v10, %s9713_s25  ;;  %3957 = vrot.lane.b32.xlu1 %v3927_v61, %s9709_s21  ;;  %v11747_v62 = vpop.permute.xlu1 %2721 }
 0x554   : > { %v4116_v11 = vpop.permute.xlu0 %4115 }
 0x555   : > { %v4123_v3 = vsel %vm561_vm2, %v4116_v11, %v11463_v38 }
 0x556   : > { %3963 = vrot.lane.b32.xlu1 %v3928_v22, %s9709_s21  ;;  %v2898_v21 = vpop.permute.xlu1 %2897 }
 0x557   : > { %v2908_v61 = vsel %vm561_vm2, %v2898_v21, %v11491_v47 }
 0x558   : > { %v11752_v41 = vpop.permute.xlu0 %4141 }
 0x559   : > { %15128 = vst [vmem:[#allocation35_spill] sm:$0xff] %v11752_v41  ;;  %v15161_v41 = vld [vmem:[#allocation2_spill] sm:$0xff] }
 0x55a   : > { %4143 = vrot.lane.b32.xlu1 %v4123_v3, %s9710_s22  ;;  %v11757_v2 = vpop.permute.xlu1 %2929 }
 0x55c   : > { %v11759_v23 = vpop.permute.xlu0 %4147 }
 0x55e   : > { %4149 = vrot.lane.b32.xlu1 %v4124_v58, %s9710_s22  ;;  %v11764_v20 = vpop.permute.xlu1 %2931 }
 0x560   : > { %v11766_v37 = vpop.permute.xlu0 %4119 }
 0x562   : > { %2711 = vrot.lane.b32.xlu1 %v2686_v14, %s9711_s23  ;;  %v3120_v38 = vpop.permute.xlu1 %3119 }
 0x564   : > { %v11771_v0 = vpop.permute.xlu0 %2519 }
 0x566   : > { %2723 = vrot.lane.b32.xlu1 %v2688_v32, %s9711_s23  ;;  %v11776_v16 = vpop.permute.xlu1 %3157 }
 0x568   : > { %v2674_v15 = vpop.permute.xlu0 %2673 }
 0x569   : > { %v2685_v10 = vsel %vm561_vm2, %v2674_v15, %v11423_v63 }
 0x56a   : > { %2705 = vrot.lane.b32.xlu0 %v2685_v10, %s9711_s23  ;;  %2933 = vrot.lane.b32.xlu1 %v2908_v61, %s9712_s24  ;;  %v2902_v1 = vpop.permute.xlu1 %2901 }
 0x56c   : > { %v11784_v46 = vpop.permute.xlu0 %2701 }
 0x56e   : > { %v11786_v11 = vpop.permute.xlu1 %3159 }
 0x570   : > { %v11788_v36 = vpop.permute.xlu0 %2523 }
 0x572   : > { %v11790_v28 = vpop.permute.xlu1 %2941 }
 0x574   : > { %v11792_v22 = vpop.permute.xlu0 %2703 }
 0x576   : > { %v11794_v47 = vpop.permute.xlu1 %2943 }
 0x578   : > { %v2678_v3 = vpop.permute.xlu0 %2677 }
 0x579   : > { %v2687_v63 = vsel %vm561_vm2, %v2678_v3, %v11460_v30 }
 0x57a   : > { %2717 = vrot.lane.b32.xlu0 %v2687_v63, %s9711_s23  ;;  %v11801_v58 = vpop.permute.xlu1 %3947 }
 0x57c   : > { %v11799_v21 = vpop.permute.xlu0 %2713 }
 0x57e   : > { %v11805_v15 = vpop.permute.xlu1 %3761 }
 0x57f   : > { %15129 = vst [vmem:[#allocation54_spill] sm:$0xff] %v11805_v15 }
 0x580   : > { %v11803_v14 = vpop.permute.xlu0 %2715 }
 0x582   : > { %v11812_v48 = vpop.permute.xlu1 %4145 }
 0x584   : > { %v2896_v32 = vpop.permute.xlu0 %2895 }
 0x585   : > { %v2907_v61 = vsel %vm561_vm2, %v2896_v32, %v11486_v40  ;;  %v2910_v32 = vsel %vm561_vm2, %v2902_v1, %v11521_v34 }
 0x586   : > { %2927 = vrot.lane.b32.xlu0 %v2907_v61, %s9712_s24  ;;  %v3124_v63 = vpop.permute.xlu1 %3123 }
 0x588   : > { %v11810_v10 = vpop.permute.xlu0 %2923 }
 0x58a   : > { %v11823_v40 = vpop.permute.xlu1 %3173 }
 0x58c   : > { %v11814_v30 = vpop.permute.xlu0 %2925 }
 0x590   : > { %v3118_v3 = vpop.permute.xlu0 %3117 }
 0x591   : > { %3155 = vrot.lane.b32.xlu1 %v3118_v3, %s9713_s25  ;;  %v3129_v49 = vsel %vm561_vm2, %v3118_v3, %v11507_v31  ;;  %v3130_v3 = vsel %vm561_vm2, %v3120_v38, %v11512_v50  ;;  %v3132_v50 = vsel %vm561_vm2, %v3124_v63, %v11537_v42  ;;  %v15136_v42 = vld [vmem:[#allocation38_spill] sm:$0xff] }
 0x592   : > { %3153 = vrot.lane.b32.xlu0 %v3129_v49, %s9713_s25  ;;  %v11833_v49 = vpop.permute.xlu1 %3175 }
 0x594   : > { %v11820_v15 = vpop.permute.xlu0 %3149 }
 0x595   : > { %3163 = vrot.lane.b32.xlu1 %v3120_v38, %s9713_s25 }
 0x596   : > { %v11840_v34 = vpop.permute.xlu1 %3549 }
 0x598   : > { %v2900_v61 = vpop.permute.xlu0 %2899 }
 0x599   : > { %v2909_v56 = vsel %vm561_vm2, %v2900_v61, %v11516_v6  ;;  %2945 = vrot.lane.b32.xlu1 %v2910_v32, %s9712_s24  ;;  %v4125_v32 = vsel %vm561_vm2, %v11766_v37, %v11458_v19  ;;  %v15138_v19 = vld [vmem:[#allocation33_spill] sm:$0xff] }
 0x59a   : > { %2939 = vrot.lane.b32.xlu0 %v2909_v56, %s9712_s24  ;;  %v11844_v61 = vpop.permute.xlu1 %3555 }
 0x59b   : > { %15132 = vst [vmem:[#allocation29_spill] sm:$0xff] %v11844_v61  ;;  %v15160_v61 = vld [vmem:[#allocation3_spill] sm:$0xff] }
 0x59c   : > { %v11831_v31 = vpop.permute.xlu0 %3151 }
 0x59e   : > { %3161 = vrot.lane.b32.xlu0 %v3130_v3, %s9713_s25  ;;  %v11854_v38 = vpop.permute.xlu1 %3561 }
 0x59f   : > { %15133 = vst [vmem:[#allocation56_spill] sm:$0xff] %v11854_v38 }
 0x5a0   : > { %v11838_v43 = vpop.permute.xlu0 %2935 }
 0x5a1   : > { %15130 = vst [vmem:[#allocation37_spill] sm:$0xff] %v11838_v43 }
 0x5a4   : > { %v11842_v1 = vpop.permute.xlu0 %2937 }
 0x5a5   : > { %15131 = vst [vmem:[#allocation17_spill] sm:$0xff] %v11842_v1 }
 0x5a8   : > { %v3122_v6 = vpop.permute.xlu0 %3121 }
 0x5a9   : > { %3171 = vrot.lane.b32.xlu1 %v3122_v6, %s9713_s25  ;;  %v3131_v56 = vsel %vm561_vm2, %v3122_v6, %v11532_v35  ;;  %v15134_v35 = vld [vmem:[#allocation41_spill] sm:$0xff]  ;;  %v11865_v6 = vpop.permute.xlu1 %3567 }
 0x5aa   : > { %3169 = vrot.lane.b32.xlu0 %v3131_v56, %s9713_s25  ;;  %v4126_v3 = vsel %vm561_vm2, %v11688_v26, %v15134_v35  ;;  %15135 = vst [vmem:[#allocation30_spill] sm:$0xff] %v11865_v6 }
 0x5ad   : > { %3179 = vrot.lane.b32.xlu1 %v3124_v63, %s9713_s25  ;;  %v15137_v63 = vld [vmem:[#allocation16_spill] sm:$0xff]  ;;  %v11874_v37 = vpop.permute.xlu1 %3747 }
 0x5ae   : > { %3177 = vrot.lane.b32.xlu0 %v3132_v50, %s9713_s25 }
 0x5b1   : > { %4155 = vrot.lane.b32.xlu1 %v4125_v32, %s9710_s22  ;;  %v11880_v26 = vpop.permute.xlu1 %3753  ;;  %v11886_v32 = vpop.permute.xlu0 %3941 }
 0x5b2   : > { %4153 = vrot.lane.b32.xlu0 %v11385_v54, %s9710_s22  ;;  %v15139_v54 = vld [vmem:[#allocation39_spill] sm:$0xff]  ;;  %15140 = vst [vmem:[#allocation6_spill] sm:$0xff] %v11880_v26 }
 0x5b5   : > { %4161 = vrot.lane.b32.xlu1 %v4126_v3, %s9710_s22  ;;  %v11882_v56 = vpop.permute.xlu1 %3945  ;;  %v11890_v3 = vpop.permute.xlu0 %3955 }
 0x5b6   : > { %4159 = vrot.lane.b32.xlu0 %v15136_v42, %s9710_s22  ;;  %15143 = vst [vmem:[#allocation28_spill] sm:$0xff] %v11890_v3 }
 0x5b9   : > { %3959 = vrot.lane.b32.xlu1 %v15137_v63, %s9709_s21  ;;  %v11884_v50 = vpop.permute.xlu1 %3759  ;;  %v11894_v63 = vpop.permute.xlu0 %3961 }
 0x5ba   : > { %3953 = vrot.lane.b32.xlu0 %v15138_v19, %s9709_s21  ;;  %15141 = vst [vmem:[#allocation19_spill] sm:$0xff] %v11884_v50  ;;  %15145 = vst [vmem:[#allocation58_spill] sm:$0xff] %v11894_v63  ;;  %v2727_v63 = vsel %vm788_vm3, %v11711_v33, %v11729_v27  ;;  %v2947_v33 = vsel %vm1011_vm4, %v11810_v10, %v11814_v30 }
 0x5bd   : > { %4157 = vrot.lane.b32.xlu1 %v15139_v54, %s9710_s22  ;;  %v11888_v35 = vpop.permute.xlu1 %3951  ;;  %v11898_v54 = vpop.permute.xlu0 %3755 }
 0x5be   : > { %4151 = vrot.lane.b32.xlu0 %v11379_v52, %s9710_s22  ;;  %15142 = vst [vmem:[#allocation20_spill] sm:$0xff] %v11888_v35  ;;  %15147 = vst [vmem:[#allocation18_spill] sm:$0xff] %v11898_v54  ;;  %v2949_v54 = vsel %vm1011_vm4, %v11757_v2, %v11764_v20 }
 0x5c1   : > { %v11892_v42 = vpop.permute.xlu1 %3765  ;;  %v11902_v6 = vpop.permute.xlu0 %4139 }
 0x5c2   : > { %15144 = vst [vmem:[#allocation4_spill] sm:$0xff] %v11892_v42 }
 0x5c5   : > { %v11896_v19 = vpop.permute.xlu1 %3957  ;;  %v11906_v50 = vpop.permute.xlu0 %3165 }
 0x5c6   : > { %15146 = vst [vmem:[#allocation48_spill] sm:$0xff] %v11896_v19  ;;  %15150 = vst [vmem:[#allocation52_spill] sm:$0xff] %v11906_v50  ;;  %v15154_v19 = vld [vmem:[#allocation11_spill] sm:$0xff] }
 0x5c7   : > { %v2748_v38 = vadd.f32 %v2727_v63, %v15154_v19  ;;  %v3181_v63 = vsel %vm1246_vm5, %v11820_v15, %v11831_v31 }
 0x5c9   : > { %v11900_v52 = vpop.permute.xlu1 %3963  ;;  %v11910_v35 = vpop.permute.xlu0 %3167 }
 0x5ca   : > { %15148 = vst [vmem:[#allocation49_spill] sm:$0xff] %v11900_v52  ;;  %15152 = vst [vmem:[#allocation34_spill] sm:$0xff] %v11910_v35  ;;  %v3184_v35 = vsel %vm1246_vm5, %v11776_v16, %v11786_v11  ;;  %v15156_v16 = vld [vmem:[#allocation42_spill] sm:$0xff] }
 0x5cd   : > { %v11904_v26 = vpop.permute.xlu1 %4143 }
 0x5ce   : > { %15149 = vst [vmem:[#allocation24_spill] sm:$0xff] %v11904_v26  ;;  %v2970_v26 = vadd.f32 %v2949_v54, %v2748_v38  ;;  %v15157_v38 = vld [vmem:[#allocation23_spill] sm:$0xff] }
 0x5cf   : > { %v2527_v54 = vsel %vm561_vm2, %v15157_v38, %v15156_v16  ;;  %v11957_v16 = vsel %vm561_vm2, %v15160_v61, %v11431_v17 }
 0x5d1   : > { %v11908_v24 = vpop.permute.xlu1 %4149 }
 0x5d2   : > { %15151 = vst [vmem:[#allocation36_spill] sm:$0xff] %v11908_v24  ;;  %v2725_v24 = vsel %vm788_vm3, %v11784_v46, %v11792_v22 }
 0x5d3   : > { %v2745_v2 = vadd.f32 %v2725_v24, %v11547_v29  ;;  %v2531_v29 = vsel %vm561_vm2, %v11771_v0, %v15157_v38  ;;  %v15162_v0 = vld [vmem:[#allocation43_spill] sm:$0xff] }
 0x5d5   : > { %v11912_v3 = vpop.permute.xlu1 %2711  ;;  %v2967_v46 = vadd.f32 %v2947_v33, %v2745_v2  ;;  %v15158_v33 = vld [vmem:[#allocation53_spill] sm:$0xff] }
 0x5d7   : > { %v3205_v24 = vadd.f32 %v3181_v63, %v2967_v46  ;;  %v11962_v63 = vsel %vm561_vm2, %v15162_v0, %v15161_v41 }
 0x5d9   : > { %v11920_v52 = vpop.permute.xlu1 %2723 }
 0x5da   : > { %15153 = vst [vmem:[#allocation25_spill] sm:$0xff] %v11920_v52  ;;  %v3208_v52 = vadd.f32 %v3184_v35, %v2970_v26 }
 0x5dc   : > { %v2706_v42 = vpop.permute.xlu0 %2705  ;;  %v3394_v15 = vadd.f32 %v11589_v12, %v3208_v52 }
 0x5dd   : > { %v11940_v43 = vpop.permute.xlu1 %2933  ;;  %v2747_v35 = vadd.f32 %v2706_v42, %v2531_v29 }
 0x5de   : > { %v3592_v41 = vadd.f32 %v11605_v60, %v3394_v15 }
 0x5ec   : > { %v11926_v50 = vpop.permute.xlu0 %2717 }
 0x5ed   : > { %15155 = vst [vmem:[#allocation50_spill] sm:$0xff] %v11926_v50  ;;  %v2726_v50 = vsel %vm788_vm3, %v11792_v22, %v2706_v42  ;;  %v15159_v22 = vld [vmem:[#allocation10_spill] sm:$0xff]  ;;  %v15164_v42 = vld [vmem:[#allocation12_spill] sm:$0xff] }
 0x5ee   : > { %v2746_v26 = vadd.f32 %v2726_v50, %v2527_v54  ;;  %v2528_v2 = vsel %vm561_vm2, %v15159_v22, %v15158_v33  ;;  %v15163_v50 = vld [vmem:[#allocation57_spill] sm:$0xff]  ;;  %v3391_v54 = vadd.f32 %v15164_v42, %v3205_v24 }
 0x5ef   : > { %v3371_v38 = vsel %vm1437_vm6, %v15164_v42, %v15163_v50  ;;  %v3372_v33 = vsel %vm1437_vm6, %v15163_v50, %v11560_v53  ;;  %v11987_v53 = vsel %vm1437_vm6, %v11600_v13, %v11607_v45  ;;  %v15169_v42 = vld [vmem:[#allocation14_spill] sm:$0xff] }
 0x5f8   : > { %v2928_v19 = vpop.permute.xlu0 %2927 }
 0x5f9   : > { %v2948_v10 = vsel %vm1011_vm4, %v11814_v30, %v2928_v19  ;;  %v2969_v46 = vadd.f32 %v2928_v19, %v2747_v35 }
 0x5fa   : > { %v2968_v30 = vadd.f32 %v2948_v10, %v2746_v26  ;;  %v15165_v26 = vld [vmem:[#allocation9_spill] sm:$0xff] }
 0x5fb   : > { %v3374_v35 = vsel %vm1437_vm6, %v15165_v26, %v11580_v4  ;;  %v3373_v24 = vsel %vm1437_vm6, %v11589_v12, %v15165_v26  ;;  %v3571_v4 = vsel %vm1636_vm7, %v11605_v60, %v11617_v5  ;;  %v3767_v60 = vsel %vm1835_vm8, %v11675_v25, %v11681_v55 }
 0x603   : > { %v3156_v1 = vpop.permute.xlu1 %3155 }
 0x604   : > { %v3154_v52 = vpop.permute.xlu0 %3153 }
 0x605   : > { %v3182_v29 = vsel %vm1246_vm5, %v11831_v31, %v3154_v52  ;;  %v3183_v17 = vsel %vm1246_vm5, %v3154_v52, %v3156_v1  ;;  %v3569_v31 = vsel %vm1636_vm7, %v11582_v44, %v11593_v9  ;;  %v15166_v1 = vld [vmem:[#allocation5_spill] sm:$0xff]  ;;  %v15168_v52 = vld [vmem:[#allocation60_spill] sm:$0xff] }
 0x606   : > { %v3206_v10 = vadd.f32 %v3182_v29, %v2968_v30  ;;  %v3207_v19 = vadd.f32 %v3183_v17, %v2969_v46  ;;  %v11992_v15 = vsel %vm1437_vm6, %v11607_v45, %v15166_v1  ;;  %v15167_v46 = vld [vmem:[#allocation27_spill] sm:$0xff]  ;;  %v2731_v45 = vsel %vm788_vm3, %v11738_v57, %v11747_v62 }
 0x607   : > { %v12000_v50 = vsel %vm1437_vm6, %v15168_v52, %v15167_v46  ;;  %v12005_v29 = vsel %vm1437_vm6, %v15167_v46, %v15169_v42  ;;  %v3589_v17 = vadd.f32 %v11582_v44, %v3391_v54  ;;  %v2532_v57 = vsel %vm561_vm2, %v11699_v59, %v15159_v22 }
 0x608   : > { %v3392_v30 = vadd.f32 %v3371_v38, %v3206_v10  ;;  %v3393_v12 = vadd.f32 %v3372_v33, %v3207_v19  ;;  %v3790_v38 = vadd.f32 %v11649_v7, %v3592_v41  ;;  %v3570_v33 = vsel %vm1636_vm7, %v11593_v9, %v11840_v34  ;;  %v15170_v9 = vld [vmem:[#allocation55_spill] sm:$0xff] }
 0x609   : > { %v3769_v19 = vsel %vm1835_vm8, %v11649_v7, %v11692_v18  ;;  %v2728_v44 = vsel %vm788_vm3, %v11729_v27, %v11912_v3  ;;  %v12030_v41 = vsel %vm561_vm2, %v11720_v51, %v15162_v0  ;;  %v2754_v34 = vadd.f32 %v2731_v45, %v15170_v9  ;;  %v15173_v9 = vld [vmem:[#allocation35_spill] sm:$0xff] }
 0x60a   : > { %v3590_v10 = vadd.f32 %v3569_v31, %v3392_v30  ;;  %v3591_v54 = vadd.f32 %v3570_v33, %v3393_v12  ;;  %v2953_v7 = vsel %vm1011_vm4, %v11790_v28, %v11794_v47  ;;  %v3988_v26 = vadd.f32 %v11801_v58, %v3790_v38 }
 0x60b   : > { %v2533_v59 = vsel %vm561_vm2, %v11788_v36, %v15160_v61  ;;  %v3787_v27 = vadd.f32 %v11675_v25, %v3589_v17  ;;  %v2950_v51 = vsel %vm1011_vm4, %v11764_v20, %v11940_v43  ;;  %v3768_v28 = vsel %vm1835_vm8, %v11681_v55, %v11874_v37 }
 0x60c   : > { %v12037_v31 = vpop.permute.xlu0 %2939  ;;  %v3788_v22 = vadd.f32 %v3767_v60, %v3590_v10  ;;  %v4186_v0 = vadd.f32 %v11812_v48, %v3988_v26  ;;  %v2749_v1 = vadd.f32 %v2728_v44, %v2528_v2  ;;  %v2750_v30 = vadd.f32 %v11912_v3, %v2532_v57  ;;  %v3164_v3 = vpop.permute.xlu1 %3163  ;;  %v15171_v60 = vld [vmem:[#allocation13_spill] sm:$0xff]  ;;  %v15172_v10 = vld [vmem:[#allocation59_spill] sm:$0xff] }
 0x60d   : > { %v2976_v12 = vadd.f32 %v2953_v7, %v2754_v34  ;;  %v2729_v36 = vsel %vm788_vm3, %v11799_v21, %v11803_v14  ;;  %v3985_v25 = vadd.f32 %v11886_v32, %v3787_v27  ;;  %v3789_v61 = vadd.f32 %v3768_v28, %v3591_v54  ;;  %v15175_v27 = vld [vmem:[#allocation17_spill] sm:$0xff] }
 0x60e   : > { %v3190_v20 = vsel %vm1246_vm5, %v11823_v40, %v11833_v49  ;;  %v3965_v46 = vsel %vm2034_vm9, %v11886_v32, %v11713_v39  ;;  %v2971_v55 = vadd.f32 %v2950_v51, %v2749_v1  ;;  %v2972_v37 = vadd.f32 %v11940_v43, %v2750_v30  ;;  %v15178_v1 = vld [vmem:[#allocation24_spill] sm:$0xff] }
 0x60f   : > { %v4183_v42 = vadd.f32 %v11902_v6, %v3985_v25  ;;  %v3986_v45 = vadd.f32 %v3965_v46, %v3788_v22  ;;  %v12067_v38 = vadd.f32 %v15171_v60, %v4186_v0  ;;  %v3966_v40 = vsel %vm2034_vm9, %v11713_v39, %v11882_v56  ;;  %v15174_v56 = vld [vmem:[#allocation29_spill] sm:$0xff]  ;;  %v15181_v25 = vld [vmem:[#allocation6_spill] sm:$0xff] }
 0x610   : > { %v3162_v2 = vpop.permute.xlu0 %3161  ;;  %v3967_v43 = vsel %vm2034_vm9, %v11801_v58, %v11731_v8  ;;  %v2751_v57 = vadd.f32 %v2729_v36, %v15172_v10  ;;  %v3214_v44 = vadd.f32 %v3190_v20, %v2976_v12  ;;  %v3987_v54 = vadd.f32 %v3966_v40, %v3789_v61  ;;  %v15176_v58 = vld [vmem:[#allocation37_spill] sm:$0xff]  ;;  %v15180_v12 = vld [vmem:[#allocation15_spill] sm:$0xff]  ;;  %v2946_v20 = vpop.permute.xlu1 %2945 }
 0x611   : > { %v3185_v21 = vsel %vm1246_vm5, %v11786_v11, %v3162_v2  ;;  %v3186_v17 = vsel %vm1246_vm5, %v3162_v2, %v3164_v3  ;;  %v4165_v11 = vsel %vm2233_vm10, %v11812_v48, %v11759_v23  ;;  %v4163_v34 = vsel %vm2233_vm10, %v11902_v6, %v15173_v9  ;;  %v15177_v22 = vld [vmem:[#allocation21_spill] sm:$0xff] }
 0x612   : > { %v3209_v32 = vadd.f32 %v3185_v21, %v2971_v55  ;;  %v3210_v33 = vadd.f32 %v3186_v17, %v2972_v37  ;;  %v3572_v26 = vsel %vm1636_vm7, %v11617_v5, %v15174_v56  ;;  %v2951_v51 = vsel %vm1011_vm4, %v15176_v58, %v15175_v27  ;;  %v15179_v5 = vld [vmem:[#allocation56_spill] sm:$0xff]  ;;  %v15182_v37 = vld [vmem:[#allocation25_spill] sm:$0xff]  ;;  %v15184_v21 = vld [vmem:[#allocation34_spill] sm:$0xff] }
 0x613   : > { %v12089_v0 = vadd.f32 %v15177_v22, %v4183_v42  ;;  %v4184_v28 = vadd.f32 %v4163_v34, %v3986_v45  ;;  %v4230_v48 = vmax.f32 %v12067_v38, 0.0  ;;  %v4164_v6 = vsel %vm2233_vm10, %v15173_v9, %v15178_v1  ;;  %v15183_v42 = vld [vmem:[#allocation20_spill] sm:$0xff] }
 0x614   : > { %v3395_v7 = vadd.f32 %v3373_v24, %v3209_v32  ;;  %v3396_v39 = vadd.f32 %v3374_v35, %v3210_v33  ;;  %v12096_v30 = vadd.f32 %v15168_v52, %v3214_v44  ;;  %v3574_v36 = vsel %vm1636_vm7, %v15180_v12, %v15179_v5  ;;  %v15185_v17 = vld [vmem:[#allocation52_spill] sm:$0xff]  ;;  %v15186_v32 = vld [vmem:[#allocation50_spill] sm:$0xff] }
 0x615   : > { %v3770_v61 = vsel %vm1835_vm8, %v11692_v18, %v15181_v25  ;;  %v4185_v46 = vadd.f32 %v4164_v6, %v3987_v54  ;;  %v2973_v55 = vadd.f32 %v2951_v51, %v2751_v57  ;;  %v2732_v3 = vsel %vm788_vm3, %v11747_v62, %v15182_v37  ;;  %v15187_v57 = vld [vmem:[#allocation36_spill] sm:$0xff] }
 0x616   : > { %v3593_v24 = vadd.f32 %v3571_v4, %v3395_v7  ;;  %v3594_v35 = vadd.f32 %v3572_v26, %v3396_v39  ;;  %v3968_v52 = vsel %vm2034_vm9, %v11731_v8, %v15183_v42  ;;  %v4227_v45 = vmax.f32 %v12089_v0, 0.0  ;;  %v15190_v42 = vld [vmem:[#allocation26_spill] sm:$0xff] }
 0x617   : > { %v3187_v40 = vsel %vm1246_vm5, %v15185_v17, %v15184_v21  ;;  %v4216_v18 = vadd.f32 %v15177_v22, %v4184_v28  ;;  %v2730_v33 = vsel %vm788_vm3, %v11803_v14, %v15186_v32  ;;  %v2753_v62 = vadd.f32 %v15186_v32, %v2533_v59 }
 0x618   : > { %v3791_v4 = vadd.f32 %v3769_v19, %v3593_v24  ;;  %v3792_v2 = vadd.f32 %v3770_v61, %v3594_v35  ;;  %v4166_v8 = vsel %vm2233_vm10, %v11759_v23, %v15187_v57  ;;  %v2755_v44 = vadd.f32 %v2732_v3, %v11962_v63 }
 0x619   : > { %v2756_v54 = vadd.f32 %v15182_v37, %v12030_v41  ;;  %v4217_v34 = vadd.f32 %v15177_v22, %v4185_v46  ;;  %v2952_v14 = vsel %vm1011_vm4, %v15175_v27, %v12037_v31  ;;  %v2975_v59 = vadd.f32 %v12037_v31, %v2753_v62  ;;  %v15188_v46 = vld [vmem:[#allocation31_spill] sm:$0xff] }
 0x61a   : > { %v3989_v19 = vadd.f32 %v3967_v43, %v3791_v4  ;;  %v3990_v10 = vadd.f32 %v3968_v52, %v3792_v2  ;;  %v2752_v56 = vadd.f32 %v2730_v33, %v11957_v16  ;;  %v2954_v23 = vsel %vm1011_vm4, %v11794_v47, %v2946_v20  ;;  %v15189_v2 = vld [vmem:[#allocation30_spill] sm:$0xff]  ;;  %v15191_v52 = vld [vmem:[#allocation19_spill] sm:$0xff]  ;;  %v15194_v33 = vld [vmem:[#allocation32_spill] sm:$0xff] }
 0x61b   : > { %v3172_v9 = vpop.permute.xlu1 %3171  ;;  %v4228_v41 = vmax.f32 %v4216_v18, 0.0  ;;  %v3211_v31 = vadd.f32 %v3187_v40, %v2973_v55  ;;  %v2978_v0 = vadd.f32 %v2946_v20, %v2756_v54  ;;  %v4229_v1 = vmax.f32 %v4217_v34, 0.0  ;;  %v15193_v18 = vld [vmem:[#allocation22_spill] sm:$0xff]  ;;  %v15196_v54 = vld [vmem:[#allocation28_spill] sm:$0xff] }
 0x61c   : > { %v3170_v43 = vpop.permute.xlu0 %3169  ;;  %v4187_v7 = vadd.f32 %v4165_v11, %v3989_v19  ;;  %v4188_v39 = vadd.f32 %v4166_v8, %v3990_v10  ;;  %v2974_v11 = vadd.f32 %v2952_v14, %v2752_v56  ;;  %v2977_v16 = vadd.f32 %v2954_v23, %v2755_v44  ;;  %v15195_v44 = vld [vmem:[#allocation48_spill] sm:$0xff]  ;;  %v15199_v56 = vld [vmem:[#allocation51_spill] sm:$0xff] }
 0x61d   : > { %v3189_v63 = vsel %vm1246_vm5, %v3170_v43, %v3172_v9  ;;  %v3188_v26 = vsel %vm1246_vm5, %v15184_v21, %v3170_v43  ;;  %v4240_v37 = vmul.f32 %v4228_v41, %v15188_v46  ;;  %v15192_v21 = vld [vmem:[#allocation46_spill] sm:$0xff]  ;;  %v4239_v62 = vmul.f32 %v4227_v45, %v15194_v33 }
 0x61e   : > { %v3213_v58 = vadd.f32 %v3189_v63, %v2975_v59  ;;  %v4219_v51 = vadd.f32 %v15171_v60, %v4187_v7  ;;  %v4220_v27 = vadd.f32 %v15171_v60, %v4188_v39  ;;  %v3212_v5 = vadd.f32 %v3188_v26, %v2974_v11  ;;  %v15197_v7 = vld [vmem:[#allocation45_spill] sm:$0xff]  ;;  %v15198_v39 = vld [vmem:[#allocation4_spill] sm:$0xff] }
 0x61f   : > { %v3180_v28 = vpop.permute.xlu1 %3179  ;;  %v3772_v17 = vsel %vm1835_vm8, %v15192_v21, %v15191_v52  ;;  %v3397_v8 = vadd.f32 %v11600_v13, %v3211_v31  ;;  %v3970_v9 = vsel %vm2034_vm9, %v15196_v54, %v15195_v44  ;;  %v4242_v59 = vmul.f32 %v4230_v48, %v15194_v33  ;;  %v15202_v31 = vld [vmem:[#allocation58_spill] sm:$0xff] }
 0x620   : > { %v3399_v6 = vadd.f32 %v11992_v15, %v3213_v58  ;;  %v3178_v47 = vpop.permute.xlu0 %3177  ;;  %v4231_v24 = vmax.f32 %v4219_v51, 0.0  ;;  %v4232_v35 = vmax.f32 %v4220_v27, 0.0  ;;  %v3576_v15 = vsel %vm1636_vm7, %v15190_v42, %v15189_v2  ;;  %v15200_v58 = vld [vmem:[#allocation47_spill] sm:$0xff]  ;;  %v15201_v27 = vld [vmem:[#allocation49_spill] sm:$0xff] }
 0x621   : > { %v3191_v25 = vsel %vm1246_vm5, %v11833_v49, %v3178_v47  ;;  %v3192_v61 = vsel %vm1246_vm5, %v3178_v47, %v3180_v28  ;;  %v4241_v49 = vmul.f32 %v4229_v1, %v15193_v18  ;;  %v3398_v45 = vadd.f32 %v11987_v53, %v3212_v5  ;;  %v15203_v1 = vld [vmem:[#allocation40_spill] sm:$0xff] }
 0x622   : > { %v3597_v3 = vadd.f32 %v3574_v36, %v3399_v6  ;;  %v3215_v55 = vadd.f32 %v3191_v25, %v2977_v16  ;;  %v3216_v20 = vadd.f32 %v3192_v61, %v2978_v0  ;;  %v4243_v4 = vmul.f32 %v4231_v24, %v15188_v46 }
 0x623   : > { %v4156_v40 = vpop.permute.xlu1 %4155  ;;  %v4244_v32 = vmul.f32 %v4232_v35, %v15193_v18  ;;  %v3575_v13 = vsel %vm1636_vm7, %v15197_v7, %v15190_v42  ;;  %v3774_v23 = vsel %vm1835_vm8, %v15199_v56, %v15198_v39  ;;  %v4251_v41 = vpack.c.bf16 %v4242_v59, %v4239_v62  ;;  %v15204_v35 = vld [vmem:[#allocation54_spill] sm:$0xff] }
 0x624   : > { %v3402_v36 = vadd.f32 %v12005_v29, %v3216_v20  ;;  %v4154_v19 = vpop.permute.xlu0 %4153  ;;  %v3795_v10 = vadd.f32 %v3772_v17, %v3597_v3  ;;  %v4252_v57 = vpack.c.bf16 %v4243_v4, %v4240_v37  ;;  %v3401_v34 = vadd.f32 %v12000_v50, %v3215_v55  ;;  %v15205_v3 = vld [vmem:[#allocation18_spill] sm:$0xff] }
 0x625   : > { %v4253_v14 = vpack.c.bf16 %v4244_v32, %v4241_v49  ;;  %v4168_v50 = vsel %vm2233_vm10, %v4154_v19, %v4156_v40  ;;  %v3598_v26 = vadd.f32 %v15197_v7, %v12096_v30  ;;  %v3573_v51 = vsel %vm1636_vm7, %v15200_v58, %v15180_v12 }
 0x626   : > { %v3600_v43 = vadd.f32 %v3576_v15, %v3402_v36  ;;  %v3993_v29 = vadd.f32 %v3970_v9, %v3795_v10  ;;  %4265 = vrot.lane.b32.xlu1 %v4252_v57, %s9714_s11  ;;  %v3972_v0 = vsel %vm2034_vm9, %v15202_v31, %v15201_v27  ;;  %v3599_v11 = vadd.f32 %v3575_v13, %v3401_v34  ;;  %v15206_v15 = vld [vmem:[#allocation44_spill] sm:$0xff] }
 0x627   : > { %4267 = vrot.lane.b32.xlu0 %v4253_v14, %s9714_s11  ;;  %v4162_v38 = vpop.permute.xlu1 %4161  ;;  %v3595_v28 = vadd.f32 %v15200_v58, %v3397_v8  ;;  %v3596_v47 = vadd.f32 %v3573_v51, %v3398_v45  ;;  %v3773_v12 = vsel %vm1835_vm8, %v15204_v35, %v15199_v56  ;;  %v3796_v25 = vadd.f32 %v15204_v35, %v3598_v26  ;;  %v9662_v35 = vld [vmem:[%s14762_s4 + $0x10] sm:$0xff]  }
 0x628   : > { %v4191_v48 = vadd.f32 %v4168_v50, %v3993_v29  ;;  %v4160_v63 = vpop.permute.xlu0 %4159  ;;  %v3798_v53 = vadd.f32 %v3774_v23, %v3600_v43  ;;  %v3771_v55 = vsel %vm1835_vm8, %v15205_v3, %v15192_v21  ;;  %v3797_v20 = vadd.f32 %v3773_v12, %v3599_v11  ;;  %v9660_v11 = vld [vmem:[%s14762_s4 + $0x8] sm:$0xff]   ;;  %v9663_v12 = vld [vmem:[%s14762_s4 + $0x18] sm:$0xff]  }
 0x629   : > { %v4170_v24 = vsel %vm2233_vm10, %v4160_v63, %v4162_v38  ;;  %v3793_v4 = vadd.f32 %v15205_v3, %v3595_v28  ;;  %v3794_v40 = vadd.f32 %v3771_v55, %v3596_v47  ;;  %v9668_v3 = vld [vmem:[%s14762_s4 + $0x40] sm:$0xff]   ;;  %v9669_v55 = vld [vmem:[%s14762_s4 + $0x48] sm:$0xff]  }
 0x62a   : > { %v4223_v16 = vadd.f32 %v15203_v1, %v4191_v48  ;;  %v3996_v6 = vadd.f32 %v3972_v0, %v3798_v53  ;;  %4263 = vrot.lane.b32.xlu1 %v4251_v41, %s9714_s11 }
 0x62b   : > { %v3960_v30 = vpop.permute.xlu1 %3959 }
 0x62c   : > { %v4194_v5 = vadd.f32 %v4170_v24, %v3996_v6  ;;  %v3971_v61 = vsel %vm2034_vm9, %v3960_v30, %v15202_v31  ;;  %v3954_v37 = vpop.permute.xlu0 %3953  ;;  %v4235_v42 = vmax.f32 %v4223_v16, 0.0  ;;  %v3994_v17 = vadd.f32 %v3960_v30, %v3796_v25  ;;  %v12252_v30 = vld [vmem:[%s14762_s4] sm:$0xff]   ;;  %v9665_v25 = vld [vmem:[%s14762_s4 + $0x28] sm:$0xff]  }
 0x62d   : > { %v3969_v2 = vsel %vm2034_vm9, %v3954_v37, %v15196_v54  ;;  %v3995_v49 = vadd.f32 %v3971_v61, %v3797_v20  ;;  %v3991_v32 = vadd.f32 %v3954_v37, %v3793_v4  ;;  %v15207_v6 = vmov 0   ;;  %v9666_v61 = vld [vmem:[%s14762_s4 + $0x30] sm:$0xff]   ;;  %v9667_v37 = vld [vmem:[%s14762_s4 + $0x38] sm:$0xff]  }
 0x62e   : > { %v4226_v52 = vadd.f32 %v15206_v15, %v4194_v5  ;;  %v3992_v10 = vadd.f32 %v3969_v2, %v3794_v40  ;;  %v4247_v54 = vmul.f32 %v4235_v42, %v15193_v18  ;;  %v9664_v5 = vld [vmem:[%s14762_s4 + $0x20] sm:$0xff]   ;;  %v9670_v20 = vld [vmem:[%s14762_s4 + $0x50] sm:$0xff]   ;;  %v9671_v4 = vld [vmem:[%s14762_s4 + $0x58] sm:$0xff]  }
 0x62f   : > { %v4158_v62 = vpop.permute.xlu1 %4157  ;;  %v9672_v2 = vld [vmem:[%s14762_s4 + $0x60] sm:$0xff]   ;;  %v9673_v42 = vld [vmem:[%s14762_s4 + $0x68] sm:$0xff]  }
 0x630   : > { %v4238_v36 = vmax.f32 %v4226_v52, 0.0  ;;  %v4169_v57 = vsel %vm2233_vm10, %v4158_v62, %v4160_v63  ;;  %v4192_v8 = vadd.f32 %v4158_v62, %v3994_v17  ;;  %v4152_v21 = vpop.permute.xlu0 %4151  ;;  %v9674_v52 = vld [vmem:[%s14762_s4 + $0x70] sm:$0xff]   ;;  %v9675_v17 = vld [vmem:[%s14762_s4 + $0x78] sm:$0xff]   ;;  %v9676_v40 = vld [vmem:[%s14762_s4 + $0x80] sm:$0xff]  }
 0x631   : > { %v4193_v44 = vadd.f32 %v4169_v57, %v3995_v49  ;;  %v4167_v9 = vsel %vm2233_vm10, %v4152_v21, %v4154_v19  ;;  %v4189_v34 = vadd.f32 %v4152_v21, %v3991_v32  ;;  %v9677_v49 = vld [vmem:[%s14762_s4 + $0x88] sm:$0xff]  }
 0x632   : > { %v4250_v14 = vmul.f32 %v4238_v36, %v15193_v18  ;;  %v4224_v59 = vadd.f32 %v15206_v15, %v4192_v8  ;;  %v4190_v45 = vadd.f32 %v4167_v9, %v3992_v10 }
 0x633   : > { %v4225_v43 = vadd.f32 %v15206_v15, %v4193_v44  ;;  %v4221_v29 = vadd.f32 %v15203_v1, %v4189_v34 }
 0x634   : > { %v4236_v7 = vmax.f32 %v4224_v59, 0.0  ;;  %v4222_v13 = vadd.f32 %v15203_v1, %v4190_v45  ;;  %v4256_v39 = vpack.c.bf16 %v4250_v14, %v4247_v54 }
 0x635   : > { %v4237_v56 = vmax.f32 %v4225_v43, 0.0  ;;  %v4233_v23 = vmax.f32 %v4221_v29, 0.0 }
 0x636   : > { %v4248_v19 = vmul.f32 %v4236_v7, %v15194_v33  ;;  %v4234_v50 = vmax.f32 %v4222_v13, 0.0  ;;  %4273 = vrot.lane.b32.xlu0 %v4256_v39, %s9714_s11 }
 0x637   : > { %v4249_v38 = vmul.f32 %v4237_v56, %v15188_v46  ;;  %v4245_v48 = vmul.f32 %v4233_v23, %v15194_v33 }
 0x638   : > { %v4246_v63 = vmul.f32 %v4234_v50, %v15188_v46 }
 0x639   : > { %v4254_v53 = vpack.c.bf16 %v4248_v19, %v4245_v48 }
 0x63a   : > { %v4255_v41 = vpack.c.bf16 %v4249_v38, %v4246_v63 }
 0x63b   : > { %4269 = vrot.lane.b32.xlu1 %v4254_v53, %s9714_s11 }
 0x63c   : > { %4271 = vrot.lane.b32.xlu0 %v4255_v41, %s9714_s11 }
 0x698   : > { %v4266_v26 = vpop.permute.xlu1 %4265 }
 0x699   : > { %v12212_v58 = vpop.permute.xlu0 %4267 }
 0x69a   : > { %v12216_v51 = vsel %vm2380_vm11, %v4266_v26, %v12212_v58  ;;  %9372 = vmatprep.subr.bf16.mxu1 %v12212_v58 }
 0x69b   : > { %4285 = vmatprep.subr.bf16.mxu0 %v12216_v51  ;;  %9373 = vmatpush3.bf16.msra.mxu1 %v12212_v58 }
 0x69c   : > { %v4264_v27 = vpop.permute.xlu1 %4263 }
 0x69d   : > { %v12222_v31 = vsel %vm2380_vm11, %v4264_v27, %v4266_v26 }
 0x69e   : > { %4286 = vmatpush1.bf16.msra.mxu0 %v12222_v31 }
 0x6a8   : > { %v12225_v0 = vpop.permute.xlu0 %4273 }
 0x6a9   : > { %9374 = vmatprep.subr.bf16.mxu1 %v12225_v0 }
 0x6aa   : > { %9375 = vmatpush3.bf16.msra.mxu1 %v12225_v0 }
 0x6ab   : > { %4423 = vmatprep.subr.bf16.mxu1 %v12216_v51 }
 0x6ad   : > { %9377 = vmatmul.mubr.msk.bf16.vlgmr.msra.gmra.mrb[108].mxu1 %vm1835_vm8, %v9660_v11  ;;  %v4270_v28 = vpop.permute.xlu1 %4269 }
 0x6ae   : > { %v4272_v16 = vpop.permute.xlu0 %4271  ;;  %4424 = vmatpush1.bf16.msra.mxu1 %v12222_v31  ;;  %4455 = vmatprep.mubr.bf16.mxu1 %v15207_v6 }
 0x6af   : > { %v12237_v47 = vsel %vm2380_vm11, %v4270_v28, %v4272_v16  ;;  %v12241_v24 = vsel %vm2380_vm11, %v4272_v16, %v12225_v0 }
 0x6b0   : > { %4287 = vmatprep.subr.bf16.mxu0 %v12241_v24  ;;  %4425 = vmatprep.subr.bf16.mxu1 %v12241_v24 }
 0x6b1   : > { %4288 = vmatpush1.bf16.msra.mxu0 %v12237_v47 }
 0x6b2   : > { %4426 = vmatpush1.bf16.msra.mxu1 %v12237_v47  ;;  %9380 = vmatprep.subr.bf16.mxu0 %v12212_v58 }
 0x6b3   : > { %9388 = vmatprep.subr.bf16.mxu1 %v12212_v58 }
 0x6b4   : > { %8992 = vmatmul.mubr.msk.bf16.vlgmr.msra.gmra.mrb[108].mxu0 %vm1835_vm8, %v12252_v30 }
 0x6b5   : > { %8996 = vmatmul.mubr.msk.bf16.vlgmr.msra.gmra.mrb[112].mxu1 %vm1835_vm8, %v9662_v35  ;;  %9381 = vmatpush3.bf16.msra.mxu0 %v12212_v58 }
 0x6b6   : > { %9382 = vmatprep.subr.bf16.mxu0 %v12225_v0  ;;  %9389 = vmatpush3.bf16.msra.mxu1 %v12212_v58 }
 0x6b7   : > { %9390 = vmatprep.subr.bf16.mxu1 %v12225_v0  ;;  %4327 = vmatprep.mubr.bf16.mxu0 %v15207_v6 }
 0x6b8   : > { %4465 = vmatprep.mubr.bf16.mxu1 %v15207_v6 }
 0x6b9   : > { %9383 = vmatpush3.bf16.msra.mxu0 %v12225_v0 }
 0x6ba   : > { %4629 = vmatprep.subr.bf16.mxu0 %v12216_v51  ;;  %9391 = vmatpush3.bf16.msra.mxu1 %v12225_v0 }
 0x6bb   : > { %4835 = vmatprep.subr.bf16.mxu1 %v12216_v51 }
 0x6bc   : > { %8993 = vmatmul.mubr.msk.bf16.gmra.mrb[112].mxu0 %vm1835_vm8, %v9660_v11 }
 0x6bd   : > { %8997 = vmatmul.mubr.msk.bf16.gmra.mrb[116].mxu1 %vm1835_vm8, %v9663_v12  ;;  %9384 = vmatprep.mubr.msk.bf16.mxu0 %vm1835_vm8, %v9662_v35 }
 0x6be   : > { %9392 = vmatprep.mubr.msk.bf16.mxu1 %vm1835_vm8, %v9664_v5 }
 0x6c4   : > { %9385 = vmatmul.mubr.msk.bf16.vlgmr.msra.gmra.mrb[116].mxu0 %vm1835_vm8, %v9663_v12 }
 0x6c5   : > { %4630 = vmatpush1.bf16.msra.mxu0 %v12222_v31  ;;  %9393 = vmatmul.mubr.msk.bf16.vlgmr.msra.gmra.mrb[120].mxu1 %vm1835_vm8, %v9665_v25 }
 0x6c6   : > { %4631 = vmatprep.subr.bf16.mxu0 %v12241_v24  ;;  %4836 = vmatpush1.bf16.msra.mxu1 %v12222_v31 }
 0x6c7   : > { %4837 = vmatprep.subr.bf16.mxu1 %v12241_v24  ;;  %4661 = vmatprep.mubr.bf16.mxu0 %v15207_v6 }
 0x6c8   : > { %4867 = vmatprep.mubr.bf16.mxu1 %v15207_v6 }
 0x6c9   : > { %4632 = vmatpush1.bf16.msra.mxu0 %v12237_v47 }
 0x6ca   : > { %4838 = vmatpush1.bf16.msra.mxu1 %v12237_v47  ;;  %9396 = vmatprep.subr.bf16.mxu0 %v12212_v58 }
 0x6cb   : > { %9404 = vmatprep.subr.bf16.mxu1 %v12212_v58 }
 0x6cc   : > { %9000 = vmatmul.mubr.msk.bf16.vlgmr.msra.gmra.mrb[120].mxu0 %vm1835_vm8, %v9664_v5 }
 0x6cd   : > { %9397 = vmatpush3.bf16.msra.mxu0 %v12212_v58  ;;  %9004 = vmatmul.mubr.msk.bf16.vlgmr.msra.gmra.mrb[124].mxu1 %vm1835_vm8, %v9666_v61 }
 0x6ce   : > { %9398 = vmatprep.subr.bf16.mxu0 %v12225_v0  ;;  %9405 = vmatpush3.bf16.msra.mxu1 %v12212_v58 }
 0x6cf   : > { %9406 = vmatprep.subr.bf16.mxu1 %v12225_v0  ;;  %4671 = vmatprep.mubr.bf16.mxu0 %v15207_v6 }
 0x6d0   : > { %4877 = vmatprep.mubr.bf16.mxu1 %v15207_v6 }
 0x6d1   : > { %9399 = vmatpush3.bf16.msra.mxu0 %v12225_v0 }
 0x6d2   : > { %5057 = vmatprep.subr.bf16.mxu0 %v12216_v51  ;;  %9407 = vmatpush3.bf16.msra.mxu1 %v12225_v0 }
 0x6d3   : > { %5227 = vmatprep.subr.bf16.mxu1 %v12216_v51 }
 0x6d4   : > { %9001 = vmatmul.mubr.msk.bf16.gmra.mrb[124].mxu0 %vm1835_vm8, %v9665_v25 }
 0x6d5   : > { %9005 = vmatmul.mubr.msk.bf16.gmra.mrb[128].mxu1 %vm1835_vm8, %v9667_v37  ;;  %9400 = vmatprep.mubr.msk.bf16.mxu0 %vm1835_vm8, %v9666_v61 }
 0x6d6   : > { %9408 = vmatprep.mubr.msk.bf16.mxu1 %vm1835_vm8, %v9668_v3 }
 0x6dc   : > { %9401 = vmatmul.mubr.msk.bf16.vlgmr.msra.gmra.mrb[128].mxu0 %vm1835_vm8, %v9667_v37 }
 0x6dd   : > { %5058 = vmatpush1.bf16.msra.mxu0 %v12222_v31  ;;  %9409 = vmatmul.mubr.msk.bf16.vlgmr.msra.gmra.mrb[132].mxu1 %vm1835_vm8, %v9669_v55 }
 0x6de   : > { %5059 = vmatprep.subr.bf16.mxu0 %v12241_v24  ;;  %5228 = vmatpush1.bf16.msra.mxu1 %v12222_v31 }
 0x6df   : > { %5229 = vmatprep.subr.bf16.mxu1 %v12241_v24  ;;  %5089 = vmatprep.mubr.bf16.mxu0 %v15207_v6 }
 0x6e0   : > { %5259 = vmatprep.mubr.bf16.mxu1 %v15207_v6 }
 0x6e1   : > { %5060 = vmatpush1.bf16.msra.mxu0 %v12237_v47 }
 0x6e2   : > { %5230 = vmatpush1.bf16.msra.mxu1 %v12237_v47  ;;  %9412 = vmatprep.subr.bf16.mxu0 %v12212_v58 }
 0x6e3   : > { %9420 = vmatprep.subr.bf16.mxu1 %v12212_v58 }
 0x6e4   : > { %9008 = vmatmul.mubr.msk.bf16.vlgmr.msra.gmra.mrb[132].mxu0 %vm1835_vm8, %v9668_v3 }
 0x6e5   : > { %9413 = vmatpush3.bf16.msra.mxu0 %v12212_v58  ;;  %9012 = vmatmul.mubr.msk.bf16.vlgmr.msra.gmra.mrb[136].mxu1 %vm1835_vm8, %v9670_v20 }
 0x6e6   : > { %9414 = vmatprep.subr.bf16.mxu0 %v12225_v0  ;;  %9421 = vmatpush3.bf16.msra.mxu1 %v12212_v58 }
 0x6e7   : > { %9422 = vmatprep.subr.bf16.mxu1 %v12225_v0  ;;  %5099 = vmatprep.mubr.bf16.mxu0 %v15207_v6 }
 0x6e8   : > { %5269 = vmatprep.mubr.bf16.mxu1 %v15207_v6 }
 0x6e9   : > { %9415 = vmatpush3.bf16.msra.mxu0 %v12225_v0 }
 0x6ea   : > { %5409 = vmatprep.subr.bf16.mxu0 %v12216_v51  ;;  %9423 = vmatpush3.bf16.msra.mxu1 %v12225_v0 }
 0x6eb   : > { %5591 = vmatprep.subr.bf16.mxu1 %v12216_v51 }
 0x6ec   : > { %9009 = vmatmul.mubr.msk.bf16.gmra.mrb[136].mxu0 %vm1835_vm8, %v9669_v55 }
 0x6ed   : > { %9013 = vmatmul.mubr.msk.bf16.gmra.mrb[140].mxu1 %vm1835_vm8, %v9671_v4  ;;  %9416 = vmatprep.mubr.msk.bf16.mxu0 %vm1835_vm8, %v9670_v20 }
 0x6ee   : > { %9424 = vmatprep.mubr.msk.bf16.mxu1 %vm1835_vm8, %v9672_v2 }
 0x6f4   : > { %9417 = vmatmul.mubr.msk.bf16.vlgmr.msra.gmra.mrb[140].mxu0 %vm1835_vm8, %v9671_v4 }
 0x6f5   : > { %5410 = vmatpush1.bf16.msra.mxu0 %v12222_v31  ;;  %9425 = vmatmul.mubr.msk.bf16.vlgmr.msra.gmra.mrb[144].mxu1 %vm1835_vm8, %v9673_v42 }
 0x6f6   : > { %5411 = vmatprep.subr.bf16.mxu0 %v12241_v24  ;;  %5592 = vmatpush1.bf16.msra.mxu1 %v12222_v31 }
 0x6f7   : > { %5593 = vmatprep.subr.bf16.mxu1 %v12241_v24  ;;  %5441 = vmatprep.mubr.bf16.mxu0 %v15207_v6 }
 0x6f8   : > { %5623 = vmatprep.mubr.bf16.mxu1 %v15207_v6 }
 0x6f9   : > { %5412 = vmatpush1.bf16.msra.mxu0 %v12237_v47 }
 0x6fa   : > { %5594 = vmatpush1.bf16.msra.mxu1 %v12237_v47  ;;  %9428 = vmatprep.subr.bf16.mxu0 %v12212_v58 }
 0x6fb   : > { %9436 = vmatprep.subr.bf16.mxu1 %v12212_v58 }
 0x6fc   : > { %9016 = vmatmul.mubr.msk.bf16.vlgmr.msra.gmra.mrb[144].mxu0 %vm1835_vm8, %v9672_v2 }
 0x6fd   : > { %9429 = vmatpush3.bf16.msra.mxu0 %v12212_v58  ;;  %9020 = vmatmul.mubr.msk.bf16.vlgmr.msra.gmra.mrb[148].mxu1 %vm1835_vm8, %v9674_v52 }
 0x6fe   : > { %9430 = vmatprep.subr.bf16.mxu0 %v12225_v0  ;;  %9437 = vmatpush3.bf16.msra.mxu1 %v12212_v58 }
 0x6ff   : > { %9438 = vmatprep.subr.bf16.mxu1 %v12225_v0  ;;  %5451 = vmatprep.mubr.bf16.mxu0 %v15207_v6 }
 0x700   : > { %5633 = vmatprep.mubr.bf16.mxu1 %v15207_v6 }
 0x701   : > { %9431 = vmatpush3.bf16.msra.mxu0 %v12225_v0 }
 0x702   : > { %5773 = vmatprep.subr.bf16.mxu0 %v12216_v51  ;;  %9439 = vmatpush3.bf16.msra.mxu1 %v12225_v0 }
 0x704   : > { %9017 = vmatmul.mubr.msk.bf16.gmra.mrb[148].mxu0 %vm1835_vm8, %v9673_v42 }
 0x705   : > { %9432 = vmatprep.mubr.msk.bf16.mxu0 %vm1835_vm8, %v9674_v52  ;;  %9021 = vmatmul.mubr.msk.bf16.gmra.mrb[152].mxu1 %vm1835_vm8, %v9675_v17 }
 0x706   : > { %9440 = vmatprep.mubr.msk.bf16.mxu1 %vm1835_vm8, %v9676_v40 }
 0x70c   : > { %9433 = vmatmul.mubr.msk.bf16.vlgmr.msra.gmra.mrb[152].mxu0 %vm1835_vm8, %v9675_v17 }
 0x70d   : > { %5774 = vmatpush1.bf16.msra.mxu0 %v12222_v31  ;;  %5805 = vmatprep.mubr.bf16.mxu0 %v15207_v6 }
 0x70e   : > { %5775 = vmatprep.subr.bf16.mxu0 %v12241_v24  ;;  %9441 = vmatmul.mubr.msk.bf16.vlgmr.msra.gmra.mrb[156].mxu1 %vm1835_vm8, %v9677_v49 }
 0x70f   : > { %6057 = vmatprep.mubr.bf16.mxu1 %v15207_v6 }
 0x711   : > { %5776 = vmatpush1.bf16.msra.mxu0 %v12237_v47 }
 0x714   : > { %9024 = vmatmul.mubr.msk.bf16.vlgmr.msra.gmra.mrb[156].mxu0 %vm1835_vm8, %v9676_v40 }
 0x715   : > { %5815 = vmatprep.mubr.bf16.mxu0 %v15207_v6 }
 0x71c   : > { %9025 = vmatmul.mubr.msk.bf16.gmra.mrb[160].mxu0 %vm1835_vm8, %v9677_v49 }
 0x71d   : > { %9448 = vmatprep.mubr.msk.bf16.mxu0 %vm1835_vm8, %v12252_v30 }
 0x780   : > { %v12414_v32 = vpop.f32.mrb[108].mxu1 }
 0x781   : > { %v12416_v62 = vpop.f32.mrb[109].mxu1 }
 0x782   : > { %v12418_v36 = vpop.f32.mrb[110].mxu1 }
 0x783   : > { %v12420_v10 = vpop.f32.mrb[111].mxu1 }
 0x787   : > { %v4319_v57 = vpop.f32.mrb[108].mxu0 }
 0x788   : > { %4387 = vrot.lane.b32.xlu0 %v4319_v57, %s9705_s17  ;;  %v4321_v8 = vpop.f32.mrb[109].mxu0  ;;  %v4457_v21 = vpop.f32.mrb[112].mxu1 }
 0x789   : > { %v4323_v44 = vpop.f32.mrb[110].mxu0  ;;  %v4459_v9 = vpop.f32.mrb[113].mxu1 }
 0x78a   : > { %4390 = vrot.lane.b32.xlu1 %v4323_v44, %s9705_s17  ;;  %v4325_v34 = vpop.f32.mrb[111].mxu0  ;;  %v4461_v54 = vpop.f32.mrb[114].mxu1 }
 0x78b   : > { %v4463_v14 = vpop.f32.mrb[115].mxu1 }
 0x78c   : > { %4399 = vrot.lane.b32.xlu0 %v4321_v8, %s9705_s17 }
 0x78e   : > { %4401 = vrot.lane.b32.xlu1 %v4325_v34, %s9705_s17 }
 0x78f   : > { %v4329_v59 = vpop.f32.mrb[112].mxu0 }
 0x790   : > { %4525 = vrot.lane.b32.xlu0 %v4457_v21, %s9705_s17  ;;  %v4331_v45 = vpop.f32.mrb[113].mxu0  ;;  %v4467_v43 = vpop.f32.mrb[116].mxu1 }
 0x791   : > { %v4333_v29 = vpop.f32.mrb[114].mxu0  ;;  %v4469_v7 = vpop.f32.mrb[117].mxu1 }
 0x792   : > { %4528 = vrot.lane.b32.xlu1 %v4461_v54, %s9705_s17  ;;  %v4335_v13 = vpop.f32.mrb[115].mxu0  ;;  %v4471_v39 = vpop.f32.mrb[118].mxu1 }
 0x793   : > { %v4473_v56 = vpop.f32.mrb[119].mxu1 }
 0x794   : > { %4537 = vrot.lane.b32.xlu0 %v4459_v9, %s9705_s17 }
 0x796   : > { %4539 = vrot.lane.b32.xlu1 %v4463_v14, %s9705_s17 }
 0x797   : > { %v12430_v23 = vpop.f32.mrb[116].mxu0 }
 0x798   : > { %4393 = vrot.lane.b32.xlu0 %v4329_v59, %s9705_s17  ;;  %v12433_v19 = vpop.f32.mrb[117].mxu0  ;;  %v12435_v50 = vpop.f32.mrb[120].mxu1 }
 0x799   : > { %v12437_v38 = vpop.f32.mrb[118].mxu0  ;;  %v12439_v48 = vpop.f32.mrb[121].mxu1 }
 0x79a   : > { %4396 = vrot.lane.b32.xlu1 %v4333_v29, %s9705_s17  ;;  %v12442_v63 = vpop.f32.mrb[119].mxu0  ;;  %v12444_v53 = vpop.f32.mrb[122].mxu1 }
 0x79b   : > { %v12446_v41 = vpop.f32.mrb[123].mxu1 }
 0x79c   : > { %4403 = vrot.lane.b32.xlu0 %v4331_v45, %s9705_s17 }
 0x79e   : > { %4405 = vrot.lane.b32.xlu1 %v4335_v13, %s9705_s17 }
 0x79f   : > { %v4663_v26 = vpop.f32.mrb[120].mxu0 }
 0x7a0   : > { %4531 = vrot.lane.b32.xlu0 %v4467_v43, %s9705_s17  ;;  %v4665_v58 = vpop.f32.mrb[121].mxu0  ;;  %v4869_v51 = vpop.f32.mrb[124].mxu1 }
 0x7a1   : > { %v4667_v27 = vpop.f32.mrb[122].mxu0  ;;  %v4871_v31 = vpop.f32.mrb[125].mxu1 }
 0x7a2   : > { %4534 = vrot.lane.b32.xlu1 %v4471_v39, %s9705_s17  ;;  %v4669_v0 = vpop.f32.mrb[123].mxu0  ;;  %v4873_v11 = vpop.f32.mrb[126].mxu1 }
 0x7a3   : > { %v4875_v28 = vpop.f32.mrb[127].mxu1 }
 0x7a4   : > { %4541 = vrot.lane.b32.xlu0 %v4469_v7, %s9705_s17 }
 0x7a6   : > { %4543 = vrot.lane.b32.xlu1 %v4473_v56, %s9705_s17 }
 0x7a7   : > { %v4673_v16 = vpop.f32.mrb[124].mxu0 }
 0x7a8   : > { %4731 = vrot.lane.b32.xlu0 %v4663_v26, %s9705_s17  ;;  %v4675_v47 = vpop.f32.mrb[125].mxu0  ;;  %v4879_v24 = vpop.f32.mrb[128].mxu1 }
 0x7a9   : > { %v4677_v30 = vpop.f32.mrb[126].mxu0  ;;  %v4881_v35 = vpop.f32.mrb[129].mxu1 }
 0x7aa   : > { %4734 = vrot.lane.b32.xlu1 %v4667_v27, %s9705_s17  ;;  %v4679_v12 = vpop.f32.mrb[127].mxu0  ;;  %v4883_v5 = vpop.f32.mrb[130].mxu1 }
 0x7ab   : > { %v4885_v25 = vpop.f32.mrb[131].mxu1 }
 0x7ac   : > { %4743 = vrot.lane.b32.xlu0 %v4665_v58, %s9705_s17 }
 0x7ae   : > { %4745 = vrot.lane.b32.xlu1 %v4669_v0, %s9705_s17 }
 0x7af   : > { %v12458_v61 = vpop.f32.mrb[128].mxu0 }
 0x7b0   : > { %4937 = vrot.lane.b32.xlu0 %v4869_v51, %s9705_s17  ;;  %v12461_v37 = vpop.f32.mrb[129].mxu0  ;;  %v9410_v3 = vpop.f32.mrb[132].mxu1 }
 0x7b1   : > { %v12463_v55 = vpop.f32.mrb[130].mxu0  ;;  %v5144_v20 = vpop.f32.mrb[133].mxu1 }
 0x7b2   : > { %4940 = vrot.lane.b32.xlu1 %v4873_v11, %s9705_s17  ;;  %v12466_v4 = vpop.f32.mrb[131].mxu0  ;;  %v9411_v2 = vpop.f32.mrb[134].mxu1 }
 0x7b3   : > { %v5147_v42 = vpop.f32.mrb[135].mxu1 }
 0x7b4   : > { %4737 = vrot.lane.b32.xlu0 %v4673_v16, %s9705_s17 }
 0x7b6   : > { %4740 = vrot.lane.b32.xlu1 %v4677_v30, %s9705_s17 }
 0x7b7   : > { %v5091_v52 = vpop.f32.mrb[132].mxu0 }
 0x7b8   : > { %4949 = vrot.lane.b32.xlu0 %v4871_v31, %s9705_s17  ;;  %v5093_v17 = vpop.f32.mrb[133].mxu0  ;;  %v5261_v40 = vpop.f32.mrb[136].mxu1 }
 0x7b9   : > { %v5095_v49 = vpop.f32.mrb[134].mxu0  ;;  %v5263_v57 = vpop.f32.mrb[137].mxu1 }
 0x7ba   : > { %4951 = vrot.lane.b32.xlu1 %v4875_v28, %s9705_s17  ;;  %v5097_v8 = vpop.f32.mrb[135].mxu0  ;;  %v5265_v21 = vpop.f32.mrb[138].mxu1 }
 0x7bb   : > { %v5267_v44 = vpop.f32.mrb[139].mxu1 }
 0x7bc   : > { %4747 = vrot.lane.b32.xlu0 %v4675_v47, %s9705_s17 }
 0x7be   : > { %4749 = vrot.lane.b32.xlu1 %v4679_v12, %s9705_s17 }
 0x7bf   : > { %v5101_v9 = vpop.f32.mrb[136].mxu0 }
 0x7c0   : > { %4943 = vrot.lane.b32.xlu0 %v4879_v24, %s9705_s17  ;;  %v5103_v34 = vpop.f32.mrb[137].mxu0  ;;  %v12475_v54 = vpop.f32.mrb[140].mxu1 }
 0x7c1   : > { %v5105_v14 = vpop.f32.mrb[138].mxu0  ;;  %v12477_v59 = vpop.f32.mrb[141].mxu1 }
 0x7c2   : > { %4946 = vrot.lane.b32.xlu1 %v4883_v5, %s9705_s17  ;;  %v5107_v45 = vpop.f32.mrb[139].mxu0  ;;  %v5275_v43 = vpop.f32.mrb[142].mxu1 }
 0x7c3   : > { %v12480_v29 = vpop.f32.mrb[143].mxu1 }
 0x7c4   : > { %4953 = vrot.lane.b32.xlu0 %v4881_v35, %s9705_s17 }
 0x7c6   : > { %4955 = vrot.lane.b32.xlu1 %v4885_v25, %s9705_s17 }
 0x7c7   : > { %v12484_v7 = vpop.f32.mrb[140].mxu0 }
 0x7c8   : > { %5171 = vrot.lane.b32.xlu0 %v5091_v52, %s9706_s18  ;;  %v12487_v13 = vpop.f32.mrb[141].mxu0  ;;  %v12489_v39 = vpop.f32.mrb[144].mxu1 }
 0x7c9   : > { %v12491_v56 = vpop.f32.mrb[142].mxu0  ;;  %v12493_v26 = vpop.f32.mrb[145].mxu1 }
 0x7ca   : > { %5187 = vrot.lane.b32.xlu1 %v9410_v3, %s9706_s18  ;;  %v12496_v58 = vpop.f32.mrb[143].mxu0  ;;  %v12498_v51 = vpop.f32.mrb[146].mxu1 }
 0x7cb   : > { %v12500_v27 = vpop.f32.mrb[147].mxu1 }
 0x7cc   : > { %5173 = vrot.lane.b32.xlu0 %v5093_v17, %s9706_s18 }
 0x7ce   : > { %5175 = vrot.lane.b32.xlu1 %v5144_v20, %s9706_s18 }
 0x7cf   : > { %v5443_v31 = vpop.f32.mrb[144].mxu0 }
 0x7d0   : > { %5179 = vrot.lane.b32.xlu0 %v5097_v8, %s9706_s18  ;;  %v5445_v0 = vpop.f32.mrb[145].mxu0  ;;  %v12505_v11 = vpop.f32.mrb[148].mxu1 }
 0x7d1   : > { %v5447_v28 = vpop.f32.mrb[146].mxu0  ;;  %v12507_v16 = vpop.f32.mrb[149].mxu1 }
 0x7d2   : > { %5193 = vrot.lane.b32.xlu1 %v9411_v2, %s9706_s18  ;;  %v12510_v47 = vpop.f32.mrb[150].mxu1  ;;  %v5449_v24 = vpop.f32.mrb[147].mxu0 }
 0x7d3   : > { %v12512_v30 = vpop.f32.mrb[151].mxu1 }
 0x7d4   : > { %5329 = vrot.lane.b32.xlu0 %v5261_v40, %s9705_s17 }
 0x7d6   : > { %5181 = vrot.lane.b32.xlu1 %v5147_v42, %s9706_s18 }
 0x7d7   : > { %v12516_v35 = vpop.f32.mrb[148].mxu0 }
 0x7d8   : > { %5353 = vrot.lane.b32.xlu0 %v5261_v40, %s9707_s19  ;;  %v12519_v12 = vpop.f32.mrb[149].mxu0  ;;  %v12521_v5 = vpop.f32.mrb[152].mxu1 }
 0x7d9   : > { %15208 = vst [vmem:[#allocation8_spill] sm:$0xff] %v12521_v5  ;;  %v12523_v25 = vpop.f32.mrb[150].mxu0  ;;  %v12525_v3 = vpop.f32.mrb[153].mxu1 }
 0x7da   : > { %5177 = vrot.lane.b32.xlu1 %v5095_v49, %s9706_s18  ;;  %v12528_v20 = vpop.f32.mrb[151].mxu0  ;;  %v12530_v2 = vpop.f32.mrb[154].mxu1 }
 0x7db   : > { %15209 = vst [vmem:[#allocation7_spill] sm:$0xff] %v12530_v2  ;;  %v12532_v52 = vpop.f32.mrb[155].mxu1 }
 0x7dc   : > { %5355 = vrot.lane.b32.xlu0 %v5263_v57, %s9707_s19 }
 0x7de   : > { %5331 = vrot.lane.b32.xlu1 %v5265_v21, %s9705_s17 }
 0x7df   : > { %v12536_v42 = vpop.f32.mrb[152].mxu0 }
 0x7e0   : > { %5183 = vrot.lane.b32.xlu0 %v5101_v9, %s9706_s18  ;;  %v12539_v17 = vpop.f32.mrb[153].mxu0 }
 0x7e1   : > { %v12541_v40 = vpop.f32.mrb[154].mxu0 }
 0x7e2   : > { %5359 = vrot.lane.b32.xlu1 %v5265_v21, %s9707_s19  ;;  %v12544_v49 = vpop.f32.mrb[155].mxu0 }
 0x7e4   : > { %5185 = vrot.lane.b32.xlu0 %v5103_v34, %s9706_s18 }
 0x7e6   : > { %5189 = vrot.lane.b32.xlu1 %v5105_v14, %s9706_s18 }
 0x7e7   : > { %v12548_v8 = vpop.f32.mrb[156].mxu0 }
 0x7e8   : > { %5361 = vrot.lane.b32.xlu0 %v5267_v44, %s9707_s19  ;;  %v12551_v57 = vpop.f32.mrb[157].mxu0 }
 0x7e9   : > { %v12553_v6 = vpop.f32.mrb[158].mxu0 }
 0x7ea   : > { %5335 = vrot.lane.b32.xlu1 %v5275_v43, %s9705_s17  ;;  %v12556_v9 = vpop.f32.mrb[159].mxu0 }
 0x7ec   : > { %5191 = vrot.lane.b32.xlu0 %v5107_v45, %s9706_s18 }
 0x7ee   : > { %5371 = vrot.lane.b32.xlu1 %v5275_v43, %s9707_s19 }
 0x7ef   : > { %v12560_v21 = vpop.f32.mrb[160].mxu0 }
 0x7f0   : > { %5333 = vrot.lane.b32.xlu0 %v12475_v54, %s9705_s17  ;;  %v12564_v34 = vpop.f32.mrb[161].mxu0 }
 0x7f1   : > { %v12566_v44 = vpop.f32.mrb[162].mxu0 }
 0x7f2   : > { %15210 = vst [vmem:[#allocation41_spill] sm:$0xff] %v12566_v44  ;;  %5513 = vrot.lane.b32.xlu1 %v5447_v28, %s9705_s17  ;;  %v12569_v14 = vpop.f32.mrb[163].mxu0 }
 0x7f3   : > { %15211 = vst [vmem:[#allocation38_spill] sm:$0xff] %v12569_v14 }
 0x7f4   : > { %5365 = vrot.lane.b32.xlu0 %v12475_v54, %s9707_s19 }
 0x7f6   : > { %5541 = vrot.lane.b32.xlu1 %v5447_v28, %s9708_s20 }
 0x7f8   : > { %5367 = vrot.lane.b32.xlu0 %v12477_v59, %s9707_s19 }
 0x7fa   : > { %v12576_v45 = vpop.permute.xlu0 %4387  ;;  %5695 = vrot.lane.b32.xlu1 %v12510_v47, %s9705_s17 }
 0x7fb   : > { %15212 = vst [vmem:[#allocation16_spill] sm:$0xff] %v12576_v45 }
 0x7fc   : > { %v12580_v43 = vpop.permute.xlu1 %4390  ;;  %5373 = vrot.lane.b32.xlu0 %v12480_v29, %s9707_s19 }
 0x7fd   : > { %15213 = vst [vmem:[#allocation33_spill] sm:$0xff] %v12580_v43 }
 0x7fe   : > { %v12584_v15 = vpop.permute.xlu0 %4399  ;;  %5517 = vrot.lane.b32.xlu1 %v12523_v25, %s9705_s17 }
 0x7ff   : > { %15214 = vst [vmem:[#allocation39_spill] sm:$0xff] %v12584_v15 }
 0x800   : > { %v12588_v54 = vpop.permute.xlu1 %4401  ;;  %5511 = vrot.lane.b32.xlu0 %v5443_v31, %s9705_s17 }
 0x801   : > { %15215 = vst [vmem:[#allocation11_spill] sm:$0xff] %v12588_v54 }
 0x802   : > { %v12591_v59 = vpop.permute.xlu0 %4525  ;;  %5699 = vrot.lane.b32.xlu1 %v12530_v2, %s9705_s17 }
 0x804   : > { %v4529_v28 = vpop.permute.xlu1 %4528  ;;  %5535 = vrot.lane.b32.xlu0 %v5443_v31, %s9708_s20  ;;  %v12613_v31 = vsel %vm561_vm2, %v12580_v43, %v12420_v10  ;;  %v12630_v10 = vpop.f32.mrb[156].mxu1 }
 0x805   : > { %15217 = vst [vmem:[#allocation23_spill] sm:$0xff] %v12613_v31  ;;  %v4530_v22 = vsel %vm561_vm2, %v4529_v28, %v12442_v63 }
 0x806   : > { %v12596_v1 = vpop.permute.xlu0 %4537  ;;  %5877 = vrot.lane.b32.xlu1 %v12553_v6, %s9705_s17 }
 0x808   : > { %v12600_v29 = vpop.permute.xlu1 %4539  ;;  %5537 = vrot.lane.b32.xlu0 %v5445_v0, %s9708_s20 }
 0x80a   : > { %v12603_v33 = vpop.permute.xlu0 %4393  ;;  %5881 = vrot.lane.b32.xlu1 %v12566_v44, %s9705_s17  ;;  %v4554_v44 = vsel %vm561_vm2, %v12600_v29, %v4529_v28 }
 0x80c   : > { %v12607_v18 = vpop.permute.xlu1 %4396  ;;  %5543 = vrot.lane.b32.xlu0 %v5449_v24, %s9708_s20 }
 0x80d   : > { %15216 = vst [vmem:[#allocation42_spill] sm:$0xff] %v12607_v18  ;;  %v12648_v15 = vsel %vm561_vm2, %v12607_v18, %v12418_v36 }
 0x80e   : > { %v12615_v46 = vpop.permute.xlu0 %4403  ;;  %4409 = vrot.lane.b32.xlu1 %v12613_v31, %s9705_s17  ;;  %15221 = vst [vmem:[#allocation2_spill] sm:$0xff] %v12648_v15 }
 0x80f   : > { %15218 = vst [vmem:[#allocation53_spill] sm:$0xff] %v12615_v46 }
 0x810   : > { %v12619_v0 = vpop.permute.xlu1 %4405  ;;  %5693 = vrot.lane.b32.xlu0 %v12505_v11, %s9705_s17 }
 0x811   : > { %15219 = vst [vmem:[#allocation10_spill] sm:$0xff] %v12619_v0  ;;  %v12635_v0 = vpop.f32.mrb[157].mxu1 }
 0x812   : > { %v12625_v60 = vpop.permute.xlu0 %4531  ;;  %4547 = vrot.lane.b32.xlu1 %v4530_v22, %s9705_s17  ;;  %v12637_v54 = vpop.f32.mrb[158].mxu1 }
 0x813   : > { %15220 = vst [vmem:[#allocation3_spill] sm:$0xff] %v12637_v54  ;;  %v12643_v63 = vpop.f32.mrb[159].mxu1 }
 0x814   : > { %v4535_v24 = vpop.permute.xlu1 %4534  ;;  %5515 = vrot.lane.b32.xlu0 %v12516_v35, %s9705_s17 }
 0x815   : > { %v4536_v36 = vsel %vm561_vm2, %v4535_v24, %v12437_v38 }
 0x816   : > { %v12632_v46 = vpop.permute.xlu0 %4541  ;;  %4579 = vrot.lane.b32.xlu1 %v4530_v22, %s9711_s23 }
 0x818   : > { %v12639_v43 = vpop.permute.xlu1 %4543  ;;  %5719 = vrot.lane.b32.xlu0 %v12507_v16, %s9709_s21 }
 0x81a   : > { %v12650_v31 = vpop.permute.xlu0 %4731  ;;  %4413 = vrot.lane.b32.xlu1 %v12648_v15, %s9705_s17 }
 0x81c   : > { %v4735_v22 = vpop.permute.xlu1 %4734  ;;  %5549 = vrot.lane.b32.xlu0 %v12519_v12, %s9708_s20 }
 0x81e   : > { %v12658_v16 = vpop.permute.xlu0 %4743  ;;  %4581 = vrot.lane.b32.xlu1 %v4554_v44, %s9711_s23 }
 0x820   : > { %v12661_v2 = vpop.permute.xlu1 %4745  ;;  %5725 = vrot.lane.b32.xlu0 %v12512_v30, %s9709_s21  ;;  %v4556_v30 = vsel %vm561_vm2, %v12639_v43, %v4535_v24 }
 0x822   : > { %v12667_v15 = vpop.permute.xlu0 %4937  ;;  %4551 = vrot.lane.b32.xlu1 %v4536_v36, %s9705_s17 }
 0x824   : > { %v4941_v12 = vpop.permute.xlu1 %4940  ;;  %5555 = vrot.lane.b32.xlu0 %v12528_v20, %s9708_s20  ;;  %v4736_v20 = vsel %vm561_vm2, %v4735_v22, %v12446_v41  ;;  %v4760_v41 = vsel %vm561_vm2, %v12661_v2, %v4735_v22 }
 0x826   : > { %v12672_v28 = vpop.permute.xlu0 %4737  ;;  %4591 = vrot.lane.b32.xlu1 %v4536_v36, %s9711_s23 }
 0x828   : > { %v4741_v44 = vpop.permute.xlu1 %4740  ;;  %5697 = vrot.lane.b32.xlu0 %v12521_v5, %s9705_s17 }
 0x82a   : > { %v12679_v38 = vpop.permute.xlu0 %4949  ;;  %4593 = vrot.lane.b32.xlu1 %v4556_v30, %s9711_s23 }
 0x82c   : > { %v12682_v18 = vpop.permute.xlu1 %4951  ;;  %5875 = vrot.lane.b32.xlu0 %v12548_v8, %s9705_s17 }
 0x82e   : > { %v12688_v36 = vpop.permute.xlu0 %4747  ;;  %4753 = vrot.lane.b32.xlu1 %v4736_v20, %s9705_s17 }
 0x830   : > { %v12691_v5 = vpop.permute.xlu1 %4749  ;;  %5901 = vrot.lane.b32.xlu0 %v12551_v57, %s9710_s22  ;;  %v4942_v57 = vsel %vm561_vm2, %v4941_v12, %v12466_v4  ;;  %v4527_v4 = vsel %vm561_vm2, %v12591_v59, %v12433_v19  ;;  %v12748_v19 = vsel %vm561_vm2, %v12603_v33, %v12414_v32 }
 0x831   : > { %15227 = vst [vmem:[#allocation27_spill] sm:$0xff] %v12748_v19  ;;  %v4762_v32 = vsel %vm561_vm2, %v12691_v5, %v4741_v44 }
 0x832   : > { %v12695_v24 = vpop.permute.xlu0 %4943  ;;  %4785 = vrot.lane.b32.xlu1 %v4736_v20, %s9712_s24 }
 0x834   : > { %v12698_v30 = vpop.permute.xlu1 %4946  ;;  %5907 = vrot.lane.b32.xlu0 %v12556_v9, %s9710_s22  ;;  %v12719_v9 = vsel %vm561_vm2, %v12576_v45, %v12416_v62  ;;  %v4742_v62 = vsel %vm561_vm2, %v4741_v44, %v12444_v53 }
 0x836   : > { %v12704_v14 = vpop.permute.xlu0 %4953  ;;  %4787 = vrot.lane.b32.xlu1 %v4760_v41, %s9712_s24 }
 0x838   : > { %v12707_v54 = vpop.permute.xlu1 %4955  ;;  %5879 = vrot.lane.b32.xlu0 %v12560_v21, %s9705_s17 }
 0x83a   : > { %v12713_v20 = vpop.permute.xlu0 %5171  ;;  %4959 = vrot.lane.b32.xlu1 %v4942_v57, %s9705_s17 }
 0x83b   : > { %15222 = vst [vmem:[#allocation43_spill] sm:$0xff] %v12713_v20 }
 0x83c   : > { %v12721_v22 = vpop.permute.xlu1 %5187  ;;  %4407 = vrot.lane.b32.xlu0 %v12719_v9, %s9705_s17 }
 0x83d   : > { %15223 = vst [vmem:[#allocation57_spill] sm:$0xff] %v12721_v22 }
 0x83e   : > { %v12725_v41 = vpop.permute.xlu0 %5173  ;;  %4997 = vrot.lane.b32.xlu1 %v4942_v57, %s9713_s25  ;;  %v4966_v57 = vsel %vm561_vm2, %v12682_v18, %v4941_v12  ;;  %v4553_v12 = vsel %vm561_vm2, %v12596_v1, %v12591_v59 }
 0x83f   : > { %15224 = vst [vmem:[#allocation12_spill] sm:$0xff] %v12725_v41 }
 0x840   : > { %v12731_v20 = vpop.permute.xlu1 %5175  ;;  %4545 = vrot.lane.b32.xlu0 %v4527_v4, %s9705_s17 }
 0x842   : > { %v12736_v45 = vpop.permute.xlu0 %5179  ;;  %4757 = vrot.lane.b32.xlu1 %v4742_v62, %s9705_s17 }
 0x843   : > { %15225 = vst [vmem:[#allocation9_spill] sm:$0xff] %v12736_v45 }
 0x844   : > { %v12739_v22 = vpop.permute.xlu1 %5193  ;;  %4573 = vrot.lane.b32.xlu0 %v4527_v4, %s9711_s23 }
 0x845   : > { %15226 = vst [vmem:[#allocation5_spill] sm:$0xff] %v12739_v22 }
 0x846   : > { %v5330_v41 = vpop.permute.xlu0 %5329  ;;  %4999 = vrot.lane.b32.xlu1 %v4966_v57, %s9713_s25 }
 0x848   : > { %v12750_v53 = vpop.permute.xlu1 %5181  ;;  %4411 = vrot.lane.b32.xlu0 %v12748_v19, %s9705_s17  ;;  %v4533_v19 = vsel %vm561_vm2, %v12625_v60, %v12430_v23  ;;  %v4555_v23 = vsel %vm561_vm2, %v12632_v46, %v12625_v60  ;;  %v4948_v60 = vsel %vm561_vm2, %v12698_v30, %v12463_v55  ;;  %v4968_v55 = vsel %vm561_vm2, %v12707_v54, %v12698_v30 }
 0x84a   : > { %v12754_v45 = vpop.permute.xlu0 %5353  ;;  %4797 = vrot.lane.b32.xlu1 %v4742_v62, %s9712_s24 }
 0x84c   : > { %v12760_v4 = vpop.permute.xlu1 %5177  ;;  %4575 = vrot.lane.b32.xlu0 %v4553_v12, %s9711_s23 }
 0x84e   : > { %v12765_v57 = vpop.permute.xlu0 %5355  ;;  %4799 = vrot.lane.b32.xlu1 %v4762_v32, %s9712_s24 }
 0x850   : > { %v5332_v62 = vpop.permute.xlu1 %5331  ;;  %4549 = vrot.lane.b32.xlu0 %v4533_v19, %s9705_s17 }
 0x852   : > { %v12772_v22 = vpop.permute.xlu0 %5183  ;;  %5723 = vrot.lane.b32.xlu1 %v12510_v47, %s9709_s21  ;;  %v4733_v47 = vsel %vm561_vm2, %v12650_v31, %v12439_v48  ;;  %v4759_v48 = vsel %vm561_vm2, %v12658_v16, %v12650_v31  ;;  %v5337_v31 = vsel %vm561_vm2, %v5330_v41, %v12487_v13 }
 0x854   : > { %v12776_v59 = vpop.permute.xlu1 %5359  ;;  %4585 = vrot.lane.b32.xlu0 %v4533_v19, %s9711_s23 }
 0x856   : > { %v12779_v44 = vpop.permute.xlu0 %5185  ;;  %5553 = vrot.lane.b32.xlu1 %v12523_v25, %s9708_s20 }
 0x858   : > { %v12786_v12 = vpop.permute.xlu1 %5189  ;;  %4587 = vrot.lane.b32.xlu0 %v4555_v23, %s9711_s23 }
 0x859   : > { %15228 = vst [vmem:[#allocation60_spill] sm:$0xff] %v12786_v12 }
 0x85a   : > { %v12789_v32 = vpop.permute.xlu0 %5361  ;;  %5905 = vrot.lane.b32.xlu1 %v12553_v6, %s9710_s22 }
 0x85c   : > { %v5336_v19 = vpop.permute.xlu1 %5335  ;;  %4751 = vrot.lane.b32.xlu0 %v4733_v47, %s9705_s17 }
 0x85e   : > { %v12800_v25 = vpop.permute.xlu0 %5191  ;;  %4963 = vrot.lane.b32.xlu1 %v4948_v60, %s9705_s17 }
 0x85f   : > { %15229 = vst [vmem:[#allocation14_spill] sm:$0xff] %v12800_v25 }
 0x860   : > { %v12803_v23 = vpop.permute.xlu1 %5371  ;;  %4779 = vrot.lane.b32.xlu0 %v4733_v47, %s9712_s24  ;;  %v4939_v47 = vsel %vm561_vm2, %v12667_v15, %v12461_v37  ;;  %v4739_v37 = vsel %vm561_vm2, %v12672_v28, %v12435_v50 }
 0x861   : > { %15230 = vst [vmem:[#allocation55_spill] sm:$0xff] %v12803_v23 }
 0x862   : > { %v5334_v6 = vpop.permute.xlu0 %5333  ;;  %5013 = vrot.lane.b32.xlu1 %v4948_v60, %s9713_s25 }
 0x863   : > { %v5339_v13 = vsel %vm561_vm2, %v5334_v6, %v12484_v7 }
 0x864   : > { %v5514_v12 = vpop.permute.xlu1 %5513  ;;  %4781 = vrot.lane.b32.xlu0 %v4759_v48, %s9712_s24 }
 0x866   : > { %v12814_v25 = vpop.permute.xlu0 %5365  ;;  %5015 = vrot.lane.b32.xlu1 %v4968_v55, %s9713_s25  ;;  %v5338_v55 = vsel %vm561_vm2, %v5332_v62, %v12496_v58  ;;  %v4965_v58 = vsel %vm561_vm2, %v12679_v38, %v12667_v15  ;;  %v4761_v15 = vsel %vm561_vm2, %v12688_v36, %v12672_v28 }
 0x867   : > { %15231 = vst [vmem:[#allocation59_spill] sm:$0xff] %v12814_v25 }
 0x868   : > { %v12820_v60 = vpop.permute.xlu1 %5541  ;;  %4957 = vrot.lane.b32.xlu0 %v4939_v47, %s9705_s17 }
 0x86a   : > { %v12825_v48 = vpop.permute.xlu0 %5367  ;;  %5357 = vrot.lane.b32.xlu1 %v5337_v31, %s9707_s19 }
 0x86b   : > { %15232 = vst [vmem:[#allocation35_spill] sm:$0xff] %v12825_v48 }
 0x86c   : > { %v5696_v30 = vpop.permute.xlu1 %5695  ;;  %4989 = vrot.lane.b32.xlu0 %v4939_v47, %s9713_s25  ;;  %v5340_v47 = vsel %vm561_vm2, %v5336_v19, %v12491_v56  ;;  %v5520_v19 = vsel %vm561_vm2, %v5514_v12, %v12500_v27 }
 0x86e   : > { %v12831_v25 = vpop.permute.xlu0 %5373  ;;  %5363 = vrot.lane.b32.xlu1 %v5338_v55, %s9707_s19 }
 0x86f   : > { %15233 = vst [vmem:[#allocation29_spill] sm:$0xff] %v12831_v25 }
 0x870   : > { %v5518_v23 = vpop.permute.xlu1 %5517  ;;  %4755 = vrot.lane.b32.xlu0 %v4739_v37, %s9705_s17 }
 0x872   : > { %v5512_v41 = vpop.permute.xlu0 %5511  ;;  %5369 = vrot.lane.b32.xlu1 %v5339_v13, %s9707_s19 }
 0x873   : > { %v5519_v7 = vsel %vm561_vm2, %v5512_v41, %v12493_v26  ;;  %v4945_v26 = vsel %vm561_vm2, %v12695_v24, %v12458_v61 }
 0x874   : > { %v5700_v62 = vpop.permute.xlu1 %5699  ;;  %4991 = vrot.lane.b32.xlu0 %v4965_v58, %s9713_s25 }
 0x876   : > { %v12847_v50 = vpop.permute.xlu0 %5535  ;;  %5375 = vrot.lane.b32.xlu1 %v5340_v47, %s9707_s19 }
 0x878   : > { %v5878_v31 = vpop.permute.xlu1 %5877  ;;  %4791 = vrot.lane.b32.xlu0 %v4739_v37, %s9712_s24 }
 0x87a   : > { %v12853_v6 = vpop.permute.xlu0 %5537  ;;  %5539 = vrot.lane.b32.xlu1 %v5519_v7, %s9708_s20 }
 0x87c   : > { %4793 = vrot.lane.b32.xlu0 %v4761_v15, %s9712_s24  ;;  %v12860_v56 = vpop.permute.xlu1 %5881 }
 0x87e   : > { %v12864_v55 = vpop.permute.xlu0 %5543  ;;  %5545 = vrot.lane.b32.xlu1 %v5520_v19, %s9708_s20  ;;  %v5704_v19 = vsel %vm561_vm2, %v5700_v62, %v12541_v40 }
 0x880   : > { %4961 = vrot.lane.b32.xlu0 %v4945_v26, %s9705_s17  ;;  %v12871_v37 = vpop.permute.xlu1 %4409 }
 0x882   : > { %v5694_v28 = vpop.permute.xlu0 %5693 }
 0x883   : > { %v5701_v13 = vsel %vm561_vm2, %v5694_v28, %v12539_v17  ;;  %v5702_v17 = vsel %vm561_vm2, %v5696_v30, %v12544_v49 }
 0x884   : > { %5717 = vrot.lane.b32.xlu0 %v12505_v11, %s9709_s21  ;;  %5721 = vrot.lane.b32.xlu1 %v5701_v13, %s9709_s21  ;;  %v4548_v27 = vpop.permute.xlu1 %4547 }
 0x886   : > { %v5516_v12 = vpop.permute.xlu0 %5515 }
 0x887   : > { %v5521_v41 = vsel %vm561_vm2, %v5516_v12, %v12489_v39  ;;  %v5884_v12 = vsel %vm561_vm2, %v5878_v31, %v12643_v63 }
 0x888   : > { %5731 = vrot.lane.b32.xlu0 %v12525_v3, %s9709_s21  ;;  %5551 = vrot.lane.b32.xlu1 %v5521_v41, %s9708_s20  ;;  %v12883_v61 = vpop.permute.xlu1 %4579  ;;  %v5522_v3 = vsel %vm561_vm2, %v5518_v23, %v12498_v51  ;;  %v4967_v23 = vsel %vm561_vm2, %v12704_v14, %v12695_v24  ;;  %v4558_v41 = vsel %vm561_vm2, %v4548_v27, %v12600_v29 }
 0x88a   : > { %v12885_v58 = vpop.permute.xlu0 %5719 }
 0x88c   : > { %5737 = vrot.lane.b32.xlu0 %v12532_v52, %s9709_s21  ;;  %5727 = vrot.lane.b32.xlu1 %v5702_v17, %s9709_s21  ;;  %v12892_v11 = vpop.permute.xlu1 %4413 }
 0x88e   : > { %v12894_v39 = vpop.permute.xlu0 %5549 }
 0x88f   : > { %15234 = vst [vmem:[#allocation17_spill] sm:$0xff] %v12894_v39 }
 0x890   : > { %5547 = vrot.lane.b32.xlu0 %v12516_v35, %s9708_s20  ;;  %5557 = vrot.lane.b32.xlu1 %v5522_v3, %s9708_s20  ;;  %v12901_v47 = vpop.permute.xlu1 %4581 }
 0x892   : > { %v12903_v49 = vpop.permute.xlu0 %5725 }
 0x894   : > { %5899 = vrot.lane.b32.xlu0 %v12548_v8, %s9710_s22  ;;  %v4552_v52 = vpop.permute.xlu1 %4551 }
 0x895   : > { %v4560_v3 = vsel %vm561_vm2, %v4552_v52, %v12639_v43 }
 0x896   : > { %v12907_v30 = vpop.permute.xlu0 %5555 }
 0x897   : > { %15235 = vst [vmem:[#allocation37_spill] sm:$0xff] %v12907_v30 }
 0x898   : > { %5005 = vrot.lane.b32.xlu0 %v4945_v26, %s9713_s25  ;;  %v12910_v7 = vpop.permute.xlu1 %4591 }
 0x89a   : > { %v5698_v51 = vpop.permute.xlu0 %5697 }
 0x89b   : > { %v5703_v35 = vsel %vm561_vm2, %v5698_v51, %v12536_v42 }
 0x89c   : > { %5007 = vrot.lane.b32.xlu0 %v4967_v23, %s9713_s25  ;;  %5733 = vrot.lane.b32.xlu1 %v5703_v35, %s9709_s21  ;;  %v12919_v8 = vpop.permute.xlu1 %4593 }
 0x89e   : > { %v5876_v15 = vpop.permute.xlu0 %5875 }
 0x89f   : > { %v5883_v42 = vsel %vm561_vm2, %v5876_v15, %v12635_v0 }
 0x8a0   : > { %5739 = vrot.lane.b32.xlu1 %v5704_v19, %s9709_s21  ;;  %v4754_v26 = vpop.permute.xlu1 %4753 }
 0x8a1   : > { %v4764_v51 = vsel %vm561_vm2, %v4754_v26, %v12661_v2 }
 0x8a2   : > { %v12924_v28 = vpop.permute.xlu0 %5901 }
 0x8a3   : > { %15236 = vst [vmem:[#allocation24_spill] sm:$0xff] %v12924_v28  ;;  %v15269_v28 = vld [vmem:[#allocation42_spill] sm:$0xff] }
 0x8a4   : > { %5903 = vrot.lane.b32.xlu1 %v5883_v42, %s9710_s22  ;;  %v12929_v24 = vpop.permute.xlu1 %4785 }
 0x8a6   : > { %v12931_v13 = vpop.permute.xlu0 %5907 }
 0x8a8   : > { %5909 = vrot.lane.b32.xlu1 %v5884_v12, %s9710_s22  ;;  %v12936_v40 = vpop.permute.xlu1 %4787 }
 0x8aa   : > { %v12938_v62 = vpop.permute.xlu0 %5879 }
 0x8ac   : > { %4583 = vrot.lane.b32.xlu1 %v4558_v41, %s9711_s23  ;;  %v4960_v0 = vpop.permute.xlu1 %4959 }
 0x8ae   : > { %v12943_v17 = vpop.permute.xlu0 %4407 }
 0x8b0   : > { %4595 = vrot.lane.b32.xlu1 %v4560_v3, %s9711_s23  ;;  %v12948_v63 = vpop.permute.xlu1 %4997 }
 0x8b2   : > { %v4546_v31 = vpop.permute.xlu0 %4545 }
 0x8b3   : > { %v4557_v35 = vsel %vm561_vm2, %v4546_v31, %v12596_v1 }
 0x8b4   : > { %4577 = vrot.lane.b32.xlu0 %v4557_v35, %s9711_s23  ;;  %4789 = vrot.lane.b32.xlu1 %v4764_v51, %s9712_s24  ;;  %v4758_v29 = vpop.permute.xlu1 %4757 }
 0x8b6   : > { %v12956_v27 = vpop.permute.xlu0 %4573 }
 0x8b8   : > { %v12958_v23 = vpop.permute.xlu1 %4999 }
 0x8ba   : > { %v12960_v43 = vpop.permute.xlu0 %4411 }
 0x8bc   : > { %v12962_v52 = vpop.permute.xlu1 %4797 }
 0x8be   : > { %v12964_v15 = vpop.permute.xlu0 %4575 }
 0x8c0   : > { %v12966_v2 = vpop.permute.xlu1 %4799 }
 0x8c2   : > { %v4550_v19 = vpop.permute.xlu0 %4549 }
 0x8c3   : > { %v4559_v1 = vsel %vm561_vm2, %v4550_v19, %v12632_v46 }
 0x8c4   : > { %4589 = vrot.lane.b32.xlu0 %v4559_v1, %s9711_s23  ;;  %v12973_v42 = vpop.permute.xlu1 %5723 }
 0x8c6   : > { %v12971_v26 = vpop.permute.xlu0 %4585 }
 0x8c8   : > { %v12977_v3 = vpop.permute.xlu1 %5553 }
 0x8c9   : > { %15237 = vst [vmem:[#allocation56_spill] sm:$0xff] %v12977_v3 }
 0x8ca   : > { %v12975_v12 = vpop.permute.xlu0 %4587 }
 0x8cc   : > { %v12984_v35 = vpop.permute.xlu1 %5905 }
 0x8ce   : > { %v4752_v41 = vpop.permute.xlu0 %4751 }
 0x8cf   : > { %v4763_v31 = vsel %vm561_vm2, %v4752_v41, %v12658_v16  ;;  %v4766_v41 = vsel %vm561_vm2, %v4758_v29, %v12691_v5 }
 0x8d0   : > { %4783 = vrot.lane.b32.xlu0 %v4763_v31, %s9712_s24  ;;  %v4964_v1 = vpop.permute.xlu1 %4963 }
 0x8d2   : > { %v12982_v51 = vpop.permute.xlu0 %4779 }
 0x8d4   : > { %v12995_v16 = vpop.permute.xlu1 %5013 }
 0x8d6   : > { %v12986_v46 = vpop.permute.xlu0 %4781 }
 0x8da   : > { %v4958_v19 = vpop.permute.xlu0 %4957 }
 0x8db   : > { %4995 = vrot.lane.b32.xlu1 %v4958_v19, %s9713_s25  ;;  %v4969_v30 = vsel %vm561_vm2, %v4958_v19, %v12679_v38  ;;  %v4970_v19 = vsel %vm561_vm2, %v4960_v0, %v12682_v18  ;;  %v4972_v18 = vsel %vm561_vm2, %v4964_v1, %v12707_v54  ;;  %v15244_v54 = vld [vmem:[#allocation38_spill] sm:$0xff] }
 0x8dc   : > { %4993 = vrot.lane.b32.xlu0 %v4969_v30, %s9713_s25  ;;  %v13005_v30 = vpop.permute.xlu1 %5015 }
 0x8de   : > { %v12992_v3 = vpop.permute.xlu0 %4989 }
 0x8df   : > { %5003 = vrot.lane.b32.xlu1 %v4960_v0, %s9713_s25 }
 0x8e0   : > { %v13012_v5 = vpop.permute.xlu1 %5357 }
 0x8e2   : > { %v4756_v31 = vpop.permute.xlu0 %4755 }
 0x8e3   : > { %v4765_v39 = vsel %vm561_vm2, %v4756_v31, %v12688_v36  ;;  %4801 = vrot.lane.b32.xlu1 %v4766_v41, %s9712_s24  ;;  %v5885_v41 = vsel %vm561_vm2, %v12938_v62, %v12630_v10  ;;  %v15246_v10 = vld [vmem:[#allocation8_spill] sm:$0xff] }
 0x8e4   : > { %4795 = vrot.lane.b32.xlu0 %v4765_v39, %s9712_s24  ;;  %v13016_v31 = vpop.permute.xlu1 %5363 }
 0x8e5   : > { %15240 = vst [vmem:[#allocation25_spill] sm:$0xff] %v13016_v31  ;;  %v15268_v31 = vld [vmem:[#allocation53_spill] sm:$0xff] }
 0x8e6   : > { %v13003_v38 = vpop.permute.xlu0 %4991 }
 0x8e8   : > { %5001 = vrot.lane.b32.xlu0 %v4970_v19, %s9713_s25  ;;  %v13026_v0 = vpop.permute.xlu1 %5369 }
 0x8e9   : > { %15241 = vst [vmem:[#allocation20_spill] sm:$0xff] %v13026_v0 }
 0x8ea   : > { %v13010_v25 = vpop.permute.xlu0 %4791 }
 0x8eb   : > { %15238 = vst [vmem:[#allocation15_spill] sm:$0xff] %v13010_v25 }
 0x8ee   : > { %v13014_v29 = vpop.permute.xlu0 %4793 }
 0x8ef   : > { %15239 = vst [vmem:[#allocation6_spill] sm:$0xff] %v13014_v29 }
 0x8f2   : > { %v4962_v36 = vpop.permute.xlu0 %4961 }
 0x8f3   : > { %5011 = vrot.lane.b32.xlu1 %v4962_v36, %s9713_s25  ;;  %v4971_v39 = vsel %vm561_vm2, %v4962_v36, %v12704_v14  ;;  %v15242_v14 = vld [vmem:[#allocation3_spill] sm:$0xff]  ;;  %v13037_v36 = vpop.permute.xlu1 %5375 }
 0x8f4   : > { %5009 = vrot.lane.b32.xlu0 %v4971_v39, %s9713_s25  ;;  %v5886_v19 = vsel %vm561_vm2, %v12860_v56, %v15242_v14  ;;  %15243 = vst [vmem:[#allocation34_spill] sm:$0xff] %v13037_v36 }
 0x8f7   : > { %5019 = vrot.lane.b32.xlu1 %v4964_v1, %s9713_s25  ;;  %v15245_v1 = vld [vmem:[#allocation7_spill] sm:$0xff]  ;;  %v13046_v62 = vpop.permute.xlu1 %5539 }
 0x8f8   : > { %5017 = vrot.lane.b32.xlu0 %v4972_v18, %s9713_s25 }
 0x8fb   : > { %5915 = vrot.lane.b32.xlu1 %v5885_v41, %s9710_s22  ;;  %v13052_v56 = vpop.permute.xlu1 %5545  ;;  %v13058_v41 = vpop.permute.xlu0 %5717 }
 0x8fc   : > { %5913 = vrot.lane.b32.xlu0 %v12564_v34, %s9710_s22  ;;  %v15247_v34 = vld [vmem:[#allocation41_spill] sm:$0xff]  ;;  %15248 = vst [vmem:[#allocation52_spill] sm:$0xff] %v13052_v56 }
 0x8ff   : > { %5921 = vrot.lane.b32.xlu1 %v5886_v19, %s9710_s22  ;;  %v13054_v39 = vpop.permute.xlu1 %5721  ;;  %v13062_v19 = vpop.permute.xlu0 %5731 }
 0x900   : > { %5919 = vrot.lane.b32.xlu0 %v15244_v54, %s9710_s22  ;;  %15251 = vst [vmem:[#allocation30_spill] sm:$0xff] %v13062_v19 }
 0x903   : > { %5735 = vrot.lane.b32.xlu1 %v15245_v1, %s9709_s21  ;;  %v13056_v18 = vpop.permute.xlu1 %5551  ;;  %v13066_v1 = vpop.permute.xlu0 %5737 }
 0x904   : > { %5729 = vrot.lane.b32.xlu0 %v15246_v10, %s9709_s21  ;;  %15249 = vst [vmem:[#allocation50_spill] sm:$0xff] %v13056_v18  ;;  %15253 = vst [vmem:[#allocation19_spill] sm:$0xff] %v13066_v1  ;;  %v4599_v1 = vsel %vm788_vm3, %v12883_v61, %v12901_v47  ;;  %v4803_v61 = vsel %vm1011_vm4, %v12982_v51, %v12986_v46 }
 0x907   : > { %5917 = vrot.lane.b32.xlu1 %v15247_v34, %s9710_s22  ;;  %v13060_v14 = vpop.permute.xlu1 %5727  ;;  %v13070_v34 = vpop.permute.xlu0 %5547 }
 0x908   : > { %5911 = vrot.lane.b32.xlu0 %v12560_v21, %s9710_s22  ;;  %15250 = vst [vmem:[#allocation36_spill] sm:$0xff] %v13060_v14  ;;  %15255 = vst [vmem:[#allocation48_spill] sm:$0xff] %v13070_v34  ;;  %v4805_v34 = vsel %vm1011_vm4, %v12929_v24, %v12936_v40 }
 0x90b   : > { %v13064_v54 = vpop.permute.xlu1 %5557  ;;  %v13074_v36 = vpop.permute.xlu0 %5899 }
 0x90c   : > { %15252 = vst [vmem:[#allocation26_spill] sm:$0xff] %v13064_v54 }
 0x90f   : > { %v13068_v10 = vpop.permute.xlu1 %5733  ;;  %v13078_v18 = vpop.permute.xlu0 %5005 }
 0x910   : > { %15254 = vst [vmem:[#allocation46_spill] sm:$0xff] %v13068_v10  ;;  %15258 = vst [vmem:[#allocation4_spill] sm:$0xff] %v13078_v18  ;;  %v15262_v10 = vld [vmem:[#allocation23_spill] sm:$0xff] }
 0x911   : > { %v4620_v0 = vadd.f32 %v4599_v1, %v15262_v10  ;;  %v5021_v1 = vsel %vm1246_vm5, %v12992_v3, %v13003_v38 }
 0x913   : > { %v13072_v21 = vpop.permute.xlu1 %5739  ;;  %v13082_v14 = vpop.permute.xlu0 %5007 }
 0x914   : > { %15256 = vst [vmem:[#allocation28_spill] sm:$0xff] %v13072_v21  ;;  %15260 = vst [vmem:[#allocation47_spill] sm:$0xff] %v13082_v14  ;;  %v5024_v14 = vsel %vm1246_vm5, %v12948_v63, %v12958_v23  ;;  %v15264_v63 = vld [vmem:[#allocation16_spill] sm:$0xff] }
 0x917   : > { %v13076_v56 = vpop.permute.xlu1 %5903 }
 0x918   : > { %15257 = vst [vmem:[#allocation45_spill] sm:$0xff] %v13076_v56  ;;  %v4826_v56 = vadd.f32 %v4805_v34, %v4620_v0  ;;  %v15265_v0 = vld [vmem:[#allocation39_spill] sm:$0xff] }
 0x919   : > { %v4415_v34 = vsel %vm561_vm2, %v15265_v0, %v15264_v63  ;;  %v13129_v63 = vsel %vm561_vm2, %v15268_v31, %v12603_v33 }
 0x91b   : > { %v13080_v48 = vpop.permute.xlu1 %5909 }
 0x91c   : > { %15259 = vst [vmem:[#allocation51_spill] sm:$0xff] %v13080_v48  ;;  %v4597_v48 = vsel %vm788_vm3, %v12956_v27, %v12964_v15 }
 0x91d   : > { %v4617_v24 = vadd.f32 %v4597_v48, %v12719_v9  ;;  %v4419_v9 = vsel %vm561_vm2, %v12943_v17, %v15265_v0  ;;  %v15270_v17 = vld [vmem:[#allocation10_spill] sm:$0xff] }
 0x91f   : > { %v13084_v19 = vpop.permute.xlu1 %4583  ;;  %v4823_v27 = vadd.f32 %v4803_v61, %v4617_v24  ;;  %v15266_v61 = vld [vmem:[#allocation33_spill] sm:$0xff] }
 0x921   : > { %v5045_v48 = vadd.f32 %v5021_v1, %v4823_v27  ;;  %v13134_v1 = vsel %vm561_vm2, %v15270_v17, %v15269_v28 }
 0x923   : > { %v13092_v21 = vpop.permute.xlu1 %4595 }
 0x924   : > { %15261 = vst [vmem:[#allocation49_spill] sm:$0xff] %v13092_v21  ;;  %v5048_v21 = vadd.f32 %v5024_v14, %v4826_v56 }
 0x926   : > { %v4578_v54 = vpop.permute.xlu0 %4577  ;;  %v5218_v3 = vadd.f32 %v12760_v4, %v5048_v21 }
 0x927   : > { %v13112_v25 = vpop.permute.xlu1 %4789  ;;  %v4619_v14 = vadd.f32 %v4578_v54, %v4419_v9 }
 0x928   : > { %v5400_v28 = vadd.f32 %v12776_v59, %v5218_v3 }
 0x936   : > { %v13098_v18 = vpop.permute.xlu0 %4589 }
 0x937   : > { %15263 = vst [vmem:[#allocation58_spill] sm:$0xff] %v13098_v18  ;;  %v4598_v18 = vsel %vm788_vm3, %v12964_v15, %v4578_v54  ;;  %v15267_v15 = vld [vmem:[#allocation11_spill] sm:$0xff] }
 0x938   : > { %v4618_v56 = vadd.f32 %v4598_v18, %v4415_v34  ;;  %v4416_v24 = vsel %vm561_vm2, %v15267_v15, %v15266_v61  ;;  %v15271_v18 = vld [vmem:[#allocation12_spill] sm:$0xff]  ;;  %v15272_v54 = vld [vmem:[#allocation43_spill] sm:$0xff] }
 0x939   : > { %v5195_v0 = vsel %vm1437_vm6, %v15272_v54, %v15271_v18  ;;  %v5215_v34 = vadd.f32 %v15272_v54, %v5045_v48  ;;  %v5196_v61 = vsel %vm1437_vm6, %v15271_v18, %v12731_v20  ;;  %v13159_v20 = vsel %vm1437_vm6, %v12772_v22, %v12779_v44  ;;  %v15277_v54 = vld [vmem:[#allocation5_spill] sm:$0xff] }
 0x942   : > { %v4784_v10 = vpop.permute.xlu0 %4783 }
 0x943   : > { %v4804_v51 = vsel %vm1011_vm4, %v12986_v46, %v4784_v10  ;;  %v4825_v27 = vadd.f32 %v4784_v10, %v4619_v14 }
 0x944   : > { %v4824_v46 = vadd.f32 %v4804_v51, %v4618_v56  ;;  %v15273_v56 = vld [vmem:[#allocation9_spill] sm:$0xff] }
 0x945   : > { %v5198_v14 = vsel %vm1437_vm6, %v15273_v56, %v12750_v53  ;;  %v5197_v48 = vsel %vm1437_vm6, %v12760_v4, %v15273_v56  ;;  %v5379_v53 = vsel %vm1636_vm7, %v12776_v59, %v12789_v32  ;;  %v5559_v59 = vsel %vm1835_vm8, %v12847_v50, %v12853_v6 }
 0x94d   : > { %v4996_v29 = vpop.permute.xlu1 %4995 }
 0x94e   : > { %v4994_v21 = vpop.permute.xlu0 %4993 }
 0x94f   : > { %v5022_v9 = vsel %vm1246_vm5, %v13003_v38, %v4994_v21  ;;  %v5023_v33 = vsel %vm1246_vm5, %v4994_v21, %v4996_v29  ;;  %v5377_v38 = vsel %vm1636_vm7, %v12754_v45, %v12765_v57  ;;  %v15274_v29 = vld [vmem:[#allocation57_spill] sm:$0xff]  ;;  %v15276_v21 = vld [vmem:[#allocation60_spill] sm:$0xff] }
 0x950   : > { %v5046_v51 = vadd.f32 %v5022_v9, %v4824_v46  ;;  %v5047_v10 = vadd.f32 %v5023_v33, %v4825_v27  ;;  %v13164_v3 = vsel %vm1437_vm6, %v12779_v44, %v15274_v29  ;;  %v15275_v27 = vld [vmem:[#allocation14_spill] sm:$0xff]  ;;  %v4603_v44 = vsel %vm788_vm3, %v12910_v7, %v12919_v8 }
 0x951   : > { %v13172_v18 = vsel %vm1437_vm6, %v15276_v21, %v15275_v27  ;;  %v13177_v9 = vsel %vm1437_vm6, %v15275_v27, %v15277_v54  ;;  %v5397_v33 = vadd.f32 %v12754_v45, %v5215_v34  ;;  %v4420_v7 = vsel %vm561_vm2, %v12871_v37, %v15267_v15 }
 0x952   : > { %v5216_v46 = vadd.f32 %v5195_v0, %v5046_v51  ;;  %v5217_v4 = vadd.f32 %v5196_v61, %v5047_v10  ;;  %v5582_v0 = vadd.f32 %v12820_v60, %v5400_v28  ;;  %v5378_v61 = vsel %vm1636_vm7, %v12765_v57, %v13012_v5  ;;  %v15278_v57 = vld [vmem:[#allocation2_spill] sm:$0xff] }
 0x953   : > { %v5561_v10 = vsel %vm1835_vm8, %v12820_v60, %v12864_v55  ;;  %v4600_v45 = vsel %vm788_vm3, %v12901_v47, %v13084_v19  ;;  %v13202_v28 = vsel %vm561_vm2, %v12892_v11, %v15270_v17  ;;  %v4626_v5 = vadd.f32 %v4603_v44, %v15278_v57  ;;  %v15281_v57 = vld [vmem:[#allocation24_spill] sm:$0xff] }
 0x954   : > { %v5398_v51 = vadd.f32 %v5377_v38, %v5216_v46  ;;  %v5399_v34 = vadd.f32 %v5378_v61, %v5217_v4  ;;  %v4809_v60 = vsel %vm1011_vm4, %v12962_v52, %v12966_v2  ;;  %v5764_v56 = vadd.f32 %v12973_v42, %v5582_v0 }
 0x955   : > { %v4421_v37 = vsel %vm561_vm2, %v12960_v43, %v15268_v31  ;;  %v5579_v47 = vadd.f32 %v12847_v50, %v5397_v33  ;;  %v4806_v11 = vsel %vm1011_vm4, %v12936_v40, %v13112_v25  ;;  %v5560_v52 = vsel %vm1835_vm8, %v12853_v6, %v13046_v62 }
 0x956   : > { %v13209_v38 = vpop.permute.xlu0 %4795  ;;  %v5580_v15 = vadd.f32 %v5559_v59, %v5398_v51  ;;  %v5946_v17 = vadd.f32 %v12984_v35, %v5764_v56  ;;  %v4621_v29 = vadd.f32 %v4600_v45, %v4416_v24  ;;  %v4622_v46 = vadd.f32 %v13084_v19, %v4420_v7  ;;  %v5004_v19 = vpop.permute.xlu1 %5003  ;;  %v15279_v59 = vld [vmem:[#allocation13_spill] sm:$0xff]  ;;  %v15280_v51 = vld [vmem:[#allocation27_spill] sm:$0xff] }
 0x957   : > { %v4832_v4 = vadd.f32 %v4809_v60, %v4626_v5  ;;  %v4601_v43 = vsel %vm788_vm3, %v12971_v26, %v12975_v12  ;;  %v5761_v50 = vadd.f32 %v13058_v41, %v5579_v47  ;;  %v5581_v31 = vadd.f32 %v5560_v52, %v5399_v34  ;;  %v15283_v47 = vld [vmem:[#allocation6_spill] sm:$0xff] }
 0x958   : > { %v5030_v40 = vsel %vm1246_vm5, %v12995_v16, %v13005_v30  ;;  %v5741_v27 = vsel %vm2034_vm9, %v13058_v41, %v12885_v58  ;;  %v4827_v6 = vadd.f32 %v4806_v11, %v4621_v29  ;;  %v4828_v62 = vadd.f32 %v13112_v25, %v4622_v46  ;;  %v15286_v29 = vld [vmem:[#allocation45_spill] sm:$0xff] }
 0x959   : > { %v5943_v54 = vadd.f32 %v13074_v36, %v5761_v50  ;;  %v5762_v44 = vadd.f32 %v5741_v27, %v5580_v15  ;;  %v13239_v0 = vadd.f32 %v5946_v17, %v15279_v59  ;;  %v5742_v16 = vsel %vm2034_vm9, %v12885_v58, %v13054_v39  ;;  %v15282_v39 = vld [vmem:[#allocation25_spill] sm:$0xff]  ;;  %v15289_v50 = vld [vmem:[#allocation52_spill] sm:$0xff] }
 0x95a   : > { %v5002_v24 = vpop.permute.xlu0 %5001  ;;  %v5743_v25 = vsel %vm2034_vm9, %v12973_v42, %v12903_v49  ;;  %v4623_v7 = vadd.f32 %v4601_v43, %v15280_v51  ;;  %v5054_v45 = vadd.f32 %v5030_v40, %v4832_v4  ;;  %v5763_v34 = vadd.f32 %v5742_v16, %v5581_v31  ;;  %v15284_v42 = vld [vmem:[#allocation15_spill] sm:$0xff]  ;;  %v15285_v15 = vld [vmem:[#allocation21_spill] sm:$0xff]  ;;  %v4802_v40 = vpop.permute.xlu1 %4801 }
 0x95b   : > { %v5025_v26 = vsel %vm1246_vm5, %v12958_v23, %v5002_v24  ;;  %v5026_v33 = vsel %vm1246_vm5, %v5002_v24, %v5004_v19  ;;  %v5925_v23 = vsel %vm2233_vm10, %v12984_v35, %v12931_v13  ;;  %v5923_v5 = vsel %vm2233_vm10, %v13074_v36, %v15281_v57  ;;  %v15288_v4 = vld [vmem:[#allocation35_spill] sm:$0xff] }
 0x95c   : > { %v5049_v41 = vadd.f32 %v5025_v26, %v4827_v6  ;;  %v5050_v61 = vadd.f32 %v5026_v33, %v4828_v62  ;;  %v5380_v56 = vsel %vm1636_vm7, %v12789_v32, %v15282_v39  ;;  %v4807_v11 = vsel %vm1011_vm4, %v15284_v42, %v15283_v47  ;;  %v15287_v32 = vld [vmem:[#allocation20_spill] sm:$0xff]  ;;  %v15290_v62 = vld [vmem:[#allocation49_spill] sm:$0xff]  ;;  %v15292_v26 = vld [vmem:[#allocation47_spill] sm:$0xff] }
 0x95d   : > { %v13261_v17 = vadd.f32 %v5943_v54, %v15285_v15  ;;  %v5944_v52 = vadd.f32 %v5923_v5, %v5762_v44  ;;  %v5970_v35 = vmax.f32 %v13239_v0, 0.0  ;;  %v5924_v36 = vsel %vm2233_vm10, %v15281_v57, %v15286_v29  ;;  %v15291_v54 = vld [vmem:[#allocation36_spill] sm:$0xff] }
 0x95e   : > { %v5219_v60 = vadd.f32 %v5197_v48, %v5049_v41  ;;  %v5220_v58 = vadd.f32 %v5198_v14, %v5050_v61  ;;  %v13268_v46 = vadd.f32 %v15276_v21, %v5054_v45  ;;  %v5382_v43 = vsel %vm1636_vm7, %v15288_v4, %v15287_v32  ;;  %v15293_v33 = vld [vmem:[#allocation4_spill] sm:$0xff]  ;;  %v15294_v41 = vld [vmem:[#allocation58_spill] sm:$0xff] }
 0x95f   : > { %v5562_v31 = vsel %vm1835_vm8, %v12864_v55, %v15289_v50  ;;  %v5945_v27 = vadd.f32 %v5924_v36, %v5763_v34  ;;  %v4829_v6 = vadd.f32 %v4807_v11, %v4623_v7  ;;  %v4604_v19 = vsel %vm788_vm3, %v12919_v8, %v15290_v62  ;;  %v15295_v7 = vld [vmem:[#allocation51_spill] sm:$0xff] }
 0x960   : > { %v5401_v48 = vadd.f32 %v5379_v53, %v5219_v60  ;;  %v5402_v14 = vadd.f32 %v5380_v56, %v5220_v58  ;;  %v5744_v21 = vsel %vm2034_vm9, %v12903_v49, %v15291_v54  ;;  %v5967_v44 = vmax.f32 %v13261_v17, 0.0  ;;  %v15298_v54 = vld [vmem:[#allocation29_spill] sm:$0xff] }
 0x961   : > { %v5027_v16 = vsel %vm1246_vm5, %v15293_v33, %v15292_v26  ;;  %v5956_v55 = vadd.f32 %v5944_v52, %v15285_v15  ;;  %v4602_v61 = vsel %vm788_vm3, %v12975_v12, %v15294_v41  ;;  %v4625_v8 = vadd.f32 %v15294_v41, %v4421_v37 }
 0x962   : > { %v5583_v53 = vadd.f32 %v5561_v10, %v5401_v48  ;;  %v5584_v24 = vadd.f32 %v5562_v31, %v5402_v14  ;;  %v5926_v49 = vsel %vm2233_vm10, %v12931_v13, %v15295_v7  ;;  %v4627_v45 = vadd.f32 %v4604_v19, %v13134_v1 }
 0x963   : > { %v4628_v34 = vadd.f32 %v15290_v62, %v13202_v28  ;;  %v5957_v5 = vadd.f32 %v5945_v27, %v15285_v15  ;;  %v4808_v12 = vsel %vm1011_vm4, %v15283_v47, %v13209_v38  ;;  %v4831_v37 = vadd.f32 %v13209_v38, %v4625_v8  ;;  %v15296_v27 = vld [vmem:[#allocation31_spill] sm:$0xff] }
 0x964   : > { %v5765_v10 = vadd.f32 %v5743_v25, %v5583_v53  ;;  %v5766_v51 = vadd.f32 %v5744_v21, %v5584_v24  ;;  %v4624_v39 = vadd.f32 %v4602_v61, %v13129_v63  ;;  %v4810_v13 = vsel %vm1011_vm4, %v12966_v2, %v4802_v40  ;;  %v15297_v24 = vld [vmem:[#allocation34_spill] sm:$0xff]  ;;  %v15302_v61 = vld [vmem:[#allocation32_spill] sm:$0xff] }
 0x965   : > { %v5012_v57 = vpop.permute.xlu1 %5011  ;;  %v5968_v28 = vmax.f32 %v5956_v55, 0.0  ;;  %v5051_v38 = vadd.f32 %v5027_v16, %v4829_v6  ;;  %v4834_v17 = vadd.f32 %v4802_v40, %v4628_v34  ;;  %v5969_v29 = vmax.f32 %v5957_v5, 0.0  ;;  %v15299_v21 = vld [vmem:[#allocation50_spill] sm:$0xff] }
 0x966   : > { %v5010_v25 = vpop.permute.xlu0 %5009  ;;  %v5947_v60 = vadd.f32 %v5925_v23, %v5765_v10  ;;  %v5948_v58 = vadd.f32 %v5926_v49, %v5766_v51  ;;  %v4830_v23 = vadd.f32 %v4808_v12, %v4624_v39  ;;  %v4833_v63 = vadd.f32 %v4810_v13, %v4627_v45  ;;  %v15301_v55 = vld [vmem:[#allocation22_spill] sm:$0xff]  ;;  %v15307_v39 = vld [vmem:[#allocation37_spill] sm:$0xff] }
 0x967   : > { %v5029_v1 = vsel %vm1246_vm5, %v5010_v25, %v5012_v57  ;;  %v5028_v56 = vsel %vm1246_vm5, %v15292_v26, %v5010_v25  ;;  %v5980_v62 = vmul.f32 %v5968_v28, %v15296_v27  ;;  %v15300_v26 = vld [vmem:[#allocation17_spill] sm:$0xff]  ;;  %v5979_v8 = vmul.f32 %v5967_v44, %v15302_v61  ;;  %v15303_v45 = vld [vmem:[#allocation46_spill] sm:$0xff] }
 0x968   : > { %v5053_v42 = vadd.f32 %v5029_v1, %v4831_v37  ;;  %v5959_v11 = vadd.f32 %v5947_v60, %v15279_v59  ;;  %v5960_v47 = vadd.f32 %v5948_v58, %v15279_v59  ;;  %v5052_v32 = vadd.f32 %v5028_v56, %v4830_v23  ;;  %v15304_v34 = vld [vmem:[#allocation30_spill] sm:$0xff]  ;;  %v15305_v60 = vld [vmem:[#allocation55_spill] sm:$0xff] }
 0x969   : > { %v5020_v52 = vpop.permute.xlu1 %5019  ;;  %v5564_v33 = vsel %vm1835_vm8, %v15300_v26, %v15299_v21  ;;  %v5221_v49 = vadd.f32 %v12772_v22, %v5051_v38  ;;  %v5746_v57 = vsel %vm2034_vm9, %v15304_v34, %v15303_v45  ;;  %v5982_v37 = vmul.f32 %v5970_v35, %v15302_v61  ;;  %v15306_v58 = vld [vmem:[#allocation26_spill] sm:$0xff]  ;;  %v15310_v38 = vld [vmem:[#allocation19_spill] sm:$0xff] }
 0x96a   : > { %v5223_v36 = vadd.f32 %v13164_v3, %v5053_v42  ;;  %v5018_v2 = vpop.permute.xlu0 %5017  ;;  %v5971_v48 = vmax.f32 %v5959_v11, 0.0  ;;  %v5972_v14 = vmax.f32 %v5960_v47, 0.0  ;;  %v5384_v3 = vsel %vm1636_vm7, %v15298_v54, %v15297_v24  ;;  %v15308_v42 = vld [vmem:[#allocation59_spill] sm:$0xff]  ;;  %v15309_v47 = vld [vmem:[#allocation28_spill] sm:$0xff] }
 0x96b   : > { %v5031_v50 = vsel %vm1246_vm5, %v13005_v30, %v5018_v2  ;;  %v5032_v31 = vsel %vm1246_vm5, %v5018_v2, %v5020_v52  ;;  %v5981_v30 = vmul.f32 %v5969_v29, %v15301_v55  ;;  %v5222_v44 = vadd.f32 %v13159_v20, %v5052_v32  ;;  %v15311_v29 = vld [vmem:[#allocation40_spill] sm:$0xff] }
 0x96c   : > { %v5405_v19 = vadd.f32 %v5382_v43, %v5223_v36  ;;  %v5055_v6 = vadd.f32 %v5031_v50, %v4833_v63  ;;  %v5056_v40 = vadd.f32 %v5032_v31, %v4834_v17  ;;  %v5983_v53 = vmul.f32 %v5971_v48, %v15296_v27 }
 0x96d   : > { %v5916_v16 = vpop.permute.xlu1 %5915  ;;  %v5984_v41 = vmul.f32 %v5972_v14, %v15301_v55  ;;  %v5383_v22 = vsel %vm1636_vm7, %v15305_v60, %v15298_v54  ;;  %v5566_v13 = vsel %vm1835_vm8, %v15307_v39, %v15306_v58  ;;  %v5991_v28 = vpack.c.bf16 %v5982_v37, %v5979_v8  ;;  %v15312_v14 = vld [vmem:[#allocation56_spill] sm:$0xff] }
 0x96e   : > { %v5226_v43 = vadd.f32 %v13177_v9, %v5056_v40  ;;  %v5914_v10 = vpop.permute.xlu0 %5913  ;;  %v5587_v51 = vadd.f32 %v5564_v33, %v5405_v19  ;;  %v5992_v7 = vpack.c.bf16 %v5983_v53, %v5980_v62  ;;  %v5225_v5 = vadd.f32 %v13172_v18, %v5055_v6  ;;  %v15313_v19 = vld [vmem:[#allocation48_spill] sm:$0xff] }
 0x96f   : > { %v5993_v12 = vpack.c.bf16 %v5984_v41, %v5981_v30  ;;  %v5928_v18 = vsel %vm2233_vm10, %v5914_v10, %v5916_v16  ;;  %v5406_v56 = vadd.f32 %v15305_v60, %v13268_v46  ;;  %v5381_v11 = vsel %vm1636_vm7, %v15308_v42, %v15288_v4 }
 0x970   : > { %v5408_v25 = vadd.f32 %v5384_v3, %v5226_v43  ;;  %v5769_v9 = vadd.f32 %v5746_v57, %v5587_v51  ;;  %6005 = vrot.lane.b32.xlu1 %v5992_v7, %s9714_s11  ;;  %v5748_v17 = vsel %vm2034_vm9, %v15310_v38, %v15309_v47  ;;  %v5407_v23 = vadd.f32 %v5383_v22, %v5225_v5  ;;  %v15314_v3 = vld [vmem:[#allocation44_spill] sm:$0xff] }
 0x971   : > { %6007 = vrot.lane.b32.xlu0 %v5993_v12, %s9714_s11  ;;  %v5922_v0 = vpop.permute.xlu1 %5921  ;;  %v5403_v52 = vadd.f32 %v15308_v42, %v5221_v49  ;;  %v5404_v2 = vadd.f32 %v5381_v11, %v5222_v44  ;;  %v5565_v4 = vsel %vm1835_vm8, %v15312_v14, %v15307_v39  ;;  %v5588_v50 = vadd.f32 %v15312_v14, %v5406_v56  ;;  %v9680_v14 = vld [vmem:[%s14762_s4 + $0x10] sm:$0xff]  }
 0x972   : > { %v5951_v35 = vadd.f32 %v5928_v18, %v5769_v9  ;;  %v5920_v1 = vpop.permute.xlu0 %5919  ;;  %v5590_v20 = vadd.f32 %v5566_v13, %v5408_v25  ;;  %v5563_v6 = vsel %vm1835_vm8, %v15313_v19, %v15300_v26  ;;  %v5589_v40 = vadd.f32 %v5565_v4, %v5407_v23  ;;  %v9678_v23 = vld [vmem:[%s14762_s4 + $0x8] sm:$0xff]   ;;  %v9681_v4 = vld [vmem:[%s14762_s4 + $0x18] sm:$0xff]  }
 0x973   : > { %v5930_v48 = vsel %vm2233_vm10, %v5920_v1, %v5922_v0  ;;  %v5585_v53 = vadd.f32 %v15313_v19, %v5403_v52  ;;  %v5586_v16 = vadd.f32 %v5563_v6, %v5404_v2  ;;  %v9686_v19 = vld [vmem:[%s14762_s4 + $0x40] sm:$0xff]   ;;  %v9687_v6 = vld [vmem:[%s14762_s4 + $0x48] sm:$0xff]  }
 0x974   : > { %v5963_v63 = vadd.f32 %v5951_v35, %v15311_v29  ;;  %v5772_v36 = vadd.f32 %v5748_v17, %v5590_v20  ;;  %6003 = vrot.lane.b32.xlu1 %v5991_v28, %s9714_s11 }
 0x975   : > { %v5736_v46 = vpop.permute.xlu1 %5735 }
 0x976   : > { %v5954_v32 = vadd.f32 %v5930_v48, %v5772_v36  ;;  %v5747_v31 = vsel %vm2034_vm9, %v5736_v46, %v15310_v38  ;;  %v5730_v62 = vpop.permute.xlu0 %5729  ;;  %v5975_v54 = vmax.f32 %v5963_v63, 0.0  ;;  %v5770_v33 = vadd.f32 %v5736_v46, %v5588_v50  ;;  %v9679_v46 = vld [vmem:[%s14762_s4] sm:$0xff]   ;;  %v9683_v50 = vld [vmem:[%s14762_s4 + $0x28] sm:$0xff]  }
 0x977   : > { %v5745_v24 = vsel %vm2034_vm9, %v5730_v62, %v15304_v34  ;;  %v5771_v30 = vadd.f32 %v5747_v31, %v5589_v40  ;;  %v5767_v41 = vadd.f32 %v5730_v62, %v5585_v53  ;;  %v15315_v36 = vmov 0   ;;  %v9684_v31 = vld [vmem:[%s14762_s4 + $0x30] sm:$0xff]   ;;  %v9685_v62 = vld [vmem:[%s14762_s4 + $0x38] sm:$0xff]  }
 0x978   : > { %v5966_v21 = vadd.f32 %v5954_v32, %v15314_v3  ;;  %v5768_v51 = vadd.f32 %v5745_v24, %v5586_v16  ;;  %v5987_v34 = vmul.f32 %v5975_v54, %v15301_v55  ;;  %v9682_v32 = vld [vmem:[%s14762_s4 + $0x20] sm:$0xff]   ;;  %v9688_v40 = vld [vmem:[%s14762_s4 + $0x50] sm:$0xff]   ;;  %v9689_v53 = vld [vmem:[%s14762_s4 + $0x58] sm:$0xff]  }
 0x979   : > { %v5918_v8 = vpop.permute.xlu1 %5917  ;;  %v9690_v24 = vld [vmem:[%s14762_s4 + $0x60] sm:$0xff]   ;;  %v9691_v54 = vld [vmem:[%s14762_s4 + $0x68] sm:$0xff]  }
 0x97a   : > { %v5978_v43 = vmax.f32 %v5966_v21, 0.0  ;;  %v5929_v7 = vsel %vm2233_vm10, %v5918_v8, %v5920_v1  ;;  %v5952_v49 = vadd.f32 %v5918_v8, %v5770_v33  ;;  %v5912_v26 = vpop.permute.xlu0 %5911  ;;  %v9692_v21 = vld [vmem:[%s14762_s4 + $0x70] sm:$0xff]   ;;  %v9693_v33 = vld [vmem:[%s14762_s4 + $0x78] sm:$0xff]   ;;  %v9694_v16 = vld [vmem:[%s14762_s4 + $0x80] sm:$0xff]  }
 0x97b   : > { %v5953_v45 = vadd.f32 %v5929_v7, %v5771_v30  ;;  %v5927_v57 = vsel %vm2233_vm10, %v5912_v26, %v5914_v10  ;;  %v5949_v5 = vadd.f32 %v5912_v26, %v5767_v41  ;;  %v9695_v30 = vld [vmem:[%s14762_s4 + $0x88] sm:$0xff]  }
 0x97c   : > { %v5990_v12 = vmul.f32 %v5978_v43, %v15301_v55  ;;  %v5964_v37 = vadd.f32 %v5952_v49, %v15314_v3  ;;  %v5950_v44 = vadd.f32 %v5927_v57, %v5768_v51 }
 0x97d   : > { %v5965_v25 = vadd.f32 %v5953_v45, %v15314_v3  ;;  %v5961_v9 = vadd.f32 %v5949_v5, %v15311_v29 }
 0x97e   : > { %v5976_v60 = vmax.f32 %v5964_v37, 0.0  ;;  %v5962_v22 = vadd.f32 %v5950_v44, %v15311_v29  ;;  %v5996_v58 = vpack.c.bf16 %v5990_v12, %v5987_v34 }
 0x97f   : > { %v5977_v39 = vmax.f32 %v5965_v25, 0.0  ;;  %v5973_v13 = vmax.f32 %v5961_v9, 0.0 }
 0x980   : > { %v5988_v10 = vmul.f32 %v5976_v60, %v15302_v61  ;;  %v5974_v18 = vmax.f32 %v5962_v22, 0.0  ;;  %6013 = vrot.lane.b32.xlu0 %v5996_v58, %s9714_s11 }
 0x981   : > { %v5989_v0 = vmul.f32 %v5977_v39, %v15296_v27  ;;  %v5985_v35 = vmul.f32 %v5973_v13, %v15302_v61 }
 0x982   : > { %v5986_v1 = vmul.f32 %v5974_v18, %v15296_v27 }
 0x983   : > { %v5994_v20 = vpack.c.bf16 %v5988_v10, %v5985_v35 }
 0x984   : > { %v5995_v28 = vpack.c.bf16 %v5989_v0, %v5986_v1 }
 0x985   : > { %6009 = vrot.lane.b32.xlu1 %v5994_v20, %s9714_s11 }
 0x986   : > { %6011 = vrot.lane.b32.xlu0 %v5995_v28, %s9714_s11 }
 0x9e2   : > { %v6006_v56 = vpop.permute.xlu1 %6005 }
 0x9e3   : > { %v13384_v42 = vpop.permute.xlu0 %6007 }
 0x9e4   : > { %v13388_v11 = vsel %vm2380_vm11, %v6006_v56, %v13384_v42  ;;  %9444 = vmatprep.subr.bf16.mxu0 %v13384_v42 }
 0x9e5   : > { %6025 = vmatprep.subr.bf16.mxu1 %v13388_v11  ;;  %9445 = vmatpush3.bf16.msra.mxu0 %v13384_v42 }
 0x9e6   : > { %v6004_v47 = vpop.permute.xlu1 %6003 }
 0x9e7   : > { %v13394_v38 = vsel %vm2380_vm11, %v6004_v47, %v6006_v56 }
 0x9e8   : > { %6026 = vmatpush1.bf16.msra.mxu1 %v13394_v38 }
 0x9f2   : > { %v13397_v17 = vpop.permute.xlu0 %6013 }
 0x9f3   : > { %9446 = vmatprep.subr.bf16.mxu0 %v13397_v17 }
 0x9f4   : > { %9447 = vmatpush3.bf16.msra.mxu0 %v13397_v17 }
 0x9f5   : > { %6163 = vmatprep.subr.bf16.mxu0 %v13388_v11 }
 0x9f7   : > { %9449 = vmatmul.mubr.msk.bf16.vlgmr.msra.gmra.mrb[164].mxu0 %vm1835_vm8, %v9678_v23  ;;  %v6010_v52 = vpop.permute.xlu1 %6009 }
 0x9f8   : > { %v6012_v63 = vpop.permute.xlu0 %6011  ;;  %6164 = vmatpush1.bf16.msra.mxu0 %v13394_v38  ;;  %6195 = vmatprep.mubr.bf16.mxu0 %v15315_v36 }
 0x9f9   : > { %v13409_v2 = vsel %vm2380_vm11, %v6010_v52, %v6012_v63  ;;  %v13413_v48 = vsel %vm2380_vm11, %v6012_v63, %v13397_v17 }
 0x9fa   : > { %6027 = vmatprep.subr.bf16.mxu1 %v13413_v48  ;;  %6165 = vmatprep.subr.bf16.mxu0 %v13413_v48 }
 0x9fb   : > { %6028 = vmatpush1.bf16.msra.mxu1 %v13409_v2 }
 0x9fc   : > { %6166 = vmatpush1.bf16.msra.mxu0 %v13409_v2  ;;  %9452 = vmatprep.subr.bf16.mxu1 %v13384_v42 }
 0x9fd   : > { %9460 = vmatprep.subr.bf16.mxu0 %v13384_v42 }
 0x9fe   : > { %9028 = vmatmul.mubr.msk.bf16.vlgmr.msra.gmra.mrb[160].mxu1 %vm1835_vm8, %v9679_v46 }
 0x9ff   : > { %9032 = vmatmul.mubr.msk.bf16.vlgmr.msra.gmra.mrb[168].mxu0 %vm1835_vm8, %v9680_v14  ;;  %9453 = vmatpush3.bf16.msra.mxu1 %v13384_v42 }
 0xa00   : > { %9454 = vmatprep.subr.bf16.mxu1 %v13397_v17  ;;  %9461 = vmatpush3.bf16.msra.mxu0 %v13384_v42 }
 0xa01   : > { %9462 = vmatprep.subr.bf16.mxu0 %v13397_v17  ;;  %6067 = vmatprep.mubr.bf16.mxu1 %v15315_v36 }
 0xa02   : > { %6205 = vmatprep.mubr.bf16.mxu0 %v15315_v36 }
 0xa03   : > { %9455 = vmatpush3.bf16.msra.mxu1 %v13397_v17 }
 0xa04   : > { %6369 = vmatprep.subr.bf16.mxu1 %v13388_v11  ;;  %9463 = vmatpush3.bf16.msra.mxu0 %v13397_v17 }
 0xa05   : > { %6575 = vmatprep.subr.bf16.mxu0 %v13388_v11 }
 0xa06   : > { %9029 = vmatmul.mubr.msk.bf16.gmra.mrb[164].mxu1 %vm1835_vm8, %v9678_v23 }
 0xa07   : > { %9033 = vmatmul.mubr.msk.bf16.gmra.mrb[172].mxu0 %vm1835_vm8, %v9681_v4  ;;  %9456 = vmatprep.mubr.msk.bf16.mxu1 %vm1835_vm8, %v9680_v14 }
 0xa08   : > { %9464 = vmatprep.mubr.msk.bf16.mxu0 %vm1835_vm8, %v9682_v32 }
 0xa0e   : > { %9457 = vmatmul.mubr.msk.bf16.vlgmr.msra.gmra.mrb[168].mxu1 %vm1835_vm8, %v9681_v4 }
 0xa0f   : > { %6370 = vmatpush1.bf16.msra.mxu1 %v13394_v38  ;;  %9465 = vmatmul.mubr.msk.bf16.vlgmr.msra.gmra.mrb[176].mxu0 %vm1835_vm8, %v9683_v50 }
 0xa10   : > { %6371 = vmatprep.subr.bf16.mxu1 %v13413_v48  ;;  %6576 = vmatpush1.bf16.msra.mxu0 %v13394_v38 }
 0xa11   : > { %6577 = vmatprep.subr.bf16.mxu0 %v13413_v48  ;;  %6401 = vmatprep.mubr.bf16.mxu1 %v15315_v36 }
 0xa12   : > { %6607 = vmatprep.mubr.bf16.mxu0 %v15315_v36 }
 0xa13   : > { %6372 = vmatpush1.bf16.msra.mxu1 %v13409_v2 }
 0xa14   : > { %6578 = vmatpush1.bf16.msra.mxu0 %v13409_v2  ;;  %9468 = vmatprep.subr.bf16.mxu1 %v13384_v42 }
 0xa15   : > { %9476 = vmatprep.subr.bf16.mxu0 %v13384_v42 }
 0xa16   : > { %9036 = vmatmul.mubr.msk.bf16.vlgmr.msra.gmra.mrb[172].mxu1 %vm1835_vm8, %v9682_v32 }
 0xa17   : > { %9469 = vmatpush3.bf16.msra.mxu1 %v13384_v42  ;;  %9040 = vmatmul.mubr.msk.bf16.vlgmr.msra.gmra.mrb[180].mxu0 %vm1835_vm8, %v9684_v31 }
 0xa18   : > { %9470 = vmatprep.subr.bf16.mxu1 %v13397_v17  ;;  %9477 = vmatpush3.bf16.msra.mxu0 %v13384_v42 }
 0xa19   : > { %9478 = vmatprep.subr.bf16.mxu0 %v13397_v17  ;;  %6411 = vmatprep.mubr.bf16.mxu1 %v15315_v36 }
 0xa1a   : > { %6617 = vmatprep.mubr.bf16.mxu0 %v15315_v36 }
 0xa1b   : > { %9471 = vmatpush3.bf16.msra.mxu1 %v13397_v17 }
 0xa1c   : > { %6797 = vmatprep.subr.bf16.mxu1 %v13388_v11  ;;  %9479 = vmatpush3.bf16.msra.mxu0 %v13397_v17 }
 0xa1d   : > { %6967 = vmatprep.subr.bf16.mxu0 %v13388_v11 }
 0xa1e   : > { %9037 = vmatmul.mubr.msk.bf16.gmra.mrb[176].mxu1 %vm1835_vm8, %v9683_v50 }
 0xa1f   : > { %9041 = vmatmul.mubr.msk.bf16.gmra.mrb[184].mxu0 %vm1835_vm8, %v9685_v62  ;;  %9472 = vmatprep.mubr.msk.bf16.mxu1 %vm1835_vm8, %v9684_v31 }
 0xa20   : > { %9480 = vmatprep.mubr.msk.bf16.mxu0 %vm1835_vm8, %v9686_v19 }
 0xa26   : > { %9473 = vmatmul.mubr.msk.bf16.vlgmr.msra.gmra.mrb[180].mxu1 %vm1835_vm8, %v9685_v62 }
 0xa27   : > { %6798 = vmatpush1.bf16.msra.mxu1 %v13394_v38  ;;  %9481 = vmatmul.mubr.msk.bf16.vlgmr.msra.gmra.mrb[188].mxu0 %vm1835_vm8, %v9687_v6 }
 0xa28   : > { %6799 = vmatprep.subr.bf16.mxu1 %v13413_v48  ;;  %6968 = vmatpush1.bf16.msra.mxu0 %v13394_v38 }
 0xa29   : > { %6969 = vmatprep.subr.bf16.mxu0 %v13413_v48  ;;  %6829 = vmatprep.mubr.bf16.mxu1 %v15315_v36 }
 0xa2a   : > { %6999 = vmatprep.mubr.bf16.mxu0 %v15315_v36 }
 0xa2b   : > { %6800 = vmatpush1.bf16.msra.mxu1 %v13409_v2 }
 0xa2c   : > { %6970 = vmatpush1.bf16.msra.mxu0 %v13409_v2  ;;  %9484 = vmatprep.subr.bf16.mxu1 %v13384_v42 }
 0xa2d   : > { %9492 = vmatprep.subr.bf16.mxu0 %v13384_v42 }
 0xa2e   : > { %9044 = vmatmul.mubr.msk.bf16.vlgmr.msra.gmra.mrb[184].mxu1 %vm1835_vm8, %v9686_v19 }
 0xa2f   : > { %9485 = vmatpush3.bf16.msra.mxu1 %v13384_v42  ;;  %9048 = vmatmul.mubr.msk.bf16.vlgmr.msra.gmra.mrb[192].mxu0 %vm1835_vm8, %v9688_v40 }
 0xa30   : > { %9486 = vmatprep.subr.bf16.mxu1 %v13397_v17  ;;  %9493 = vmatpush3.bf16.msra.mxu0 %v13384_v42 }
 0xa31   : > { %9494 = vmatprep.subr.bf16.mxu0 %v13397_v17  ;;  %6839 = vmatprep.mubr.bf16.mxu1 %v15315_v36 }
 0xa32   : > { %7009 = vmatprep.mubr.bf16.mxu0 %v15315_v36 }
 0xa33   : > { %9487 = vmatpush3.bf16.msra.mxu1 %v13397_v17 }
 0xa34   : > { %7149 = vmatprep.subr.bf16.mxu1 %v13388_v11  ;;  %9495 = vmatpush3.bf16.msra.mxu0 %v13397_v17 }
 0xa35   : > { %7331 = vmatprep.subr.bf16.mxu0 %v13388_v11 }
 0xa36   : > { %9045 = vmatmul.mubr.msk.bf16.gmra.mrb[188].mxu1 %vm1835_vm8, %v9687_v6 }
 0xa37   : > { %9049 = vmatmul.mubr.msk.bf16.gmra.mrb[196].mxu0 %vm1835_vm8, %v9689_v53  ;;  %9488 = vmatprep.mubr.msk.bf16.mxu1 %vm1835_vm8, %v9688_v40 }
 0xa38   : > { %9496 = vmatprep.mubr.msk.bf16.mxu0 %vm1835_vm8, %v9690_v24 }
 0xa3e   : > { %9489 = vmatmul.mubr.msk.bf16.vlgmr.msra.gmra.mrb[192].mxu1 %vm1835_vm8, %v9689_v53 }
 0xa3f   : > { %7150 = vmatpush1.bf16.msra.mxu1 %v13394_v38  ;;  %9497 = vmatmul.mubr.msk.bf16.vlgmr.msra.gmra.mrb[200].mxu0 %vm1835_vm8, %v9691_v54 }
 0xa40   : > { %7151 = vmatprep.subr.bf16.mxu1 %v13413_v48  ;;  %7332 = vmatpush1.bf16.msra.mxu0 %v13394_v38 }
 0xa41   : > { %7333 = vmatprep.subr.bf16.mxu0 %v13413_v48  ;;  %7181 = vmatprep.mubr.bf16.mxu1 %v15315_v36 }
 0xa42   : > { %7363 = vmatprep.mubr.bf16.mxu0 %v15315_v36 }
 0xa43   : > { %7152 = vmatpush1.bf16.msra.mxu1 %v13409_v2 }
 0xa44   : > { %7334 = vmatpush1.bf16.msra.mxu0 %v13409_v2  ;;  %9500 = vmatprep.subr.bf16.mxu1 %v13384_v42 }
 0xa45   : > { %9508 = vmatprep.subr.bf16.mxu0 %v13384_v42 }
 0xa46   : > { %9052 = vmatmul.mubr.msk.bf16.vlgmr.msra.gmra.mrb[196].mxu1 %vm1835_vm8, %v9690_v24 }
 0xa47   : > { %9501 = vmatpush3.bf16.msra.mxu1 %v13384_v42  ;;  %9056 = vmatmul.mubr.msk.bf16.vlgmr.msra.gmra.mrb[204].mxu0 %vm1835_vm8, %v9692_v21 }
 0xa48   : > { %9502 = vmatprep.subr.bf16.mxu1 %v13397_v17  ;;  %9509 = vmatpush3.bf16.msra.mxu0 %v13384_v42 }
 0xa49   : > { %9510 = vmatprep.subr.bf16.mxu0 %v13397_v17  ;;  %7191 = vmatprep.mubr.bf16.mxu1 %v15315_v36 }
 0xa4a   : > { %7373 = vmatprep.mubr.bf16.mxu0 %v15315_v36 }
 0xa4b   : > { %9503 = vmatpush3.bf16.msra.mxu1 %v13397_v17 }
 0xa4c   : > { %7513 = vmatprep.subr.bf16.mxu1 %v13388_v11  ;;  %9511 = vmatpush3.bf16.msra.mxu0 %v13397_v17 }
 0xa4e   : > { %9053 = vmatmul.mubr.msk.bf16.gmra.mrb[200].mxu1 %vm1835_vm8, %v9691_v54 }
 0xa4f   : > { %9504 = vmatprep.mubr.msk.bf16.mxu1 %vm1835_vm8, %v9692_v21  ;;  %9057 = vmatmul.mubr.msk.bf16.gmra.mrb[208].mxu0 %vm1835_vm8, %v9693_v33 }
 0xa50   : > { %9512 = vmatprep.mubr.msk.bf16.mxu0 %vm1835_vm8, %v9694_v16 }
 0xa56   : > { %9505 = vmatmul.mubr.msk.bf16.vlgmr.msra.gmra.mrb[204].mxu1 %vm1835_vm8, %v9693_v33 }
 0xa57   : > { %7514 = vmatpush1.bf16.msra.mxu1 %v13394_v38  ;;  %7545 = vmatprep.mubr.bf16.mxu1 %v15315_v36 }
 0xa58   : > { %7515 = vmatprep.subr.bf16.mxu1 %v13413_v48  ;;  %9513 = vmatmul.mubr.msk.bf16.vlgmr.msra.gmra.mrb[212].mxu0 %vm1835_vm8, %v9695_v30 }
 0xa59   : > { %7800 = vmatprep.mubr.bf16.mxu0 %v15315_v36 }
 0xa5b   : > { %7516 = vmatpush1.bf16.msra.mxu1 %v13409_v2 }
 0xa5e   : > { %9060 = vmatmul.mubr.msk.bf16.vlgmr.msra.gmra.mrb[208].mxu1 %vm1835_vm8, %v9694_v16 }
 0xa5f   : > { %7555 = vmatprep.mubr.bf16.mxu1 %v15315_v36 }
 0xa66   : > { %9061 = vmatmul.mubr.msk.bf16.gmra.mrb[212].mxu1 %vm1835_vm8, %v9695_v30 }
 0xaca   : > { %v13581_v41 = vpop.f32.mrb[164].mxu0 }
 0xacb   : > { %v13583_v8 = vpop.f32.mrb[165].mxu0 }
 0xacc   : > { %v13585_v43 = vpop.f32.mrb[166].mxu0 }
 0xacd   : > { %v13587_v51 = vpop.f32.mrb[167].mxu0 }
 0xad1   : > { %v6059_v7 = vpop.f32.mrb[160].mxu1 }
 0xad2   : > { %6127 = vrot.lane.b32.xlu0 %v6059_v7, %s9705_s17  ;;  %v6061_v49 = vpop.f32.mrb[161].mxu1  ;;  %v6197_v26 = vpop.f32.mrb[168].mxu0 }
 0xad3   : > { %v6063_v45 = vpop.f32.mrb[162].mxu1  ;;  %v6199_v57 = vpop.f32.mrb[169].mxu0 }
 0xad4   : > { %6130 = vrot.lane.b32.xlu1 %v6063_v45, %s9705_s17  ;;  %v6065_v5 = vpop.f32.mrb[163].mxu1  ;;  %v6201_v34 = vpop.f32.mrb[170].mxu0 }
 0xad5   : > { %v6203_v12 = vpop.f32.mrb[171].mxu0 }
 0xad6   : > { %6139 = vrot.lane.b32.xlu0 %v6061_v49, %s9705_s17 }
 0xad8   : > { %6141 = vrot.lane.b32.xlu1 %v6065_v5, %s9705_s17 }
 0xad9   : > { %v6069_v37 = vpop.f32.mrb[164].mxu1 }
 0xada   : > { %6265 = vrot.lane.b32.xlu0 %v6197_v26, %s9705_s17  ;;  %v6071_v44 = vpop.f32.mrb[165].mxu1  ;;  %v6207_v25 = vpop.f32.mrb[172].mxu0 }
 0xadb   : > { %v6073_v9 = vpop.f32.mrb[166].mxu1  ;;  %v6209_v60 = vpop.f32.mrb[173].mxu0 }
 0xadc   : > { %6268 = vrot.lane.b32.xlu1 %v6201_v34, %s9705_s17  ;;  %v6075_v22 = vpop.f32.mrb[167].mxu1  ;;  %v6211_v58 = vpop.f32.mrb[174].mxu0 }
 0xadd   : > { %v6213_v39 = vpop.f32.mrb[175].mxu0 }
 0xade   : > { %6277 = vrot.lane.b32.xlu0 %v6199_v57, %s9705_s17 }
 0xae0   : > { %6279 = vrot.lane.b32.xlu1 %v6203_v12, %s9705_s17 }
 0xae1   : > { %v13597_v13 = vpop.f32.mrb[168].mxu1 }
 0xae2   : > { %6133 = vrot.lane.b32.xlu0 %v6069_v37, %s9705_s17  ;;  %v13600_v10 = vpop.f32.mrb[169].mxu1  ;;  %v13602_v18 = vpop.f32.mrb[176].mxu0 }
 0xae3   : > { %v13604_v0 = vpop.f32.mrb[170].mxu1  ;;  %v13606_v35 = vpop.f32.mrb[177].mxu0 }
 0xae4   : > { %6136 = vrot.lane.b32.xlu1 %v6073_v9, %s9705_s17  ;;  %v13609_v1 = vpop.f32.mrb[171].mxu1  ;;  %v13611_v20 = vpop.f32.mrb[178].mxu0 }
 0xae5   : > { %v13613_v28 = vpop.f32.mrb[179].mxu0 }
 0xae6   : > { %6143 = vrot.lane.b32.xlu0 %v6071_v44, %s9705_s17 }
 0xae8   : > { %6145 = vrot.lane.b32.xlu1 %v6075_v22, %s9705_s17 }
 0xae9   : > { %v6403_v56 = vpop.f32.mrb[172].mxu1 }
 0xaea   : > { %6271 = vrot.lane.b32.xlu0 %v6207_v25, %s9705_s17  ;;  %v6405_v42 = vpop.f32.mrb[173].mxu1  ;;  %v6609_v11 = vpop.f32.mrb[180].mxu0 }
 0xaeb   : > { %v6407_v47 = vpop.f32.mrb[174].mxu1  ;;  %v6611_v38 = vpop.f32.mrb[181].mxu0 }
 0xaec   : > { %6274 = vrot.lane.b32.xlu1 %v6211_v58, %s9705_s17  ;;  %v6409_v17 = vpop.f32.mrb[175].mxu1  ;;  %v6613_v23 = vpop.f32.mrb[182].mxu0 }
 0xaed   : > { %v6615_v52 = vpop.f32.mrb[183].mxu0 }
 0xaee   : > { %6281 = vrot.lane.b32.xlu0 %v6209_v60, %s9705_s17 }
 0xaf0   : > { %6283 = vrot.lane.b32.xlu1 %v6213_v39, %s9705_s17 }
 0xaf1   : > { %v6413_v63 = vpop.f32.mrb[176].mxu1 }
 0xaf2   : > { %6471 = vrot.lane.b32.xlu0 %v6403_v56, %s9705_s17  ;;  %v6415_v2 = vpop.f32.mrb[177].mxu1  ;;  %v6619_v48 = vpop.f32.mrb[184].mxu0 }
 0xaf3   : > { %v6417_v46 = vpop.f32.mrb[178].mxu1  ;;  %v6621_v14 = vpop.f32.mrb[185].mxu0 }
 0xaf4   : > { %6474 = vrot.lane.b32.xlu1 %v6407_v47, %s9705_s17  ;;  %v6419_v4 = vpop.f32.mrb[179].mxu1  ;;  %v6623_v32 = vpop.f32.mrb[186].mxu0 }
 0xaf5   : > { %v6625_v50 = vpop.f32.mrb[187].mxu0 }
 0xaf6   : > { %6483 = vrot.lane.b32.xlu0 %v6405_v42, %s9705_s17 }
 0xaf8   : > { %6485 = vrot.lane.b32.xlu1 %v6409_v17, %s9705_s17 }
 0xaf9   : > { %v13625_v31 = vpop.f32.mrb[180].mxu1 }
 0xafa   : > { %6677 = vrot.lane.b32.xlu0 %v6609_v11, %s9705_s17  ;;  %v13628_v62 = vpop.f32.mrb[181].mxu1  ;;  %v9482_v19 = vpop.f32.mrb[188].mxu0 }
 0xafb   : > { %v13630_v6 = vpop.f32.mrb[182].mxu1  ;;  %v6884_v40 = vpop.f32.mrb[189].mxu0 }
 0xafc   : > { %6680 = vrot.lane.b32.xlu1 %v6613_v23, %s9705_s17  ;;  %v13633_v53 = vpop.f32.mrb[183].mxu1  ;;  %v9483_v24 = vpop.f32.mrb[190].mxu0 }
 0xafd   : > { %v6887_v54 = vpop.f32.mrb[191].mxu0 }
 0xafe   : > { %6477 = vrot.lane.b32.xlu0 %v6413_v63, %s9705_s17 }
 0xb00   : > { %6480 = vrot.lane.b32.xlu1 %v6417_v46, %s9705_s17 }
 0xb01   : > { %v6831_v21 = vpop.f32.mrb[184].mxu1 }
 0xb02   : > { %6689 = vrot.lane.b32.xlu0 %v6611_v38, %s9705_s17  ;;  %v6833_v33 = vpop.f32.mrb[185].mxu1  ;;  %v7001_v16 = vpop.f32.mrb[192].mxu0 }
 0xb03   : > { %v6835_v30 = vpop.f32.mrb[186].mxu1  ;;  %v7003_v7 = vpop.f32.mrb[193].mxu0 }
 0xb04   : > { %6691 = vrot.lane.b32.xlu1 %v6615_v52, %s9705_s17  ;;  %v6837_v49 = vpop.f32.mrb[187].mxu1  ;;  %v7005_v26 = vpop.f32.mrb[194].mxu0 }
 0xb05   : > { %v7007_v45 = vpop.f32.mrb[195].mxu0 }
 0xb06   : > { %6487 = vrot.lane.b32.xlu0 %v6415_v2, %s9705_s17 }
 0xb08   : > { %6489 = vrot.lane.b32.xlu1 %v6419_v4, %s9705_s17 }
 0xb09   : > { %v6841_v57 = vpop.f32.mrb[188].mxu1 }
 0xb0a   : > { %6683 = vrot.lane.b32.xlu0 %v6619_v48, %s9705_s17  ;;  %v6843_v5 = vpop.f32.mrb[189].mxu1  ;;  %v7011_v34 = vpop.f32.mrb[196].mxu0 }
 0xb0b   : > { %v6845_v12 = vpop.f32.mrb[190].mxu1  ;;  %v7013_v37 = vpop.f32.mrb[197].mxu0 }
 0xb0c   : > { %6686 = vrot.lane.b32.xlu1 %v6623_v32, %s9705_s17  ;;  %v6847_v44 = vpop.f32.mrb[191].mxu1  ;;  %v7015_v25 = vpop.f32.mrb[198].mxu0 }
 0xb0d   : > { %v7017_v9 = vpop.f32.mrb[199].mxu0 }
 0xb0e   : > { %6693 = vrot.lane.b32.xlu0 %v6621_v14, %s9705_s17 }
 0xb10   : > { %6695 = vrot.lane.b32.xlu1 %v6625_v50, %s9705_s17 }
 0xb11   : > { %v13645_v60 = vpop.f32.mrb[192].mxu1 }
 0xb12   : > { %6927 = vrot.lane.b32.xlu0 %v9482_v19, %s9706_s18  ;;  %v13648_v22 = vpop.f32.mrb[193].mxu1  ;;  %v13650_v58 = vpop.f32.mrb[200].mxu0 }
 0xb13   : > { %v13652_v39 = vpop.f32.mrb[194].mxu1  ;;  %v13654_v56 = vpop.f32.mrb[201].mxu0 }
 0xb14   : > { %6913 = vrot.lane.b32.xlu1 %v6833_v33, %s9706_s18  ;;  %v13657_v42 = vpop.f32.mrb[195].mxu1  ;;  %v13659_v11 = vpop.f32.mrb[202].mxu0 }
 0xb15   : > { %v13661_v47 = vpop.f32.mrb[203].mxu0 }
 0xb16   : > { %6911 = vrot.lane.b32.xlu0 %v6831_v21, %s9706_s18 }
 0xb18   : > { %6933 = vrot.lane.b32.xlu1 %v9483_v24, %s9706_s18 }
 0xb19   : > { %v7183_v38 = vpop.f32.mrb[196].mxu1 }
 0xb1a   : > { %6915 = vrot.lane.b32.xlu0 %v6884_v40, %s9706_s18  ;;  %v7185_v17 = vpop.f32.mrb[197].mxu1  ;;  %v7365_v23 = vpop.f32.mrb[204].mxu0 }
 0xb1b   : > { %v7187_v52 = vpop.f32.mrb[198].mxu1  ;;  %v7367_v63 = vpop.f32.mrb[205].mxu0 }
 0xb1c   : > { %6917 = vrot.lane.b32.xlu1 %v6835_v30, %s9706_s18  ;;  %v7189_v2 = vpop.f32.mrb[199].mxu1  ;;  %v7369_v48 = vpop.f32.mrb[206].mxu0 }
 0xb1d   : > { %v13667_v46 = vpop.f32.mrb[207].mxu0 }
 0xb1e   : > { %6919 = vrot.lane.b32.xlu0 %v6837_v49, %s9706_s18 }
 0xb20   : > { %6921 = vrot.lane.b32.xlu1 %v6887_v54, %s9706_s18 }
 0xb21   : > { %v7193_v14 = vpop.f32.mrb[200].mxu1 }
 0xb22   : > { %7069 = vrot.lane.b32.xlu0 %v7001_v16, %s9705_s17  ;;  %v7195_v4 = vpop.f32.mrb[201].mxu1  ;;  %v13672_v32 = vpop.f32.mrb[208].mxu0 }
 0xb23   : > { %v13674_v50 = vpop.f32.mrb[202].mxu1  ;;  %v13676_v19 = vpop.f32.mrb[209].mxu0 }
 0xb24   : > { %7095 = vrot.lane.b32.xlu1 %v7003_v7, %s9707_s19  ;;  %v13679_v40 = vpop.f32.mrb[203].mxu1  ;;  %v13681_v24 = vpop.f32.mrb[210].mxu0 }
 0xb25   : > { %v13683_v21 = vpop.f32.mrb[211].mxu0 }
 0xb26   : > { %7093 = vrot.lane.b32.xlu0 %v7001_v16, %s9707_s19 }
 0xb28   : > { %7071 = vrot.lane.b32.xlu1 %v7005_v26, %s9705_s17 }
 0xb29   : > { %v13687_v54 = vpop.f32.mrb[204].mxu1 }
 0xb2a   : > { %6923 = vrot.lane.b32.xlu0 %v6841_v57, %s9706_s18  ;;  %v13690_v33 = vpop.f32.mrb[205].mxu1 }
 0xb2b   : > { %v13692_v30 = vpop.f32.mrb[206].mxu1 }
 0xb2c   : > { %7099 = vrot.lane.b32.xlu1 %v7005_v26, %s9707_s19  ;;  %v13695_v7 = vpop.f32.mrb[207].mxu1 }
 0xb2e   : > { %7101 = vrot.lane.b32.xlu0 %v7007_v45, %s9707_s19 }
 0xb30   : > { %6925 = vrot.lane.b32.xlu1 %v6843_v5, %s9706_s18 }
 0xb31   : > { %v13699_v49 = vpop.f32.mrb[208].mxu1 }
 0xb32   : > { %6931 = vrot.lane.b32.xlu0 %v6847_v44, %s9706_s18  ;;  %v7549_v16 = vpop.f32.mrb[209].mxu1 }
 0xb33   : > { %v13702_v36 = vpop.f32.mrb[210].mxu1 }
 0xb34   : > { %6929 = vrot.lane.b32.xlu1 %v6845_v12, %s9706_s18  ;;  %v7553_v57 = vpop.f32.mrb[211].mxu1 }
 0xb36   : > { %7073 = vrot.lane.b32.xlu0 %v7011_v34, %s9705_s17 }
 0xb38   : > { %7107 = vrot.lane.b32.xlu1 %v7013_v37, %s9707_s19 }
 0xb39   : > { %v13707_v26 = vpop.f32.mrb[212].mxu1 }
 0xb3a   : > { %15316 = vst [vmem:[#allocation54_spill] sm:$0xff] %v13707_v26  ;;  %7105 = vrot.lane.b32.xlu0 %v7011_v34, %s9707_s19  ;;  %v13710_v45 = vpop.f32.mrb[213].mxu1 }
 0xb3b   : > { %15317 = vst [vmem:[#allocation18_spill] sm:$0xff] %v13710_v45  ;;  %v13712_v5 = vpop.f32.mrb[214].mxu1 }
 0xb3c   : > { %15318 = vst [vmem:[#allocation3_spill] sm:$0xff] %v13712_v5  ;;  %7075 = vrot.lane.b32.xlu1 %v7015_v25, %s9705_s17  ;;  %v13715_v44 = vpop.f32.mrb[215].mxu1 }
 0xb3d   : > { %15319 = vst [vmem:[#allocation38_spill] sm:$0xff] %v13715_v44 }
 0xb3e   : > { %7113 = vrot.lane.b32.xlu0 %v7017_v9, %s9707_s19 }
 0xb40   : > { %7111 = vrot.lane.b32.xlu1 %v7015_v25, %s9707_s19 }
 0xb42   : > { %7251 = vrot.lane.b32.xlu0 %v7183_v38, %s9705_s17 }
 0xb44   : > { %v13720_v12 = vpop.permute.xlu0 %6127  ;;  %7277 = vrot.lane.b32.xlu1 %v7185_v17, %s9708_s20 }
 0xb45   : > { %15320 = vst [vmem:[#allocation7_spill] sm:$0xff] %v13720_v12  ;;  %v13824_v45 = vsel %vm561_vm2, %v13720_v12, %v13583_v8 }
 0xb46   : > { %v13723_v37 = vpop.permute.xlu1 %6130  ;;  %7275 = vrot.lane.b32.xlu0 %v7183_v38, %s9708_s20  ;;  %15330 = vst [vmem:[#allocation10_spill] sm:$0xff] %v13824_v45 }
 0xb47   : > { %15321 = vst [vmem:[#allocation8_spill] sm:$0xff] %v13723_v37 }
 0xb48   : > { %v13726_v34 = vpop.permute.xlu0 %6139  ;;  %7253 = vrot.lane.b32.xlu1 %v7187_v52, %s9705_s17 }
 0xb49   : > { %15322 = vst [vmem:[#allocation41_spill] sm:$0xff] %v13726_v34 }
 0xb4a   : > { %v13729_v3 = vpop.permute.xlu1 %6141  ;;  %7283 = vrot.lane.b32.xlu0 %v7189_v2, %s9708_s20 }
 0xb4b   : > { %15323 = vst [vmem:[#allocation23_spill] sm:$0xff] %v13729_v3 }
 0xb4c   : > { %v13732_v9 = vpop.permute.xlu0 %6265  ;;  %7281 = vrot.lane.b32.xlu1 %v7187_v52, %s9708_s20 }
 0xb4d   : > { %v6267_v8 = vsel %vm561_vm2, %v13732_v9, %v13600_v10 }
 0xb4e   : > { %v13735_v25 = vpop.permute.xlu1 %6268  ;;  %7433 = vrot.lane.b32.xlu0 %v7365_v23, %s9705_s17 }
 0xb50   : > { %v13738_v17 = vpop.permute.xlu0 %6277  ;;  %7459 = vrot.lane.b32.xlu1 %v7367_v63, %s9709_s21  ;;  %v13756_v63 = vpop.f32.mrb[212].mxu0 }
 0xb51   : > { %15328 = vst [vmem:[#allocation53_spill] sm:$0xff] %v13756_v63  ;;  %v6293_v10 = vsel %vm561_vm2, %v13738_v17, %v13732_v9 }
 0xb52   : > { %v13741_v38 = vpop.permute.xlu1 %6279  ;;  %7457 = vrot.lane.b32.xlu0 %v7365_v23, %s9709_s21  ;;  %v13761_v23 = vpop.f32.mrb[213].mxu0 }
 0xb54   : > { %v13744_v29 = vpop.permute.xlu0 %6133  ;;  %7435 = vrot.lane.b32.xlu1 %v7369_v48, %s9705_s17 }
 0xb55   : > { %15324 = vst [vmem:[#allocation16_spill] sm:$0xff] %v13744_v29 }
 0xb56   : > { %v13747_v2 = vpop.permute.xlu1 %6136  ;;  %7255 = vrot.lane.b32.xlu0 %v7193_v14, %s9705_s17 }
 0xb57   : > { %15325 = vst [vmem:[#allocation39_spill] sm:$0xff] %v13747_v2 }
 0xb58   : > { %v13750_v52 = vpop.permute.xlu0 %6143  ;;  %7463 = vrot.lane.b32.xlu1 %v7369_v48, %s9709_s21  ;;  %v13771_v48 = vpop.f32.mrb[214].mxu0 }
 0xb59   : > { %15326 = vst [vmem:[#allocation33_spill] sm:$0xff] %v13750_v52  ;;  %15329 = vst [vmem:[#allocation42_spill] sm:$0xff] %v13771_v48 }
 0xb5a   : > { %v13753_v55 = vpop.permute.xlu1 %6145  ;;  %7287 = vrot.lane.b32.xlu0 %v7193_v14, %s9708_s20 }
 0xb5b   : > { %15327 = vst [vmem:[#allocation11_spill] sm:$0xff] %v13753_v55 }
 0xb5c   : > { %v13758_v27 = vpop.permute.xlu0 %6271  ;;  %7289 = vrot.lane.b32.xlu1 %v7195_v4, %s9708_s20  ;;  %v13777_v4 = vpop.f32.mrb[215].mxu0 }
 0xb5e   : > { %v13763_v3 = vpop.permute.xlu1 %6274  ;;  %7465 = vrot.lane.b32.xlu0 %v13667_v46, %s9709_s21 }
 0xb60   : > { %v13767_v52 = vpop.permute.xlu0 %6281  ;;  %7257 = vrot.lane.b32.xlu1 %v13674_v50, %s9705_s17 }
 0xb62   : > { %v13773_v14 = vpop.permute.xlu1 %6283  ;;  %7295 = vrot.lane.b32.xlu0 %v13679_v40, %s9708_s20 }
 0xb64   : > { %v13779_v55 = vpop.permute.xlu0 %6471  ;;  %7293 = vrot.lane.b32.xlu1 %v13674_v50, %s9708_s20 }
 0xb66   : > { %v13783_v46 = vpop.permute.xlu1 %6474  ;;  %7437 = vrot.lane.b32.xlu0 %v13672_v32, %s9705_s17 }
 0xb68   : > { %v13787_v34 = vpop.permute.xlu0 %6483  ;;  %7439 = vrot.lane.b32.xlu1 %v13681_v24, %s9705_s17 }
 0xb6a   : > { %v13791_v44 = vpop.permute.xlu1 %6485  ;;  %7615 = vrot.lane.b32.xlu0 %v13699_v49, %s9705_s17 }
 0xb6c   : > { %v13795_v40 = vpop.permute.xlu0 %6677  ;;  %7641 = vrot.lane.b32.xlu1 %v7549_v16, %s9710_s22 }
 0xb6e   : > { %v13798_v50 = vpop.permute.xlu1 %6680  ;;  %7639 = vrot.lane.b32.xlu0 %v13699_v49, %s9710_s22 }
 0xb70   : > { %v13802_v48 = vpop.permute.xlu0 %6477  ;;  %7617 = vrot.lane.b32.xlu1 %v13702_v36, %s9705_s17 }
 0xb72   : > { %v13806_v61 = vpop.permute.xlu1 %6480  ;;  %7647 = vrot.lane.b32.xlu0 %v7553_v57, %s9710_s22 }
 0xb74   : > { %v13809_v63 = vpop.permute.xlu0 %6689  ;;  %7645 = vrot.lane.b32.xlu1 %v13702_v36, %s9710_s22  ;;  %v13833_v36 = vsel %vm561_vm2, %v13723_v37, %v13587_v51 }
 0xb76   : > { %v13813_v16 = vpop.permute.xlu1 %6691  ;;  %7619 = vrot.lane.b32.xlu0 %v13707_v26, %s9705_s17 }
 0xb78   : > { %v13817_v49 = vpop.permute.xlu0 %6487  ;;  %7621 = vrot.lane.b32.xlu1 %v13712_v5, %s9705_s17  ;;  %v6270_v5 = vsel %vm561_vm2, %v13735_v25, %v13609_v1  ;;  %v13866_v1 = vsel %vm561_vm2, %v13747_v2, %v13585_v43  ;;  %v6276_v43 = vsel %vm561_vm2, %v13763_v3, %v13604_v0  ;;  %v6273_v0 = vsel %vm561_vm2, %v13758_v27, %v13597_v13 }
 0xb79   : > { %15332 = vst [vmem:[#allocation43_spill] sm:$0xff] %v13866_v1  ;;  %v6295_v13 = vsel %vm561_vm2, %v13767_v52, %v13758_v27 }
 0xb7a   : > { %v13826_v57 = vpop.permute.xlu1 %6489  ;;  %6147 = vrot.lane.b32.xlu0 %v13824_v45, %s9705_s17 }
 0xb7c   : > { %v13835_v59 = vpop.permute.xlu0 %6683  ;;  %6149 = vrot.lane.b32.xlu1 %v13833_v36, %s9705_s17 }
 0xb7e   : > { %v13842_v12 = vpop.permute.xlu1 %6686  ;;  %6285 = vrot.lane.b32.xlu0 %v6267_v8, %s9705_s17 }
 0xb80   : > { %v13848_v26 = vpop.permute.xlu0 %6693  ;;  %6287 = vrot.lane.b32.xlu1 %v6270_v5, %s9705_s17 }
 0xb82   : > { %v13851_v51 = vpop.permute.xlu1 %6695  ;;  %6313 = vrot.lane.b32.xlu0 %v6267_v8, %s9711_s23 }
 0xb84   : > { %v13854_v37 = vpop.permute.xlu0 %6927  ;;  %6319 = vrot.lane.b32.xlu1 %v6270_v5, %s9711_s23  ;;  %v13875_v5 = vsel %vm561_vm2, %v13744_v29, %v13581_v41 }
 0xb85   : > { %15331 = vst [vmem:[#allocation12_spill] sm:$0xff] %v13854_v37 }
 0xb86   : > { %v13860_v15 = vpop.permute.xlu1 %6913  ;;  %6315 = vrot.lane.b32.xlu0 %v6293_v10, %s9711_s23  ;;  %v6294_v10 = vsel %vm561_vm2, %v13741_v38, %v13735_v25  ;;  %v6476_v25 = vsel %vm561_vm2, %v13783_v46, %v13613_v28  ;;  %v6682_v28 = vsel %vm561_vm2, %v13798_v50, %v13633_v53  ;;  %v6473_v53 = vsel %vm561_vm2, %v13779_v55, %v13606_v35 }
 0xb87   : > { %v6706_v35 = vsel %vm561_vm2, %v13813_v16, %v13798_v50  ;;  %v6500_v50 = vsel %vm561_vm2, %v13791_v44, %v13783_v46 }
 0xb88   : > { %v13868_v45 = vpop.permute.xlu0 %6911  ;;  %6153 = vrot.lane.b32.xlu1 %v13866_v1, %s9705_s17 }
 0xb8a   : > { %v13877_v9 = vpop.permute.xlu1 %6933  ;;  %6151 = vrot.lane.b32.xlu0 %v13875_v5, %s9705_s17 }
 0xb8b   : > { %15333 = vst [vmem:[#allocation9_spill] sm:$0xff] %v13877_v9 }
 0xb8c   : > { %v13884_v8 = vpop.permute.xlu0 %6915  ;;  %6291 = vrot.lane.b32.xlu1 %v6276_v43, %s9705_s17 }
 0xb8e   : > { %v13890_v37 = vpop.permute.xlu1 %6917  ;;  %6321 = vrot.lane.b32.xlu0 %v6294_v10, %s9711_s23 }
 0xb90   : > { %v13893_v41 = vpop.permute.xlu0 %6919  ;;  %6331 = vrot.lane.b32.xlu1 %v6276_v43, %s9711_s23 }
 0xb92   : > { %v13899_v9 = vpop.permute.xlu1 %6921  ;;  %6289 = vrot.lane.b32.xlu0 %v6273_v0, %s9705_s17 }
 0xb93   : > { %15334 = vst [vmem:[#allocation57_spill] sm:$0xff] %v13899_v9 }
 0xb94   : > { %v13905_v2 = vpop.permute.xlu0 %7069  ;;  %6493 = vrot.lane.b32.xlu1 %v6476_v25, %s9705_s17 }
 0xb96   : > { %v13908_v10 = vpop.permute.xlu1 %7095  ;;  %6325 = vrot.lane.b32.xlu0 %v6273_v0, %s9711_s23  ;;  %v6296_v0 = vsel %vm561_vm2, %v13773_v14, %v13763_v3  ;;  %v6482_v3 = vsel %vm561_vm2, %v13806_v61, %v13611_v20  ;;  %v6499_v20 = vsel %vm561_vm2, %v13787_v34, %v13779_v55  ;;  %v6679_v55 = vsel %vm561_vm2, %v13795_v40, %v13628_v62 }
 0xb97   : > { %v6479_v62 = vsel %vm561_vm2, %v13802_v48, %v13602_v18 }
 0xb98   : > { %v13911_v43 = vpop.permute.xlu0 %7093  ;;  %6525 = vrot.lane.b32.xlu1 %v6476_v25, %s9712_s24 }
 0xb9a   : > { %v7072_v29 = vpop.permute.xlu1 %7071  ;;  %6327 = vrot.lane.b32.xlu0 %v6295_v13, %s9711_s23 }
 0xb9c   : > { %v13921_v1 = vpop.permute.xlu0 %6923  ;;  %6699 = vrot.lane.b32.xlu1 %v6682_v28, %s9705_s17 }
 0xb9d   : > { %15335 = vst [vmem:[#allocation14_spill] sm:$0xff] %v13921_v1 }
 0xb9e   : > { %v13927_v25 = vpop.permute.xlu1 %7099  ;;  %6333 = vrot.lane.b32.xlu0 %v6296_v0, %s9711_s23 }
 0xba0   : > { %v13930_v27 = vpop.permute.xlu0 %7101  ;;  %6737 = vrot.lane.b32.xlu1 %v6682_v28, %s9713_s25 }
 0xba2   : > { %v13936_v13 = vpop.permute.xlu1 %6925  ;;  %6491 = vrot.lane.b32.xlu0 %v6473_v53, %s9705_s17 }
 0xba3   : > { %15336 = vst [vmem:[#allocation60_spill] sm:$0xff] %v13936_v13 }
 0xba4   : > { %v13942_v9 = vpop.permute.xlu0 %6931  ;;  %6497 = vrot.lane.b32.xlu1 %v6482_v3, %s9705_s17 }
 0xba5   : > { %15337 = vst [vmem:[#allocation5_spill] sm:$0xff] %v13942_v9 }
 0xba6   : > { %v13945_v0 = vpop.permute.xlu1 %6929  ;;  %6519 = vrot.lane.b32.xlu0 %v6473_v53, %s9712_s24 }
 0xba7   : > { %15338 = vst [vmem:[#allocation2_spill] sm:$0xff] %v13945_v0 }
 0xba8   : > { %v13951_v28 = vpop.permute.xlu0 %7073  ;;  %6739 = vrot.lane.b32.xlu1 %v6706_v35, %s9713_s25 }
 0xbaa   : > { %v13957_v13 = vpop.permute.xlu1 %7107  ;;  %6521 = vrot.lane.b32.xlu0 %v6499_v20, %s9712_s24 }
 0xbab   : > { %15339 = vst [vmem:[#allocation27_spill] sm:$0xff] %v13957_v13 }
 0xbac   : > { %v13960_v9 = vpop.permute.xlu0 %7105  ;;  %6537 = vrot.lane.b32.xlu1 %v6482_v3, %s9712_s24 }
 0xbad   : > { %15340 = vst [vmem:[#allocation24_spill] sm:$0xff] %v13960_v9 }
 0xbae   : > { %v7076_v53 = vpop.permute.xlu1 %7075  ;;  %6527 = vrot.lane.b32.xlu0 %v6500_v50, %s9712_s24 }
 0xbb0   : > { %v13967_v35 = vpop.permute.xlu0 %7113  ;;  %7471 = vrot.lane.b32.xlu1 %v13676_v19, %s9709_s21  ;;  %v6688_v19 = vsel %vm561_vm2, %v13842_v12, %v13630_v6 }
 0xbb1   : > { %15341 = vst [vmem:[#allocation25_spill] sm:$0xff] %v13967_v35 }
 0xbb2   : > { %v13974_v20 = vpop.permute.xlu1 %7111  ;;  %6697 = vrot.lane.b32.xlu0 %v6679_v55, %s9705_s17 }
 0xbb3   : > { %15342 = vst [vmem:[#allocation6_spill] sm:$0xff] %v13974_v20  ;;  %v6708_v20 = vsel %vm561_vm2, %v13851_v51, %v13842_v12  ;;  %v7080_v12 = vsel %vm561_vm2, %v7076_v53, %v13652_v39  ;;  %v6685_v39 = vsel %vm561_vm2, %v13835_v59, %v13625_v31 }
 0xbb4   : > { %v13977_v3 = vpop.permute.xlu0 %7251  ;;  %7475 = vrot.lane.b32.xlu1 %v13681_v24, %s9709_s21 }
 0xbb6   : > { %v13981_v46 = vpop.permute.xlu1 %7277  ;;  %6729 = vrot.lane.b32.xlu0 %v6679_v55, %s9713_s25  ;;  %v6705_v55 = vsel %vm561_vm2, %v13809_v63, %v13795_v40  ;;  %v6501_v40 = vsel %vm561_vm2, %v13817_v49, %v13802_v48 }
 0xbb8   : > { %v13987_v50 = vpop.permute.xlu0 %7275  ;;  %6703 = vrot.lane.b32.xlu1 %v6688_v19, %s9705_s17 }
 0xbba   : > { %v7254_v35 = vpop.permute.xlu1 %7253  ;;  %6495 = vrot.lane.b32.xlu0 %v6479_v62, %s9705_s17 }
 0xbbb   : > { %v7260_v48 = vsel %vm561_vm2, %v7254_v35, %v13661_v47 }
 0xbbc   : > { %v13994_v24 = vpop.permute.xlu0 %7283  ;;  %6753 = vrot.lane.b32.xlu1 %v6688_v19, %s9713_s25  ;;  %v7078_v19 = vsel %vm561_vm2, %v7072_v29, %v13657_v42  ;;  %v6502_v29 = vsel %vm561_vm2, %v13826_v57, %v13806_v61 }
 0xbbe   : > { %v14000_v6 = vpop.permute.xlu1 %7281  ;;  %6731 = vrot.lane.b32.xlu0 %v6705_v55, %s9713_s25 }
 0xbc0   : > { %v7434_v18 = vpop.permute.xlu0 %7433  ;;  %6755 = vrot.lane.b32.xlu1 %v6708_v20, %s9713_s25 }
 0xbc2   : > { %v14007_v13 = vpop.permute.xlu1 %7459  ;;  %6531 = vrot.lane.b32.xlu0 %v6479_v62, %s9712_s24 }
 0xbc4   : > { %v14012_v0 = vpop.permute.xlu0 %7457  ;;  %7103 = vrot.lane.b32.xlu1 %v7078_v19, %s9707_s19 }
 0xbc6   : > { %v7436_v55 = vpop.permute.xlu1 %7435  ;;  %6533 = vrot.lane.b32.xlu0 %v6501_v40, %s9712_s24 }
 0xbc7   : > { %v7442_v61 = vsel %vm561_vm2, %v7436_v55, %v13695_v7 }
 0xbc8   : > { %v7256_v20 = vpop.permute.xlu0 %7255  ;;  %7115 = vrot.lane.b32.xlu1 %v7080_v12, %s9707_s19 }
 0xbca   : > { %v14025_v42 = vpop.permute.xlu1 %7463  ;;  %6539 = vrot.lane.b32.xlu0 %v6502_v29, %s9712_s24 }
 0xbcc   : > { %v14030_v62 = vpop.permute.xlu0 %7287  ;;  %7285 = vrot.lane.b32.xlu1 %v7260_v48, %s9708_s20 }
 0xbcd   : > { %15343 = vst [vmem:[#allocation15_spill] sm:$0xff] %v14030_v62 }
 0xbce   : > { %v14036_v53 = vpop.permute.xlu1 %7289  ;;  %6701 = vrot.lane.b32.xlu0 %v6685_v39, %s9705_s17 }
 0xbcf   : > { %15344 = vst [vmem:[#allocation45_spill] sm:$0xff] %v14036_v53 }
 0xbd0   : > { %v14041_v19 = vpop.permute.xlu0 %7465  ;;  %7467 = vrot.lane.b32.xlu1 %v7442_v61, %s9709_s21 }
 0xbd2   : > { %v7258_v47 = vpop.permute.xlu1 %7257  ;;  %7469 = vrot.lane.b32.xlu0 %v13672_v32, %s9709_s21 }
 0xbd3   : > { %v7262_v35 = vsel %vm561_vm2, %v7258_v47, %v13659_v11  ;;  %v6707_v11 = vsel %vm561_vm2, %v13848_v26, %v13835_v59  ;;  %v7079_v59 = vsel %vm561_vm2, %v13951_v28, %v13645_v60 }
 0xbd4   : > { %v14048_v40 = vpop.permute.xlu0 %7295  ;;  %7297 = vrot.lane.b32.xlu1 %v7262_v35, %s9708_s20 }
 0xbd5   : > { %15345 = vst [vmem:[#allocation20_spill] sm:$0xff] %v14048_v40 }
 0xbd6   : > { %v14051_v31 = vpop.permute.xlu1 %7293  ;;  %7477 = vrot.lane.b32.xlu0 %v13683_v21, %s9709_s21  ;;  %v7077_v21 = vsel %vm561_vm2, %v13905_v2, %v13648_v22  ;;  %v7259_v22 = vsel %vm561_vm2, %v13977_v3, %v13654_v56 }
 0xbd7   : > { %15346 = vst [vmem:[#allocation35_spill] sm:$0xff] %v14051_v31 }
 0xbd8   : > { %v7438_v7 = vpop.permute.xlu0 %7437 }
 0xbda   : > { %v7440_v55 = vpop.permute.xlu1 %7439  ;;  %6745 = vrot.lane.b32.xlu0 %v6685_v39, %s9713_s25 }
 0xbdb   : > { %v7444_v12 = vsel %vm561_vm2, %v7440_v55, %v13692_v30  ;;  %v7441_v55 = vsel %vm561_vm2, %v7434_v18, %v13690_v33  ;;  %v7443_v33 = vsel %vm561_vm2, %v7438_v7, %v13687_v54 }
 0xbdc   : > { %v7616_v32 = vpop.permute.xlu0 %7615  ;;  %7479 = vrot.lane.b32.xlu1 %v7444_v12, %s9709_s21  ;;  %v7261_v12 = vsel %vm561_vm2, %v7256_v20, %v13650_v58 }
 0xbde   : > { %v14062_v29 = vpop.permute.xlu1 %7641  ;;  %6747 = vrot.lane.b32.xlu0 %v6707_v11, %s9713_s25 }
 0xbe0   : > { %v14065_v48 = vpop.permute.xlu0 %7639 }
 0xbe2   : > { %v7618_v39 = vpop.permute.xlu1 %7617  ;;  %7097 = vrot.lane.b32.xlu0 %v7077_v21, %s9707_s19 }
 0xbe3   : > { %v7624_v30 = vsel %vm561_vm2, %v7618_v39, %v13777_v4 }
 0xbe4   : > { %v14073_v61 = vpop.permute.xlu0 %7647  ;;  %7649 = vrot.lane.b32.xlu1 %v7624_v30, %s9710_s22 }
 0xbe6   : > { %v14079_v47 = vpop.permute.xlu1 %7645  ;;  %7109 = vrot.lane.b32.xlu0 %v7079_v59, %s9707_s19 }
 0xbe8   : > { %v14082_v35 = vpop.permute.xlu0 %7619 }
 0xbea   : > { %7279 = vrot.lane.b32.xlu0 %v7259_v22, %s9708_s20  ;;  %v14088_v2 = vpop.permute.xlu1 %7621 }
 0xbec   : > { %v14090_v4 = vpop.permute.xlu0 %6147 }
 0xbee   : > { %7461 = vrot.lane.b32.xlu0 %v7441_v55, %s9709_s21  ;;  %v14095_v60 = vpop.permute.xlu1 %6149 }
 0xbf0   : > { %v6286_v28 = vpop.permute.xlu0 %6285 }
 0xbf1   : > { %v6297_v56 = vsel %vm561_vm2, %v6286_v28, %v13738_v17  ;;  %v7623_v17 = vsel %vm561_vm2, %v7616_v32, %v13761_v23 }
 0xbf2   : > { %7291 = vrot.lane.b32.xlu0 %v7261_v12, %s9708_s20  ;;  %6317 = vrot.lane.b32.xlu1 %v6297_v56, %s9711_s23  ;;  %v6288_v3 = vpop.permute.xlu1 %6287 }
 0xbf3   : > { %v6298_v18 = vsel %vm561_vm2, %v6288_v3, %v13741_v38 }
 0xbf4   : > { %v6314_v11 = vpop.permute.xlu0 %6313 }
 0xbf6   : > { %7473 = vrot.lane.b32.xlu0 %v7443_v33, %s9709_s21  ;;  %6323 = vrot.lane.b32.xlu1 %v6298_v18, %s9711_s23  ;;  %v6320_v58 = vpop.permute.xlu1 %6319 }
 0xbf8   : > { %v14109_v20 = vpop.permute.xlu0 %6315 }
 0xbfa   : > { %7643 = vrot.lane.b32.xlu0 %v7623_v17, %s9710_s22  ;;  %v14114_v21 = vpop.permute.xlu1 %6153 }
 0xbfb   : > { %15347 = vst [vmem:[#allocation52_spill] sm:$0xff] %v14114_v21 }
 0xbfc   : > { %v14116_v39 = vpop.permute.xlu0 %6151 }
 0xbfd   : > { %15348 = vst [vmem:[#allocation49_spill] sm:$0xff] %v14116_v39 }
 0xbfe   : > { %v6292_v54 = vpop.permute.xlu1 %6291 }
 0xbff   : > { %v6300_v23 = vsel %vm561_vm2, %v6292_v54, %v13773_v14 }
 0xc00   : > { %v14118_v7 = vpop.permute.xlu0 %6321 }
 0xc02   : > { %v14120_v38 = vpop.permute.xlu1 %6331 }
 0xc04   : > { %v6290_v30 = vpop.permute.xlu0 %6289 }
 0xc05   : > { %v6299_v59 = vsel %vm561_vm2, %v6290_v30, %v13767_v52 }
 0xc06   : > { %6329 = vrot.lane.b32.xlu1 %v6299_v59, %s9711_s23  ;;  %v6494_v22 = vpop.permute.xlu1 %6493 }
 0xc07   : > { %v6504_v14 = vsel %vm561_vm2, %v6494_v22, %v13791_v44  ;;  %v6339_v22 = vsel %vm788_vm3, %v6320_v58, %v14118_v7 }
 0xc08   : > { %v14125_v55 = vpop.permute.xlu0 %6325 }
 0xc0a   : > { %6335 = vrot.lane.b32.xlu1 %v6300_v23, %s9711_s23  ;;  %v6526_v32 = vpop.permute.xlu1 %6525 }
 0xc0c   : > { %v14130_v28 = vpop.permute.xlu0 %6327 }
 0xc0d   : > { %15349 = vst [vmem:[#allocation36_spill] sm:$0xff] %v14130_v28 }
 0xc0e   : > { %v6700_v12 = vpop.permute.xlu1 %6699 }
 0xc10   : > { %v14132_v56 = vpop.permute.xlu0 %6333 }
 0xc12   : > { %v6738_v3 = vpop.permute.xlu1 %6737 }
 0xc14   : > { %v6492_v33 = vpop.permute.xlu0 %6491 }
 0xc15   : > { %v6503_v52 = vsel %vm561_vm2, %v6492_v33, %v13787_v34 }
 0xc16   : > { %6523 = vrot.lane.b32.xlu1 %v6503_v52, %s9712_s24  ;;  %v6498_v18 = vpop.permute.xlu1 %6497 }
 0xc18   : > { %v6520_v17 = vpop.permute.xlu0 %6519 }
 0xc1a   : > { %6529 = vrot.lane.b32.xlu1 %v6504_v14, %s9712_s24  ;;  %v14140_v54 = vpop.permute.xlu1 %6739  ;;  %v6710_v14 = vsel %vm561_vm2, %v6700_v12, %v13813_v16 }
 0xc1c   : > { %v14142_v30 = vpop.permute.xlu0 %6521 }
 0xc1d   : > { %v6543_v58 = vsel %vm1011_vm4, %v6520_v17, %v14142_v30 }
 0xc1e   : > { %v14144_v59 = vpop.permute.xlu1 %6537 }
 0xc20   : > { %v14146_v23 = vpop.permute.xlu0 %6527 }
 0xc22   : > { %v14148_v31 = vpop.permute.xlu1 %7471 }
 0xc23   : > { %15350 = vst [vmem:[#allocation47_spill] sm:$0xff] %v14148_v31  ;;  %v6545_v31 = vsel %vm1011_vm4, %v6526_v32, %v14146_v23 }
 0xc24   : > { %v6698_v34 = vpop.permute.xlu0 %6697 }
 0xc25   : > { %6735 = vrot.lane.b32.xlu0 %v6698_v34, %s9713_s25  ;;  %v6709_v33 = vsel %vm561_vm2, %v6698_v34, %v13809_v63  ;;  %v6337_v63 = vsel %vm788_vm3, %v6314_v11, %v14109_v20  ;;  %v6360_v34 = vadd.f32 %v6339_v22, %v13833_v36  ;;  %v6506_v36 = vsel %vm561_vm2, %v6498_v18, %v13826_v57 }
 0xc26   : > { %6733 = vrot.lane.b32.xlu1 %v6709_v33, %s9713_s25  ;;  %v14154_v44 = vpop.permute.xlu1 %7475 }
 0xc27   : > { %15351 = vst [vmem:[#allocation4_spill] sm:$0xff] %v14154_v44  ;;  %v6566_v44 = vadd.f32 %v6545_v31, %v6360_v34 }
 0xc28   : > { %v6730_v52 = vpop.permute.xlu0 %6729 }
 0xc29   : > { %6741 = vrot.lane.b32.xlu0 %v6710_v14, %s9713_s25  ;;  %v15352_v14 = vld [vmem:[#allocation10_spill] sm:$0xff] }
 0xc2a   : > { %6743 = vrot.lane.b32.xlu1 %v6700_v12, %s9713_s25  ;;  %v6704_v40 = vpop.permute.xlu1 %6703  ;;  %v6357_v53 = vadd.f32 %v6337_v63, %v15352_v14  ;;  %v6764_v12 = vsel %vm1246_vm5, %v6738_v3, %v14140_v54 }
 0xc2b   : > { %v6788_v17 = vadd.f32 %v6764_v12, %v6566_v44 }
 0xc2c   : > { %v6496_v33 = vpop.permute.xlu0 %6495  ;;  %v6563_v11 = vadd.f32 %v6543_v58, %v6357_v53 }
 0xc2d   : > { %v6505_v16 = vsel %vm561_vm2, %v6496_v33, %v13817_v49  ;;  %v6958_v3 = vadd.f32 %v13890_v37, %v6788_v17 }
 0xc2e   : > { %6535 = vrot.lane.b32.xlu1 %v6505_v16, %s9712_s24  ;;  %v14173_v32 = vpop.permute.xlu1 %6753 }
 0xc2f   : > { %15353 = vst [vmem:[#allocation58_spill] sm:$0xff] %v14173_v32  ;;  %v7140_v57 = vadd.f32 %v13927_v25, %v6958_v3  ;;  %v6712_v3 = vsel %vm561_vm2, %v6704_v40, %v13851_v51  ;;  %v6341_v51 = vsel %vm788_vm3, %v14125_v55, %v14130_v28  ;;  %v15368_v32 = vld [vmem:[#allocation42_spill] sm:$0xff] }
 0xc30   : > { %v14177_v21 = vpop.permute.xlu0 %6731 }
 0xc31   : > { %v6761_v31 = vsel %vm1246_vm5, %v6730_v52, %v14177_v21  ;;  %v7322_v16 = vadd.f32 %v14000_v6, %v7140_v57 }
 0xc32   : > { %v6785_v49 = vadd.f32 %v6761_v31, %v6563_v11  ;;  %6541 = vrot.lane.b32.xlu1 %v6506_v36, %s9712_s24  ;;  %v14184_v22 = vpop.permute.xlu1 %6755 }
 0xc33   : > { %v7504_v36 = vadd.f32 %v14025_v42, %v7322_v16  ;;  %v15359_v16 = vld [vmem:[#allocation54_spill] sm:$0xff] }
 0xc34   : > { %v6955_v63 = vadd.f32 %v13868_v45, %v6785_v49  ;;  %v6532_v34 = vpop.permute.xlu0 %6531 }
 0xc36   : > { %v14188_v53 = vpop.permute.xlu1 %7103  ;;  %v7137_v33 = vadd.f32 %v13911_v43, %v6955_v63 }
 0xc38   : > { %v14191_v58 = vpop.permute.xlu0 %6533  ;;  %v7319_v44 = vadd.f32 %v13987_v50, %v7137_v33  ;;  %v7686_v33 = vadd.f32 %v14079_v47, %v7504_v36 }
 0xc39   : > { %15354 = vst [vmem:[#allocation51_spill] sm:$0xff] %v14191_v58 }
 0xc3a   : > { %v14194_v18 = vpop.permute.xlu1 %7115  ;;  %v7501_v12 = vadd.f32 %v14012_v0, %v7319_v44 }
 0xc3b   : > { %15355 = vst [vmem:[#allocation34_spill] sm:$0xff] %v14194_v18  ;;  %v15362_v18 = vld [vmem:[#allocation18_spill] sm:$0xff] }
 0xc3c   : > { %v14197_v52 = vpop.permute.xlu0 %6539  ;;  %v7683_v31 = vadd.f32 %v14065_v48, %v7501_v12  ;;  %v15360_v12 = vld [vmem:[#allocation13_spill] sm:$0xff] }
 0xc3e   : > { %v14200_v14 = vpop.permute.xlu1 %7285 }
 0xc40   : > { %v6702_v11 = vpop.permute.xlu0 %6701 }
 0xc41   : > { %v6711_v17 = vsel %vm561_vm2, %v6702_v11, %v13848_v26  ;;  %6751 = vrot.lane.b32.xlu0 %v6702_v11, %s9713_s25  ;;  %v15357_v26 = vld [vmem:[#allocation21_spill] sm:$0xff]  ;;  %v7698_v11 = vadd.f32 %v7686_v33, %v15360_v12 }
 0xc42   : > { %6749 = vrot.lane.b32.xlu1 %v6711_v17, %s9713_s25  ;;  %v14209_v49 = vpop.permute.xlu1 %7467  ;;  %v7695_v57 = vadd.f32 %v7683_v31, %v15357_v26 }
 0xc43   : > { %v7710_v33 = vmax.f32 %v7698_v11, 0.0  ;;  %v15369_v11 = vld [vmem:[#allocation38_spill] sm:$0xff] }
 0xc44   : > { %v14211_v63 = vpop.permute.xlu0 %7469  ;;  %v7707_v36 = vmax.f32 %v7695_v57, 0.0  ;;  %v15366_v57 = vld [vmem:[#allocation32_spill] sm:$0xff] }
 0xc45   : > { %15356 = vst [vmem:[#allocation29_spill] sm:$0xff] %v14211_v63  ;;  %6757 = vrot.lane.b32.xlu0 %v6712_v3, %s9713_s25 }
 0xc46   : > { %6759 = vrot.lane.b32.xlu1 %v6704_v40, %s9713_s25  ;;  %v14224_v17 = vpop.permute.xlu1 %7297  ;;  %v15363_v40 = vld [vmem:[#allocation53_spill] sm:$0xff]  ;;  %v7719_v28 = vmul.f32 %v7707_v36, %v15366_v57 }
 0xc47   : > { %15361 = vst [vmem:[#allocation17_spill] sm:$0xff] %v14224_v17  ;;  %v7625_v31 = vsel %vm561_vm2, %v14082_v35, %v15363_v40  ;;  %v6363_v17 = vadd.f32 %v6341_v51, %v13875_v5  ;;  %v7722_v51 = vmul.f32 %v7710_v33, %v15366_v57  ;;  %v15375_v57 = vld [vmem:[#allocation7_spill] sm:$0xff] }
 0xc48   : > { %v14219_v44 = vpop.permute.xlu0 %7477 }
 0xc49   : > { %15358 = vst [vmem:[#allocation50_spill] sm:$0xff] %v14219_v44  ;;  %7651 = vrot.lane.b32.xlu0 %v15359_v16, %s9710_s22  ;;  %v6547_v16 = vsel %vm1011_vm4, %v6532_v34, %v14191_v58  ;;  %v7626_v34 = vsel %vm561_vm2, %v14088_v2, %v15368_v32 }
 0xc4a   : > { %7653 = vrot.lane.b32.xlu1 %v15362_v18, %s9710_s22  ;;  %v15364_v18 = vld [vmem:[#allocation3_spill] sm:$0xff]  ;;  %v6569_v35 = vadd.f32 %v6547_v16, %v6363_v17 }
 0xc4c   : > { %v6746_v3 = vpop.permute.xlu0 %6745 }
 0xc4d   : > { %7655 = vrot.lane.b32.xlu0 %v7625_v31, %s9710_s22 }
 0xc4e   : > { %7657 = vrot.lane.b32.xlu1 %v15364_v18, %s9710_s22  ;;  %v7480_v39 = vpop.permute.xlu1 %7479 }
 0xc4f   : > { %v14242_v55 = vsel %vm2034_vm9, %v14219_v44, %v7480_v39  ;;  %v7731_v39 = vpack.c.bf16 %v7722_v51, %v7719_v28 }
 0xc50   : > { %15365 = vst [vmem:[#allocation46_spill] sm:$0xff] %v14242_v55  ;;  %v14245_v40 = vpop.permute.xlu0 %6747  ;;  %v15376_v55 = vld [vmem:[#allocation41_spill] sm:$0xff] }
 0xc51   : > { %15367 = vst [vmem:[#allocation30_spill] sm:$0xff] %v14245_v40  ;;  %v6767_v5 = vsel %vm1246_vm5, %v6746_v3, %v14245_v40  ;;  %7659 = vrot.lane.b32.xlu0 %v15369_v11, %s9710_s22  ;;  %v6155_v44 = vsel %vm561_vm2, %v15376_v55, %v15375_v57 }
 0xc52   : > { %v6791_v31 = vadd.f32 %v6767_v5, %v6569_v35  ;;  %7661 = vrot.lane.b32.xlu1 %v7626_v34, %s9710_s22 }
 0xc54   : > { %v6961_v17 = vadd.f32 %v13921_v1, %v6791_v31  ;;  %v7098_v3 = vpop.permute.xlu0 %7097 }
 0xc55   : > { %7743 = vrot.lane.b32.xlu0 %v7731_v39, %s9714_s11 }
 0xc56   : > { %v7143_v36 = vadd.f32 %v13960_v9, %v6961_v17  ;;  %v14265_v18 = vpop.permute.xlu1 %7649  ;;  %v15378_v9 = vld [vmem:[#allocation23_spill] sm:$0xff] }
 0xc58   : > { %v7325_v2 = vadd.f32 %v14030_v62, %v7143_v36  ;;  %v14263_v16 = vpop.permute.xlu0 %7109 }
 0xc59   : > { %15371 = vst [vmem:[#allocation26_spill] sm:$0xff] %v14263_v16 }
 0xc5a   : > { %v14261_v32 = vadd.f32 %v14211_v63, %v7325_v2  ;;  %v6159_v63 = vsel %vm561_vm2, %v14090_v4, %v15376_v55  ;;  %v6160_v4 = vsel %vm561_vm2, %v14095_v60, %v15378_v9 }
 0xc5c   : > { %15370 = vst [vmem:[#allocation55_spill] sm:$0xff] %v14261_v32  ;;  %v7280_v35 = vpop.permute.xlu0 %7279 }
 0xc60   : > { %v7462_v28 = vpop.permute.xlu0 %7461 }
 0xc64   : > { %v6318_v33 = vpop.permute.xlu1 %6317  ;;  %v14269_v11 = vpop.permute.xlu0 %7291 }
 0xc65   : > { %15372 = vst [vmem:[#allocation37_spill] sm:$0xff] %v14269_v11  ;;  %v6338_v17 = vsel %vm788_vm3, %v14109_v20, %v6318_v33  ;;  %v6359_v62 = vadd.f32 %v6318_v33, %v6159_v63  ;;  %v15377_v20 = vld [vmem:[#allocation8_spill] sm:$0xff] }
 0xc66   : > { %v6358_v11 = vadd.f32 %v6338_v17, %v6155_v44  ;;  %v6156_v40 = vsel %vm561_vm2, %v15378_v9, %v15377_v20  ;;  %v6937_v9 = vsel %vm1437_vm6, %v13890_v37, %v13893_v41  ;;  %v15379_v37 = vld [vmem:[#allocation57_spill] sm:$0xff]  ;;  %v7301_v17 = vsel %vm1835_vm8, %v14000_v6, %v13994_v24 }
 0xc68   : > { %v6324_v34 = vpop.permute.xlu1 %6323  ;;  %v14273_v31 = vpop.permute.xlu0 %7473 }
 0xc69   : > { %15374 = vst [vmem:[#allocation28_spill] sm:$0xff] %v14273_v31  ;;  %v6340_v31 = vsel %vm788_vm3, %v14118_v7, %v6324_v34  ;;  %v6362_v44 = vadd.f32 %v6324_v34, %v6160_v4 }
 0xc6c   : > { %v7644_v36 = vpop.permute.xlu0 %7643 }
 0xc78   : > { %v14267_v5 = vpop.permute.xlu1 %6329 }
 0xc7c   : > { %v14271_v51 = vpop.permute.xlu1 %6335 }
 0xc7d   : > { %15373 = vst [vmem:[#allocation59_spill] sm:$0xff] %v14271_v51 }
 0xc88   : > { %v6524_v39 = vpop.permute.xlu1 %6523 }
 0xc89   : > { %v6544_v32 = vsel %vm1011_vm4, %v14142_v30, %v6524_v39  ;;  %v6565_v51 = vadd.f32 %v6524_v39, %v6359_v62  ;;  %v6361_v30 = vadd.f32 %v6340_v31, %v6156_v40  ;;  %v6935_v62 = vsel %vm1437_vm6, %v13868_v45, %v13860_v15 }
 0xc8a   : > { %v6564_v1 = vadd.f32 %v6544_v32, %v6358_v11  ;;  %v7117_v45 = vsel %vm1636_vm7, %v13911_v43, %v13908_v10  ;;  %v6938_v11 = vsel %vm1437_vm6, %v13893_v41, %v15379_v37  ;;  %v7299_v43 = vsel %vm1835_vm8, %v13987_v50, %v13981_v46  ;;  %v15384_v37 = vld [vmem:[#allocation36_spill] sm:$0xff] }
 0xc8b   : > { %v7482_v50 = vsel %vm2034_vm9, %v14007_v13, %v7462_v28 }
 0xc8c   : > { %v6530_v2 = vpop.permute.xlu1 %6529 }
 0xc8d   : > { %v6546_v57 = vsel %vm1011_vm4, %v14146_v23, %v6530_v2  ;;  %v6936_v23 = vsel %vm1437_vm6, %v13860_v15, %v13884_v8  ;;  %v7118_v15 = vsel %vm1636_vm7, %v13908_v10, %v7098_v3  ;;  %v7300_v10 = vsel %vm1835_vm8, %v13981_v46, %v7280_v35 }
 0xc8e   : > { %v6567_v60 = vadd.f32 %v6546_v57, %v6361_v30  ;;  %v7481_v57 = vsel %vm2034_vm9, %v14012_v0, %v14007_v13  ;;  %v7483_v35 = vsel %vm2034_vm9, %v14025_v42, %v14041_v19  ;;  %v7302_v0 = vsel %vm1835_vm8, %v13994_v24, %v14200_v14 }
 0xc8f   : > { %v7665_v42 = vsel %vm2233_vm10, %v14079_v47, %v14073_v61  ;;  %v6343_v24 = vsel %vm788_vm3, %v14120_v38, %v14132_v56  ;;  %v7666_v47 = vsel %vm2233_vm10, %v14073_v61, %v14265_v18 }
 0xc97   : > { %v6736_v16 = vpop.permute.xlu0 %6735 }
 0xc98   : > { %v6734_v58 = vpop.permute.xlu1 %6733 }
 0xc99   : > { %v6762_v63 = vsel %vm1246_vm5, %v14177_v21, %v6734_v58  ;;  %v6763_v7 = vsel %vm1246_vm5, %v6734_v58, %v6736_v16  ;;  %v6568_v21 = vadd.f32 %v6530_v2, %v6362_v44  ;;  %v7484_v44 = vsel %vm2034_vm9, %v14041_v19, %v14209_v49 }
 0xc9a   : > { %v6786_v55 = vadd.f32 %v6762_v63, %v6564_v1  ;;  %v6787_v33 = vadd.f32 %v6763_v7, %v6565_v51  ;;  %v7663_v63 = vsel %vm2233_vm10, %v14065_v48, %v14062_v29  ;;  %v6549_v19 = vsel %vm1011_vm4, %v14144_v59, %v14197_v52 }
 0xc9b   : > { %v6742_v40 = vpop.permute.xlu0 %6741 }
 0xc9c   : > { %v6956_v32 = vadd.f32 %v6935_v62, %v6786_v55  ;;  %v6957_v58 = vadd.f32 %v6936_v23, %v6787_v33  ;;  %v6765_v1 = vsel %vm1246_vm5, %v14140_v54, %v6742_v40  ;;  %v6744_v16 = vpop.permute.xlu1 %6743  ;;  %v7119_v54 = vsel %vm1636_vm7, %v13927_v25, %v13930_v27  ;;  %v15380_v62 = vld [vmem:[#allocation43_spill] sm:$0xff] }
 0xc9d   : > { %v6789_v8 = vadd.f32 %v6765_v1, %v6567_v60  ;;  %v6766_v34 = vsel %vm1246_vm5, %v6742_v40, %v6744_v16  ;;  %v7120_v25 = vsel %vm1636_vm7, %v13930_v27, %v14188_v53  ;;  %v7664_v27 = vsel %vm2233_vm10, %v14062_v29, %v7644_v36  ;;  %v15381_v1 = vld [vmem:[#allocation31_spill] sm:$0xff]  ;;  %v15382_v16 = vld [vmem:[#allocation58_spill] sm:$0xff] }
 0xc9e   : > { %v7138_v51 = vadd.f32 %v7117_v45, %v6956_v32  ;;  %v7139_v31 = vadd.f32 %v7118_v15, %v6957_v58  ;;  %v6790_v39 = vadd.f32 %v6766_v34, %v6568_v21  ;;  %v9715_v55 = vmov 0.0   ;;  %v15383_v45 = vld [vmem:[#allocation22_spill] sm:$0xff] }
 0xc9f   : > { %v6959_v3 = vadd.f32 %v6937_v9, %v6789_v8  ;;  %9516 = vmatprep.subr.bf16.mxu1 %v9715_v55  ;;  %v6366_v23 = vadd.f32 %v6343_v24, %v15380_v62  ;;  %v6770_v59 = vsel %vm1246_vm5, %v15382_v16, %v14184_v22  ;;  %v15397_v24 = vld [vmem:[#allocation30_spill] sm:$0xff]  ;;  %9520 = vmatprep.mubr.msk.bf16.mxu1 %vm9716_vm12, %v9715_v55 }
 0xca0   : > { %v7320_v41 = vadd.f32 %v7299_v43, %v7138_v51  ;;  %v7321_v2 = vadd.f32 %v7300_v10, %v7139_v31  ;;  %v6960_v20 = vadd.f32 %v6938_v11, %v6790_v39  ;;  %v6536_v60 = vpop.permute.xlu1 %6535  ;;  %v15385_v39 = vld [vmem:[#allocation16_spill] sm:$0xff]  ;;  %v15387_v10 = vld [vmem:[#allocation49_spill] sm:$0xff] }
 0xca1   : > { %v7141_v46 = vadd.f32 %v7119_v54, %v6959_v3  ;;  %v15386_v54 = vld [vmem:[#allocation33_spill] sm:$0xff] }
 0xca2   : > { %v7502_v6 = vadd.f32 %v7481_v57, %v7320_v41  ;;  %v7503_v4 = vadd.f32 %v7482_v50, %v7321_v2  ;;  %v7142_v30 = vadd.f32 %v7120_v25, %v6960_v20  ;;  %v6157_v43 = vsel %vm561_vm2, %v15386_v54, %v15385_v39  ;;  %v15389_v57 = vld [vmem:[#allocation59_spill] sm:$0xff] }
 0xca3   : > { %v7323_v13 = vadd.f32 %v7301_v17, %v7141_v46  ;;  %v6161_v3 = vsel %vm561_vm2, %v15387_v10, %v15386_v54  ;;  %v15388_v17 = vld [vmem:[#allocation51_spill] sm:$0xff]  ;;  %v6344_v25 = vsel %vm788_vm3, %v14132_v56, %v15389_v57 }
 0xca4   : > { %v7684_v53 = vadd.f32 %v7663_v63, %v7502_v6  ;;  %v7685_v28 = vadd.f32 %v7664_v27, %v7503_v4  ;;  %v7324_v7 = vadd.f32 %v7302_v0, %v7142_v30  ;;  %v6542_v51 = vpop.permute.xlu1 %6541  ;;  %v6548_v41 = vsel %vm1011_vm4, %v15388_v17, %v6536_v60  ;;  %v15390_v50 = vld [vmem:[#allocation39_spill] sm:$0xff]  ;;  %v15392_v6 = vld [vmem:[#allocation60_spill] sm:$0xff]  ;;  %v15393_v4 = vld [vmem:[#allocation14_spill] sm:$0xff] }
 0xca5   : > { %v7505_v48 = vadd.f32 %v7483_v35, %v7323_v13  ;;  %v6365_v20 = vadd.f32 %v14267_v5, %v6161_v3  ;;  %v15391_v46 = vld [vmem:[#allocation11_spill] sm:$0xff]  ;;  %v6939_v30 = vsel %vm1437_vm6, %v15393_v4, %v15392_v6  ;;  %v15394_v63 = vld [vmem:[#allocation2_spill] sm:$0xff]  ;;  %v15395_v13 = vld [vmem:[#allocation12_spill] sm:$0xff]  ;;  %v6550_v56 = vsel %vm1011_vm4, %v14197_v52, %v6542_v51 }
 0xca6   : > { %v7506_v29 = vadd.f32 %v7484_v44, %v7324_v7  ;;  %v7696_v14 = vadd.f32 %v7684_v53, %v15357_v26  ;;  %v7697_v36 = vadd.f32 %v7685_v28, %v15357_v26  ;;  %v6572_v26 = vadd.f32 %v6549_v19, %v6366_v23  ;;  %v15400_v23 = vld [vmem:[#allocation27_spill] sm:$0xff]  ;;  %v15409_v17 = vld [vmem:[#allocation37_spill] sm:$0xff] }
 0xca7   : > { %v7687_v33 = vadd.f32 %v7665_v42, %v7505_v48  ;;  %v6158_v35 = vsel %vm561_vm2, %v15391_v46, %v15390_v50  ;;  %v6571_v28 = vadd.f32 %v6536_v60, %v6365_v20  ;;  %v15396_v42 = vld [vmem:[#allocation52_spill] sm:$0xff]  ;;  %v15408_v10 = vld [vmem:[#allocation35_spill] sm:$0xff] }
 0xca8   : > { %v7688_v49 = vadd.f32 %v7666_v47, %v7506_v29  ;;  %v7708_v38 = vmax.f32 %v7696_v14, 0.0  ;;  %v7709_v21 = vmax.f32 %v7697_v36, 0.0  ;;  %v6794_v34 = vadd.f32 %v6770_v59, %v6572_v26  ;;  %v15398_v36 = vld [vmem:[#allocation9_spill] sm:$0xff]  ;;  %v15410_v50 = vld [vmem:[#allocation55_spill] sm:$0xff] }
 0xca9   : > { %v7699_v9 = vadd.f32 %v7687_v33, %v15360_v12  ;;  %v6162_v44 = vsel %vm561_vm2, %v15396_v42, %v15391_v46  ;;  %v6367_v48 = vadd.f32 %v6344_v25, %v6158_v35  ;;  %v15399_v47 = vld [vmem:[#allocation5_spill] sm:$0xff] }
 0xcaa   : > { %v7700_v40 = vadd.f32 %v7688_v49, %v15360_v12  ;;  %v7720_v61 = vmul.f32 %v7708_v38, %v15381_v1  ;;  %v7721_v15 = vmul.f32 %v7709_v21, %v15383_v45  ;;  %v6342_v12 = vsel %vm788_vm3, %v15384_v37, %v14267_v5  ;;  %v15402_v21 = vld [vmem:[#allocation6_spill] sm:$0xff]  ;;  %v15403_v59 = vld [vmem:[#allocation25_spill] sm:$0xff] }
 0xcab   : > { %v7711_v32 = vmax.f32 %v7699_v9, 0.0  ;;  %v6364_v2 = vadd.f32 %v6342_v12, %v6157_v43  ;;  %v6964_v0 = vadd.f32 %v15394_v63, %v6794_v34  ;;  %v6940_v5 = vsel %vm1437_vm6, %v15392_v6, %v15395_v13  ;;  %v15401_v9 = vld [vmem:[#allocation24_spill] sm:$0xff] }
 0xcac   : > { %v7712_v58 = vmax.f32 %v7700_v40, 0.0  ;;  %v6942_v33 = vsel %vm1437_vm6, %v15399_v47, %v15398_v36  ;;  %v6368_v19 = vadd.f32 %v15389_v57, %v6162_v44  ;;  %v6941_v52 = vsel %vm1437_vm6, %v15394_v63, %v15399_v47  ;;  %v15417_v47 = vld [vmem:[#allocation4_spill] sm:$0xff] }
 0xcad   : > { %v7723_v18 = vmul.f32 %v7711_v32, %v15381_v1  ;;  %v6570_v53 = vadd.f32 %v6548_v41, %v6364_v2  ;;  %v7121_v38 = vsel %vm1636_vm7, %v15401_v9, %v15400_v23  ;;  %v6573_v60 = vadd.f32 %v6550_v56, %v6367_v48  ;;  %v15415_v56 = vld [vmem:[#allocation17_spill] sm:$0xff] }
 0xcae   : > { %v7724_v8 = vmul.f32 %v7712_v58, %v15383_v45  ;;  %v7146_v26 = vadd.f32 %v15402_v21, %v6964_v0  ;;  %v6574_v32 = vadd.f32 %v6542_v51, %v6368_v19  ;;  %v15412_v0 = vld [vmem:[#allocation47_spill] sm:$0xff] }
 0xcaf   : > { %v7732_v11 = vpack.c.bf16 %v7723_v18, %v7720_v61 }
 0xcb0   : > { %v7733_v31 = vpack.c.bf16 %v7724_v8, %v7721_v15  ;;  %v7123_v15 = vsel %vm1636_vm7, %v15402_v21, %v15403_v59  ;;  %v15404_v8 = vld [vmem:[#allocation26_spill] sm:$0xff]  ;;  %v7328_v57 = vadd.f32 %v15408_v10, %v7146_v26 }
 0xcb1   : > { %7745 = vrot.lane.b32.xlu0 %v7732_v11, %s9714_s11  ;;  %v7122_v34 = vsel %vm1636_vm7, %v15400_v23, %v15404_v8  ;;  %v15405_v11 = vld [vmem:[#allocation45_spill] sm:$0xff]  ;;  %v15419_v21 = vld [vmem:[#allocation46_spill] sm:$0xff] }
 0xcb2   : > { %7747 = vrot.lane.b32.xlu1 %v7733_v31, %s9714_s11  ;;  %v15406_v31 = vld [vmem:[#allocation15_spill] sm:$0xff]  ;;  %v7304_v41 = vsel %vm1835_vm8, %v15405_v11, %v15409_v17 }
 0xcb3   : > { %v6752_v27 = vpop.permute.xlu0 %6751  ;;  %v7303_v51 = vsel %vm1835_vm8, %v15406_v31, %v15405_v11 }
 0xcb4   : > { %v6750_v7 = vpop.permute.xlu1 %6749 }
 0xcb5   : > { %v6768_v29 = vsel %vm1246_vm5, %v15397_v24, %v6750_v7  ;;  %v6769_v14 = vsel %vm1246_vm5, %v6750_v7, %v6752_v27  ;;  %v15413_v27 = vld [vmem:[#allocation29_spill] sm:$0xff]  ;;  %v15416_v24 = vld [vmem:[#allocation40_spill] sm:$0xff] }
 0xcb6   : > { %v6792_v49 = vadd.f32 %v6768_v29, %v6570_v53  ;;  %v6793_v62 = vadd.f32 %v6769_v14, %v6571_v28  ;;  %v7485_v13 = vsel %vm2034_vm9, %v15413_v27, %v15412_v0 }
 0xcb7   : > { %v6758_v40 = vpop.permute.xlu0 %6757 }
 0xcb8   : > { %v6962_v58 = vadd.f32 %v6939_v30, %v6792_v49  ;;  %v6963_v61 = vadd.f32 %v6940_v5, %v6793_v62  ;;  %v6771_v18 = vsel %vm1246_vm5, %v14184_v22, %v6758_v40  ;;  %v6760_v16 = vpop.permute.xlu1 %6759  ;;  %v15407_v22 = vld [vmem:[#allocation20_spill] sm:$0xff]  ;;  %v15411_v30 = vld [vmem:[#allocation34_spill] sm:$0xff] }
 0xcb9   : > { %v6795_v37 = vadd.f32 %v6771_v18, %v6573_v60  ;;  %v6772_v12 = vsel %vm1246_vm5, %v6758_v40, %v6760_v16  ;;  %v7305_v3 = vsel %vm1835_vm8, %v15408_v10, %v15407_v22  ;;  %v7124_v63 = vsel %vm1636_vm7, %v15403_v59, %v15411_v30  ;;  %v15414_v5 = vld [vmem:[#allocation28_spill] sm:$0xff]  ;;  %v15418_v60 = vld [vmem:[#allocation50_spill] sm:$0xff] }
 0xcba   : > { %v7144_v39 = vadd.f32 %v7121_v38, %v6962_v58  ;;  %v7145_v54 = vadd.f32 %v7122_v34, %v6963_v61  ;;  %v6796_v43 = vadd.f32 %v6772_v12, %v6574_v32  ;;  %v7486_v53 = vsel %vm2034_vm9, %v15412_v0, %v15414_v5  ;;  %v15420_v61 = vld [vmem:[#allocation44_spill] sm:$0xff] }
 0xcbb   : > { %v6965_v2 = vadd.f32 %v6941_v52, %v6795_v37  ;;  %v7652_v20 = vpop.permute.xlu0 %7651  ;;  %v7306_v7 = vsel %vm1835_vm8, %v15407_v22, %v15415_v56  ;;  %v7487_v40 = vsel %vm2034_vm9, %v15417_v47, %v15418_v60  ;;  %v15422_v56 = vmov 0  }
 0xcbc   : > { %v6966_v25 = vadd.f32 %v6942_v33, %v6796_v43  ;;  %v7689_v46 = vadd.f32 %v7652_v20, %v15410_v50  ;;  %v7326_v35 = vadd.f32 %v7303_v51, %v7144_v39  ;;  %v7654_v6 = vpop.permute.xlu1 %7653  ;;  %v7327_v4 = vadd.f32 %v7304_v41, %v7145_v54  ;;  %v15421_v51 = vld [vmem:[#allocation32_spill] sm:$0xff] }
 0xcbd   : > { %v7147_v28 = vadd.f32 %v7123_v15, %v6965_v2  ;;  %v7667_v14 = vsel %vm2233_vm10, %v7652_v20, %v7654_v6  ;;  %v7510_v33 = vadd.f32 %v15417_v47, %v7328_v57 }
 0xcbe   : > { %v7148_v42 = vadd.f32 %v7124_v63, %v6966_v25  ;;  %v7508_v44 = vadd.f32 %v7485_v13, %v7326_v35  ;;  %v7509_v48 = vadd.f32 %v7486_v53, %v7327_v4  ;;  %v7701_v29 = vadd.f32 %v7689_v46, %v15416_v24  ;;  %v396_v13 = vld [vmem:[%s14764_s6] sm:$0x3] }
 0xcbf   : > { %v7656_v36 = vpop.permute.xlu0 %7655  ;;  %v7329_v19 = vadd.f32 %v7305_v3, %v7147_v28  ;;  %v8864_v28 = vld [vmem:[%s14764_s6 + $0x2] sm:$0x3] }
 0xcc0   : > { %v7690_v49 = vadd.f32 %v7667_v14, %v7508_v44  ;;  %v7668_v62 = vsel %vm2233_vm10, %v7654_v6, %v7656_v36  ;;  %v7658_v52 = vpop.permute.xlu1 %7657  ;;  %v7330_v23 = vadd.f32 %v7306_v7, %v7148_v42  ;;  %v7713_v32 = vmax.f32 %v7701_v29, 0.0  ;;  %v8865_v7 = vld [vmem:[%s14764_s6 + $0x4] sm:$0x3]  ;;  %v8866_v42 = vld [vmem:[%s14764_s6 + $0x6] sm:$0x3] }
 0xcc1   : > { %v7691_v9 = vadd.f32 %v7668_v62, %v7509_v48  ;;  %v7692_v38 = vadd.f32 %v7658_v52, %v7510_v33  ;;  %v7511_v59 = vadd.f32 %v7487_v40, %v7329_v19  ;;  %v8867_v44 = vld [vmem:[%s14764_s6 + $0x8] sm:$0x3]  ;;  %v8868_v48 = vld [vmem:[%s14764_s6 + $0xa] sm:$0x3]  ;;  %v8870_v29 = vld [vmem:[%s14764_s6 + $0xe] sm:$0x3] }
 0xcc2   : > { %v7512_v26 = vadd.f32 %v15419_v21, %v7330_v23  ;;  %v7702_v58 = vadd.f32 %v7690_v49, %v15416_v24  ;;  %v7725_v39 = vmul.f32 %v7713_v32, %v15421_v51  ;;  %v8871_v14 = vld [vmem:[%s14764_s6 + $0x10] sm:$0x3] }
 0xcc3   : > { %v7704_v18 = vadd.f32 %v7692_v38, %v15420_v61  ;;  %v7660_v16 = vpop.permute.xlu0 %7659  ;;  %v7703_v15 = vadd.f32 %v7691_v9, %v15416_v24  ;;  %v8869_v24 = vld [vmem:[%s14764_s6 + $0xc] sm:$0x3] }
 0xcc4   : > { %v7669_v8 = vsel %vm2233_vm10, %v7658_v52, %v7660_v16  ;;  %v7662_v34 = vpop.permute.xlu1 %7661  ;;  %v7714_v54 = vmax.f32 %v7702_v58, 0.0 }
 0xcc5   : > { %v7716_v37 = vmax.f32 %v7704_v18, 0.0  ;;  %v7693_v12 = vadd.f32 %v7669_v8, %v7511_v59  ;;  %v7670_v11 = vsel %vm2233_vm10, %v7660_v16, %v7662_v34  ;;  %v7715_v10 = vmax.f32 %v7703_v15, 0.0 }
 0xcc6   : > { %v7694_v31 = vadd.f32 %v7670_v11, %v7512_v26  ;;  %v7726_v20 = vmul.f32 %v7714_v54, %v15381_v1 }
 0xcc7   : > { %v7728_v43 = vmul.f32 %v7716_v37, %v15421_v51  ;;  %v7705_v22 = vadd.f32 %v7693_v12, %v15420_v61  ;;  %v7727_v25 = vmul.f32 %v7715_v10, %v15383_v45  ;;  %v7744_v6 = vpop.permute.xlu0 %7743 }
 0xcc8   : > { %v7706_v3 = vadd.f32 %v7694_v31, %v15420_v61 }
 0xcc9   : > { %v7717_v17 = vmax.f32 %v7705_v22, 0.0  ;;  %v7734_v41 = vpack.c.bf16 %v7728_v43, %v7725_v39 }
 0xcca   : > { %v7718_v2 = vmax.f32 %v7706_v3, 0.0 }
 0xccb   : > { %v7729_v57 = vmul.f32 %v7717_v17, %v15381_v1 }
 0xccc   : > { %v7730_v50 = vmul.f32 %v7718_v2, %v15383_v45 }
 0xccd   : > { %v7735_v46 = vpack.c.bf16 %v7729_v57, %v7726_v20 }
 0xcce   : > { %v7736_v35 = vpack.c.bf16 %v7730_v50, %v7727_v25 }
 0xccf   : > { %7751 = vrot.lane.b32.xlu1 %v7735_v46, %s9714_s11 }
 0xcd0   : > { %7753 = vrot.lane.b32.xlu0 %v7736_v35, %s9714_s11 }
 0xcd3   : > { %7749 = vrot.lane.b32.xlu1 %v7734_v41, %s9714_s11 }
 0xd23   : > { %v7746_v4 = vpop.permute.xlu0 %7745 }
 0xd24   : > { %v14480_v30 = vpop.permute.xlu1 %7747  ;;  %v14488_v45 = vsel %vm2380_vm11, %v7744_v6, %v7746_v4 }
 0xd25   : > { %9517 = vmatpush3.bf16.msra.mxu1 %v14480_v30  ;;  %v14485_v1 = vsel %vm2380_vm11, %v7746_v4, %v14480_v30 }
 0xd26   : > { %7768 = vmatprep.subr.bf16.mxu0 %v14485_v1  ;;  %9518 = vmatprep.subr.bf16.mxu1 %v9715_v55 }
 0xd27   : > { %7769 = vmatpush1.bf16.msra.mxu0 %v14488_v45 }
 0xd41   : > { %v7752_v63 = vpop.permute.xlu1 %7751 }
 0xd42   : > { %v14493_v0 = vpop.permute.xlu0 %7753 }
 0xd43   : > { %9519 = vmatpush3.bf16.msra.mxu1 %v14493_v0  ;;  %v14498_v27 = vsel %vm2380_vm11, %v7752_v63, %v14493_v0 }
 0xd44   : > { %7770 = vmatprep.subr.bf16.mxu0 %v14498_v27  ;;  %9524 = vmatprep.subr.bf16.mxu1 %v9715_v55 }
 0xd45   : > { %v7750_v5 = vpop.permute.xlu1 %7749 }
 0xd46   : > { %v14506_v53 = vsel %vm2380_vm11, %v7750_v5, %v7752_v63  ;;  %9521 = vmatmul.mubr.msk.bf16.vlgmr.msra.gmra.mrb[216].mxu1 %vm1835_vm8, %v396_v13 }
 0xd47   : > { %7771 = vmatpush1.bf16.msra.mxu0 %v14506_v53  ;;  %9525 = vmatpush3.bf16.msra.mxu1 %v14480_v30 }
 0xd48   : > { %7861 = vmatprep.subr.bf16.mxu0 %v14485_v1  ;;  %9526 = vmatprep.subr.bf16.mxu1 %v9715_v55 }
 0xd49   : > { %9528 = vmatprep.mubr.msk.bf16.mxu1 %vm9716_vm12, %v9715_v55 }
 0xd4a   : > { %9064 = vmatmul.mubr.msk.bf16.vlgmr.msra.gmra.mrb[216].mxu0 %vm1835_vm8, %v396_v13 }
 0xd4b   : > { %7862 = vmatpush1.bf16.msra.mxu0 %v14488_v45  ;;  %9527 = vmatpush3.bf16.msra.mxu1 %v14493_v0 }
 0xd4c   : > { %7863 = vmatprep.subr.bf16.mxu0 %v14498_v27  ;;  %9532 = vmatprep.subr.bf16.mxu1 %v9715_v55 }
 0xd4d   : > { %7893 = vmatprep.mubr.bf16.mxu0 %v15422_v56 }
 0xd4e   : > { %9529 = vmatmul.mubr.msk.bf16.vlgmr.msra.gmra.mrb[220].mxu1 %vm1835_vm8, %v8864_v28 }
 0xd4f   : > { %7864 = vmatpush1.bf16.msra.mxu0 %v14506_v53  ;;  %9533 = vmatpush3.bf16.msra.mxu1 %v14480_v30 }
 0xd50   : > { %7971 = vmatprep.subr.bf16.mxu0 %v14485_v1  ;;  %9534 = vmatprep.subr.bf16.mxu1 %v9715_v55 }
 0xd51   : > { %9536 = vmatprep.mubr.msk.bf16.mxu1 %vm9716_vm12, %v9715_v55 }
 0xd52   : > { %9066 = vmatmul.mubr.msk.bf16.vlgmr.msra.gmra.mrb[220].mxu0 %vm1835_vm8, %v8864_v28 }
 0xd53   : > { %7972 = vmatpush1.bf16.msra.mxu0 %v14488_v45  ;;  %9535 = vmatpush3.bf16.msra.mxu1 %v14493_v0 }
 0xd54   : > { %7973 = vmatprep.subr.bf16.mxu0 %v14498_v27  ;;  %9540 = vmatprep.subr.bf16.mxu1 %v9715_v55 }
 0xd55   : > { %8003 = vmatprep.mubr.bf16.mxu0 %v15422_v56 }
 0xd56   : > { %9537 = vmatmul.mubr.msk.bf16.vlgmr.msra.gmra.mrb[224].mxu1 %vm1835_vm8, %v8865_v7 }
 0xd57   : > { %7974 = vmatpush1.bf16.msra.mxu0 %v14506_v53  ;;  %9541 = vmatpush3.bf16.msra.mxu1 %v14480_v30 }
 0xd58   : > { %8081 = vmatprep.subr.bf16.mxu0 %v14485_v1  ;;  %9542 = vmatprep.subr.bf16.mxu1 %v9715_v55 }
 0xd59   : > { %9544 = vmatprep.mubr.msk.bf16.mxu1 %vm9716_vm12, %v9715_v55 }
 0xd5a   : > { %9068 = vmatmul.mubr.msk.bf16.vlgmr.msra.gmra.mrb[224].mxu0 %vm1835_vm8, %v8865_v7 }
 0xd5b   : > { %8082 = vmatpush1.bf16.msra.mxu0 %v14488_v45  ;;  %9543 = vmatpush3.bf16.msra.mxu1 %v14493_v0 }
 0xd5c   : > { %8083 = vmatprep.subr.bf16.mxu0 %v14498_v27  ;;  %9548 = vmatprep.subr.bf16.mxu1 %v9715_v55 }
 0xd5d   : > { %8113 = vmatprep.mubr.bf16.mxu0 %v15422_v56 }
 0xd5e   : > { %9545 = vmatmul.mubr.msk.bf16.vlgmr.msra.gmra.mrb[228].mxu1 %vm1835_vm8, %v8866_v42 }
 0xd5f   : > { %8084 = vmatpush1.bf16.msra.mxu0 %v14506_v53  ;;  %9549 = vmatpush3.bf16.msra.mxu1 %v14480_v30 }
 0xd60   : > { %8195 = vmatprep.subr.bf16.mxu0 %v14485_v1  ;;  %9550 = vmatprep.subr.bf16.mxu1 %v9715_v55 }
 0xd61   : > { %9552 = vmatprep.mubr.msk.bf16.mxu1 %vm9716_vm12, %v9715_v55 }
 0xd62   : > { %9070 = vmatmul.mubr.msk.bf16.vlgmr.msra.gmra.mrb[228].mxu0 %vm1835_vm8, %v8866_v42 }
 0xd63   : > { %8196 = vmatpush1.bf16.msra.mxu0 %v14488_v45  ;;  %9551 = vmatpush3.bf16.msra.mxu1 %v14493_v0 }
 0xd64   : > { %8197 = vmatprep.subr.bf16.mxu0 %v14498_v27  ;;  %9556 = vmatprep.subr.bf16.mxu1 %v9715_v55 }
 0xd65   : > { %8227 = vmatprep.mubr.bf16.mxu0 %v15422_v56 }
 0xd66   : > { %9553 = vmatmul.mubr.msk.bf16.vlgmr.msra.gmra.mrb[232].mxu1 %vm1835_vm8, %v8867_v44 }
 0xd67   : > { %8198 = vmatpush1.bf16.msra.mxu0 %v14506_v53  ;;  %9557 = vmatpush3.bf16.msra.mxu1 %v14480_v30 }
 0xd68   : > { %8296 = vmatprep.subr.bf16.mxu0 %v14485_v1  ;;  %9558 = vmatprep.subr.bf16.mxu1 %v9715_v55 }
 0xd69   : > { %9560 = vmatprep.mubr.msk.bf16.mxu1 %vm9716_vm12, %v9715_v55 }
 0xd6a   : > { %9072 = vmatmul.mubr.msk.bf16.vlgmr.msra.gmra.mrb[232].mxu0 %vm1835_vm8, %v8867_v44 }
 0xd6b   : > { %8297 = vmatpush1.bf16.msra.mxu0 %v14488_v45  ;;  %9559 = vmatpush3.bf16.msra.mxu1 %v14493_v0 }
 0xd6c   : > { %8298 = vmatprep.subr.bf16.mxu0 %v14498_v27  ;;  %9564 = vmatprep.subr.bf16.mxu1 %v9715_v55 }
 0xd6d   : > { %8328 = vmatprep.mubr.bf16.mxu0 %v15422_v56 }
 0xd6e   : > { %9561 = vmatmul.mubr.msk.bf16.vlgmr.msra.gmra.mrb[236].mxu1 %vm1835_vm8, %v8868_v48 }
 0xd6f   : > { %8299 = vmatpush1.bf16.msra.mxu0 %v14506_v53  ;;  %9565 = vmatpush3.bf16.msra.mxu1 %v14480_v30 }
 0xd70   : > { %8400 = vmatprep.subr.bf16.mxu0 %v14485_v1  ;;  %9566 = vmatprep.subr.bf16.mxu1 %v9715_v55 }
 0xd71   : > { %9568 = vmatprep.mubr.msk.bf16.mxu1 %vm9716_vm12, %v9715_v55 }
 0xd72   : > { %9074 = vmatmul.mubr.msk.bf16.vlgmr.msra.gmra.mrb[236].mxu0 %vm1835_vm8, %v8868_v48 }
 0xd73   : > { %8401 = vmatpush1.bf16.msra.mxu0 %v14488_v45  ;;  %9567 = vmatpush3.bf16.msra.mxu1 %v14493_v0 }
 0xd74   : > { %8402 = vmatprep.subr.bf16.mxu0 %v14498_v27  ;;  %9572 = vmatprep.subr.bf16.mxu1 %v9715_v55 }
 0xd75   : > { %8432 = vmatprep.mubr.bf16.mxu0 %v15422_v56 }
 0xd76   : > { %9569 = vmatmul.mubr.msk.bf16.vlgmr.msra.gmra.mrb[240].mxu1 %vm1835_vm8, %v8869_v24 }
 0xd77   : > { %8403 = vmatpush1.bf16.msra.mxu0 %v14506_v53  ;;  %9573 = vmatpush3.bf16.msra.mxu1 %v14480_v30 }
 0xd78   : > { %8504 = vmatprep.subr.bf16.mxu0 %v14485_v1  ;;  %9574 = vmatprep.subr.bf16.mxu1 %v9715_v55 }
 0xd79   : > { %9576 = vmatprep.mubr.msk.bf16.mxu1 %vm9716_vm12, %v9715_v55 }
 0xd7a   : > { %9076 = vmatmul.mubr.msk.bf16.vlgmr.msra.gmra.mrb[240].mxu0 %vm1835_vm8, %v8869_v24 }
 0xd7b   : > { %8505 = vmatpush1.bf16.msra.mxu0 %v14488_v45  ;;  %9575 = vmatpush3.bf16.msra.mxu1 %v14493_v0 }
 0xd7c   : > { %8506 = vmatprep.subr.bf16.mxu0 %v14498_v27  ;;  %9580 = vmatprep.subr.bf16.mxu1 %v9715_v55 }
 0xd7d   : > { %8536 = vmatprep.mubr.bf16.mxu0 %v15422_v56 }
 0xd7e   : > { %9577 = vmatmul.mubr.msk.bf16.vlgmr.msra.gmra.mrb[244].mxu1 %vm1835_vm8, %v8870_v29 }
 0xd7f   : > { %8507 = vmatpush1.bf16.msra.mxu0 %v14506_v53  ;;  %9581 = vmatpush3.bf16.msra.mxu1 %v14480_v30 }
 0xd80   : > { %8608 = vmatprep.subr.bf16.mxu0 %v14485_v1  ;;  %9582 = vmatprep.subr.bf16.mxu1 %v9715_v55 }
 0xd81   : > { %9584 = vmatprep.mubr.msk.bf16.mxu1 %vm9716_vm12, %v9715_v55 }
 0xd82   : > { %9078 = vmatmul.mubr.msk.bf16.vlgmr.msra.gmra.mrb[244].mxu0 %vm1835_vm8, %v8870_v29 }
 0xd83   : > { %8609 = vmatpush1.bf16.msra.mxu0 %v14488_v45  ;;  %9583 = vmatpush3.bf16.msra.mxu1 %v14493_v0 }
 0xd84   : > { %8610 = vmatprep.subr.bf16.mxu0 %v14498_v27  ;;  %8640 = vmatprep.mubr.bf16.mxu0 %v15422_v56 }
 0xd86   : > { %9585 = vmatmul.mubr.msk.bf16.vlgmr.msra.gmra.mrb[248].mxu1 %vm1835_vm8, %v8871_v14 }
 0xd87   : > { %8611 = vmatpush1.bf16.msra.mxu0 %v14506_v53 }
 0xd8a   : > { %9080 = vmatmul.mubr.msk.bf16.vlgmr.msra.gmra.mrb[248].mxu0 %vm1835_vm8, %v8871_v14 }
 0xe19   : > { %v14638_v55 = vpop.f32.mrb[216].mxu1 }
 0xe1a   : > { %v9522_v36 = vpop.f32.mrb[217].mxu1 }
 0xe1b   : > { %v7846_v47 = vpop.f32.mrb[218].mxu1 }
 0xe1c   : > { %v9523_v33 = vpop.f32.mrb[219].mxu1 }
 0xe1d   : > { %v7802_v19 = vpop.f32.mrb[216].mxu0 }
 0xe1e   : > { %v14640_v49 = vpop.f32.mrb[217].mxu0 }
 0xe1f   : > { %v7806_v62 = vpop.f32.mrb[218].mxu0 }
 0xe20   : > { %v7807_v52 = vpop.f32.mrb[219].mxu0 }
 0xe21   : > { %v7936_v23 = vpop.f32.mrb[220].mxu1 }
 0xe22   : > { %v9530_v9 = vpop.f32.mrb[221].mxu1 }
 0xe23   : > { %v7939_v38 = vpop.f32.mrb[222].mxu1 }
 0xe24   : > { %v9531_v60 = vpop.f32.mrb[223].mxu1 }
 0xe25   : > { %v7895_v40 = vpop.f32.mrb[220].mxu0 }
 0xe26   : > { %7942 = vrot.lane.b32.xlu0 %v7895_v40, %s9705_s17  ;;  %v7897_v21 = vpop.f32.mrb[221].mxu0 }
 0xe27   : > { %v7899_v26 = vpop.f32.mrb[222].mxu0 }
 0xe28   : > { %v7900_v32 = vpop.f32.mrb[223].mxu0 }
 0xe29   : > { %v8046_v58 = vpop.f32.mrb[224].mxu1 }
 0xe2a   : > { %v9538_v61 = vpop.f32.mrb[225].mxu1 }
 0xe2b   : > { %v8049_v18 = vpop.f32.mrb[226].mxu1 }
 0xe2c   : > { %v9539_v16 = vpop.f32.mrb[227].mxu1 }
 0xe2d   : > { %v8005_v59 = vpop.f32.mrb[224].mxu0 }
 0xe2e   : > { %8052 = vrot.lane.b32.xlu1 %v8005_v59, %s9705_s17  ;;  %v8007_v15 = vpop.f32.mrb[225].mxu0 }
 0xe2f   : > { %v8009_v8 = vpop.f32.mrb[226].mxu0 }
 0xe30   : > { %v8010_v34 = vpop.f32.mrb[227].mxu0 }
 0xe31   : > { %v8156_v37 = vpop.f32.mrb[228].mxu1 }
 0xe32   : > { %7945 = vrot.lane.b32.xlu1 %v7897_v21, %s9705_s17  ;;  %v9546_v12 = vpop.f32.mrb[229].mxu1 }
 0xe33   : > { %v8159_v11 = vpop.f32.mrb[230].mxu1 }
 0xe34   : > { %v9547_v31 = vpop.f32.mrb[231].mxu1 }
 0xe35   : > { %v8115_v51 = vpop.f32.mrb[228].mxu0 }
 0xe36   : > { %7849 = vrot.lane.b32.xlu1 %v7802_v19, %s9705_s17  ;;  %8162 = vrot.lane.b32.xlu0 %v8115_v51, %s9705_s17  ;;  %v8117_v39 = vpop.f32.mrb[229].mxu0 }
 0xe37   : > { %v8119_v54 = vpop.f32.mrb[230].mxu0 }
 0xe38   : > { %v8120_v43 = vpop.f32.mrb[231].mxu0 }
 0xe39   : > { %v14648_v22 = vpop.f32.mrb[232].mxu1 }
 0xe3a   : > { %8055 = vrot.lane.b32.xlu0 %v8007_v15, %s9705_s17  ;;  %v9554_v10 = vpop.f32.mrb[233].mxu1 }
 0xe3b   : > { %v8273_v3 = vpop.f32.mrb[234].mxu1 }
 0xe3c   : > { %v9555_v41 = vpop.f32.mrb[235].mxu1 }
 0xe3d   : > { %v8229_v17 = vpop.f32.mrb[232].mxu0 }
 0xe3e   : > { %v8231_v2 = vpop.f32.mrb[233].mxu0 }
 0xe3f   : > { %v8233_v20 = vpop.f32.mrb[234].mxu0 }
 0xe40   : > { %v8234_v57 = vpop.f32.mrb[235].mxu0 }
 0xe41   : > { %v8371_v56 = vpop.f32.mrb[236].mxu1 }
 0xe42   : > { %v9562_v7 = vpop.f32.mrb[237].mxu1 }
 0xe43   : > { %v8374_v42 = vpop.f32.mrb[238].mxu1 }
 0xe44   : > { %v9563_v44 = vpop.f32.mrb[239].mxu1 }
 0xe45   : > { %v8330_v25 = vpop.f32.mrb[236].mxu0 }
 0xe46   : > { %v8332_v50 = vpop.f32.mrb[237].mxu0 }
 0xe47   : > { %v8334_v46 = vpop.f32.mrb[238].mxu0 }
 0xe48   : > { %v8335_v35 = vpop.f32.mrb[239].mxu0 }
 0xe49   : > { %v8475_v29 = vpop.f32.mrb[240].mxu1 }
 0xe4a   : > { %v9570_v14 = vpop.f32.mrb[241].mxu1 }
 0xe4b   : > { %v8478_v47 = vpop.f32.mrb[242].mxu1 }
 0xe4c   : > { %v9571_v19 = vpop.f32.mrb[243].mxu1 }
 0xe4d   : > { %v8434_v6 = vpop.f32.mrb[240].mxu0 }
 0xe4e   : > { %v8436_v4 = vpop.f32.mrb[241].mxu0 }
 0xe4f   : > { %v8438_v30 = vpop.f32.mrb[242].mxu0 }
 0xe50   : > { %v8439_v1 = vpop.f32.mrb[243].mxu0 }
 0xe51   : > { %v8579_v62 = vpop.f32.mrb[244].mxu1 }
 0xe52   : > { %v9578_v52 = vpop.f32.mrb[245].mxu1 }
 0xe53   : > { %v8582_v9 = vpop.f32.mrb[246].mxu1 }
 0xe54   : > { %v9579_v38 = vpop.f32.mrb[247].mxu1 }
 0xe55   : > { %v14650_v45 = vpop.f32.mrb[244].mxu0 }
 0xe56   : > { %v14652_v63 = vpop.f32.mrb[245].mxu0 }
 0xe57   : > { %v8542_v0 = vpop.f32.mrb[246].mxu0 }
 0xe58   : > { %v8543_v27 = vpop.f32.mrb[247].mxu0 }
 0xe59   : > { %v8683_v61 = vpop.f32.mrb[248].mxu1 }
 0xe5a   : > { %v9586_v18 = vpop.f32.mrb[249].mxu1 }
 0xe5b   : > { %v8686_v16 = vpop.f32.mrb[250].mxu1 }
 0xe5c   : > { %v9587_v59 = vpop.f32.mrb[251].mxu1 }
 0xe5d   : > { %v14654_v13 = vpop.f32.mrb[248].mxu0 }
 0xe5e   : > { %v14656_v5 = vpop.f32.mrb[249].mxu0 }
 0xe5f   : > { %v8646_v53 = vpop.f32.mrb[250].mxu0 }
 0xe60   : > { %v8647_v28 = vpop.f32.mrb[251].mxu0 }
 0xe98   : > { %v7943_v48 = vpop.permute.xlu0 %7942 }
 0xe99   : > { %v7944_v24 = vsel %vm561_vm2, %v7943_v48, %v7936_v23 }
 0xe9a   : > { %7947 = vrot.lane.b32.xlu0 %v7944_v24, %s9705_s17 }
 0xe9e   : > { %8165 = vrot.lane.b32.xlu0 %v8117_v39, %s9705_s17 }
 0xea0   : > { %v8053_v36 = vpop.permute.xlu1 %8052 }
 0xea1   : > { %v8054_v33 = vsel %vm561_vm2, %v8053_v36, %v8046_v58 }
 0xea2   : > { %8057 = vrot.lane.b32.xlu1 %v8054_v33, %s9705_s17  ;;  %8377 = vrot.lane.b32.xlu0 %v8330_v25, %s9705_s17 }
 0xea4   : > { %v7946_v23 = vpop.permute.xlu1 %7945 }
 0xea5   : > { %v7949_v21 = vsel %vm561_vm2, %v7946_v23, %v7943_v48 }
 0xea6   : > { %8585 = vrot.lane.b32.xlu0 %v14650_v45, %s9705_s17 }
 0xea8   : > { %v8163_v60 = vpop.permute.xlu0 %8162  ;;  %v14671_v26 = vpop.permute.xlu1 %7849 }
 0xea9   : > { %v8164_v40 = vsel %vm561_vm2, %v8163_v60, %v8156_v37  ;;  %v14678_v32 = vsel %vm561_vm2, %v14671_v26, %v14638_v55  ;;  %v421_v55 = vld [vmem:[%s14765_s7] sm:$0x7] }
 0xeaa   : > { %8167 = vrot.lane.b32.xlu1 %v8164_v40, %s9705_s17  ;;  %7852 = vrot.lane.b32.xlu0 %v14640_v49, %s9705_s17 }
 0xeac   : > { %v8056_v58 = vpop.permute.xlu0 %8055 }
 0xead   : > { %v8059_v49 = vsel %vm561_vm2, %v8056_v58, %v8053_v36 }
 0xeae   : > { %8481 = vrot.lane.b32.xlu1 %v8434_v6, %s9705_s17  ;;  %7956 = vrot.lane.b32.xlu0 %v7949_v21, %s9711_s23 }
 0xeb2   : > { %7854 = vrot.lane.b32.xlu0 %v14678_v32, %s9705_s17  ;;  %8689 = vrot.lane.b32.xlu1 %v14654_v13, %s9705_s17 }
 0xeb6   : > { %8066 = vrot.lane.b32.xlu0 %v8059_v49, %s9712_s24  ;;  %7954 = vrot.lane.b32.xlu1 %v7944_v24, %s9711_s23 }
 0xeba   : > { %8279 = vrot.lane.b32.xlu0 %v8229_v17, %s9706_s18  ;;  %8064 = vrot.lane.b32.xlu1 %v8054_v33, %s9712_s24 }
 0xebe   : > { %8283 = vrot.lane.b32.xlu0 %v14648_v22, %s9706_s18  ;;  %8281 = vrot.lane.b32.xlu1 %v8231_v2, %s9706_s18 }
 0xec2   : > { %8385 = vrot.lane.b32.xlu0 %v8332_v50, %s9707_s19  ;;  %8383 = vrot.lane.b32.xlu1 %v8330_v25, %s9707_s19 }
 0xec6   : > { %8487 = vrot.lane.b32.xlu0 %v8434_v6, %s9708_s20  ;;  %8489 = vrot.lane.b32.xlu1 %v8436_v4, %s9708_s20 }
 0xeca   : > { %8711 = vperm.xlu0 %9619, %v421_v55  }
 0xece   : > { %8175 = vrot.lane.b32.xlu0 %v8164_v40, %s9713_s25 }
 0xf0c   : > { %v7948_v15 = vpop.permute.xlu0 %7947 }
 0xf0d   : > { %v7950_v10 = vsel %vm561_vm2, %v7948_v15, %v7946_v23 }
 0xf10   : > { %v8166_v8 = vpop.permute.xlu0 %8165 }
 0xf11   : > { %v8169_v34 = vsel %vm561_vm2, %v8166_v8, %v8163_v60 }
 0xf12   : > { %8177 = vrot.lane.b32.xlu1 %v8169_v34, %s9713_s25 }
 0xf14   : > { %v8378_v37 = vpop.permute.xlu0 %8377  ;;  %v8058_v11 = vpop.permute.xlu1 %8057 }
 0xf15   : > { %v8379_v12 = vsel %vm561_vm2, %v8378_v37, %v8371_v56  ;;  %v8060_v3 = vsel %vm561_vm2, %v8058_v11, %v8056_v58 }
 0xf16   : > { %8387 = vrot.lane.b32.xlu1 %v8379_v12, %s9707_s19 }
 0xf18   : > { %v8586_v43 = vpop.permute.xlu0 %8585 }
 0xf19   : > { %v8587_v22 = vsel %vm561_vm2, %v8586_v43, %v8579_v62 }
 0xf1c   : > { %v8168_v31 = vpop.permute.xlu1 %8167  ;;  %v7853_v2 = vpop.permute.xlu0 %7852 }
 0xf1d   : > { %v8170_v51 = vsel %vm561_vm2, %v8168_v31, %v8166_v8  ;;  %v7856_v36 = vsel %vm561_vm2, %v7853_v2, %v14671_v26 }
 0xf1e   : > { %8179 = vrot.lane.b32.xlu0 %v8170_v51, %s9713_s25 }
 0xf20   : > { %v8482_v39 = vpop.permute.xlu1 %8481  ;;  %v7957_v20 = vpop.permute.xlu0 %7956 }
 0xf21   : > { %v8483_v54 = vsel %vm561_vm2, %v8482_v39, %v8475_v29 }
 0xf22   : > { %8591 = vrot.lane.b32.xlu0 %v14650_v45, %s9709_s21  ;;  %8491 = vrot.lane.b32.xlu1 %v8483_v54, %s9708_s20  ;;  %s305_s20 = scalar_lea.vmem %s14766_s8, %s9597_s9 }
 0xf24   : > { %v8690_v17 = vpop.permute.xlu1 %8689  ;;  %v7855_v57 = vpop.permute.xlu0 %7854 }
 0xf25   : > { %v8691_v41 = vsel %vm561_vm2, %v8690_v17, %v8683_v61  ;;  %v7857_v62 = vsel %vm561_vm2, %v7855_v57, %v7853_v2 }
 0xf26   : > { %8595 = vrot.lane.b32.xlu0 %v8587_v22, %s9709_s21  ;;  %7958 = vrot.lane.b32.xlu1 %v7950_v10, %s9711_s23 }
 0xf28   : > { %v7955_v25 = vpop.permute.xlu1 %7954  ;;  %v8067_v50 = vpop.permute.xlu0 %8066 }
 0xf2a   : > { %8068 = vrot.lane.b32.xlu1 %v8060_v3, %s9712_s24  ;;  %8697 = vrot.lane.b32.xlu0 %v14656_v5, %s9710_s22  ;;  %v7960_v5 = vsel %vm788_vm3, %v7955_v25, %v7957_v20 }
 0xf2b   : > { %v7965_v7 = vadd.f32 %v7960_v5, %v14678_v32 }
 0xf2c   : > { %v8065_v46 = vpop.permute.xlu1 %8064  ;;  %v8280_v35 = vpop.permute.xlu0 %8279 }
 0xf2d   : > { %v8070_v28 = vsel %vm1011_vm4, %v8065_v46, %v8067_v50 }
 0xf2e   : > { %8181 = vrot.lane.b32.xlu1 %v8168_v31, %s9713_s25  ;;  %v8075_v48 = vadd.f32 %v8070_v28, %v7965_v7 }
 0xf30   : > { %v8282_v6 = vpop.permute.xlu1 %8281  ;;  %v8284_v4 = vpop.permute.xlu0 %8283 }
 0xf31   : > { %v8285_v58 = vsel %vm1437_vm6, %v8280_v35, %v8282_v6  ;;  %v8286_v59 = vsel %vm1437_vm6, %v8282_v6, %v8284_v4 }
 0xf32   : > { %8593 = vrot.lane.b32.xlu1 %v14652_v63, %s9709_s21 }
 0xf34   : > { %v8384_v30 = vpop.permute.xlu1 %8383  ;;  %v8386_v1 = vpop.permute.xlu0 %8385 }
 0xf35   : > { %v8389_v55 = vsel %vm1636_vm7, %v8384_v30, %v8386_v1 }
 0xf36   : > { %8695 = vrot.lane.b32.xlu1 %v14654_v13, %s9710_s22 }
 0xf38   : > { %v8490_v45 = vpop.permute.xlu1 %8489  ;;  %v8488_v63 = vpop.permute.xlu0 %8487 }
 0xf39   : > { %v8493_v37 = vsel %vm1835_vm8, %v8488_v63, %v8490_v45 }
 0xf3a   : > { %8699 = vrot.lane.b32.xlu1 %v8691_v41, %s9710_s22 }
 0xf49   : > { %v8712_v27 = vpop.permute.xlu0 %8711 }
 0xf4d   : > { %v8176_v53 = vpop.permute.xlu0 %8175 }
 0xf84   : > { %v8178_v0 = vpop.permute.xlu1 %8177 }
 0xf85   : > { %v8183_v42 = vsel %vm1246_vm5, %v8176_v53, %v8178_v0 }
 0xf86   : > { %v8189_v29 = vadd.f32 %v8183_v42, %v8075_v48 }
 0xf88   : > { %v8388_v13 = vpop.permute.xlu1 %8387  ;;  %v8290_v52 = vadd.f32 %v8280_v35, %v8189_v29 }
 0xf89   : > { %v8390_v12 = vsel %vm1636_vm7, %v8386_v1, %v8388_v13 }
 0xf8a   : > { %v8394_v49 = vadd.f32 %v8384_v30, %v8290_v52 }
 0xf8c   : > { %v8498_v11 = vadd.f32 %v8488_v63, %v8394_v49 }
 0xf90   : > { %v8180_v44 = vpop.permute.xlu0 %8179 }
 0xf91   : > { %v8184_v60 = vsel %vm1246_vm5, %v8178_v0, %v8180_v44 }
 0xf94   : > { %v8492_v56 = vpop.permute.xlu1 %8491  ;;  %v8592_v47 = vpop.permute.xlu0 %8591 }
 0xf95   : > { %v8602_v39 = vadd.f32 %v8592_v47, %v8498_v11  ;;  %v8494_v54 = vsel %vm1835_vm8, %v8490_v45, %v8492_v56 }
 0xf98   : > { %v7959_v24 = vpop.permute.xlu1 %7958  ;;  %v8596_v61 = vpop.permute.xlu0 %8595 }
 0xf99   : > { %v7961_v14 = vsel %vm788_vm3, %v7957_v20, %v7959_v24  ;;  %v7967_v38 = vadd.f32 %v7959_v24, %v7857_v62 }
 0xf9a   : > { %v7966_v33 = vadd.f32 %v7961_v14, %v7856_v36 }
 0xf9c   : > { %v8069_v19 = vpop.permute.xlu1 %8068  ;;  %v8698_v22 = vpop.permute.xlu0 %8697 }
 0xf9d   : > { %v8071_v9 = vsel %vm1011_vm4, %v8067_v50, %v8069_v19  ;;  %v8077_v40 = vadd.f32 %v8069_v19, %v7967_v38 }
 0xf9e   : > { %v8076_v23 = vadd.f32 %v8071_v9, %v7966_v33 }
 0xfa0   : > { %v8190_v21 = vadd.f32 %v8184_v60, %v8076_v23  ;;  %v8182_v32 = vpop.permute.xlu1 %8181 }
 0xfa1   : > { %v8185_v26 = vsel %vm1246_vm5, %v8180_v44, %v8182_v32 }
 0xfa2   : > { %v8291_v18 = vadd.f32 %v8285_v58, %v8190_v21  ;;  %v8191_v16 = vadd.f32 %v8185_v26, %v8077_v40 }
 0xfa4   : > { %v8292_v15 = vadd.f32 %v8286_v59, %v8191_v16  ;;  %v8395_v8 = vadd.f32 %v8389_v55, %v8291_v18  ;;  %v8594_v34 = vpop.permute.xlu1 %8593 }
 0xfa5   : > { %v8597_v43 = vsel %vm2034_vm9, %v8592_v47, %v8594_v34  ;;  %v8598_v57 = vsel %vm2034_vm9, %v8594_v34, %v8596_v61 }
 0xfa6   : > { %v8396_v31 = vadd.f32 %v8390_v12, %v8292_v15  ;;  %v8499_v51 = vadd.f32 %v8493_v37, %v8395_v8 }
 0xfa8   : > { %v8500_v10 = vadd.f32 %v8494_v54, %v8396_v31  ;;  %v8603_v3 = vadd.f32 %v8597_v43, %v8499_v51  ;;  %v8696_v17 = vpop.permute.xlu1 %8695 }
 0xfa9   : > { %v8701_v41 = vsel %vm2233_vm10, %v8696_v17, %v8698_v22  ;;  %v8706_v2 = vadd.f32 %v8696_v17, %v8602_v39 }
 0xfaa   : > { %v8707_v20 = vadd.f32 %v8701_v41, %v8603_v3  ;;  %v8604_v50 = vadd.f32 %v8598_v57, %v8500_v10 }
 0xfab   : > { %v8714_v25 = vadd.f32 %v8712_v27, %v8706_v2 }
 0xfac   : > { %v8715_v46 = vadd.f32 %v8712_v27, %v8707_v20  ;;  %v8700_v35 = vpop.permute.xlu1 %8699 }
 0xfad   : > { %v8717_v6 = vmax.f32 %v8714_v25, 0.0  ;;  %v8702_v4 = vsel %vm2233_vm10, %v8698_v22, %v8700_v35 }
 0xfae   : > { %v8718_v30 = vmax.f32 %v8715_v46, 0.0  ;;  %v8708_v1 = vadd.f32 %v8702_v4, %v8604_v50 }
 0xfb0   : > { %v8723_v45 = vcombine.low %v8717_v6, %v8718_v30  ;;  %v8716_v63 = vadd.f32 %v8712_v27, %v8708_v1 }
 0xfb2   : > { %v8719_v0 = vmax.f32 %v8716_v63, 0.0  ;;  %8724 = vrot.lane.b32.xlu0 %v8723_v45, %s9714_s11 }
 0xfb4   : > { %8726 = vrot.lane.b32.xlu1 %v8719_v0, %s9714_s11 }
0x1024   : > { %v8725_v13 = vpop.permute.xlu0 %8724 }
0x1025   : > { %v8728_v53 = vrot.slane %v8725_v13, 4 }
0x1026   : > { %v8727_v5 = vpop.permute.xlu1 %8726 }
0x1027   : > { %v8729_v28 = vrot.slane %v8727_v5, 4  ;;  %8737 = vst.msk [vmem:[%s305_s20 + $0x8] sm:$0x7] %vm8736_vm13, %v8727_v5 }
0x1029   : > { %v8730_v56 = vsel %vm449_vm1, %v8728_v53, %v8729_v28 }
0x102a   : > { %v8732_v27 = vsel %vm2380_vm11, %v8725_v13, %v8730_v56 }
0x102b   : > { %8735 = vst [vmem:[%s305_s20] sm:$0x77] %v8732_v27 }
0x102c PF: > { %s18_s27 = sadd.s32 1, %s9702_s27  }
0x102d   : > { %p15_p4 = scmp.ge.s32.totalorder %s18_s27, 4  }
0x102f   :  { %17 = sbr.rel (!%p15_p4) target bundleno = 1 (0x1), region = 106 }

</bundles_post_ra>
